<compile_context>
chip_gen: v7x
topology: tpu7x:2x2x1
jax: 0.10.0
libtpu: 0.0.40
codegen_flags: <defaults>
</compile_context>

<pallas_src>
import functools

import numpy as np
import jax
import jax.numpy as jnp
from jax import lax
from jax.experimental import pallas as pl
from jax.experimental.pallas import tpu as pltpu


def _plan_taps(dilation_series, padding_series, H, W):
    """Trace-time tap planning.

    Tap (ky, kx) of a conv with (dilation d, padding p) reads the input shifted by
    (dy, dx) = (ky*d - p, kx*d - p).  Taps whose window [dy, dy+H) x [dx, dx+W)
    misses the real data entirely contribute exact zeros and are dropped; taps of
    different convs with identical (dy, dx) are merged (weights summed later).
    Returns (offsets, members_per_offset, (pad_top, pad_bot, pad_left, pad_right)).
    """
    groups = {}
    for ci, (d, p) in enumerate(zip(dilation_series, padding_series)):
        for ky in range(3):
            dy = ky * d - p
            if dy + H <= 0 or dy >= H:      # rows entirely in zero padding
                continue
            for kx in range(3):
                dx = kx * d - p
                if dx + W <= 0 or dx >= W:  # cols entirely in zero padding
                    continue
                groups.setdefault((dy, dx), []).append((ci, ky, kx))
    offsets = sorted(groups.keys())
    assert offsets, "all conv taps fall outside the input"
    dys = [o[0] for o in offsets]
    dxs = [o[1] for o in offsets]
    pads = (max(0, -min(dys)), max(0, max(dys)),
            max(0, -min(dxs)), max(0, max(dxs)))
    return offsets, [groups[o] for o in offsets], pads


def _aspp_kernel(x_ref, w_ref, b_ref, out_ref, zpad_ref, *,
                 H, W, NL, offsets, pad_top, pad_left):
    # x_ref   : (1, H, W, Cin)          bf16   activation tile for this image
    # w_ref   : (Cin, P)                bf16   stacked per-tap projection weights
    # b_ref   : (1, NL)                 f32    summed biases
    # out_ref : (1, H, W, NL)           f32
    # zpad_ref: (Hp, Wp, P)             f32    zero-ring-padded projection buffer
    Hp, Wp, P = zpad_ref.shape
    Cin = x_ref.shape[-1]

    # --- Zero only the padding ring (the interior is fully rewritten below).  Done
    # unconditionally each grid step so there is NO cross-step scratch state: this is
    # correct even when the "parallel" batch axis is sharded across TensorCores,
    # where each core owns a private scratch and its own sub-grid.
    if pad_top > 0:
        zpad_ref[0:pad_top, :, :] = jnp.zeros((pad_top, Wp, P), jnp.float32)
    if pad_top + H < Hp:
        zpad_ref[pad_top + H:Hp, :, :] = jnp.zeros(
            (Hp - pad_top - H, Wp, P), jnp.float32)
    if pad_left > 0:
        zpad_ref[pad_top:pad_top + H, 0:pad_left, :] = jnp.zeros(
            (H, pad_left, P), jnp.float32)
    if pad_left + W < Wp:
        zpad_ref[pad_top:pad_top + H, pad_left + W:Wp, :] = jnp.zeros(
            (H, Wp - pad_left - W, P), jnp.float32)

    # --- Stage 1: ONE MXU channel contraction for all taps & labels.
    # (1,H,W,Cin) -> (H*W, Cin) is a layout-preserving flatten (W is a multiple of 8
    # and Cin of 128), so the matmul LHS is the contiguous input tile: no copies.
    x2d = x_ref[0].reshape(H * W, Cin)
    z = jnp.dot(x2d, w_ref[...], preferred_element_type=jnp.float32)   # (H*W, P) f32
    zpad_ref[pad_top:pad_top + H, pad_left:pad_left + W, :] = z.reshape(H, W, P)

    # --- Stage 2: tiny spatial shift-accumulates on z (VPU adds; ~4 KiB of useful
    # data per tap).  Static Python loop -> fully unrolled.
    acc = jnp.zeros((H, W, NL), jnp.float32)
    for t, (oy, ox) in enumerate(offsets):
        acc = acc + zpad_ref[oy:oy + H, ox:ox + W, t * NL:(t + 1) * NL]

    res = acc + b_ref[...]                      # summed biases, added once
    out_ref[...] = res.reshape(out_ref.shape).astype(out_ref.dtype)


def classifier_module_pallas(x_nhwc, weights, biases,
                             dilation_series, padding_series):
    N, H, W, Cin = x_nhwc.shape
    num_convs, kh, kw, Cin_w, NoLabels = weights.shape
    assert (kh, kw) == (3, 3) and Cin_w == Cin
    assert num_convs == len(dilation_series) == len(padding_series)
    for d, p in zip(dilation_series, padding_series):
        # All conv outputs must share the input's spatial size (they are summed).
        assert H + 2 * p - 2 * d == H and W + 2 * p - 2 * d == W
    assert Cin % 128 == 0 and W % 8 == 0

    offsets, members, (pt, pb, pleft, pright) = _plan_taps(
        dilation_series, padding_series, H, W)
    num_taps = len(offsets)
    Hp, Wp = pt + H + pb, pleft + W + pright
    scr_offsets = tuple((pt + dy, pleft + dx) for dy, dx in offsets)

    # Pre-sum coincident taps and stack ALL taps' weights into one lane-aligned
    # (Cin, num_taps*NoLabels) projection matrix, zero-padded to 128 output lanes.
    cols = []
    for mem in members:
        wt = weights[mem[0][0], mem[0][1], mem[0][2]]        # (Cin, NoLabels)
        for ci, ky, kx in mem[1:]:
            wt = wt + weights[ci, ky, kx]
        cols.append(wt)
    w_stack = jnp.concatenate(cols, axis=1)                  # (Cin, num_taps*NL)
    P = ((num_taps * NoLabels + 127) // 128) * 128
    if w_stack.shape[1] < P:
        w_stack = jnp.pad(w_stack, ((0, 0), (0, P - w_stack.shape[1])))

    # bf16 at the wrapper boundary (halves HBM traffic, native bf16 MXU pass);
    # accumulation stays f32 via preferred_element_type inside the kernel.
    x_bf16 = x_nhwc.astype(jnp.bfloat16)
    w_stack = w_stack.astype(jnp.bfloat16)
    bias_total = jnp.sum(biases, axis=0).reshape(1, NoLabels).astype(jnp.float32)

    kernel = functools.partial(
        _aspp_kernel, H=H, W=W, NL=NoLabels,
        offsets=scr_offsets, pad_top=pt, pad_left=pleft)

    # VMEM footprint: x tile 2x1 MiB (double-buffered) + weights 2x0.5 MiB +
    # z buffer (Hp*Wp*P*4 = 0.8 MiB) + small out tiles  ~= 4 MiB: under every
    # generation's default scoped VMEM limit, so no explicit vmem_limit_bytes.
    return pl.pallas_call(
        kernel,
        out_shape=jax.ShapeDtypeStruct((N, H, W, NoLabels), jnp.float32),
        grid_spec=pltpu.PrefetchScalarGridSpec(
            num_scalar_prefetch=0,
            grid=(N,),
            in_specs=[
                # unpadded activation tile for this image
                pl.BlockSpec((1, H, W, Cin), lambda n: (n, 0, 0, 0)),
                # full stacked projection weights, fetched once (constant index)
                pl.BlockSpec((Cin, P), lambda n: (0, 0)),
                # summed bias
                pl.BlockSpec((1, NoLabels), lambda n: (0, 0)),
            ],
            out_specs=pl.BlockSpec((1, H, W, NoLabels), lambda n: (n, 0, 0, 0)),
            scratch_shapes=[
                pltpu.VMEM((Hp, Wp, P), jnp.float32),   # zero-ring-padded z buffer
            ],
        ),
        compiler_params=pltpu.CompilerParams(
            dimension_semantics=("parallel",)),
    )(x_bf16, w_stack, bias_total)


def classifier_module_reference(x_nhwc, weights, biases,
                                dilation_series, padding_series):
    out = None
    for i, (d, pad) in enumerate(zip(dilation_series, padding_series)):
        o = lax.conv_general_dilated(
            x_nhwc, weights[i],
            window_strides=(1, 1),
            padding=[(pad, pad), (pad, pad)],
            rhs_dilation=(d, d),
            dimension_numbers=('NHWC', 'HWIO', 'NHWC'),
            precision=lax.Precision.HIGHEST)
        o = o + biases[i][None, None, None, :]
        out = o if out is None else out + o
    return out


if __name__ == "__main__":
    # Module-consistent shapes: Conv2d(2048, NoLabels, 3, ...) summed over the
    # standard ASPP dilation/padding series, at a small spatial size.
    N, H, W, Cin = 2, 16, 16, 2048
    NoLabels = 4
    dilation_series = [6, 12, 18, 24]
    padding_series = [6, 12, 18, 24]
    num_convs = len(dilation_series)

    key = jax.random.PRNGKey(0)
    kx, kw, kb = jax.random.split(key, 3)

    # Deterministic parameter init mirroring the module's __init__:
    #   weight ~ Normal(0, 0.01); bias ~ PyTorch Conv2d default uniform.
    x = jax.random.normal(kx, (N, H, W, Cin), dtype=jnp.float32)
    weights = 0.01 * jax.random.normal(
        kw, (num_convs, 3, 3, Cin, NoLabels), dtype=jnp.float32)
    bound = 1.0 / np.sqrt(Cin * 3 * 3)
    biases = jax.random.uniform(
        kb, (num_convs, NoLabels), dtype=jnp.float32, minval=-bound, maxval=bound)

    out = classifier_module_pallas(x, weights, biases,
                                   dilation_series, padding_series)
    out = jax.block_until_ready(out)

    ref = jax.block_until_ready(
        classifier_module_reference(x, weights, biases,
                                    dilation_series, padding_series))

    # Reference is exact f32 (Precision.HIGHEST).  The kernel quantizes activations
    # and weights to bf16 at the wrapper boundary (per perf review) while keeping
    # f32 accumulation; the resulting per-element error bound is ~1e-2 here
    # (sqrt(#products) * bf16 rounding of ~1e-3 relative on |x*w|~0.01 products),
    # so these tolerances have comfortable margin while still catching real bugs.
    np.testing.assert_allclose(np.asarray(out), np.asarray(ref),
                               rtol=2e-2, atol=4e-2)
    print("KERNEL_OK")
</pallas_src>

<mosaic_0001>
module attributes {stable_mosaic.version = 11 : i64} {
  func.func @_aspp_kernel(%arg0: i32, %arg1: memref<1x16x16x2048xbf16, #tpu.memory_space<vmem>>, %arg2: memref<2048x128xbf16, #tpu.memory_space<vmem>>, %arg3: memref<1x4xf32, #tpu.memory_space<vmem>>, %arg4: memref<1x16x16x4xf32, #tpu.memory_space<vmem>>, %arg5: memref<40x40x128xf32, #tpu.memory_space<vmem>>) attributes {dimension_semantics = [#tpu.dimension_semantics<parallel>], iteration_bounds = array<i64: 2>, scalar_prefetch = 0 : i64, scratch_operands = 1 : i64, tpu.core_type = #tpu.core_type<tc>, window_params = [{transform_indices = @transform_0, window_bounds = array<i64: 1, 16, 16, 2048>}, {pipeline_mode = #tpu.pipeline_mode<synchronous>, transform_indices = @transform_1, window_bounds = array<i64: 2048, 128>}, {pipeline_mode = #tpu.pipeline_mode<synchronous>, transform_indices = @transform_2, window_bounds = array<i64: 1, 4>}, {transform_indices = @transform_3, window_bounds = array<i64: 1, 16, 16, 4>}]} {
    %cst = arith.constant 0.000000e+00 : f32
    %0 = vector.broadcast %cst : f32 to vector<12x40x128xf32>
    %c0 = arith.constant 0 : index
    %c0_0 = arith.constant 0 : index
    %c0_1 = arith.constant 0 : index
    %1 = vector.load %arg5[%c0, %c0_0, %c0_1] : memref<40x40x128xf32, #tpu.memory_space<vmem>>, vector<12x40x128xf32>
    tpu.vector_store %arg5[%c0, %c0_0, %c0_1], %0 {strides = array<i32>} : memref<40x40x128xf32, #tpu.memory_space<vmem>>, vector<12x40x128xf32>,
    %cst_2 = arith.constant 0.000000e+00 : f32
    %2 = vector.broadcast %cst_2 : f32 to vector<12x40x128xf32>
    %c28 = arith.constant 28 : index
    %c0_3 = arith.constant 0 : index
    %c0_4 = arith.constant 0 : index
    %3 = vector.load %arg5[%c28, %c0_3, %c0_4] : memref<40x40x128xf32, #tpu.memory_space<vmem>>, vector<12x40x128xf32>
    tpu.vector_store %arg5[%c28, %c0_3, %c0_4], %2 {strides = array<i32>} : memref<40x40x128xf32, #tpu.memory_space<vmem>>, vector<12x40x128xf32>,
    %cst_5 = arith.constant 0.000000e+00 : f32
    %4 = vector.broadcast %cst_5 : f32 to vector<16x12x128xf32>
    %c12 = arith.constant 12 : index
    %c0_6 = arith.constant 0 : index
    %c0_7 = arith.constant 0 : index
    %5 = vector.load %arg5[%c12, %c0_6, %c0_7] : memref<40x40x128xf32, #tpu.memory_space<vmem>>, vector<16x12x128xf32>
    tpu.vector_store %arg5[%c12, %c0_6, %c0_7], %4 {strides = array<i32>} : memref<40x40x128xf32, #tpu.memory_space<vmem>>, vector<16x12x128xf32>,
    %cst_8 = arith.constant 0.000000e+00 : f32
    %6 = vector.broadcast %cst_8 : f32 to vector<16x12x128xf32>
    %c12_9 = arith.constant 12 : index
    %c28_10 = arith.constant 28 : index
    %c0_11 = arith.constant 0 : index
    %7 = vector.load %arg5[%c12_9, %c28_10, %c0_11] : memref<40x40x128xf32, #tpu.memory_space<vmem>>, vector<16x12x128xf32>
    tpu.vector_store %arg5[%c12_9, %c28_10, %c0_11], %6 {strides = array<i32>} : memref<40x40x128xf32, #tpu.memory_space<vmem>>, vector<16x12x128xf32>,
    %c0_12 = arith.constant 0 : index
    %c0_13 = arith.constant 0 : index
    %c0_14 = arith.constant 0 : index
    %c0_15 = arith.constant 0 : index
    %8 = vector.load %arg1[%c0_12, %c0_13, %c0_14, %c0_15] : memref<1x16x16x2048xbf16, #tpu.memory_space<vmem>>, vector<1x16x16x2048xbf16>
    %9 = vector.shape_cast %8 : vector<1x16x16x2048xbf16> to vector<16x16x2048xbf16>
    %10 = vector.shape_cast %9 : vector<16x16x2048xbf16> to vector<256x2048xbf16>
    %c0_16 = arith.constant 0 : index
    %c0_17 = arith.constant 0 : index
    %11 = vector.load %arg2[%c0_16, %c0_17] : memref<2048x128xbf16, #tpu.memory_space<vmem>>, vector<2048x128xbf16>
    %cst_18 = arith.constant dense<0.000000e+00> : vector<256x128xf32>
    %12 = tpu.matmul %10, %11, %cst_18 {dimension_numbers = #tpu.dot_dimension_numbers<[1], [0], [0], [1], [0, 0, 1, 1], [], []>} : vector<256x2048xbf16>, vector<2048x128xbf16>, vector<256x128xf32> -> vector<256x128xf32>
    %13 = vector.shape_cast %12 : vector<256x128xf32> to vector<16x16x128xf32>
    %c12_19 = arith.constant 12 : index
    %c12_20 = arith.constant 12 : index
    %c0_21 = arith.constant 0 : index
    %14 = vector.load %arg5[%c12_19, %c12_20, %c0_21] : memref<40x40x128xf32, #tpu.memory_space<vmem>>, vector<16x16x128xf32>
    tpu.vector_store %arg5[%c12_19, %c12_20, %c0_21], %13 {strides = array<i32>} : memref<40x40x128xf32, #tpu.memory_space<vmem>>, vector<16x16x128xf32>,
    %cst_22 = arith.constant 0.000000e+00 : f32
    %15 = vector.broadcast %cst_22 : f32 to vector<16x16x4xf32>
    %c0_23 = arith.constant 0 : index
    %c0_24 = arith.constant 0 : index
    %c0_25 = arith.constant 0 : index
    %16 = vector.load %arg5[%c0_23, %c0_24, %c0_25] : memref<40x40x128xf32, #tpu.memory_space<vmem>>, vector<16x16x4xf32>
    %17 = arith.addf %15, %16 : vector<16x16x4xf32>
    %c0_26 = arith.constant 0 : index
    %c12_27 = arith.constant 12 : index
    %c4 = arith.constant 4 : index
    %18 = vector.load %arg5[%c0_26, %c12_27, %c4] : memref<40x40x128xf32, #tpu.memory_space<vmem>>, vector<16x16x4xf32>
    %19 = arith.addf %17, %18 : vector<16x16x4xf32>
    %c0_28 = arith.constant 0 : index
    %c24 = arith.constant 24 : index
    %c8 = arith.constant 8 : index
    %20 = vector.load %arg5[%c0_28, %c24, %c8] : memref<40x40x128xf32, #tpu.memory_space<vmem>>, vector<16x16x4xf32>
    %21 = arith.addf %19, %20 : vector<16x16x4xf32>
    %c6 = arith.constant 6 : index
    %c6_29 = arith.constant 6 : index
    %c12_30 = arith.constant 12 : index
    %22 = vector.load %arg5[%c6, %c6_29, %c12_30] : memref<40x40x128xf32, #tpu.memory_space<vmem>>, vector<16x16x4xf32>
    %23 = arith.addf %21, %22 : vector<16x16x4xf32>
    %c6_31 = arith.constant 6 : index
    %c12_32 = arith.constant 12 : index
    %c16 = arith.constant 16 : index
    %24 = vector.load %arg5[%c6_31, %c12_32, %c16] : memref<40x40x128xf32, #tpu.memory_space<vmem>>, vector<16x16x4xf32>
    %25 = arith.addf %23, %24 : vector<16x16x4xf32>
    %c6_33 = arith.constant 6 : index
    %c18 = arith.constant 18 : index
    %c20 = arith.constant 20 : index
    %26 = vector.load %arg5[%c6_33, %c18, %c20] : memref<40x40x128xf32, #tpu.memory_space<vmem>>, vector<16x16x4xf32>
    %27 = arith.addf %25, %26 : vector<16x16x4xf32>
    %c12_34 = arith.constant 12 : index
    %c0_35 = arith.constant 0 : index
    %c24_36 = arith.constant 24 : index
    %28 = vector.load %arg5[%c12_34, %c0_35, %c24_36] : memref<40x40x128xf32, #tpu.memory_space<vmem>>, vector<16x16x4xf32>
    %29 = arith.addf %27, %28 : vector<16x16x4xf32>
    %c12_37 = arith.constant 12 : index
    %c6_38 = arith.constant 6 : index
    %c28_39 = arith.constant 28 : index
    %30 = vector.load %arg5[%c12_37, %c6_38, %c28_39] : memref<40x40x128xf32, #tpu.memory_space<vmem>>, vector<16x16x4xf32>
    %31 = arith.addf %29, %30 : vector<16x16x4xf32>
    %c12_40 = arith.constant 12 : index
    %c12_41 = arith.constant 12 : index
    %c32 = arith.constant 32 : index
    %32 = vector.load %arg5[%c12_40, %c12_41, %c32] : memref<40x40x128xf32, #tpu.memory_space<vmem>>, vector<16x16x4xf32>
    %33 = arith.addf %31, %32 : vector<16x16x4xf32>
    %c12_42 = arith.constant 12 : index
    %c18_43 = arith.constant 18 : index
    %c36 = arith.constant 36 : index
    %34 = vector.load %arg5[%c12_42, %c18_43, %c36] : memref<40x40x128xf32, #tpu.memory_space<vmem>>, vector<16x16x4xf32>
    %35 = arith.addf %33, %34 : vector<16x16x4xf32>
    %c12_44 = arith.constant 12 : index
    %c24_45 = arith.constant 24 : index
    %c40 = arith.constant 40 : index
    %36 = vector.load %arg5[%c12_44, %c24_45, %c40] : memref<40x40x128xf32, #tpu.memory_space<vmem>>, vector<16x16x4xf32>
    %37 = arith.addf %35, %36 : vector<16x16x4xf32>
    %c18_46 = arith.constant 18 : index
    %c6_47 = arith.constant 6 : index
    %c44 = arith.constant 44 : index
    %38 = vector.load %arg5[%c18_46, %c6_47, %c44] : memref<40x40x128xf32, #tpu.memory_space<vmem>>, vector<16x16x4xf32>
    %39 = arith.addf %37, %38 : vector<16x16x4xf32>
    %c18_48 = arith.constant 18 : index
    %c12_49 = arith.constant 12 : index
    %c48 = arith.constant 48 : index
    %40 = vector.load %arg5[%c18_48, %c12_49, %c48] : memref<40x40x128xf32, #tpu.memory_space<vmem>>, vector<16x16x4xf32>
    %41 = arith.addf %39, %40 : vector<16x16x4xf32>
    %c18_50 = arith.constant 18 : index
    %c18_51 = arith.constant 18 : index
    %c52 = arith.constant 52 : index
    %42 = vector.load %arg5[%c18_50, %c18_51, %c52] : memref<40x40x128xf32, #tpu.memory_space<vmem>>, vector<16x16x4xf32>
    %43 = arith.addf %41, %42 : vector<16x16x4xf32>
    %c24_52 = arith.constant 24 : index
    %c0_53 = arith.constant 0 : index
    %c56 = arith.constant 56 : index
    %44 = vector.load %arg5[%c24_52, %c0_53, %c56] : memref<40x40x128xf32, #tpu.memory_space<vmem>>, vector<16x16x4xf32>
    %45 = arith.addf %43, %44 : vector<16x16x4xf32>
    %c24_54 = arith.constant 24 : index
    %c12_55 = arith.constant 12 : index
    %c60 = arith.constant 60 : index
    %46 = vector.load %arg5[%c24_54, %c12_55, %c60] : memref<40x40x128xf32, #tpu.memory_space<vmem>>, vector<16x16x4xf32>
    %47 = arith.addf %45, %46 : vector<16x16x4xf32>
    %c24_56 = arith.constant 24 : index
    %c24_57 = arith.constant 24 : index
    %c64 = arith.constant 64 : index
    %48 = vector.load %arg5[%c24_56, %c24_57, %c64] : memref<40x40x128xf32, #tpu.memory_space<vmem>>, vector<16x16x4xf32>
    %49 = arith.addf %47, %48 : vector<16x16x4xf32>
    %c0_58 = arith.constant 0 : index
    %c0_59 = arith.constant 0 : index
    %50 = vector.load %arg3[%c0_58, %c0_59] : memref<1x4xf32, #tpu.memory_space<vmem>>, vector<1x4xf32>
    %51 = vector.shape_cast %50 : vector<1x4xf32> to vector<1x1x4xf32>
    %52 = vector.broadcast %51 : vector<1x1x4xf32> to vector<16x16x4xf32>
    %53 = arith.addf %49, %52 : vector<16x16x4xf32>
    %54 = vector.shape_cast %53 : vector<16x16x4xf32> to vector<1x16x16x4xf32>
    %c0_60 = arith.constant 0 : index
    %c0_61 = arith.constant 0 : index
    %c0_62 = arith.constant 0 : index
    %c0_63 = arith.constant 0 : index
    %55 = vector.load %arg4[%c0_60, %c0_61, %c0_62, %c0_63] : memref<1x16x16x4xf32, #tpu.memory_space<vmem>>, vector<1x16x16x4xf32>
    tpu.vector_store %arg4[%c0_60, %c0_61, %c0_62, %c0_63], %54 {strides = array<i32>} : memref<1x16x16x4xf32, #tpu.memory_space<vmem>>, vector<1x16x16x4xf32>,
    return
  }
  func.func @transform_0(%arg0: i32) -> (i32, i32, i32, i32) {
    %c0_i32 = arith.constant 0 : i32
    %c0_i32_0 = arith.constant 0 : i32
    %c0_i32_1 = arith.constant 0 : i32
    %c0_i32_2 = arith.constant 0 : i32
    return %arg0, %c0_i32, %c0_i32_0, %c0_i32_1 : i32, i32, i32, i32
  }
  func.func @transform_1(%arg0: i32) -> (i32, i32) {
    %c0_i32 = arith.constant 0 : i32
    %c0_i32_0 = arith.constant 0 : i32
    %c0_i32_1 = arith.constant 0 : i32
    return %c0_i32, %c0_i32_0 : i32, i32
  }
  func.func @transform_2(%arg0: i32) -> (i32, i32) {
    %c0_i32 = arith.constant 0 : i32
    %c0_i32_0 = arith.constant 0 : i32
    %c0_i32_1 = arith.constant 0 : i32
    return %c0_i32, %c0_i32_0 : i32, i32
  }
  func.func @transform_3(%arg0: i32) -> (i32, i32, i32, i32) {
    %c0_i32 = arith.constant 0 : i32
    %c0_i32_0 = arith.constant 0 : i32
    %c0_i32_1 = arith.constant 0 : i32
    %c0_i32_2 = arith.constant 0 : i32
    return %arg0, %c0_i32, %c0_i32_0, %c0_i32_1 : i32, i32, i32, i32
  }
}

</mosaic_0001>

<bundles_post_ra>
// kernel: tpu_custom_call.1
= control target key start
LH: loop header
LB: loop body
LE: loop exit
PB: predicated region body
PF: predicated region fallthrough
CT: control target
= control target key end

     0   :  { %8 = vsyncpa [#allocation4], 0  ;;  %s13046_s0 = inlined_call_operand.hbm [shape: bf16[2,16,16,2048], index: 0, kind: input, shape index: {}]   ;;  %s13047_s1 = inlined_call_operand.hbm [shape: bf16[2048,128], index: 1, kind: input, shape index: {}]   ;;  %s13048_s2 = inlined_call_operand.hbm [shape: f32[1,4], index: 2, kind: input, shape index: {}]   ;;  %s13049_s3 = inlined_call_operand.vmem [shape: f32[2,16,16,4], index: 3, kind: output, shape index: {}]  }
   0x1   :  { %10 = vsyncpa [#allocation4 + $0x1], 0 }
   0x2   :  { %11 = vsyncpa [#allocation6], 0  ;;  %s9265_s12 = smov 0   ;;  %s9267_s13 = smov 0  }
   0x3   :  { %s9269_s14 = smov 0   ;;  %s9271_s15 = smov 0  }
   0x4 LB: > { %s9284_s16 = sadd.s32 4294967295, %s9220_s15   ;;  %p37_p0 = scmp.ne.s32.totalorder %s9212_s13, %s9208_s12  ;;  %s9220_s15 = sphi %s9271_s15, %s13904_s15   ;;  %s9216_s14 = sphi %s9269_s14, %s13903_s14   ;;  %s9212_s13 = sphi %s9267_s13, %s13902_s13   ;;  %s9208_s12 = sphi %s9265_s12, %s13901_s12  }
   0x5   : > { %p13050_p1 = scmp.eq.s32.totalorder %s9284_s16, 0  ;;  %p7583_p2 = scmp.ge.s32.totalorder %s9220_s15, 1 }
   0x6   : > { %p116_p3 = scmp.lt.s32.totalorder %s9220_s15, 3  ;;  %s9222_s19 = smov [#allocation5]  }
   0x7   : > { %p9292_p4 = por %p13050_p1, %p37_p0  ;;  %s128_s20 = sshll.u32 %s9222_s19, 4  ;;  %s129_s20 = int_to_ptr.vmem [resolvable:$true] %s128_s20 }
   0x8   : > { %p9296_p5 = pnand %p7583_p2, %p116_p3  ;;  %s9223_s22 = smov [#allocation7]  }
   0x9   : > { %s13053_s17 = scalar_select %p9292_p4, 1, 0 }
   0xa   : > { %s13054_s18 = scalar_select %p9296_p5, 1, 0 }
   0xb   : > { %p8891_p6 = pneg %p9296_p5  ;;  %s142_s23 = sshll.u32 %s9223_s22, 4  ;;  %s9308_s23 = int_to_ptr.vmem [resolvable:$true] %s142_s23 }
   0xc   : > { %s9096_s26 = scalar_lea.hbm %s13047_s1, 16384 }
   0xd   : > { %p9304_p7 = pnand %p8891_p6, %p13050_p1  ;;  %p9097_p8 = scmp.ne.s32.totalorder %s13047_s1, %s9096_s26 }
   0xe   : > { %p9103_p12 = scmp.lt.u32.totalorder %s9096_s26, %s13047_s1 }
   0xf   : > { %p9098_p9 = pneg %p9304_p7 }
  0x11   : > { %p9099_p10 = pnand %p9098_p9, %p9097_p8 }
  0x13   : > { %p9100_p11 = pneg %p9099_p10 }
  0x15   : > { %p9105_p13 = pnand %p9103_p12, %p9100_p11 }
  0x17   : > { %9108 = shalt.err (!%p9105_p13)
}
  0x18   : > { %s9109_s4 = scalar_lea.vmem %s129_s20, 16384  ;;  %p9117_p6 = scmp.lt.s32.totalorder %s129_s20, %s129_s20 }
  0x19   : > { %p9110_p0 = scmp.ne.s32.totalorder %s129_s20, %s9109_s4  ;;  %p9118_p1 = scmp.lt.s32.totalorder %s9109_s4, %s9109_s4 }
  0x1b   : > { %p9112_p2 = pnand %p9110_p0, %p9098_p9  ;;  %p9119_p4 = por %p9118_p1, %p9117_p6 }
  0x1d   : > { %p9113_p3 = pneg %p9112_p2 }
  0x1f   : > { %p9120_p5 = pnand %p9119_p4, %p9113_p3 }
  0x21   : > { %9123 = shalt.err (!%p9120_p5)
}
  0x22   : > { %s9224_s5 = smov 64   ;;  %s9225_s6 = smov 4  }
  0x23   : > { %8894 = dma.hbm_to_vmem [thread:$0]  (!%p9304_p7), %s13047_s1, 16384, %s129_s20, [#allocation6], %s9224_s5, %s9224_s5, %s9225_s6  }
  0x24   : > { %s9124_s11 = scalar_lea.hbm %s13048_s2, 16 }
  0x25   : > { %p9125_p1 = scmp.ne.s32.totalorder %s13048_s2, %s9124_s11  ;;  %p9131_p8 = scmp.lt.u32.totalorder %s9124_s11, %s13048_s2 }
  0x27   : > { %p9127_p4 = pnand %p9125_p1, %p9098_p9 }
  0x29   : > { %p9128_p5 = pneg %p9127_p4 }
  0x2b   : > { %p9133_p10 = pnand %p9131_p8, %p9128_p5 }
  0x2d   : > { %9136 = shalt.err (!%p9133_p10)
}
  0x2e   : > { %s9137_s20 = scalar_lea.vmem %s9308_s23, 16  ;;  %s9144_s25 = scalar_lea.vmem %s9308_s23, 32 }
  0x2f   : > { %p9138_p11 = scmp.ne.s32.totalorder %s9308_s23, %s9137_s20  ;;  %p9145_p0 = scmp.lt.s32.totalorder %s9308_s23, %s9308_s23 }
  0x30   : > { %p9146_p2 = scmp.lt.s32.totalorder %s9144_s25, %s9137_s20 }
  0x31   : > { %p9140_p12 = pnand %p9138_p11, %p9098_p9 }
  0x32   : > { %p9147_p3 = por %p9146_p2, %p9145_p0 }
  0x33   : > { %p9141_p13 = pneg %p9140_p12 }
  0x35   : > { %p9148_p6 = pnand %p9147_p3, %p9141_p13 }
  0x37   : > { %9151 = shalt.err (!%p9148_p6)
}
  0x38   : > { %8897 = dma.hbm_to_vmem [thread:$0]  (!%p9304_p7), %s13048_s2, 16, %s9308_s23, [#allocation6]  }
  0x39   : > { %s9361_s28 = sadd.s32 1, %s9220_s15   ;;  %s24_s29 = sadd.s32 1, %s9216_s14 }
  0x3a   : > { %s21_s21 = ssub.s32 %s9220_s15, %s9361_s28  ;;  %p31_p9 = scmp.ne.s32.totalorder %s9216_s14, %s9212_s13 }
  0x3b   : > { %p22_p1 = scmp.eq.s32.totalorder %s21_s21, 0  ;;  %p32_p4 = scmp.eq.s32.totalorder %s9220_s15, 0 }
  0x3c   : > { %p8904_p5 = scmp.lt.s32.totalorder %s9220_s15, 2  ;;  %s153_s30 = sand.u32 1, %s9216_s14  }
  0x3d   : > { %s9372_s4 = scalar_select %p22_p1, %s9216_s14, %s24_s29  }
  0x3e   : > { %p33_p8 = por %p32_p4, %p31_p9  ;;  %s7587_s6 = sshll.u32 %s153_s30, 11 }
  0x3f   : > { %s7983_s7 = sshll.u32 %s9220_s15, 15  ;;  %s157_s23 = scalar_lea.vmem [#allocation3], %s7587_s6 }
  0x40   : > { %s9378_s10 = scalar_lea.hbm %s13046_s0, %s7983_s7  ;;  %s164_s11 = sshll.u32 %s157_s23, 4  ;;  %s9384_s11 = int_to_ptr.vmem [resolvable:$true] %s164_s11 }
  0x41   : > { %p9380_p7 = pnand %p8904_p5, %p33_p8  ;;  %s9386_s15 = scalar_lea.sflag [#allocation4], %s153_s30 }
  0x42   : > { %s9152_s19 = scalar_lea.hbm %s9378_s10, 32768  ;;  %s9157_s20 = scalar_lea.hbm %s13046_s0, 65536 }
  0x43   : > { %p9153_p10 = scmp.ne.s32.totalorder %s9378_s10, %s9152_s19  ;;  %p9154_p11 = pneg %p9380_p7 }
  0x44   : > { %p9158_p0 = scmp.lt.u32.totalorder %s9378_s10, %s13046_s0  ;;  %p9159_p2 = scmp.lt.u32.totalorder %s9157_s20, %s9152_s19 }
  0x45   : > { %p9155_p12 = pnand %p9154_p11, %p9153_p10  ;;  %p9161_p6 = scmp.lt.u32.totalorder %s9152_s19, %s9378_s10 }
  0x46   : > { %p9160_p3 = por %p9159_p2, %p9158_p0 }
  0x47   : > { %p9156_p13 = pneg %p9155_p12 }
  0x48   : > { %p9162_p9 = por %p9161_p6, %p9160_p3 }
  0x4a   : > { %p9163_p1 = pnand %p9162_p9, %p9156_p13 }
  0x4c   : > { %9166 = shalt.err (!%p9163_p1)
}
  0x4d   : > { %s9167_s27 = scalar_lea.vmem %s9384_s11, 32768  ;;  %s9226_s29 = smov [#allocation3]  }
  0x4e   : > { %p9168_p4 = scmp.ne.s32.totalorder %s9384_s11, %s9167_s27  ;;  %s9172_s21 = sshll.u32 %s9226_s29, 4  ;;  %s9173_s21 = int_to_ptr.vmem [resolvable:$false] %s9172_s21 }
  0x4f   : > { %s9174_s30 = scalar_lea.vmem %s9173_s21, 65536  ;;  %p9175_p10 = scmp.lt.s32.totalorder %s9384_s11, %s9173_s21 }
  0x50   : > { %p9170_p5 = pnand %p9168_p4, %p9154_p11  ;;  %p9176_p12 = scmp.lt.s32.totalorder %s9174_s30, %s9167_s27 }
  0x52   : > { %p9171_p8 = pneg %p9170_p5  ;;  %p9177_p0 = por %p9176_p12, %p9175_p10 }
  0x54   : > { %p9178_p2 = pnand %p9177_p0, %p9171_p8 }
  0x56   : > { %9181 = shalt.err (!%p9178_p2)
}
  0x57   : > { %s9227_s6 = smov 1024   ;;  %p13057_p11 = scmp.ne.s32.totalorder %s13054_s18, 0 }
  0x58   : > { %8901 = dma.hbm_to_vmem [thread:$0]  (!%p9380_p7), %s9378_s10, 32768, %s9384_s11, %s9386_s15, %s9227_s6, %s9227_s6, %s9224_s5  }
  0x59   : > { %176 = sbr.rel (%p13057_p11) target bundleno = 1616 (0x650), region = 32 }
  0x60   : > { %s178_s7 = sand.u32 1, %s9212_s13   ;;  %p13058_p13 = scmp.ne.s32.totalorder %s13053_s17, 0 }
  0x61   : > { %s7591_s8 = sshll.u32 %s178_s7, 11  ;;  %s179_s9 = scalar_lea.sflag [#allocation4], %s178_s7 }
  0x62   : > { %s9418_s23 = scalar_lea.vmem [#allocation3], %s7591_s8 }
  0x63   : > { %9199 = dma.done.wait (%p13058_p13), %s179_s9, 32768  }
  0x64   : > { %9201 = vsyncadd (%p13058_p13), %s179_s9, 4294934528  ;;  %p13059_p3 = scmp.eq.s32.totalorder %s9284_s16, 0 }
  0x66   : > { %9203 = dma.done.wait (%p13059_p3), [#allocation6], 16400   ;;  %p13060_p7 = pmov %p13059_p3 }
  0x67   : > { %v8961_v0 = vld [vmem:[#allocation5 + $0x40] sm:$0xff]   ;;  %v8965_v4 = vld [vmem:[#allocation5 + $0x48] sm:$0xff]   ;;  %v8969_v8 = vld [vmem:[#allocation5 + $0x50] sm:$0xff]   ;;  %s9229_s17 = smov 124   ;;  %s9230_s18 = smov 120   ;;  %vm7463_vm0 = vcmask 31744  }
  0x68   : > { %9205 = vsyncadd (%p13060_p7), [#allocation6], 4294950896  ;;  %v8962_v1 = vld [vmem:[#allocation5 + $0xc0] sm:$0xff]   ;;  %7985 = vmatprep.subr.bf16.mxu0 %v8961_v0  ;;  %v8966_v5 = vld [vmem:[#allocation5 + $0xc8] sm:$0xff]   ;;  %s9231_s5 = smov 116   ;;  %s9232_s10 = smov 112  }
  0x69   : > { %v8963_v2 = vld [vmem:[#allocation5] sm:$0xff]   ;;  %8097 = vmatprep.subr.bf16.mxu1 %v8962_v1  ;;  %v8967_v6 = vld [vmem:[#allocation5 + $0x8] sm:$0xff]   ;;  %v8970_v9 = vld [vmem:[#allocation5 + $0xd0] sm:$0xff]   ;;  %s9233_s11 = smov 108   ;;  %s9234_s12 = smov 104  }
  0x6a   : > { %v8964_v3 = vld [vmem:[#allocation5 + $0x80] sm:$0xff]   ;;  %7986 = vmatpush3.bf16.msra.mxu0 %v8963_v2  ;;  %v8968_v7 = vld [vmem:[#allocation5 + $0x88] sm:$0xff]   ;;  %v8971_v10 = vld [vmem:[#allocation5 + $0x10] sm:$0xff]   ;;  %s9235_s15 = smov 88   ;;  %s9236_s19 = smov 84  }
  0x6b   : > { %8098 = vmatpush3.bf16.msra.mxu1 %v8964_v3  ;;  %7987 = vmatprep.subr.bf16.mxu0 %v8965_v4  ;;  %v8972_v11 = vld [vmem:[#allocation5 + $0x90] sm:$0xff]   ;;  %v8973_v12 = vld [vmem:[#allocation5 + $0x58] sm:$0xff]   ;;  %v8977_v16 = vld [vmem:[#allocation5 + $0x60] sm:$0xff]   ;;  %s9237_s22 = smov 80   ;;  %s9238_s24 = smov 100  }
  0x6c   : > { %8099 = vmatprep.subr.bf16.mxu1 %v8966_v5  ;;  %v8974_v13 = vld [vmem:[#allocation5 + $0xd8] sm:$0xff]   ;;  %v8978_v17 = vld [vmem:[#allocation5 + $0xe0] sm:$0xff]   ;;  %v8981_v20 = vld [vmem:[#allocation5 + $0x68] sm:$0xff]   ;;  %s9239_s20 = smov 96   ;;  %s9240_s25 = smov 92  }
  0x6d   : > { %v8975_v14 = vld [vmem:[#allocation5 + $0x18] sm:$0xff]   ;;  %v8979_v18 = vld [vmem:[#allocation5 + $0x20] sm:$0xff]   ;;  %v8982_v21 = vld [vmem:[#allocation5 + $0xe8] sm:$0xff]   ;;  %s9241_s26 = smov 76   ;;  %s9242_s27 = smov 72  }
  0x6e   : > { %7988 = vmatpush3.bf16.msra.mxu0 %v8967_v6  ;;  %v8976_v15 = vld [vmem:[#allocation5 + $0x98] sm:$0xff]   ;;  %v8980_v19 = vld [vmem:[#allocation5 + $0xa0] sm:$0xff]   ;;  %v8983_v22 = vld [vmem:[#allocation5 + $0x28] sm:$0xff]   ;;  %s9243_s29 = smov 68   ;;  %s9244_s21 = smov 64  }
  0x6f   : > { %8100 = vmatpush3.bf16.msra.mxu1 %v8968_v7  ;;  %7989 = vmatprep.subr.bf16.mxu0 %v8969_v8  ;;  %v8984_v23 = vld [vmem:[#allocation5 + $0xa8] sm:$0xff]   ;;  %v8985_v24 = vld [vmem:[#allocation5 + $0x70] sm:$0xff]   ;;  %v8989_v28 = vld [vmem:[#allocation5 + $0x78] sm:$0xff]   ;;  %p213_p6 = scmp.lt.s32.totalorder %s9284_s16, 1 }
  0x70   : > { %8101 = vmatprep.subr.bf16.mxu1 %v8970_v9  ;;  %v8986_v25 = vld [vmem:[#allocation5 + $0xf0] sm:$0xff]   ;;  %v8990_v29 = vld [vmem:[#allocation5 + $0xf8] sm:$0xff]   ;;  %v405_v32 = vld [vmem:[%s9418_s23] sm:$0xff] }
  0x71   : > { %v8987_v26 = vld [vmem:[#allocation5 + $0x30] sm:$0xff]   ;;  %v8991_v30 = vld [vmem:[#allocation5 + $0x38] sm:$0xff]   ;;  %v413_v33 = vld [vmem:[%s9418_s23 + $0x40] sm:$0xff]  ;;  %s13906_s16 = smov (!%p213_p6, %s9284_s16), 1 }
  0x72   : > { %7990 = vmatpush3.bf16.msra.mxu0 %v8971_v10  ;;  %v8988_v27 = vld [vmem:[#allocation5 + $0xb0] sm:$0xff]   ;;  %v8992_v31 = vld [vmem:[#allocation5 + $0xb8] sm:$0xff]   ;;  %v406_v34 = vld [vmem:[%s9418_s23 + $0x8] sm:$0xff]  ;;  %v7596_v35 = vcombine.low %v405_v32, %v413_v33  ;;  %v7597_v36 = vcombine.high %v405_v32, %v413_v33  ;;  %s7984_s30 = sshll.u32 %s13906_s16, 8 }
  0x73   : > { %8102 = vmatpush3.bf16.msra.mxu1 %v8972_v11  ;;  %7991 = vmatprep.subr.bf16.mxu0 %v8973_v12  ;;  %v414_v37 = vld [vmem:[%s9418_s23 + $0x48] sm:$0xff]  ;;  %v8993_v40 = vld [vmem:[#allocation5 + $0x140] sm:$0xff]   ;;  %v9001_v2 = vld [vmem:[#allocation5 + $0x150] sm:$0xff]   ;;  %s12713_s7 = scalar_lea.vmem %s13049_s3, %s7984_s30 }
  0x74   : > { %8103 = vmatprep.subr.bf16.mxu1 %v8974_v13  ;;  %v7598_v38 = vcombine.low %v406_v34, %v414_v37  ;;  %v7599_v39 = vcombine.high %v406_v34, %v414_v37  ;;  %2997 = vmatprep.mubr.bf16.mxu0 %v7597_v36  ;;  %v8994_v41 = vld [vmem:[#allocation5 + $0x100] sm:$0xff]   ;;  %v422_v47 = vld [vmem:[%s9418_s23 + $0x88] sm:$0xff]  ;;  %v9002_v4 = vld [vmem:[#allocation5 + $0x110] sm:$0xff]   ;;  %v9228_v34 = vmov 0.0  }
  0x75   : > { %v8995_v42 = vld [vmem:[#allocation5 + $0x1c0] sm:$0xff]   ;;  %v430_v48 = vld [vmem:[%s9418_s23 + $0xc8] sm:$0xff]  ;;  %v9003_v7 = vld [vmem:[#allocation5 + $0x1d0] sm:$0xff]   ;;  %220 = vst [vmem:[#allocation2 + $0x8] sm:$0xff] %v9228_v34 }
  0x76   : > { %7992 = vmatpush3.bf16.msra.mxu0 %v8975_v14  ;;  %3158 = vmatprep.mubr.bf16.mxu1 %v7599_v39  ;;  %v8996_v43 = vld [vmem:[#allocation5 + $0x180] sm:$0xff]   ;;  %v7615_v50 = vcombine.high %v422_v47, %v430_v48  ;;  %v438_v52 = vld [vmem:[%s9418_s23 + $0x108] sm:$0xff]  ;;  %v7614_v56 = vcombine.low %v422_v47, %v430_v48  ;;  %v9004_v9 = vld [vmem:[#allocation5 + $0x190] sm:$0xff]   ;;  %221 = vst [vmem:[#allocation2 + $0x10] sm:$0xff] %v9228_v34 }
  0x77   : > { %8104 = vmatpush3.bf16.msra.mxu1 %v8976_v15  ;;  %7993 = vmatprep.subr.bf16.mxu0 %v8977_v16  ;;  %v421_v44 = vld [vmem:[%s9418_s23 + $0x80] sm:$0xff]  ;;  %v446_v53 = vld [vmem:[%s9418_s23 + $0x148] sm:$0xff]  ;;  %v9005_v14 = vld [vmem:[#allocation5 + $0x158] sm:$0xff]   ;;  %222 = vst [vmem:[#allocation2 + $0x18] sm:$0xff] %v9228_v34 }
  0x78   : > { %8105 = vmatprep.subr.bf16.mxu1 %v8978_v17  ;;  %v429_v45 = vld [vmem:[%s9418_s23 + $0xc0] sm:$0xff]  ;;  %v8997_v55 = vld [vmem:[#allocation5 + $0x148] sm:$0xff]   ;;  %v7631_v59 = vcombine.high %v438_v52, %v446_v53  ;;  %v7630_v5 = vcombine.low %v438_v52, %v446_v53  ;;  %v9006_v15 = vld [vmem:[#allocation5 + $0x118] sm:$0xff]   ;;  %225 = vst [vmem:[#allocation2 + $0x30] sm:$0xff] %v9228_v34 }
  0x79   : > { %v7613_v46 = vcombine.high %v421_v44, %v429_v45  ;;  %v437_v49 = vld [vmem:[%s9418_s23 + $0x100] sm:$0xff]  ;;  %v7612_v54 = vcombine.low %v421_v44, %v429_v45  ;;  %v8998_v58 = vld [vmem:[#allocation5 + $0x108] sm:$0xff]   ;;  %v9007_v17 = vld [vmem:[#allocation5 + $0x1d8] sm:$0xff]   ;;  %226 = vst [vmem:[#allocation2 + $0x38] sm:$0xff] %v9228_v34 }
  0x7a   : > { %7994 = vmatpush3.bf16.msra.mxu0 %v8979_v18  ;;  %v445_v51 = vld [vmem:[%s9418_s23 + $0x140] sm:$0xff]  ;;  %v8999_v60 = vld [vmem:[#allocation5 + $0x1c8] sm:$0xff]   ;;  %227 = vst [vmem:[#allocation2 + $0x40] sm:$0xff] %v9228_v34  ;;  %230 = vst [vmem:[#allocation2 + $0x58] sm:$0xff] %v9228_v34 }
  0x7b   : > { %8106 = vmatpush3.bf16.msra.mxu1 %v8980_v19  ;;  %7995 = vmatprep.subr.bf16.mxu0 %v8981_v20  ;;  %v7629_v57 = vcombine.high %v437_v49, %v445_v51  ;;  %v9000_v61 = vld [vmem:[#allocation5 + $0x188] sm:$0xff]   ;;  %v453_v62 = vld [vmem:[%s9418_s23 + $0x180] sm:$0xff]  ;;  %v7628_v3 = vcombine.low %v437_v49, %v445_v51  ;;  %v9008_v20 = vld [vmem:[#allocation5 + $0x198] sm:$0xff]   ;;  %231 = vst [vmem:[#allocation2 + $0x60] sm:$0xff] %v9228_v34 }
  0x7c   : > { %8107 = vmatprep.subr.bf16.mxu1 %v8982_v21  ;;  %v461_v63 = vld [vmem:[%s9418_s23 + $0x1c0] sm:$0xff]  ;;  %v454_v0 = vld [vmem:[%s9418_s23 + $0x188] sm:$0xff]  ;;  %232 = vst [vmem:[#allocation2 + $0x68] sm:$0xff] %v9228_v34  ;;  %235 = vst [vmem:[#allocation2 + $0x80] sm:$0xff] %v9228_v34 }
  0x7d   : > { %v462_v1 = vld [vmem:[%s9418_s23 + $0x1c8] sm:$0xff]  ;;  %v7645_v6 = vcombine.high %v453_v62, %v461_v63  ;;  %v9445_v10 = vld [vmem:[%s9418_s23 + $0x200] sm:$0xff]  ;;  %v7644_v16 = vcombine.low %v453_v62, %v461_v63  ;;  %236 = vst [vmem:[#allocation2 + $0x88] sm:$0xff] %v9228_v34  ;;  %237 = vst [vmem:[#allocation2 + $0x90] sm:$0xff] %v9228_v34 }
  0x7e   : > { %7996 = vmatpush3.bf16.msra.mxu0 %v8983_v22  ;;  %v7647_v8 = vcombine.high %v454_v0, %v462_v1  ;;  %v9448_v11 = vld [vmem:[%s9418_s23 + $0x240] sm:$0xff]  ;;  %v9451_v12 = vld [vmem:[%s9418_s23 + $0x208] sm:$0xff]  ;;  %v7646_v18 = vcombine.low %v454_v0, %v462_v1  ;;  %240 = vst [vmem:[#allocation2 + $0xa8] sm:$0xff] %v9228_v34  ;;  %241 = vst [vmem:[#allocation2 + $0xb0] sm:$0xff] %v9228_v34 }
  0x7f   : > { %8108 = vmatpush3.bf16.msra.mxu1 %v8984_v23  ;;  %7997 = vmatprep.subr.bf16.mxu0 %v8985_v24  ;;  %v9454_v13 = vld [vmem:[%s9418_s23 + $0x248] sm:$0xff]  ;;  %v7661_v19 = vcombine.high %v9445_v10, %v9448_v11  ;;  %v9461_v22 = vld [vmem:[%s9418_s23 + $0x280] sm:$0xff]  ;;  %242 = vst [vmem:[#allocation2 + $0xb8] sm:$0xff] %v9228_v34  ;;  %245 = vst [vmem:[#allocation2 + $0xd0] sm:$0xff] %v9228_v34 }
  0x80   : > { %8109 = vmatprep.subr.bf16.mxu1 %v8986_v25  ;;  %v7663_v21 = vcombine.high %v9451_v12, %v9454_v13  ;;  %v9464_v23 = vld [vmem:[%s9418_s23 + $0x2c0] sm:$0xff]  ;;  %v9467_v25 = vld [vmem:[%s9418_s23 + $0x288] sm:$0xff]  ;;  %246 = vst [vmem:[#allocation2 + $0xd8] sm:$0xff] %v9228_v34  ;;  %247 = vst [vmem:[#allocation2 + $0xe0] sm:$0xff] %v9228_v34 }
  0x81   : > { %v9009_v24 = vld [vmem:[#allocation5 + $0x160] sm:$0xff]   ;;  %v7677_v32 = vcombine.high %v9461_v22, %v9464_v23  ;;  %249 = vst [vmem:[#allocation2 + $0xf0] sm:$0xff] %v9228_v34  ;;  %250 = vst [vmem:[#allocation2 + $0xf8] sm:$0xff] %v9228_v34  ;;  %v9014_v37 = vld [vmem:[#allocation5 + $0x128] sm:$0xff]  }
  0x82   : > { %7998 = vmatpush3.bf16.msra.mxu0 %v8987_v26  ;;  %v9470_v26 = vld [vmem:[%s9418_s23 + $0x2c8] sm:$0xff]  ;;  %251 = vst [vmem:[#allocation2 + $0x100] sm:$0xff] %v9228_v34  ;;  %252 = vst [vmem:[#allocation2 + $0x108] sm:$0xff] %v9228_v34  ;;  %v501_v36 = vld [vmem:[%s9418_s23 + $0x300] sm:$0xff] }
  0x83   : > { %8110 = vmatpush3.bf16.msra.mxu1 %v8988_v27  ;;  %7999 = vmatprep.subr.bf16.mxu0 %v8989_v28  ;;  %v9010_v27 = vld [vmem:[#allocation5 + $0x120] sm:$0xff]   ;;  %v7679_v33 = vcombine.high %v9467_v25, %v9470_v26  ;;  %253 = vst [vmem:[#allocation2 + $0x110] sm:$0xff] %v9228_v34  ;;  %254 = vst [vmem:[#allocation2 + $0x118] sm:$0xff] %v9228_v34  ;;  %v7678_v44 = vcombine.low %v9467_v25, %v9470_v26  ;;  %v9017_v47 = vld [vmem:[#allocation5 + $0x170] sm:$0xff]  }
  0x84   : > { %8111 = vmatprep.subr.bf16.mxu1 %v8990_v29  ;;  %v9011_v28 = vld [vmem:[#allocation5 + $0x1e0] sm:$0xff]   ;;  %255 = vst [vmem:[#allocation2 + $0x120] sm:$0xff] %v9228_v34  ;;  %256 = vst [vmem:[#allocation2 + $0x128] sm:$0xff] %v9228_v34  ;;  %v9018_v48 = vld [vmem:[#allocation5 + $0x130] sm:$0xff]  }
  0x85   : > { %v9012_v29 = vld [vmem:[#allocation5 + $0x1a0] sm:$0xff]   ;;  %257 = vst [vmem:[#allocation2 + $0x130] sm:$0xff] %v9228_v34  ;;  %258 = vst [vmem:[#allocation2 + $0x138] sm:$0xff] %v9228_v34  ;;  %v9019_v49 = vld [vmem:[#allocation5 + $0x1f0] sm:$0xff]  }
  0x86   : > { %8000 = vmatpush3.bf16.msra.mxu0 %v8991_v30  ;;  %v7660_v30 = vcombine.low %v9445_v10, %v9448_v11  ;;  %259 = vst [vmem:[#allocation2 + $0x140] sm:$0xff] %v9228_v34  ;;  %260 = vst [vmem:[#allocation2 + $0x148] sm:$0xff] %v9228_v34  ;;  %v509_v39 = vld [vmem:[%s9418_s23 + $0x340] sm:$0xff]  ;;  %v518_v53 = vld [vmem:[%s9418_s23 + $0x388] sm:$0xff] }
  0x87   : > { %8112 = vmatpush3.bf16.msra.mxu1 %v8992_v31  ;;  %8209 = vmatprep.subr.bf16.mxu0 %v8993_v40  ;;  %v7662_v31 = vcombine.low %v9451_v12, %v9454_v13  ;;  %261 = vst [vmem:[#allocation2 + $0x150] sm:$0xff] %v9228_v34  ;;  %262 = vst [vmem:[#allocation2 + $0x158] sm:$0xff] %v9228_v34  ;;  %v9016_v40 = vld [vmem:[#allocation5 + $0x1a8] sm:$0xff]   ;;  %v7693_v45 = vcombine.high %v501_v36, %v509_v39  ;;  %v517_v51 = vld [vmem:[%s9418_s23 + $0x380] sm:$0xff] }
  0x88   : > { %8321 = vmatprep.subr.bf16.mxu1 %v8995_v42  ;;  %263 = vst [vmem:[#allocation2 + $0x160] sm:$0xff] %v9228_v34  ;;  %264 = vst [vmem:[#allocation2 + $0x168] sm:$0xff] %v9228_v34  ;;  %v510_v42 = vld [vmem:[%s9418_s23 + $0x348] sm:$0xff]  ;;  %v525_v52 = vld [vmem:[%s9418_s23 + $0x3c0] sm:$0xff] }
  0x89   : > { %2998 = vmatmul.mubr.bf16.vlgmr.msra.gmra.mrb[0].mxu0 %v7596_v35  ;;  %265 = vst [vmem:[#allocation2 + $0x170] sm:$0xff] %v9228_v34  ;;  %266 = vst [vmem:[#allocation2 + $0x178] sm:$0xff] %v9228_v34  ;;  %v9013_v35 = vld [vmem:[#allocation5 + $0x168] sm:$0xff]   ;;  %v9024_v62 = vld [vmem:[#allocation5 + $0x1b8] sm:$0xff]  }
  0x8a   : > { %3159 = vmatmul.mubr.bf16.vlgmr.msra.gmra.mrb[0].mxu1 %v7598_v38  ;;  %8210 = vmatpush3.bf16.msra.mxu0 %v8994_v41  ;;  %267 = vst [vmem:[#allocation2 + $0x180] sm:$0xff] %v9228_v34  ;;  %268 = vst [vmem:[#allocation2 + $0x188] sm:$0xff] %v9228_v34  ;;  %v9015_v38 = vld [vmem:[#allocation5 + $0x1e8] sm:$0xff]   ;;  %v533_v63 = vld [vmem:[%s9418_s23 + $0x400] sm:$0xff] }
  0x8b   : > { %8322 = vmatpush3.bf16.msra.mxu1 %v8996_v43  ;;  %3005 = vmatprep.mubr.bf16.mxu0 %v7613_v46  ;;  %269 = vst [vmem:[#allocation2 + $0x190] sm:$0xff] %v9228_v34  ;;  %270 = vst [vmem:[#allocation2 + $0x198] sm:$0xff] %v9228_v34  ;;  %v502_v41 = vld [vmem:[%s9418_s23 + $0x308] sm:$0xff]  ;;  %v7676_v43 = vcombine.low %v9461_v22, %v9464_v23  ;;  %v541_v0 = vld [vmem:[%s9418_s23 + $0x440] sm:$0xff] }
  0x8c   : > { %3166 = vmatprep.mubr.bf16.mxu1 %v7615_v50  ;;  %8211 = vmatprep.subr.bf16.mxu0 %v8997_v55  ;;  %271 = vst [vmem:[#allocation2 + $0x1a0] sm:$0xff] %v9228_v34  ;;  %272 = vst [vmem:[#allocation2 + $0x1a8] sm:$0xff] %v9228_v34  ;;  %v7695_v46 = vcombine.high %v502_v41, %v510_v42  ;;  %v9020_v50 = vld [vmem:[#allocation5 + $0x1b0] sm:$0xff]   ;;  %v7692_v55 = vcombine.low %v501_v36, %v509_v39  ;;  %v534_v1 = vld [vmem:[%s9418_s23 + $0x408] sm:$0xff] }
  0x8d   : > { %8323 = vmatprep.subr.bf16.mxu1 %v8999_v60  ;;  %273 = vst [vmem:[#allocation2 + $0x1b0] sm:$0xff] %v9228_v34  ;;  %274 = vst [vmem:[#allocation2 + $0x1b8] sm:$0xff] %v9228_v34  ;;  %v557_v10 = vld [vmem:[%s9418_s23 + $0x4c0] sm:$0xff]  ;;  %v550_v11 = vld [vmem:[%s9418_s23 + $0x488] sm:$0xff]  ;;  %v7724_v13 = vcombine.low %v533_v63, %v541_v0 }
  0x8e   : > { %8212 = vmatpush3.bf16.msra.mxu0 %v8998_v58  ;;  %275 = vst [vmem:[#allocation2 + $0x1c0] sm:$0xff] %v9228_v34  ;;  %276 = vst [vmem:[#allocation2 + $0x1c8] sm:$0xff] %v9228_v34  ;;  %v7709_v58 = vcombine.high %v517_v51, %v525_v52  ;;  %v558_v12 = vld [vmem:[%s9418_s23 + $0x4c8] sm:$0xff]  ;;  %v4350_v26 = vld [vmem:[#allocation2 + $0x14] sm:$0xff] }
  0x8f   : > { %8324 = vmatpush3.bf16.msra.mxu1 %v9000_v61  ;;  %8213 = vmatprep.subr.bf16.mxu0 %v9001_v2  ;;  %277 = vst [vmem:[#allocation2 + $0x1d0] sm:$0xff] %v9228_v34  ;;  %278 = vst [vmem:[#allocation2 + $0x1d8] sm:$0xff] %v9228_v34  ;;  %v9023_v61 = vld [vmem:[#allocation5 + $0x1f8] sm:$0xff]   ;;  %v542_v2 = vld [vmem:[%s9418_s23 + $0x448] sm:$0xff]  ;;  %v7742_v22 = vcombine.low %v550_v11, %v558_v12 }
  0x90   : > { %8325 = vmatprep.subr.bf16.mxu1 %v9003_v7  ;;  %280 = vst [vmem:[#allocation2 + $0x460] sm:$0xff] %v9228_v34  ;;  %281 = vst [vmem:[#allocation2 + $0x468] sm:$0xff] %v9228_v34  ;;  %v9027_v7 = vld [vmem:[#allocation5 + $0x2c0] sm:$0xff]  }
  0x91   : > { %3006 = vmatmul.mubr.bf16.gmra.mrb[4].mxu0 %v7612_v54  ;;  %282 = vst [vmem:[#allocation2 + $0x470] sm:$0xff] %v9228_v34  ;;  %283 = vst [vmem:[#allocation2 + $0x478] sm:$0xff] %v9228_v34  ;;  %v526_v54 = vld [vmem:[%s9418_s23 + $0x3c8] sm:$0xff] }
  0x92   : > { %3167 = vmatmul.mubr.bf16.gmra.mrb[4].mxu1 %v7614_v56  ;;  %3013 = vmatprep.mubr.bf16.mxu0 %v7629_v57  ;;  %284 = vst [vmem:[#allocation2 + $0x480] sm:$0xff] %v9228_v34  ;;  %285 = vst [vmem:[#allocation2 + $0x488] sm:$0xff] %v9228_v34  ;;  %v9021_v56 = vld [vmem:[#allocation5 + $0x178] sm:$0xff]   ;;  %v7694_v57 = vcombine.low %v502_v41, %v510_v42  ;;  %v7711_v60 = vcombine.high %v518_v53, %v526_v54  ;;  %v4355_v39 = vld [vmem:[#allocation2 + $0x84] sm:$0xff] }
  0x93   : > { %3174 = vmatprep.mubr.bf16.mxu1 %v7631_v59  ;;  %8214 = vmatpush3.bf16.msra.mxu0 %v9002_v4  ;;  %286 = vst [vmem:[#allocation2 + $0x490] sm:$0xff] %v9228_v34  ;;  %287 = vst [vmem:[#allocation2 + $0x498] sm:$0xff] %v9228_v34  ;;  %v9022_v59 = vld [vmem:[#allocation5 + $0x138] sm:$0xff]   ;;  %v7708_v4 = vcombine.low %v517_v51, %v525_v52  ;;  %v605_v41 = vld [vmem:[%s9418_s23 + $0x640] sm:$0xff] }
  0x94   : > { %8326 = vmatpush3.bf16.msra.mxu1 %v9004_v9  ;;  %8215 = vmatprep.subr.bf16.mxu0 %v9005_v14  ;;  %288 = vst [vmem:[#allocation2 + $0x4a0] sm:$0xff] %v9228_v34  ;;  %289 = vst [vmem:[#allocation2 + $0x4a8] sm:$0xff] %v9228_v34  ;;  %v549_v9 = vld [vmem:[%s9418_s23 + $0x480] sm:$0xff]  ;;  %v7726_v14 = vcombine.low %v534_v1, %v542_v2  ;;  %v4359_v51 = vld [vmem:[#allocation2 + $0xd4] sm:$0xff] }
  0x95   : > { %8327 = vmatprep.subr.bf16.mxu1 %v9007_v17  ;;  %290 = vst [vmem:[#allocation2 + $0x4b0] sm:$0xff] %v9228_v34  ;;  %291 = vst [vmem:[#allocation2 + $0x4b8] sm:$0xff] %v9228_v34  ;;  %v565_v17 = vld [vmem:[%s9418_s23 + $0x500] sm:$0xff] }
  0x96   : > { %292 = vst [vmem:[#allocation2 + $0x4c0] sm:$0xff] %v9228_v34  ;;  %293 = vst [vmem:[#allocation2 + $0x4c8] sm:$0xff] %v9228_v34  ;;  %v4354_v42 = vld [vmem:[#allocation2 + $0x64] sm:$0xff] }
  0x97   : > { %8216 = vmatpush3.bf16.msra.mxu0 %v9006_v15  ;;  %294 = vst [vmem:[#allocation2 + $0x4d0] sm:$0xff] %v9228_v34  ;;  %295 = vst [vmem:[#allocation2 + $0x4d8] sm:$0xff] %v9228_v34  ;;  %v7741_v15 = vcombine.high %v549_v9, %v557_v10  ;;  %v613_v52 = vld [vmem:[%s9418_s23 + $0x680] sm:$0xff] }
  0x98   : > { %8328 = vmatpush3.bf16.msra.mxu1 %v9008_v20  ;;  %8217 = vmatprep.subr.bf16.mxu0 %v9009_v24  ;;  %296 = vst [vmem:[#allocation2 + $0x4e0] sm:$0xff] %v9228_v34  ;;  %297 = vst [vmem:[#allocation2 + $0x4e8] sm:$0xff] %v9228_v34  ;;  %v574_v20 = vld [vmem:[%s9418_s23 + $0x548] sm:$0xff] }
  0x99   : > { %3014 = vmatmul.mubr.bf16.gmra.mrb[8].mxu0 %v7628_v3  ;;  %8329 = vmatprep.subr.bf16.mxu1 %v9011_v28  ;;  %298 = vst [vmem:[#allocation2 + $0x4f0] sm:$0xff] %v9228_v34  ;;  %299 = vst [vmem:[#allocation2 + $0x4f8] sm:$0xff] %v9228_v34  ;;  %v9025_v3 = vld [vmem:[#allocation5 + $0x240] sm:$0xff]   ;;  %v4349_v24 = vld [vmem:[#allocation2 + $0xc] sm:$0xff] }
  0x9a   : > { %3175 = vmatmul.mubr.bf16.gmra.mrb[8].mxu1 %v7630_v5  ;;  %3021 = vmatprep.mubr.bf16.mxu0 %v7645_v6  ;;  %300 = vst [vmem:[#allocation2 + $0x500] sm:$0xff] %v9228_v34  ;;  %301 = vst [vmem:[#allocation2 + $0x508] sm:$0xff] %v9228_v34  ;;  %v7710_v5 = vcombine.low %v518_v53, %v526_v54  ;;  %v7725_v6 = vcombine.high %v533_v63, %v541_v0  ;;  %v589_v28 = vld [vmem:[%s9418_s23 + $0x5c0] sm:$0xff]  ;;  %v4358_v54 = vld [vmem:[#allocation2 + $0xb4] sm:$0xff] }
  0x9b   : > { %3182 = vmatprep.mubr.bf16.mxu1 %v7647_v8  ;;  %8218 = vmatpush3.bf16.msra.mxu0 %v9010_v27  ;;  %302 = vst [vmem:[#allocation2 + $0x510] sm:$0xff] %v9228_v34  ;;  %303 = vst [vmem:[#allocation2 + $0x518] sm:$0xff] %v9228_v34  ;;  %v7727_v8 = vcombine.high %v534_v1, %v542_v2  ;;  %v581_v27 = vld [vmem:[%s9418_s23 + $0x580] sm:$0xff] }
  0x9c   : > { %8330 = vmatpush3.bf16.msra.mxu1 %v9012_v29  ;;  %304 = vst [vmem:[#allocation2 + $0x520] sm:$0xff] %v9228_v34  ;;  %305 = vst [vmem:[#allocation2 + $0x528] sm:$0xff] %v9228_v34  ;;  %8219 = vmatprep.subr.bf16.mxu0 %v9013_v35  ;;  %v582_v29 = vld [vmem:[%s9418_s23 + $0x588] sm:$0xff]  ;;  %v7773_v36 = vcombine.high %v581_v27, %v589_v28  ;;  %v621_v53 = vld [vmem:[%s9418_s23 + $0x6c0] sm:$0xff] }
  0x9d   : > { %306 = vst [vmem:[#allocation2 + $0x530] sm:$0xff] %v9228_v34  ;;  %307 = vst [vmem:[#allocation2 + $0x538] sm:$0xff] %v9228_v34  ;;  %8331 = vmatprep.subr.bf16.mxu1 %v9015_v38  ;;  %4413 = vrot.lane.b32.xlu0 %v4349_v24, %s9229_s17  ;;  %v9703_v63 = vld [vmem:[#allocation2 + $0x124] sm:$0xff] }
  0x9e   : > { %308 = vst [vmem:[#allocation2 + $0x540] sm:$0xff] %v9228_v34  ;;  %309 = vst [vmem:[#allocation2 + $0x548] sm:$0xff] %v9228_v34  ;;  %v629_v0 = vld [vmem:[%s9418_s23 + $0x700] sm:$0xff] }
  0x9f   : > { %311 = vst [vmem:[#allocation2 + $0x558] sm:$0xff] %v9228_v34  ;;  %312 = vst [vmem:[#allocation2 + $0x560] sm:$0xff] %v9228_v34  ;;  %8220 = vmatpush3.bf16.msra.mxu0 %v9014_v37  ;;  %v4352_v37 = vld [vmem:[#allocation2 + $0x3c] sm:$0xff]  ;;  %v4362_v2 = vld [vmem:[#allocation2 + $0x104] sm:$0xff] }
  0xa0   : > { %313 = vst [vmem:[#allocation2 + $0x568] sm:$0xff] %v9228_v34  ;;  %316 = vst [vmem:[#allocation2 + $0x580] sm:$0xff] %v9228_v34  ;;  %8332 = vmatpush3.bf16.msra.mxu1 %v9016_v40  ;;  %8221 = vmatprep.subr.bf16.mxu0 %v9017_v47  ;;  %v597_v40 = vld [vmem:[%s9418_s23 + $0x600] sm:$0xff] }
  0xa1   : > { %3022 = vmatmul.mubr.bf16.gmra.mrb[12].mxu0 %v7644_v16  ;;  %317 = vst [vmem:[#allocation2 + $0x588] sm:$0xff] %v9228_v34  ;;  %318 = vst [vmem:[#allocation2 + $0x590] sm:$0xff] %v9228_v34  ;;  %8333 = vmatprep.subr.bf16.mxu1 %v9019_v49  ;;  %v7743_v16 = vcombine.high %v550_v11, %v558_v12  ;;  %v4356_v49 = vld [vmem:[#allocation2 + $0x8c] sm:$0xff]  ;;  %v637_v1 = vld [vmem:[%s9418_s23 + $0x740] sm:$0xff] }
  0xa2   : > { %3183 = vmatmul.mubr.bf16.gmra.mrb[12].mxu1 %v7646_v18  ;;  %3029 = vmatprep.mubr.bf16.mxu0 %v7661_v19  ;;  %321 = vst [vmem:[#allocation2 + $0x5a8] sm:$0xff] %v9228_v34  ;;  %322 = vst [vmem:[#allocation2 + $0x5b0] sm:$0xff] %v9228_v34  ;;  %v573_v18 = vld [vmem:[%s9418_s23 + $0x540] sm:$0xff]  ;;  %v566_v19 = vld [vmem:[%s9418_s23 + $0x508] sm:$0xff] }
  0xa3   : > { %3190 = vmatprep.mubr.bf16.mxu1 %v7663_v21  ;;  %323 = vst [vmem:[#allocation2 + $0x5b8] sm:$0xff] %v9228_v34  ;;  %326 = vst [vmem:[#allocation2 + $0x5d0] sm:$0xff] %v9228_v34  ;;  %8222 = vmatpush3.bf16.msra.mxu0 %v9018_v48  ;;  %v7740_v21 = vcombine.low %v549_v9, %v557_v10  ;;  %v7757_v23 = vcombine.high %v565_v17, %v573_v18  ;;  %v4364_v9 = vld [vmem:[#allocation2 + $0x12c] sm:$0xff]  ;;  %v4367_v11 = vld [vmem:[#allocation2 + $0x174] sm:$0xff] }
  0xa4   : > { %327 = vst [vmem:[#allocation2 + $0x5d8] sm:$0xff] %v9228_v34  ;;  %328 = vst [vmem:[#allocation2 + $0x5e0] sm:$0xff] %v9228_v34  ;;  %8334 = vmatpush3.bf16.msra.mxu1 %v9020_v50  ;;  %8223 = vmatprep.subr.bf16.mxu0 %v9021_v56  ;;  %v7759_v25 = vcombine.high %v566_v19, %v574_v20  ;;  %v7758_v35 = vcombine.low %v566_v19, %v574_v20  ;;  %v622_v56 = vld [vmem:[%s9418_s23 + $0x6c8] sm:$0xff]  ;;  %v4366_v12 = vld [vmem:[#allocation2 + $0x154] sm:$0xff] }
  0xa5   : > { %331 = vst [vmem:[#allocation2 + $0x5f8] sm:$0xff] %v9228_v34  ;;  %332 = vst [vmem:[#allocation2 + $0x600] sm:$0xff] %v9228_v34  ;;  %8335 = vmatprep.subr.bf16.mxu1 %v9023_v61  ;;  %4415 = vrot.lane.b32.xlu0 %v4350_v26, %s9229_s17  ;;  %v7789_v48 = vcombine.high %v597_v40, %v605_v41  ;;  %v4360_v61 = vld [vmem:[#allocation2 + $0xdc] sm:$0xff]  ;;  %v4370_v24 = vld [vmem:[#allocation2 + $0x1a4] sm:$0xff] }
  0xa6   : > { %333 = vst [vmem:[#allocation2 + $0x608] sm:$0xff] %v9228_v34  ;;  %336 = vst [vmem:[#allocation2 + $0x620] sm:$0xff] %v9228_v34  ;;  %v415_v26 = vld [vmem:[%s9418_s23 + $0x50] sm:$0xff] }
  0xa7   : > { %337 = vst [vmem:[#allocation2 + $0x628] sm:$0xff] %v9228_v34  ;;  %338 = vst [vmem:[#allocation2 + $0x630] sm:$0xff] %v9228_v34  ;;  %8224 = vmatpush3.bf16.msra.mxu0 %v9022_v59 }
  0xa8   : > { %341 = vst [vmem:[#allocation2 + $0x1e0] sm:$0xff] %v9228_v34  ;;  %342 = vst [vmem:[#allocation2 + $0x1e8] sm:$0xf] %v9228_v34  ;;  %8336 = vmatpush3.bf16.msra.mxu1 %v9024_v62  ;;  %8433 = vmatprep.subr.bf16.mxu0 %v9025_v3  ;;  %v630_v3 = vld [vmem:[%s9418_s23 + $0x708] sm:$0xff] }
  0xa9   : > { %343 = vst [vmem:[#allocation2 + $0x208] sm:$0xff] %v9228_v34  ;;  %344 = vst [vmem:[#allocation2 + $0x210] sm:$0xf] %v9228_v34  ;;  %3030 = vmatmul.mubr.bf16.gmra.mrb[16].mxu0 %v7660_v30  ;;  %8545 = vmatprep.subr.bf16.mxu1 %v9027_v7  ;;  %v590_v30 = vld [vmem:[%s9418_s23 + $0x5c8] sm:$0xff] }
  0xaa   : > { %345 = vst [vmem:[#allocation2 + $0x230] sm:$0xff] %v9228_v34  ;;  %346 = vst [vmem:[#allocation2 + $0x238] sm:$0xf] %v9228_v34  ;;  %3191 = vmatmul.mubr.bf16.gmra.mrb[16].mxu1 %v7662_v31  ;;  %3037 = vmatprep.mubr.bf16.mxu0 %v7677_v32  ;;  %v4353_v31 = vld [vmem:[#allocation2 + $0x5c] sm:$0xff]  ;;  %v4351_v32 = vld [vmem:[#allocation2 + $0x34] sm:$0xff]  ;;  %v7775_v38 = vcombine.high %v582_v29, %v590_v30  ;;  %v7774_v47 = vcombine.low %v582_v29, %v590_v30 }
  0xab   : > { %347 = vst [vmem:[#allocation2 + $0x258] sm:$0xff] %v9228_v34  ;;  %348 = vst [vmem:[#allocation2 + $0x260] sm:$0xf] %v9228_v34  ;;  %3198 = vmatprep.mubr.bf16.mxu1 %v7679_v33  ;;  %v7756_v33 = vcombine.low %v565_v17, %v573_v18  ;;  %4417 = vrot.lane.b32.xlu1 %v4351_v32, %s9229_s17  ;;  %v4369_v17 = vld [vmem:[#allocation2 + $0x19c] sm:$0xff]  ;;  %v7820_v18 = vcombine.low %v629_v0, %v637_v1  ;;  %v4372_v32 = vld [vmem:[#allocation2 + $0x1cc] sm:$0xff] }
  0xac   : > { %349 = vst [vmem:[#allocation2 + $0x280] sm:$0xff] %v9228_v34  ;;  %350 = vst [vmem:[#allocation2 + $0x288] sm:$0xf] %v9228_v34  ;;  %4421 = vrot.lane.b32.xlu0 %v4353_v31, %s9229_s17 }
  0xad   : > { %351 = vst [vmem:[#allocation2 + $0x2a8] sm:$0xff] %v9228_v34  ;;  %352 = vst [vmem:[#allocation2 + $0x2b0] sm:$0xf] %v9228_v34 }
  0xae   : > { %353 = vst [vmem:[#allocation2 + $0x2d0] sm:$0xff] %v9228_v34  ;;  %354 = vst [vmem:[#allocation2 + $0x2d8] sm:$0xf] %v9228_v34 }
  0xaf   : > { %355 = vst [vmem:[#allocation2 + $0x2f8] sm:$0xff] %v9228_v34  ;;  %356 = vst [vmem:[#allocation2 + $0x300] sm:$0xf] %v9228_v34  ;;  %4419 = vrot.lane.b32.xlu1 %v4352_v37, %s9229_s17  ;;  %v424_v37 = vld [vmem:[%s9418_s23 + $0x98] sm:$0xff] }
  0xb0   : > { %357 = vst [vmem:[#allocation2 + $0x320] sm:$0xff] %v9228_v34  ;;  %358 = vst [vmem:[#allocation2 + $0x328] sm:$0xf] %v9228_v34  ;;  %4425 = vrot.lane.b32.xlu0 %v4355_v39, %s9229_s17  ;;  %v9739_v39 = vld [vmem:[#allocation2 + $0x8] sm:$0xff] }
  0xb1   : > { %359 = vst [vmem:[#allocation2 + $0x348] sm:$0xff] %v9228_v34  ;;  %360 = vst [vmem:[#allocation2 + $0x350] sm:$0xf] %v9228_v34  ;;  %3038 = vmatmul.mubr.bf16.gmra.mrb[20].mxu0 %v7676_v43  ;;  %v598_v43 = vld [vmem:[%s9418_s23 + $0x608] sm:$0xff] }
  0xb2   : > { %361 = vst [vmem:[#allocation2 + $0x370] sm:$0xff] %v9228_v34  ;;  %362 = vst [vmem:[#allocation2 + $0x378] sm:$0xf] %v9228_v34  ;;  %3199 = vmatmul.mubr.bf16.gmra.mrb[20].mxu1 %v7678_v44  ;;  %3045 = vmatprep.mubr.bf16.mxu0 %v7693_v45  ;;  %v606_v44 = vld [vmem:[%s9418_s23 + $0x648] sm:$0xff] }
  0xb3   : > { %363 = vst [vmem:[#allocation2 + $0x398] sm:$0xff] %v9228_v34  ;;  %364 = vst [vmem:[#allocation2 + $0x3a0] sm:$0xf] %v9228_v34  ;;  %3206 = vmatprep.mubr.bf16.mxu1 %v7695_v46  ;;  %v4357_v45 = vld [vmem:[#allocation2 + $0xac] sm:$0xff]  ;;  %v7772_v46 = vcombine.low %v581_v27, %v589_v28  ;;  %4423 = vrot.lane.b32.xlu1 %v4354_v42, %s9229_s17  ;;  %v7791_v50 = vcombine.high %v598_v43, %v606_v44  ;;  %v408_v27 = vld [vmem:[%s9418_s23 + $0x18] sm:$0xff] }
  0xb4   : > { %365 = vst [vmem:[#allocation2 + $0x3c0] sm:$0xff] %v9228_v34  ;;  %366 = vst [vmem:[#allocation2 + $0x3c8] sm:$0xf] %v9228_v34  ;;  %4429 = vrot.lane.b32.xlu0 %v4357_v45, %s9229_s17  ;;  %v7790_v59 = vcombine.low %v598_v43, %v606_v44  ;;  %v416_v28 = vld [vmem:[%s9418_s23 + $0x58] sm:$0xff]  ;;  %v9028_v42 = vld [vmem:[#allocation5 + $0x280] sm:$0xff]  }
  0xb5   : > { %367 = vst [vmem:[#allocation2 + $0x3e8] sm:$0xff] %v9228_v34  ;;  %368 = vst [vmem:[#allocation2 + $0x3f0] sm:$0xf] %v9228_v34  ;;  %v9029_v43 = vld [vmem:[#allocation5 + $0x248] sm:$0xff]  }
  0xb6   : > { %369 = vst [vmem:[#allocation2 + $0x410] sm:$0xff] %v9228_v34  ;;  %370 = vst [vmem:[#allocation2 + $0x418] sm:$0xf] %v9228_v34  ;;  %v9031_v45 = vld [vmem:[#allocation5 + $0x2c8] sm:$0xff]  }
  0xb7   : > { %371 = vst [vmem:[#allocation2 + $0x438] sm:$0xff] %v9228_v34  ;;  %372 = vst [vmem:[#allocation2 + $0x440] sm:$0xf] %v9228_v34  ;;  %4427 = vrot.lane.b32.xlu1 %v4356_v49, %s9229_s17  ;;  %v447_v49 = vld [vmem:[%s9418_s23 + $0x150] sm:$0xff] }
  0xb8   : > { %373 = vst [vmem:[#allocation2 + $0x1fc] sm:$0xff] %v9228_v34  ;;  %374 = vst [vmem:[#allocation2 + $0x204] sm:$0xf] %v9228_v34  ;;  %4433 = vrot.lane.b32.xlu0 %v4359_v51, %s9229_s17  ;;  %v448_v51 = vld [vmem:[%s9418_s23 + $0x158] sm:$0xff] }
  0xb9   : > { %375 = vst [vmem:[#allocation2 + $0x224] sm:$0xff] %v9228_v34  ;;  %376 = vst [vmem:[#allocation2 + $0x22c] sm:$0xf] %v9228_v34  ;;  %3046 = vmatmul.mubr.bf16.gmra.mrb[24].mxu0 %v7692_v55  ;;  %v614_v55 = vld [vmem:[%s9418_s23 + $0x688] sm:$0xff] }
  0xba   : > { %377 = vst [vmem:[#allocation2 + $0x24c] sm:$0xff] %v9228_v34  ;;  %378 = vst [vmem:[#allocation2 + $0x254] sm:$0xf] %v9228_v34  ;;  %3207 = vmatmul.mubr.bf16.gmra.mrb[24].mxu1 %v7694_v57  ;;  %3053 = vmatprep.mubr.bf16.mxu0 %v7709_v58  ;;  %v9698_v57 = vld [vmem:[#allocation2 + $0xfc] sm:$0xff]  ;;  %v7788_v58 = vcombine.low %v597_v40, %v605_v41  ;;  %v7807_v62 = vcombine.high %v614_v55, %v622_v56 }
  0xbb   : > { %379 = vst [vmem:[#allocation2 + $0x274] sm:$0xff] %v9228_v34  ;;  %380 = vst [vmem:[#allocation2 + $0x27c] sm:$0xf] %v9228_v34  ;;  %3214 = vmatprep.mubr.bf16.mxu1 %v7711_v60  ;;  %4431 = vrot.lane.b32.xlu1 %v4358_v54, %s9229_s17  ;;  %v7805_v60 = vcombine.high %v613_v52, %v621_v53  ;;  %v7806_v7 = vcombine.low %v614_v55, %v622_v56  ;;  %v9026_v41 = vld [vmem:[#allocation5 + $0x200] sm:$0xff]   ;;  %v9035_v54 = vld [vmem:[#allocation5 + $0x2d0] sm:$0xff]  }
  0xbc   : > { %381 = vst [vmem:[#allocation2 + $0x29c] sm:$0xff] %v9228_v34  ;;  %382 = vst [vmem:[#allocation2 + $0x2a4] sm:$0xf] %v9228_v34  ;;  %4437 = vrot.lane.b32.xlu0 %v9698_v57, %s9229_s17 }
  0xbd   : > { %383 = vst [vmem:[#allocation2 + $0x2c4] sm:$0xff] %v9228_v34  ;;  %384 = vst [vmem:[#allocation2 + $0x2cc] sm:$0xf] %v9228_v34 }
  0xbe   : > { %385 = vst [vmem:[#allocation2 + $0x2ec] sm:$0xff] %v9228_v34  ;;  %386 = vst [vmem:[#allocation2 + $0x2f4] sm:$0xf] %v9228_v34 }
  0xbf   : > { %387 = vst [vmem:[#allocation2 + $0x314] sm:$0xff] %v9228_v34  ;;  %388 = vst [vmem:[#allocation2 + $0x31c] sm:$0xf] %v9228_v34  ;;  %4435 = vrot.lane.b32.xlu1 %v4360_v61, %s9229_s17  ;;  %v9036_v61 = vld [vmem:[#allocation5 + $0x290] sm:$0xff]  }
  0xc0   : > { %389 = vst [vmem:[#allocation2 + $0x33c] sm:$0xff] %v9228_v34  ;;  %390 = vst [vmem:[#allocation2 + $0x344] sm:$0xf] %v9228_v34  ;;  %4441 = vrot.lane.b32.xlu0 %v9703_v63, %s9229_s17 }
  0xc1   : > { %391 = vst [vmem:[#allocation2 + $0x364] sm:$0xff] %v9228_v34  ;;  %392 = vst [vmem:[#allocation2 + $0x36c] sm:$0xf] %v9228_v34  ;;  %3054 = vmatmul.mubr.bf16.gmra.mrb[28].mxu0 %v7708_v4  ;;  %v638_v4 = vld [vmem:[%s9418_s23 + $0x748] sm:$0xff] }
  0xc2   : > { %393 = vst [vmem:[#allocation2 + $0x38c] sm:$0xff] %v9228_v34  ;;  %394 = vst [vmem:[#allocation2 + $0x394] sm:$0xf] %v9228_v34  ;;  %3215 = vmatmul.mubr.bf16.gmra.mrb[28].mxu1 %v7710_v5  ;;  %3061 = vmatprep.mubr.bf16.mxu0 %v7725_v6  ;;  %v9712_v5 = vld [vmem:[#allocation2 + $0x14c] sm:$0xff]  ;;  %v7804_v6 = vcombine.low %v613_v52, %v621_v53  ;;  %v7823_v10 = vcombine.high %v630_v3, %v638_v4 }
  0xc3   : > { %395 = vst [vmem:[#allocation2 + $0x3b4] sm:$0xff] %v9228_v34  ;;  %396 = vst [vmem:[#allocation2 + $0x3bc] sm:$0xf] %v9228_v34  ;;  %3222 = vmatprep.mubr.bf16.mxu1 %v7727_v8  ;;  %4439 = vrot.lane.b32.xlu1 %v4362_v2, %s9229_s17  ;;  %v7821_v8 = vcombine.high %v629_v0, %v637_v1  ;;  %v7822_v19 = vcombine.low %v630_v3, %v638_v4  ;;  %v9032_v52 = vld [vmem:[#allocation5 + $0x288] sm:$0xff]   ;;  %v9033_v53 = vld [vmem:[#allocation5 + $0x250] sm:$0xff]  }
  0xc4   : > { %397 = vst [vmem:[#allocation2 + $0x3dc] sm:$0xff] %v9228_v34  ;;  %398 = vst [vmem:[#allocation2 + $0x3e4] sm:$0xf] %v9228_v34  ;;  %4445 = vrot.lane.b32.xlu0 %v9712_v5, %s9229_s17  ;;  %v9039_v0 = vld [vmem:[#allocation5 + $0x2d8] sm:$0xff]   ;;  %v455_v1 = vld [vmem:[%s9418_s23 + $0x190] sm:$0xff] }
  0xc5   : > { %399 = vst [vmem:[#allocation2 + $0x404] sm:$0xff] %v9228_v34  ;;  %400 = vst [vmem:[#allocation2 + $0x40c] sm:$0xf] %v9228_v34  ;;  %v463_v2 = vld [vmem:[%s9418_s23 + $0x1d0] sm:$0xff]  ;;  %v456_v3 = vld [vmem:[%s9418_s23 + $0x198] sm:$0xff] }
  0xc6   : > { %401 = vst [vmem:[#allocation2 + $0x42c] sm:$0xff] %v9228_v34  ;;  %402 = vst [vmem:[#allocation2 + $0x434] sm:$0xf] %v9228_v34  ;;  %v9038_v4 = vld [vmem:[#allocation5 + $0x218] sm:$0xff]  }
  0xc7   : > { %403 = vst [vmem:[#allocation2 + $0x454] sm:$0xff] %v9228_v34  ;;  %404 = vst [vmem:[#allocation2 + $0x45c] sm:$0xf] %v9228_v34  ;;  %4443 = vrot.lane.b32.xlu1 %v4364_v9, %s9229_s17 }
  0xc8   : > { %4449 = vrot.lane.b32.xlu0 %v4367_v11, %s9229_s17 }
  0xc9   : > { %3062 = vmatmul.mubr.bf16.gmra.mrb[32].mxu0 %v7724_v13  ;;  %v645_v13 = vld [vmem:[%s9418_s23 + $0x780] sm:$0xff] }
  0xca   : > { %3223 = vmatmul.mubr.bf16.gmra.mrb[32].mxu1 %v7726_v14  ;;  %3069 = vmatprep.mubr.bf16.mxu0 %v7741_v15  ;;  %v653_v14 = vld [vmem:[%s9418_s23 + $0x7c0] sm:$0xff]  ;;  %v646_v15 = vld [vmem:[%s9418_s23 + $0x788] sm:$0xff] }
  0xcb   : > { %3230 = vmatprep.mubr.bf16.mxu1 %v7743_v16  ;;  %v654_v16 = vld [vmem:[%s9418_s23 + $0x7c8] sm:$0xff]  ;;  %4447 = vrot.lane.b32.xlu1 %v4366_v12, %s9229_s17  ;;  %v7837_v20 = vcombine.high %v645_v13, %v653_v14  ;;  %v7836_v29 = vcombine.low %v645_v13, %v653_v14  ;;  %v7649_v12 = vcombine.high %v455_v1, %v463_v2  ;;  %v9042_v14 = vld [vmem:[#allocation5 + $0x220] sm:$0xff]  }
  0xcc   : > { %4453 = vrot.lane.b32.xlu0 %v4369_v17, %s9229_s17  ;;  %v7838_v30 = vcombine.low %v646_v15, %v654_v16  ;;  %v9047_v17 = vld [vmem:[#allocation5 + $0x2e8] sm:$0xff]  }
  0xd1   : > { %3070 = vmatmul.mubr.bf16.gmra.mrb[36].mxu0 %v7740_v21  ;;  %v4368_v21 = vld [vmem:[#allocation2 + $0x17c] sm:$0xff] }
  0xd2   : > { %3231 = vmatmul.mubr.bf16.gmra.mrb[36].mxu1 %v7742_v22  ;;  %3077 = vmatprep.mubr.bf16.mxu0 %v7757_v23  ;;  %v7839_v22 = vcombine.high %v646_v15, %v654_v16  ;;  %v4371_v23 = vld [vmem:[#allocation2 + $0x1c4] sm:$0xff] }
  0xd3   : > { %3238 = vmatprep.mubr.bf16.mxu1 %v7759_v25  ;;  %v407_v25 = vld [vmem:[%s9418_s23 + $0x10] sm:$0xff]  ;;  %4451 = vrot.lane.b32.xlu1 %v4368_v21, %s9229_s17  ;;  %v9044_v15 = vld [vmem:[#allocation5 + $0x2a0] sm:$0xff]   ;;  %v9045_v16 = vld [vmem:[#allocation5 + $0x268] sm:$0xff]  }
  0xd4   : > { %4457 = vrot.lane.b32.xlu0 %v4371_v23, %s9229_s17  ;;  %v7601_v31 = vcombine.high %v407_v25, %v415_v26  ;;  %v7600_v40 = vcombine.low %v407_v25, %v415_v26  ;;  %v9046_v21 = vld [vmem:[#allocation5 + $0x228] sm:$0xff]   ;;  %v7648_v25 = vcombine.low %v455_v1, %v463_v2  ;;  %v9051_v26 = vld [vmem:[#allocation5 + $0x2f0] sm:$0xff]   ;;  %v4736_v2 = vld [vmem:[#allocation2 + $0x11e] sm:$0xff] }
  0xd5   : > { %v9048_v23 = vld [vmem:[#allocation5 + $0x2a8] sm:$0xff]  }
  0xd7   : > { %4455 = vrot.lane.b32.xlu1 %v4370_v24, %s9229_s17  ;;  %v9049_v24 = vld [vmem:[#allocation5 + $0x270] sm:$0xff]  }
  0xd8   : > { %4605 = vrot.lane.b32.xlu0 %v9228_v34, %s9230_s18  ;;  %v7602_v34 = vcombine.low %v408_v27, %v416_v28 }
  0xd9   : > { %3078 = vmatmul.mubr.bf16.gmra.mrb[40].mxu0 %v7756_v33  ;;  %v7603_v33 = vcombine.high %v408_v27, %v416_v28 }
  0xda   : > { %3239 = vmatmul.mubr.bf16.gmra.mrb[40].mxu1 %v7758_v35  ;;  %3085 = vmatprep.mubr.bf16.mxu0 %v7773_v36  ;;  %v423_v35 = vld [vmem:[%s9418_s23 + $0x90] sm:$0xff] }
  0xdb   : > { %3246 = vmatprep.mubr.bf16.mxu1 %v7775_v38  ;;  %4459 = vrot.lane.b32.xlu1 %v4372_v32, %s9229_s17  ;;  %v431_v36 = vld [vmem:[%s9418_s23 + $0xd0] sm:$0xff]  ;;  %v432_v38 = vld [vmem:[%s9418_s23 + $0xd8] sm:$0xff] }
  0xdc   : > { %4609 = vrot.lane.b32.xlu0 %v9739_v39, %s9230_s18  ;;  %v7617_v44 = vcombine.high %v423_v35, %v431_v36  ;;  %v7616_v55 = vcombine.low %v423_v35, %v431_v36  ;;  %v7618_v56 = vcombine.low %v424_v37, %v432_v38  ;;  %v9053_v32 = vld [vmem:[#allocation5 + $0x278] sm:$0xff]   ;;  %v487_v35 = vld [vmem:[%s9418_s23 + $0x290] sm:$0xff] }
  0xdd   : > { %v495_v36 = vld [vmem:[%s9418_s23 + $0x2d0] sm:$0xff] }
  0xdf   : > { %4607 = vrot.lane.b32.xlu1 %v9739_v39, %s9230_s18 }
  0xe0   : > { %4613 = vrot.lane.b32.xlu0 %v9739_v39, %s9230_s18 }
  0xe1   : > { %3086 = vmatmul.mubr.bf16.gmra.mrb[44].mxu0 %v7772_v46  ;;  %v7619_v46 = vcombine.high %v424_v37, %v432_v38  ;;  %v488_v37 = vld [vmem:[%s9418_s23 + $0x298] sm:$0xff] }
  0xe2   : > { %3247 = vmatmul.mubr.bf16.gmra.mrb[44].mxu1 %v7774_v47  ;;  %3093 = vmatprep.mubr.bf16.mxu0 %v7789_v48  ;;  %v9030_v47 = vld [vmem:[#allocation5 + $0x208] sm:$0xff]   ;;  %v439_v48 = vld [vmem:[%s9418_s23 + $0x110] sm:$0xff]  ;;  %v9054_v38 = vld [vmem:[#allocation5 + $0x238] sm:$0xff]  }
  0xe3   : > { %3254 = vmatprep.mubr.bf16.mxu1 %v7791_v50  ;;  %4611 = vrot.lane.b32.xlu1 %v9739_v39, %s9230_s18  ;;  %v440_v50 = vld [vmem:[%s9418_s23 + $0x118] sm:$0xff]  ;;  %v7632_v9 = vcombine.low %v439_v48, %v447_v49 }
  0xe4   : > { %4617 = vrot.lane.b32.xlu0 %v9739_v39, %s9230_s18  ;;  %v7634_v11 = vcombine.low %v440_v50, %v448_v51 }
  0xe7   : > { %4615 = vrot.lane.b32.xlu1 %v9739_v39, %s9230_s18 }
  0xe8   : > { %4621 = vrot.lane.b32.xlu0 %v9739_v39, %s9230_s18 }
  0xe9   : > { %3094 = vmatmul.mubr.bf16.gmra.mrb[48].mxu0 %v7788_v58  ;;  %v7633_v58 = vcombine.high %v439_v48, %v447_v49  ;;  %v511_v48 = vld [vmem:[%s9418_s23 + $0x350] sm:$0xff]  ;;  %v504_v49 = vld [vmem:[%s9418_s23 + $0x318] sm:$0xff] }
  0xea   : > { %3255 = vmatmul.mubr.bf16.gmra.mrb[48].mxu1 %v7790_v59  ;;  %3101 = vmatprep.mubr.bf16.mxu0 %v7805_v60  ;;  %v9034_v59 = vld [vmem:[#allocation5 + $0x210] sm:$0xff]   ;;  %v7635_v60 = vcombine.high %v440_v50, %v448_v51  ;;  %v512_v50 = vld [vmem:[%s9418_s23 + $0x358] sm:$0xff]  ;;  %v7680_v51 = vcombine.low %v487_v35, %v495_v36 }
  0xeb   : > { %3262 = vmatprep.mubr.bf16.mxu1 %v7807_v62  ;;  %v9037_v62 = vld [vmem:[#allocation5 + $0x258] sm:$0xff]   ;;  %4619 = vrot.lane.b32.xlu1 %v9739_v39, %s9230_s18 }
  0xec   : > { %4625 = vrot.lane.b32.xlu0 %v9739_v39, %s9230_s18 }
  0xef   : > { %4623 = vrot.lane.b32.xlu1 %v9739_v39, %s9230_s18 }
  0xf0   : > { %4629 = vrot.lane.b32.xlu0 %v9739_v39, %s9230_s18 }
  0xf1   : > { %3102 = vmatmul.mubr.bf16.gmra.mrb[52].mxu0 %v7804_v6  ;;  %v464_v6 = vld [vmem:[%s9418_s23 + $0x1d8] sm:$0xff] }
  0xf2   : > { %3263 = vmatmul.mubr.bf16.gmra.mrb[52].mxu1 %v7806_v7  ;;  %3109 = vmatprep.mubr.bf16.mxu0 %v7821_v8  ;;  %v9040_v7 = vld [vmem:[#allocation5 + $0x298] sm:$0xff]   ;;  %v9041_v8 = vld [vmem:[#allocation5 + $0x260] sm:$0xff]   ;;  %v7651_v13 = vcombine.high %v456_v3, %v464_v6  ;;  %v7650_v27 = vcombine.low %v456_v3, %v464_v6  ;;  %v535_v3 = vld [vmem:[%s9418_s23 + $0x410] sm:$0xff] }
  0xf3   : > { %3270 = vmatprep.mubr.bf16.mxu1 %v7823_v10  ;;  %v9043_v10 = vld [vmem:[#allocation5 + $0x2e0] sm:$0xff]   ;;  %4627 = vrot.lane.b32.xlu1 %v9739_v39, %s9230_s18  ;;  %v536_v6 = vld [vmem:[%s9418_s23 + $0x418] sm:$0xff] }
  0xf4   : > { %4633 = vrot.lane.b32.xlu0 %v9739_v39, %s9230_s18 }
  0xf7   : > { %4631 = vrot.lane.b32.xlu1 %v9739_v39, %s9230_s18 }
  0xf8   : > { %4637 = vrot.lane.b32.xlu0 %v9739_v39, %s9230_s18 }
  0xf9   : > { %3110 = vmatmul.mubr.bf16.gmra.mrb[56].mxu0 %v7820_v18  ;;  %v471_v18 = vld [vmem:[%s9418_s23 + $0x210] sm:$0xff] }
  0xfa   : > { %3271 = vmatmul.mubr.bf16.gmra.mrb[56].mxu1 %v7822_v19  ;;  %3117 = vmatprep.mubr.bf16.mxu0 %v7837_v20  ;;  %v479_v19 = vld [vmem:[%s9418_s23 + $0x250] sm:$0xff]  ;;  %v472_v20 = vld [vmem:[%s9418_s23 + $0x218] sm:$0xff] }
  0xfb   : > { %3278 = vmatprep.mubr.bf16.mxu1 %v7839_v22  ;;  %v480_v22 = vld [vmem:[%s9418_s23 + $0x258] sm:$0xff]  ;;  %v7665_v28 = vcombine.high %v471_v18, %v479_v19  ;;  %4635 = vrot.lane.b32.xlu1 %v9739_v39, %s9230_s18 }
  0xfc   : > { %4641 = vrot.lane.b32.xlu0 %v9739_v39, %s9230_s18 }
  0xff   : > { %4639 = vrot.lane.b32.xlu1 %v9739_v39, %s9230_s18 }
 0x100   : > { %4645 = vrot.lane.b32.xlu0 %v9739_v39, %s9230_s18 }
 0x101   : > { %3118 = vmatmul.mubr.bf16.gmra.mrb[60].mxu0 %v7836_v29  ;;  %v7667_v29 = vcombine.high %v472_v20, %v480_v22 }
 0x102   : > { %3279 = vmatmul.mubr.bf16.gmra.mrb[60].mxu1 %v7838_v30  ;;  %3319 = vmatprep.mubr.bf16.mxu0 %v7601_v31  ;;  %v9050_v30 = vld [vmem:[#allocation5 + $0x230] sm:$0xff]  }
 0x103   : > { %3480 = vmatprep.mubr.bf16.mxu1 %v7603_v33  ;;  %v9052_v31 = vld [vmem:[#allocation5 + $0x2b0] sm:$0xff]   ;;  %v9055_v33 = vld [vmem:[#allocation5 + $0x2f8] sm:$0xff]   ;;  %4643 = vrot.lane.b32.xlu1 %v9739_v39, %s9230_s18 }
 0x104   : > { %4649 = vrot.lane.b32.xlu0 %v9739_v39, %s9230_s18 }
 0x107   : > { %4647 = vrot.lane.b32.xlu1 %v9739_v39, %s9230_s18 }
 0x109   : > { %3320 = vmatmul.mubr.bf16.vlgmr.msra.gmra.mrb[64].mxu0 %v7600_v40  ;;  %v496_v40 = vld [vmem:[%s9418_s23 + $0x2d8] sm:$0xff] }
 0x10a   : > { %3481 = vmatmul.mubr.bf16.vlgmr.msra.gmra.mrb[64].mxu1 %v7602_v34  ;;  %8434 = vmatpush3.bf16.msra.mxu0 %v9026_v41  ;;  %v9056_v34 = vld [vmem:[#allocation5 + $0x2b8] sm:$0xff]   ;;  %v9057_v41 = vld [vmem:[#allocation5 + $0x340] sm:$0xff]  }
 0x10b   : > { %8546 = vmatpush3.bf16.msra.mxu1 %v9028_v42  ;;  %3327 = vmatprep.mubr.bf16.mxu0 %v7617_v44  ;;  %v7664_v42 = vcombine.low %v471_v18, %v479_v19  ;;  %v7681_v44 = vcombine.high %v487_v35, %v495_v36  ;;  %v552_v18 = vld [vmem:[%s9418_s23 + $0x498] sm:$0xff] }
 0x10c   : > { %3488 = vmatprep.mubr.bf16.mxu1 %v7619_v46  ;;  %8435 = vmatprep.subr.bf16.mxu0 %v9029_v43  ;;  %v7666_v43 = vcombine.low %v472_v20, %v480_v22  ;;  %v9059_v46 = vld [vmem:[#allocation5 + $0x3c0] sm:$0xff]   ;;  %v560_v19 = vld [vmem:[%s9418_s23 + $0x4d8] sm:$0xff]  ;;  %v4568_v20 = vld [vmem:[#allocation2 + $0x228] sm:$0xff] }
 0x10d   : > { %8547 = vmatprep.subr.bf16.mxu1 %v9031_v45  ;;  %v7683_v45 = vcombine.high %v488_v37, %v496_v40  ;;  %4651 = vrot.lane.b32.xlu1 %v9739_v39, %s9230_s18  ;;  %v568_v35 = vld [vmem:[%s9418_s23 + $0x518] sm:$0xff] }
 0x10e   : > { %8436 = vmatpush3.bf16.msra.mxu0 %v9030_v47  ;;  %v503_v47 = vld [vmem:[%s9418_s23 + $0x310] sm:$0xff]  ;;  %v576_v36 = vld [vmem:[%s9418_s23 + $0x558] sm:$0xff] }
 0x10f   : > { %8548 = vmatpush3.bf16.msra.mxu1 %v9032_v52  ;;  %8437 = vmatprep.subr.bf16.mxu0 %v9033_v53  ;;  %v7682_v52 = vcombine.low %v488_v37, %v496_v40  ;;  %v7697_v53 = vcombine.high %v503_v47, %v511_v48  ;;  %v4572_v37 = vld [vmem:[#allocation2 + $0x278] sm:$0xff] }
 0x110   : > { %8549 = vmatprep.subr.bf16.mxu1 %v9035_v54  ;;  %v7699_v54 = vcombine.high %v504_v49, %v512_v50 }
 0x111   : > { %3328 = vmatmul.mubr.bf16.gmra.mrb[68].mxu0 %v7616_v55  ;;  %v519_v55 = vld [vmem:[%s9418_s23 + $0x390] sm:$0xff] }
 0x112   : > { %3489 = vmatmul.mubr.bf16.gmra.mrb[68].mxu1 %v7618_v56  ;;  %3335 = vmatprep.mubr.bf16.mxu0 %v7633_v58  ;;  %v527_v56 = vld [vmem:[%s9418_s23 + $0x3d0] sm:$0xff]  ;;  %v520_v58 = vld [vmem:[%s9418_s23 + $0x398] sm:$0xff] }
 0x113   : > { %3496 = vmatprep.mubr.bf16.mxu1 %v7635_v60  ;;  %8438 = vmatpush3.bf16.msra.mxu0 %v9034_v59  ;;  %v528_v59 = vld [vmem:[%s9418_s23 + $0x3d8] sm:$0xff]  ;;  %v7696_v60 = vcombine.low %v503_v47, %v511_v48  ;;  %v591_v47 = vld [vmem:[%s9418_s23 + $0x5d0] sm:$0xff] }
 0x114   : > { %8550 = vmatpush3.bf16.msra.mxu1 %v9036_v61  ;;  %8439 = vmatprep.subr.bf16.mxu0 %v9037_v62  ;;  %v7698_v61 = vcombine.low %v504_v49, %v512_v50  ;;  %v7713_v62 = vcombine.high %v519_v55, %v527_v56  ;;  %v7715_v1 = vcombine.high %v520_v58, %v528_v59  ;;  %v584_v49 = vld [vmem:[%s9418_s23 + $0x598] sm:$0xff] }
 0x115   : > { %8551 = vmatprep.subr.bf16.mxu1 %v9039_v0  ;;  %v4734_v0 = vld [vmem:[#allocation2 + $0xf6] sm:$0xff] }
 0x116   : > { %4798 = vrot.lane.b32.xlu0 %v4734_v0, %s9231_s5  ;;  %v592_v50 = vld [vmem:[%s9418_s23 + $0x5d8] sm:$0xff] }
 0x117   : > { %8440 = vmatpush3.bf16.msra.mxu0 %v9038_v4  ;;  %v543_v4 = vld [vmem:[%s9418_s23 + $0x450] sm:$0xff]  ;;  %v9877_v0 = vld [vmem:[%s9418_s23 + $0x618] sm:$0xff] }
 0x118   : > { %8552 = vmatpush3.bf16.msra.mxu1 %v9040_v7  ;;  %8441 = vmatprep.subr.bf16.mxu0 %v9041_v8  ;;  %v544_v7 = vld [vmem:[%s9418_s23 + $0x458] sm:$0xff]  ;;  %v7712_v8 = vcombine.low %v519_v55, %v527_v56  ;;  %v7779_v55 = vcombine.high %v584_v49, %v592_v50 }
 0x119   : > { %3336 = vmatmul.mubr.bf16.gmra.mrb[72].mxu0 %v7632_v9  ;;  %8553 = vmatprep.subr.bf16.mxu1 %v9043_v10  ;;  %v7714_v9 = vcombine.low %v520_v58, %v528_v59  ;;  %v7729_v10 = vcombine.high %v535_v3, %v543_v4  ;;  %v4739_v58 = vld [vmem:[#allocation2 + $0x14e] sm:$0xff] }
 0x11a   : > { %3497 = vmatmul.mubr.bf16.gmra.mrb[72].mxu1 %v7634_v11  ;;  %3343 = vmatprep.mubr.bf16.mxu0 %v7649_v12  ;;  %v4738_v11 = vld [vmem:[#allocation2 + $0x146] sm:$0xff]  ;;  %v7731_v12 = vcombine.high %v536_v6, %v544_v7  ;;  %v4932_v59 = vld [vmem:[#allocation2 + $0x174] sm:$0xff] }
 0x11b   : > { %3504 = vmatprep.mubr.bf16.mxu1 %v7651_v13  ;;  %8442 = vmatpush3.bf16.msra.mxu0 %v9042_v14  ;;  %v4566_v13 = vld [vmem:[#allocation2 + $0x200] sm:$0xff]  ;;  %v9818_v14 = vpop.permute.xlu0 %4413 }
 0x11c   : > { %8554 = vmatpush3.bf16.msra.mxu1 %v9044_v15  ;;  %8443 = vmatprep.subr.bf16.mxu0 %v9045_v16  ;;  %v4740_v15 = vld [vmem:[#allocation2 + $0x16e] sm:$0xff] }
 0x11d   : > { %8555 = vmatprep.subr.bf16.mxu1 %v9047_v17  ;;  %4802 = vrot.lane.b32.xlu0 %v4736_v2, %s9231_s5  ;;  %v551_v16 = vld [vmem:[%s9418_s23 + $0x490] sm:$0xff] }
 0x11e   : > { %v559_v17 = vld [vmem:[%s9418_s23 + $0x4d0] sm:$0xff]  ;;  %4655 = vrot.lane.b32.xlu1 %v4566_v13, %s9230_s18 }
 0x11f   : > { %8444 = vmatpush3.bf16.msra.mxu0 %v9046_v21  ;;  %v7728_v21 = vcombine.low %v535_v3, %v543_v4  ;;  %v9826_v22 = vpop.permute.xlu0 %4415  ;;  %v4741_v2 = vld [vmem:[#allocation2 + $0x176] sm:$0xff] }
 0x120   : > { %8556 = vmatpush3.bf16.msra.mxu1 %v9048_v23  ;;  %8445 = vmatprep.subr.bf16.mxu0 %v9049_v24  ;;  %v7730_v23 = vcombine.low %v536_v6, %v544_v7  ;;  %v7745_v24 = vcombine.high %v551_v16, %v559_v17 }
 0x121   : > { %3344 = vmatmul.mubr.bf16.gmra.mrb[76].mxu0 %v7648_v25  ;;  %8557 = vmatprep.subr.bf16.mxu1 %v9051_v26  ;;  %v4742_v25 = vld [vmem:[#allocation2 + $0x196] sm:$0xff]  ;;  %v7747_v26 = vcombine.high %v552_v18, %v560_v19 }
 0x122   : > { %3505 = vmatmul.mubr.bf16.gmra.mrb[76].mxu1 %v7650_v27  ;;  %3351 = vmatprep.mubr.bf16.mxu0 %v7665_v28  ;;  %v9829_v27 = vpop.permute.xlu1 %4417  ;;  %v4570_v28 = vld [vmem:[#allocation2 + $0x250] sm:$0xff] }
 0x123   : > { %3512 = vmatprep.mubr.bf16.mxu1 %v7667_v29  ;;  %8446 = vmatpush3.bf16.msra.mxu0 %v9050_v30  ;;  %v9832_v29 = vpop.permute.xlu0 %4421  ;;  %v4744_v30 = vld [vmem:[#allocation2 + $0x1be] sm:$0xff] }
 0x124   : > { %8558 = vmatpush3.bf16.msra.mxu1 %v9052_v31  ;;  %8447 = vmatprep.subr.bf16.mxu0 %v9053_v32  ;;  %v567_v31 = vld [vmem:[%s9418_s23 + $0x510] sm:$0xff] }
 0x125   : > { %8559 = vmatprep.subr.bf16.mxu1 %v9055_v33  ;;  %4806 = vrot.lane.b32.xlu0 %v4738_v11, %s9231_s5  ;;  %v575_v32 = vld [vmem:[%s9418_s23 + $0x550] sm:$0xff] }
 0x126   : > { %4659 = vrot.lane.b32.xlu1 %v4568_v20, %s9230_s18  ;;  %v9837_v33 = vpop.permute.xlu1 %4419  ;;  %v4743_v20 = vld [vmem:[#allocation2 + $0x19e] sm:$0xff] }
 0x127   : > { %8448 = vmatpush3.bf16.msra.mxu0 %v9054_v38  ;;  %13061 = vst [vmem:[#allocation10_spill] sm:$0xff] %v9837_v33  ;;  %v7744_v38 = vcombine.low %v551_v16, %v559_v17  ;;  %v9842_v40 = vpop.permute.xlu0 %4425  ;;  %v6101_v33 = vld [vmem:[#allocation2 + $0x3b8] sm:$0xff] }
 0x128   : > { %8560 = vmatpush3.bf16.msra.mxu1 %v9056_v34  ;;  %8657 = vmatprep.subr.bf16.mxu0 %v9057_v41  ;;  %13062 = vst [vmem:[#allocation11_spill] sm:$0xff] %v9842_v40  ;;  %v7746_v34 = vcombine.low %v552_v18, %v560_v19  ;;  %v7761_v41 = vcombine.high %v567_v31, %v575_v32 }
 0x129   : > { %3352 = vmatmul.mubr.bf16.gmra.mrb[80].mxu0 %v7664_v42  ;;  %8769 = vmatprep.subr.bf16.mxu1 %v9059_v46  ;;  %v7763_v42 = vcombine.high %v568_v35, %v576_v36  ;;  %v583_v46 = vld [vmem:[%s9418_s23 + $0x590] sm:$0xff] }
 0x12a   : > { %3513 = vmatmul.mubr.bf16.gmra.mrb[80].mxu1 %v7666_v43  ;;  %3359 = vmatprep.mubr.bf16.mxu0 %v7681_v44  ;;  %v9845_v43 = vpop.permute.xlu1 %4423  ;;  %v4735_v44 = vld [vmem:[#allocation2 + $0xfe] sm:$0xff]  ;;  %v7776_v6 = vcombine.low %v583_v46, %v591_v47 }
 0x12b   : > { %3520 = vmatprep.mubr.bf16.mxu1 %v7683_v45  ;;  %4810 = vrot.lane.b32.xlu0 %v4740_v15, %s9231_s5  ;;  %13063 = vst [vmem:[#allocation12_spill] sm:$0xff] %v9845_v43  ;;  %v9849_v45 = vpop.permute.xlu0 %4429 }
 0x12c   : > { %4663 = vrot.lane.b32.xlu1 %v4570_v28, %s9230_s18  ;;  %13064 = vst [vmem:[#allocation13_spill] sm:$0xff] %v9849_v45  ;;  %v9896_v28 = vld [vmem:[%s9418_s23 + $0x6d0] sm:$0xff] }
 0x12e   : > { %v9854_v48 = vpop.permute.xlu1 %4427 }
 0x12f   : > { %4814 = vrot.lane.b32.xlu0 %v4742_v25, %s9231_s5  ;;  %13065 = vst [vmem:[#allocation14_spill] sm:$0xff] %v9854_v48 }
 0x130   : > { %4667 = vrot.lane.b32.xlu1 %v4572_v37, %s9230_s18 }
 0x131   : > { %3360 = vmatmul.mubr.bf16.gmra.mrb[84].mxu0 %v7680_v51  ;;  %v4737_v51 = vld [vmem:[#allocation2 + $0x126] sm:$0xff] }
 0x132   : > { %3521 = vmatmul.mubr.bf16.gmra.mrb[84].mxu1 %v7682_v52  ;;  %3367 = vmatprep.mubr.bf16.mxu0 %v7697_v53  ;;  %v7760_v52 = vcombine.low %v567_v31, %v575_v32  ;;  %v7762_v53 = vcombine.low %v568_v35, %v576_v36  ;;  %v9863_v56 = vpop.permute.xlu1 %4431  ;;  %v9902_v32 = vld [vmem:[%s9418_s23 + $0x698] sm:$0xff]  ;;  %v4745_v36 = vld [vmem:[#allocation2 + $0x1c6] sm:$0xff] }
 0x133   : > { %3528 = vmatprep.mubr.bf16.mxu1 %v7699_v54  ;;  %4818 = vrot.lane.b32.xlu0 %v4744_v30, %s9231_s5  ;;  %v7777_v54 = vcombine.high %v583_v46, %v591_v47  ;;  %13067 = vst [vmem:[#allocation16_spill] sm:$0xff] %v9863_v56  ;;  %v9905_v35 = vld [vmem:[%s9418_s23 + $0x6d8] sm:$0xff] }
 0x134   : > { %4800 = vrot.lane.b32.xlu1 %v4735_v44, %s9231_s5 }
 0x136   : > { %v9880_v3 = vpop.permute.xlu1 %4435 }
 0x137   : > { %4990 = vrot.lane.b32.xlu0 %v9698_v57, %s9232_s10  ;;  %v9860_v57 = vpop.permute.xlu0 %4433  ;;  %13069 = vst [vmem:[#allocation18_spill] sm:$0xff] %v9880_v3 }
 0x138   : > { %13066 = vst [vmem:[#allocation15_spill] sm:$0xff] %v9860_v57  ;;  %4804 = vrot.lane.b32.xlu1 %v4737_v51, %s9231_s5 }
 0x139   : > { %3368 = vmatmul.mubr.bf16.gmra.mrb[88].mxu0 %v7696_v60  ;;  %v9871_v60 = vld [vmem:[%s9418_s23 + $0x650] sm:$0xff] }
 0x13a   : > { %3529 = vmatmul.mubr.bf16.gmra.mrb[88].mxu1 %v7698_v61  ;;  %3375 = vmatprep.mubr.bf16.mxu0 %v7713_v62  ;;  %v9907_v37 = vpop.permute.xlu1 %4439 }
 0x13b   : > { %3536 = vmatprep.mubr.bf16.mxu1 %v7715_v1  ;;  %4994 = vrot.lane.b32.xlu0 %v9703_v63, %s9232_s10  ;;  %v9868_v63 = vld [vmem:[%s9418_s23 + $0x610] sm:$0xff]  ;;  %v9874_v61 = vpop.permute.xlu0 %4437  ;;  %v608_v1 = vld [vmem:[%s9418_s23 + $0x658] sm:$0xff]  ;;  %13071 = vst [vmem:[#allocation20_spill] sm:$0xff] %v9907_v37 }
 0x13c   : > { %4808 = vrot.lane.b32.xlu1 %v4739_v58, %s9231_s5  ;;  %13068 = vst [vmem:[#allocation17_spill] sm:$0xff] %v9874_v61  ;;  %v7793_v11 = vcombine.high %v9868_v63, %v9871_v60  ;;  %v7795_v17 = vcombine.high %v9877_v0, %v608_v1  ;;  %v7794_v47 = vcombine.low %v9877_v0, %v608_v1 }
 0x13e   : > { %v9921_v0 = vpop.permute.xlu1 %4443 }
 0x13f   : > { %4998 = vrot.lane.b32.xlu0 %v9712_v5, %s9232_s10  ;;  %v9899_v30 = vpop.permute.xlu0 %4441  ;;  %13072 = vst [vmem:[#allocation21_spill] sm:$0xff] %v9921_v0 }
 0x140   : > { %4812 = vrot.lane.b32.xlu1 %v4741_v2, %s9231_s5  ;;  %13070 = vst [vmem:[#allocation19_spill] sm:$0xff] %v9899_v30  ;;  %v9926_v2 = vld [vmem:[%s9418_s23 + $0x710] sm:$0xff] }
 0x141   : > { %3376 = vmatmul.mubr.bf16.gmra.mrb[92].mxu0 %v7712_v8 }
 0x142   : > { %3537 = vmatmul.mubr.bf16.gmra.mrb[92].mxu1 %v7714_v9  ;;  %3383 = vmatprep.mubr.bf16.mxu0 %v7729_v10  ;;  %v7778_v10 = vcombine.low %v584_v49, %v592_v50  ;;  %v5118_v50 = vld [vmem:[#allocation2 + $0x102] sm:$0xff] }
 0x143   : > { %3544 = vmatprep.mubr.bf16.mxu1 %v7731_v12  ;;  %5002 = vrot.lane.b32.xlu0 %v4932_v59, %s9232_s10  ;;  %v4934_v12 = vld [vmem:[#allocation2 + $0x19c] sm:$0xff]  ;;  %v4927_v59 = vld [vmem:[#allocation2 + $0x104] sm:$0xff] }
 0x144   : > { %4816 = vrot.lane.b32.xlu1 %v4743_v20, %s9231_s5 }
 0x147   : > { %5006 = vrot.lane.b32.xlu0 %v4934_v12, %s9232_s10 }
 0x148   : > { %4820 = vrot.lane.b32.xlu1 %v4745_v36, %s9231_s5  ;;  %v4931_v36 = vld [vmem:[#allocation2 + $0x154] sm:$0xff] }
 0x149   : > { %3384 = vmatmul.mubr.bf16.gmra.mrb[96].mxu0 %v7728_v21 }
 0x14a   : > { %3545 = vmatmul.mubr.bf16.gmra.mrb[96].mxu1 %v7730_v23  ;;  %3391 = vmatprep.mubr.bf16.mxu0 %v7745_v24  ;;  %v4936_v24 = vld [vmem:[#allocation2 + $0x1c4] sm:$0xff] }
 0x14b   : > { %3552 = vmatprep.mubr.bf16.mxu1 %v7747_v26  ;;  %v9893_v26 = vld [vmem:[%s9418_s23 + $0x690] sm:$0xff]  ;;  %5010 = vrot.lane.b32.xlu0 %v4936_v24, %s9232_s10 }
 0x14c   : > { %v7809_v49 = vcombine.high %v9893_v26, %v9896_v28  ;;  %4992 = vrot.lane.b32.xlu1 %v4927_v59, %s9232_s10  ;;  %v7808_v12 = vcombine.low %v9893_v26, %v9896_v28 }
 0x14f   : > { %5182 = vrot.lane.b32.xlu0 %v5118_v50, %s9233_s11  ;;  %v656_v50 = vld [vmem:[%s9418_s23 + $0x7d8] sm:$0xff] }
 0x151   : > { %3392 = vmatmul.mubr.bf16.gmra.mrb[100].mxu0 %v7744_v38 }
 0x152   : > { %3553 = vmatmul.mubr.bf16.gmra.mrb[100].mxu1 %v7746_v34  ;;  %3399 = vmatprep.mubr.bf16.mxu0 %v7761_v41  ;;  %v7792_v41 = vcombine.low %v9868_v63, %v9871_v60 }
 0x153   : > { %3560 = vmatprep.mubr.bf16.mxu1 %v7763_v42 }
 0x159   : > { %3400 = vmatmul.mubr.bf16.gmra.mrb[104].mxu0 %v7760_v52 }
 0x15a   : > { %3561 = vmatmul.mubr.bf16.gmra.mrb[104].mxu1 %v7762_v53  ;;  %3407 = vmatprep.mubr.bf16.mxu0 %v7777_v54  ;;  %v7811_v54 = vcombine.high %v9902_v32, %v9905_v35 }
 0x15b   : > { %3568 = vmatprep.mubr.bf16.mxu1 %v7779_v55 }
 0x15c   : > { %v8001_v62 = vpop.f32.mrb[0].mxu0 }
 0x15d   : > { %v8113_v5 = vpop.f32.mrb[0].mxu1  ;;  %v8002_v4 = vpop.f32.mrb[1].mxu0 }
 0x15e   : > { %v8003_v7 = vadd.f32 %v8002_v4, %v8001_v62  ;;  %v8114_v8 = vpop.f32.mrb[1].mxu1  ;;  %v8004_v9 = vpop.f32.mrb[2].mxu0  ;;  %v5120_v62 = vld [vmem:[#allocation2 + $0x12a] sm:$0xff] }
 0x15f   : > { %v8115_v13 = vadd.f32 %v8114_v8, %v8113_v5  ;;  %v8116_v15 = vpop.f32.mrb[2].mxu1  ;;  %v8005_v16 = vpop.f32.mrb[3].mxu0  ;;  %v9929_v5 = vld [vmem:[%s9418_s23 + $0x750] sm:$0xff]  ;;  %5186 = vrot.lane.b32.xlu0 %v5120_v62, %s9233_s11 }
 0x160   : > { %v8006_v18 = vadd.f32 %v8005_v16, %v8004_v9  ;;  %v8117_v19 = vpop.f32.mrb[3].mxu1  ;;  %v9936_v8 = vpop.permute.xlu0 %4445  ;;  %v4929_v9 = vld [vmem:[#allocation2 + $0x12c] sm:$0xff] }
 0x161   : > { %v9887_v21 = vadd.f32 %v8115_v13, %v8003_v7  ;;  %v8118_v23 = vadd.f32 %v8117_v19, %v8116_v15  ;;  %3408 = vmatmul.mubr.bf16.gmra.mrb[108].mxu0 %v7776_v6  ;;  %v9933_v6 = vld [vmem:[%s9418_s23 + $0x718] sm:$0xff]  ;;  %13073 = vst [vmem:[#allocation22_spill] sm:$0xff] %v9936_v8  ;;  %4996 = vrot.lane.b32.xlu1 %v4929_v9, %s9232_s10  ;;  %v5126_v9 = vld [vmem:[#allocation2 + $0x1a2] sm:$0xff] }
 0x162   : > { %3569 = vmatmul.mubr.bf16.gmra.mrb[108].mxu1 %v7778_v10  ;;  %3415 = vmatprep.mubr.bf16.mxu0 %v7793_v11  ;;  %v640_v7 = vld [vmem:[%s9418_s23 + $0x758] sm:$0xff] }
 0x163   : > { %v9890_v25 = vadd.f32 %v8118_v23, %v8006_v18  ;;  %3576 = vmatprep.mubr.bf16.mxu1 %v7795_v17  ;;  %v7810_v17 = vcombine.low %v9902_v32, %v9905_v35  ;;  %v7825_v18 = vcombine.high %v9926_v2, %v9929_v5  ;;  %v5122_v19 = vld [vmem:[#allocation2 + $0x152] sm:$0xff]  ;;  %v7826_v62 = vcombine.low %v9933_v6, %v640_v7 }
 0x164   : > { %v8007_v31 = vpop.f32.mrb[4].mxu0  ;;  %5190 = vrot.lane.b32.xlu0 %v5122_v19, %s9233_s11  ;;  %v9985_v19 = vld [vmem:[%s9418_s23 + $0x20] sm:$0xff] }
 0x165   : > { %v8119_v38 = vpop.f32.mrb[4].mxu1  ;;  %v8008_v34 = vpop.f32.mrb[5].mxu0  ;;  %5000 = vrot.lane.b32.xlu1 %v4931_v36, %s9232_s10 }
 0x166   : > { %v8009_v42 = vadd.f32 %v8008_v34, %v8007_v31  ;;  %v8120_v44 = vpop.f32.mrb[5].mxu1  ;;  %v8010_v46 = vpop.f32.mrb[6].mxu0  ;;  %v7827_v31 = vcombine.high %v9933_v6, %v640_v7  ;;  %v5124_v34 = vld [vmem:[#allocation2 + $0x17a] sm:$0xff] }
 0x167   : > { %v8121_v51 = vadd.f32 %v8120_v44, %v8119_v38  ;;  %v8122_v52 = vpop.f32.mrb[6].mxu1  ;;  %v8011_v53 = vpop.f32.mrb[7].mxu0  ;;  %v9958_v44 = vld [vmem:[%s9418_s23 + $0x7d0] sm:$0xff] }
 0x168   : > { %v8012_v55 = vadd.f32 %v8011_v53, %v8010_v46  ;;  %v8123_v58 = vpop.f32.mrb[7].mxu1  ;;  %v9947_v38 = vpop.permute.xlu1 %4447  ;;  %5194 = vrot.lane.b32.xlu0 %v5124_v34, %s9233_s11 }
 0x169   : > { %v9918_v63 = vadd.f32 %v8121_v51, %v8009_v42  ;;  %v8124_v60 = vadd.f32 %v8123_v58, %v8122_v52  ;;  %3416 = vmatmul.mubr.bf16.gmra.mrb[112].mxu0 %v7792_v41  ;;  %13074 = vst [vmem:[#allocation23_spill] sm:$0xff] %v9947_v38  ;;  %v9955_v42 = vld [vmem:[%s9418_s23 + $0x790] sm:$0xff]  ;;  %v9960_v46 = vpop.permute.xlu0 %4449  ;;  %v4933_v51 = vld [vmem:[#allocation2 + $0x17c] sm:$0xff] }
 0x16a   : > { %3577 = vmatmul.mubr.bf16.gmra.mrb[112].mxu1 %v7794_v47  ;;  %3423 = vmatprep.mubr.bf16.mxu0 %v7809_v49  ;;  %13075 = vst [vmem:[#allocation24_spill] sm:$0xff] %v9960_v46  ;;  %v9964_v49 = vld [vmem:[%s9418_s23 + $0x798] sm:$0xff]  ;;  %v7840_v34 = vcombine.low %v9955_v42, %v9958_v44 }
 0x16b   : > { %v9923_v1 = vadd.f32 %v8124_v60, %v8012_v55  ;;  %3584 = vmatprep.mubr.bf16.mxu1 %v7811_v54  ;;  %v7824_v55 = vcombine.low %v9926_v2, %v9929_v5  ;;  %5004 = vrot.lane.b32.xlu1 %v4933_v51, %s9232_s10 }
 0x16c   : > { %v8013_v4 = vpop.f32.mrb[8].mxu0  ;;  %v9967_v52 = vpop.permute.xlu1 %4451  ;;  %5198 = vrot.lane.b32.xlu0 %v5126_v9, %s9233_s11  ;;  %v5119_v9 = vld [vmem:[#allocation2 + $0x10a] sm:$0xff] }
 0x16d   : > { %v8125_v10 = vpop.f32.mrb[8].mxu1  ;;  %v8014_v11 = vpop.f32.mrb[9].mxu0  ;;  %13076 = vst [vmem:[#allocation25_spill] sm:$0xff] %v9967_v52 }
 0x16e   : > { %v8015_v13 = vadd.f32 %v8014_v11, %v8013_v4  ;;  %v8126_v15 = vpop.f32.mrb[9].mxu1  ;;  %v8016_v16 = vpop.f32.mrb[10].mxu0  ;;  %v7841_v4 = vcombine.high %v9955_v42, %v9958_v44 }
 0x16f   : > { %v8127_v20 = vadd.f32 %v8126_v15, %v8125_v10  ;;  %v8128_v23 = vpop.f32.mrb[10].mxu1  ;;  %v8017_v24 = vpop.f32.mrb[11].mxu0  ;;  %v4935_v15 = vld [vmem:[#allocation2 + $0x1a4] sm:$0xff] }
 0x170   : > { %v8018_v26 = vadd.f32 %v8017_v24, %v8016_v16  ;;  %v8129_v28 = vpop.f32.mrb[11].mxu1  ;;  %v9980_v7 = vpop.permute.xlu1 %4455  ;;  %5008 = vrot.lane.b32.xlu1 %v4935_v15, %s9232_s10  ;;  %v9992_v24 = vld [vmem:[%s9418_s23 + $0x28] sm:$0xff]  ;;  %v5121_v15 = vld [vmem:[#allocation2 + $0x132] sm:$0xff] }
 0x171   : > { %v9949_v32 = vadd.f32 %v8127_v20, %v8015_v13  ;;  %v8130_v35 = vadd.f32 %v8129_v28, %v8128_v23  ;;  %3424 = vmatmul.mubr.bf16.gmra.mrb[116].mxu0 %v7808_v12  ;;  %v7843_v13 = vcombine.high %v9964_v49, %v656_v50  ;;  %13077 = vst [vmem:[#allocation26_spill] sm:$0xff] %v9980_v7  ;;  %v9988_v20 = vld [vmem:[%s9418_s23 + $0x60] sm:$0xff]  ;;  %v4937_v28 = vld [vmem:[#allocation2 + $0x1cc] sm:$0xff] }
 0x172   : > { %3585 = vmatmul.mubr.bf16.gmra.mrb[116].mxu1 %v7810_v17  ;;  %3431 = vmatprep.mubr.bf16.mxu0 %v7825_v18  ;;  %v5128_v17 = vld [vmem:[#allocation2 + $0x1ca] sm:$0xff] }
 0x173   : > { %v9952_v41 = vadd.f32 %v8130_v35, %v8018_v26  ;;  %3592 = vmatprep.mubr.bf16.mxu1 %v7827_v31  ;;  %v9995_v31 = vld [vmem:[%s9418_s23 + $0x68] sm:$0xff]  ;;  %v9997_v26 = vpop.permute.xlu0 %4453  ;;  %5202 = vrot.lane.b32.xlu0 %v5128_v17, %s9233_s11 }
 0x174   : > { %v8019_v47 = vpop.f32.mrb[12].mxu0  ;;  %13078 = vst [vmem:[#allocation27_spill] sm:$0xff] %v9997_v26  ;;  %5012 = vrot.lane.b32.xlu1 %v4937_v28, %s9232_s10  ;;  %v10008_v44 = vpop.permute.xlu1 %4459  ;;  %v10030_v28 = vld [vmem:[%s9418_s23 + $0xa8] sm:$0xff] }
 0x175   : > { %v8131_v53 = vpop.f32.mrb[12].mxu1  ;;  %v8020_v54 = vpop.f32.mrb[13].mxu0  ;;  %13079 = vst [vmem:[#allocation28_spill] sm:$0xff] %v10008_v44 }
 0x176   : > { %v8021_v58 = vadd.f32 %v8020_v54, %v8019_v47  ;;  %v8132_v59 = vpop.f32.mrb[13].mxu1  ;;  %v8022_v60 = vpop.f32.mrb[14].mxu0  ;;  %v7842_v54 = vcombine.low %v9964_v49, %v656_v50 }
 0x177   : > { %v8133_v10 = vadd.f32 %v8132_v59, %v8131_v53  ;;  %v8134_v11 = vpop.f32.mrb[14].mxu1  ;;  %v8023_v12 = vpop.f32.mrb[15].mxu0  ;;  %5374 = vrot.lane.b32.xlu0 %v9739_v39, %s9234_s12 }
 0x178   : > { %v8024_v2 = vadd.f32 %v8023_v12, %v8022_v60  ;;  %v8135_v5 = vpop.f32.mrb[15].mxu1  ;;  %5184 = vrot.lane.b32.xlu1 %v5119_v9, %s9233_s11  ;;  %v10049_v9 = vld [vmem:[%s9418_s23 + $0x120] sm:$0xff] }
 0x179   : > { %v9977_v16 = vadd.f32 %v8133_v10, %v8021_v58  ;;  %v8136_v6 = vadd.f32 %v8135_v5, %v8134_v11  ;;  %3432 = vmatmul.mubr.bf16.gmra.mrb[120].mxu0 %v7824_v55  ;;  %v7605_v55 = vcombine.high %v9985_v19, %v9988_v20  ;;  %v10016_v11 = vpop.permute.xlu0 %4457  ;;  %v10025_v5 = vpop.permute.xlu1 %4607 }
 0x17a   : > { %3593 = vmatmul.mubr.bf16.gmra.mrb[120].mxu1 %v7826_v62  ;;  %3439 = vmatprep.mubr.bf16.mxu0 %v7841_v4  ;;  %v7607_v62 = vcombine.high %v9992_v24, %v9995_v31  ;;  %13080 = vst [vmem:[#allocation29_spill] sm:$0xff] %v10016_v11  ;;  %13081 = vst [vmem:[#allocation30_spill] sm:$0xff] %v10025_v5  ;;  %v490_v11 = vld [vmem:[%s9418_s23 + $0x2a8] sm:$0xff] }
 0x17b   : > { %v9982_v18 = vadd.f32 %v8136_v6, %v8024_v2  ;;  %3600 = vmatprep.mubr.bf16.mxu1 %v7843_v13  ;;  %v10020_v13 = vld [vmem:[%s9418_s23 + $0xa0] sm:$0xff]  ;;  %5378 = vrot.lane.b32.xlu0 %v9739_v39, %s9234_s12 }
 0x17c   : > { %v8025_v23 = vpop.f32.mrb[16].mxu0  ;;  %v10023_v2 = vld [vmem:[%s9418_s23 + $0xe0] sm:$0xff]  ;;  %5188 = vrot.lane.b32.xlu1 %v5121_v15, %s9233_s11 }
 0x17d   : > { %v8137_v36 = vpop.f32.mrb[16].mxu1  ;;  %v8026_v35 = vpop.f32.mrb[17].mxu0  ;;  %v5123_v15 = vld [vmem:[#allocation2 + $0x15a] sm:$0xff] }
 0x17e   : > { %v8027_v47 = vadd.f32 %v8026_v35, %v8025_v23  ;;  %v8138_v51 = vpop.f32.mrb[17].mxu1  ;;  %v8028_v53 = vpop.f32.mrb[18].mxu0  ;;  %v7604_v23 = vcombine.low %v9985_v19, %v9988_v20  ;;  %v7621_v19 = vcombine.high %v10020_v13, %v10023_v2 }
 0x17f   : > { %v8139_v58 = vadd.f32 %v8138_v51, %v8137_v36  ;;  %v8140_v59 = vpop.f32.mrb[18].mxu1  ;;  %v8029_v60 = vpop.f32.mrb[19].mxu0  ;;  %v10033_v36 = vld [vmem:[%s9418_s23 + $0xe8] sm:$0xff]  ;;  %v7606_v51 = vcombine.low %v9992_v24, %v9995_v31  ;;  %5382 = vrot.lane.b32.xlu0 %v9739_v39, %s9234_s12 }
 0x180   : > { %v8030_v4 = vadd.f32 %v8029_v60, %v8028_v53  ;;  %v8141_v42 = vpop.f32.mrb[19].mxu1  ;;  %v9058_v53 = vld [vmem:[#allocation5 + $0x300] sm:$0xff]   ;;  %v9063_v31 = vld [vmem:[#allocation5 + $0x3c8] sm:$0xff]   ;;  %5192 = vrot.lane.b32.xlu1 %v5123_v15, %s9233_s11 }
 0x181   : > { %v10010_v10 = vadd.f32 %v8139_v58, %v8027_v47  ;;  %v8142_v49 = vadd.f32 %v8141_v42, %v8140_v59  ;;  %3440 = vmatmul.mubr.bf16.gmra.mrb[124].mxu0 %v7840_v34  ;;  %v9060_v59 = vld [vmem:[#allocation5 + $0x380] sm:$0xff]   ;;  %v10059_v39 = vld [vmem:[%s9418_s23 + $0x128] sm:$0xff] }
 0x182   : > { %3601 = vmatmul.mubr.bf16.gmra.mrb[124].mxu1 %v7842_v54  ;;  %3641 = vmatprep.mubr.bf16.mxu0 %v7605_v55 }
 0x183   : > { %v10014_v50 = vadd.f32 %v8142_v49, %v8030_v4  ;;  %3802 = vmatprep.mubr.bf16.mxu1 %v7607_v62  ;;  %v7623_v62 = vcombine.high %v10030_v28, %v10033_v36  ;;  %v9061_v4 = vld [vmem:[#allocation5 + $0x348] sm:$0xff]  }
 0x184   : > { %v8031_v12 = vpop.f32.mrb[20].mxu0  ;;  %v9062_v49 = vld [vmem:[#allocation5 + $0x308] sm:$0xff]  }
 0x185   : > { %v8143_v6 = vpop.f32.mrb[20].mxu1  ;;  %v8032_v17 = vpop.f32.mrb[21].mxu0 }
 0x186   : > { %v8033_v35 = vadd.f32 %v8032_v17, %v8031_v12  ;;  %v8144_v34 = vpop.f32.mrb[21].mxu1  ;;  %v8034_v47 = vpop.f32.mrb[22].mxu0  ;;  %v10056_v17 = vld [vmem:[%s9418_s23 + $0x160] sm:$0xff] }
 0x187   : > { %v8145_v54 = vadd.f32 %v8144_v34, %v8143_v6  ;;  %v8146_v55 = vpop.f32.mrb[22].mxu1  ;;  %v8035_v58 = vpop.f32.mrb[23].mxu0 }
 0x188   : > { %v8036_v20 = vadd.f32 %v8035_v58, %v8034_v47  ;;  %v8147_v60 = vpop.f32.mrb[23].mxu1  ;;  %v10051_v12 = vpop.permute.xlu1 %4611  ;;  %v10062_v47 = vld [vmem:[%s9418_s23 + $0x168] sm:$0xff]  ;;  %v7620_v58 = vcombine.low %v10020_v13, %v10023_v2 }
 0x189   : > { %v10044_v42 = vadd.f32 %v8145_v54, %v8033_v35  ;;  %v8148_v24 = vadd.f32 %v8147_v60, %v8146_v55  ;;  %3642 = vmatmul.mubr.bf16.vlgmr.msra.gmra.mrb[128].mxu0 %v7604_v23  ;;  %13082 = vst [vmem:[#allocation31_spill] sm:$0xff] %v10051_v12  ;;  %v9064_v23 = vld [vmem:[#allocation5 + $0x388] sm:$0xff]   ;;  %v9065_v35 = vld [vmem:[#allocation5 + $0x350] sm:$0xff]   ;;  %v7622_v60 = vcombine.low %v10030_v28, %v10033_v36 }
 0x18a   : > { %3803 = vmatmul.mubr.bf16.vlgmr.msra.gmra.mrb[128].mxu1 %v7606_v51  ;;  %8658 = vmatpush3.bf16.msra.mxu0 %v9058_v53  ;;  %v9067_v51 = vld [vmem:[#allocation5 + $0x3d0] sm:$0xff]   ;;  %v10064_v53 = vpop.permute.xlu0 %4605  ;;  %v7639_v15 = vcombine.high %v10059_v39, %v10062_v47 }
 0x18b   : > { %v10053_v6 = vadd.f32 %v8148_v24, %v8036_v20  ;;  %8770 = vmatpush3.bf16.msra.mxu1 %v9060_v59  ;;  %3649 = vmatprep.mubr.bf16.mxu0 %v7621_v19  ;;  %13083 = vst [vmem:[#allocation32_spill] sm:$0xff] %v10064_v53  ;;  %v10073_v24 = vld [vmem:[#allocation2 + $0x8] sm:$0xff]  ;;  %v9066_v28 = vld [vmem:[#allocation5 + $0x310] sm:$0xff]  }
 0x18c   : > { %v8037_v34 = vpop.f32.mrb[24].mxu0  ;;  %3810 = vmatprep.mubr.bf16.mxu1 %v7623_v62  ;;  %8659 = vmatprep.subr.bf16.mxu0 %v9061_v4  ;;  %v7637_v62 = vcombine.high %v10049_v9, %v10056_v17  ;;  %v5125_v4 = vld [vmem:[#allocation2 + $0x182] sm:$0xff]  ;;  %v10079_v12 = vpop.permute.xlu1 %4615 }
 0x18d   : > { %v8149_v54 = vpop.f32.mrb[24].mxu1  ;;  %v8038_v55 = vpop.f32.mrb[25].mxu0  ;;  %8771 = vmatprep.subr.bf16.mxu1 %v9063_v31  ;;  %5386 = vrot.lane.b32.xlu0 %v10073_v24, %s9234_s12  ;;  %13084 = vst [vmem:[#allocation33_spill] sm:$0xff] %v10079_v12 }
 0x18e   : > { %v8039_v59 = vadd.f32 %v8038_v55, %v8037_v34  ;;  %v8150_v19 = vpop.f32.mrb[25].mxu1  ;;  %v8040_v20 = vpop.f32.mrb[26].mxu0  ;;  %8660 = vmatpush3.bf16.msra.mxu0 %v9062_v49  ;;  %v9068_v49 = vld [vmem:[#allocation5 + $0x390] sm:$0xff]   ;;  %v9069_v55 = vld [vmem:[#allocation5 + $0x358] sm:$0xff]   ;;  %5196 = vrot.lane.b32.xlu1 %v5125_v4, %s9233_s11 }
 0x18f   : > { %v8151_v13 = vadd.f32 %v8150_v19, %v8149_v54  ;;  %v8152_v2 = vpop.f32.mrb[26].mxu1  ;;  %v8041_v31 = vpop.f32.mrb[27].mxu0  ;;  %8772 = vmatpush3.bf16.msra.mxu1 %v9064_v23  ;;  %8661 = vmatprep.subr.bf16.mxu0 %v9065_v35  ;;  %v9071_v19 = vld [vmem:[#allocation5 + $0x3d8] sm:$0xff]   ;;  %v10085_v23 = vld [vmem:[%s9418_s23 + $0x1a0] sm:$0xff]  ;;  %v5127_v35 = vld [vmem:[#allocation2 + $0x1aa] sm:$0xff] }
 0x190   : > { %v8042_v36 = vadd.f32 %v8041_v31, %v8040_v20  ;;  %v8153_v34 = vpop.f32.mrb[27].mxu1  ;;  %8773 = vmatprep.subr.bf16.mxu1 %v9067_v51  ;;  %v10090_v51 = vld [vmem:[%s9418_s23 + $0x1e0] sm:$0xff]  ;;  %v10093_v31 = vld [vmem:[%s9418_s23 + $0x1a8] sm:$0xff]  ;;  %v10100_v4 = vpop.permute.xlu1 %4619 }
 0x191   : > { %v10081_v5 = vadd.f32 %v8151_v13, %v8039_v59  ;;  %v8154_v54 = vadd.f32 %v8153_v34, %v8152_v2  ;;  %3650 = vmatmul.mubr.bf16.gmra.mrb[132].mxu0 %v7620_v58  ;;  %v9070_v59 = vld [vmem:[#allocation5 + $0x318] sm:$0xff]   ;;  %v10095_v13 = vpop.permute.xlu0 %4609  ;;  %v10098_v2 = vld [vmem:[%s9418_s23 + $0x1e8] sm:$0xff]  ;;  %13086 = vst [vmem:[#allocation35_spill] sm:$0xff] %v10100_v4  ;;  %5390 = vrot.lane.b32.xlu0 %v10073_v24, %s9234_s12 }
 0x192   : > { %3811 = vmatmul.mubr.bf16.gmra.mrb[132].mxu1 %v7622_v60  ;;  %3657 = vmatprep.mubr.bf16.mxu0 %v7637_v62  ;;  %13085 = vst [vmem:[#allocation34_spill] sm:$0xff] %v10095_v13  ;;  %v9072_v60 = vld [vmem:[#allocation5 + $0x398] sm:$0xff]   ;;  %v9073_v62 = vld [vmem:[#allocation5 + $0x360] sm:$0xff]  }
 0x193   : > { %v10087_v20 = vadd.f32 %v8154_v54, %v8042_v36  ;;  %3818 = vmatprep.mubr.bf16.mxu1 %v7639_v15  ;;  %8662 = vmatpush3.bf16.msra.mxu0 %v9066_v28  ;;  %v7636_v15 = vcombine.low %v10049_v9, %v10056_v17  ;;  %v9075_v54 = vld [vmem:[#allocation5 + $0x3e0] sm:$0xff]   ;;  %v7655_v9 = vcombine.high %v10093_v31, %v10098_v2 }
 0x194   : > { %v8043_v58 = vpop.f32.mrb[28].mxu0  ;;  %8774 = vmatpush3.bf16.msra.mxu1 %v9068_v49  ;;  %8663 = vmatprep.subr.bf16.mxu0 %v9069_v55  ;;  %v7638_v49 = vcombine.low %v10059_v39, %v10062_v47  ;;  %v7653_v55 = vcombine.high %v10085_v23, %v10090_v51  ;;  %v9074_v17 = vld [vmem:[#allocation5 + $0x320] sm:$0xff]   ;;  %v9077_v47 = vld [vmem:[#allocation5 + $0x368] sm:$0xff]  }
 0x195   : > { %v8155_v36 = vpop.f32.mrb[28].mxu1  ;;  %v8044_v34 = vpop.f32.mrb[29].mxu0  ;;  %8775 = vmatprep.subr.bf16.mxu1 %v9071_v19  ;;  %5200 = vrot.lane.b32.xlu1 %v5127_v35, %s9233_s11  ;;  %v9076_v39 = vld [vmem:[#allocation5 + $0x3a0] sm:$0xff]  }
 0x196   : > { %v8045_v28 = vadd.f32 %v8044_v34, %v8043_v58  ;;  %v8156_v12 = vpop.f32.mrb[29].mxu1  ;;  %v8046_v44 = vpop.f32.mrb[30].mxu0  ;;  %5394 = vrot.lane.b32.xlu0 %v10073_v24, %s9234_s12 }
 0x197   : > { %v8157_v4 = vadd.f32 %v8156_v12, %v8155_v36  ;;  %v8158_v13 = vpop.f32.mrb[30].mxu1  ;;  %v8047_v7 = vpop.f32.mrb[31].mxu0  ;;  %8664 = vmatpush3.bf16.msra.mxu0 %v9070_v59  ;;  %v9079_v12 = vld [vmem:[#allocation5 + $0x3e8] sm:$0xff]   ;;  %v10116_v36 = vld [vmem:[%s9418_s23 + $0x220] sm:$0xff]  ;;  %v5129_v59 = vld [vmem:[#allocation2 + $0x1d2] sm:$0xff] }
 0x198   : > { %v8048_v19 = vadd.f32 %v8047_v7, %v8046_v44  ;;  %v8159_v35 = vpop.f32.mrb[31].mxu1  ;;  %8776 = vmatpush3.bf16.msra.mxu1 %v9072_v60  ;;  %8665 = vmatprep.subr.bf16.mxu0 %v9073_v62  ;;  %v10121_v44 = vld [vmem:[%s9418_s23 + $0x260] sm:$0xff]  ;;  %v10124_v60 = vld [vmem:[%s9418_s23 + $0x228] sm:$0xff] }
 0x199   : > { %v10113_v58 = vadd.f32 %v8157_v4, %v8045_v28  ;;  %v8160_v34 = vadd.f32 %v8159_v35, %v8158_v13  ;;  %3658 = vmatmul.mubr.bf16.gmra.mrb[136].mxu0 %v7636_v15  ;;  %8777 = vmatprep.subr.bf16.mxu1 %v9075_v54  ;;  %v9078_v62 = vld [vmem:[#allocation5 + $0x328] sm:$0xff]   ;;  %v10126_v4 = vpop.permute.xlu0 %4613  ;;  %v9081_v28 = vld [vmem:[#allocation5 + $0x370] sm:$0xff]  }
 0x19a   : > { %3819 = vmatmul.mubr.bf16.gmra.mrb[136].mxu1 %v7638_v49  ;;  %3665 = vmatprep.mubr.bf16.mxu0 %v7653_v55  ;;  %13087 = vst [vmem:[#allocation36_spill] sm:$0xff] %v10126_v4  ;;  %v10129_v15 = vld [vmem:[%s9418_s23 + $0x268] sm:$0xff]  ;;  %v10131_v49 = vpop.permute.xlu1 %4623  ;;  %v9083_v35 = vld [vmem:[#allocation5 + $0x3f0] sm:$0xff]  }
 0x19b   : > { %v10118_v7 = vadd.f32 %v8160_v34, %v8048_v19  ;;  %3826 = vmatprep.mubr.bf16.mxu1 %v7655_v9  ;;  %8666 = vmatpush3.bf16.msra.mxu0 %v9074_v17  ;;  %v9080_v54 = vld [vmem:[#allocation5 + $0x3a8] sm:$0xff]   ;;  %13088 = vst [vmem:[#allocation37_spill] sm:$0xff] %v10131_v49  ;;  %v7652_v9 = vcombine.low %v10085_v23, %v10090_v51  ;;  %v9082_v51 = vld [vmem:[#allocation5 + $0x330] sm:$0xff]  }
 0x19c   : > { %v8049_v13 = vpop.f32.mrb[32].mxu0  ;;  %8778 = vmatpush3.bf16.msra.mxu1 %v9076_v39  ;;  %8667 = vmatprep.subr.bf16.mxu0 %v9077_v47  ;;  %v7654_v39 = vcombine.low %v10093_v31, %v10098_v2  ;;  %v7669_v47 = vcombine.high %v10116_v36, %v10121_v44  ;;  %v7671_v23 = vcombine.high %v10124_v60, %v10129_v15  ;;  %v9084_v31 = vld [vmem:[#allocation5 + $0x3b0] sm:$0xff]   ;;  %v9085_v2 = vld [vmem:[#allocation5 + $0x378] sm:$0xff]  }
 0x19d   : > { %v8161_v55 = vpop.f32.mrb[32].mxu1  ;;  %v8050_v19 = vpop.f32.mrb[33].mxu0  ;;  %8779 = vmatprep.subr.bf16.mxu1 %v9079_v12  ;;  %5204 = vrot.lane.b32.xlu1 %v5129_v59, %s9233_s11 }
 0x19e   : > { %v8051_v17 = vadd.f32 %v8050_v19, %v8049_v13  ;;  %v8162_v34 = vpop.f32.mrb[33].mxu1  ;;  %v8052_v4 = vpop.f32.mrb[34].mxu0  ;;  %v9087_v19 = vld [vmem:[#allocation5 + $0x3f8] sm:$0xff]   ;;  %5398 = vrot.lane.b32.xlu0 %v10073_v24, %s9234_s12 }
 0x19f   : > { %v8163_v49 = vadd.f32 %v8162_v34, %v8161_v55  ;;  %v8164_v53 = vpop.f32.mrb[34].mxu1  ;;  %v8053_v52 = vpop.f32.mrb[35].mxu0  ;;  %8668 = vmatpush3.bf16.msra.mxu0 %v9078_v62 }
 0x1a0   : > { %v8054_v12 = vadd.f32 %v8053_v52, %v8052_v4  ;;  %v8165_v59 = vpop.f32.mrb[35].mxu1  ;;  %8780 = vmatpush3.bf16.msra.mxu1 %v9080_v54  ;;  %8669 = vmatprep.subr.bf16.mxu0 %v9081_v28  ;;  %v489_v52 = vld [vmem:[%s9418_s23 + $0x2a0] sm:$0xff]  ;;  %v10150_v34 = vpop.permute.xlu0 %4617  ;;  %v9086_v54 = vld [vmem:[#allocation5 + $0x338] sm:$0xff]  }
 0x1a1   : > { %v10144_v13 = vadd.f32 %v8163_v49, %v8051_v17  ;;  %v8166_v55 = vadd.f32 %v8165_v59, %v8164_v53  ;;  %3666 = vmatmul.mubr.bf16.gmra.mrb[140].mxu0 %v7652_v9  ;;  %8781 = vmatprep.subr.bf16.mxu1 %v9083_v35  ;;  %v497_v4 = vld [vmem:[%s9418_s23 + $0x2e0] sm:$0xff]  ;;  %13089 = vst [vmem:[#allocation38_spill] sm:$0xff] %v10150_v34  ;;  %v498_v49 = vld [vmem:[%s9418_s23 + $0x2e8] sm:$0xff]  ;;  %v10154_v17 = vpop.permute.xlu1 %4627  ;;  %v9088_v53 = vld [vmem:[#allocation5 + $0x3b8] sm:$0xff]  }
 0x1a2   : > { %3827 = vmatmul.mubr.bf16.gmra.mrb[140].mxu1 %v7654_v39  ;;  %3673 = vmatprep.mubr.bf16.mxu0 %v7669_v47  ;;  %13090 = vst [vmem:[#allocation39_spill] sm:$0xff] %v10154_v17  ;;  %v7668_v39 = vcombine.low %v10116_v36, %v10121_v44  ;;  %v7685_v59 = vcombine.high %v489_v52, %v497_v4 }
 0x1a3   : > { %v10146_v62 = vadd.f32 %v8166_v55, %v8054_v12  ;;  %3834 = vmatprep.mubr.bf16.mxu1 %v7671_v23  ;;  %8670 = vmatpush3.bf16.msra.mxu0 %v9082_v51  ;;  %v7670_v12 = vcombine.low %v10124_v60, %v10129_v15  ;;  %v7687_v17 = vcombine.high %v490_v11, %v498_v49  ;;  %v505_v15 = vld [vmem:[%s9418_s23 + $0x320] sm:$0xff] }
 0x1a4   : > { %v8055_v28 = vpop.f32.mrb[36].mxu0  ;;  %8782 = vmatpush3.bf16.msra.mxu1 %v9084_v31  ;;  %8671 = vmatprep.subr.bf16.mxu0 %v9085_v2 }
 0x1a5   : > { %v8167_v9 = vpop.f32.mrb[36].mxu1  ;;  %v8056_v35 = vpop.f32.mrb[37].mxu0  ;;  %8783 = vmatprep.subr.bf16.mxu1 %v9087_v19  ;;  %5402 = vrot.lane.b32.xlu0 %v10073_v24, %s9234_s12 }
 0x1a6   : > { %v8057_v47 = vadd.f32 %v8056_v35, %v8055_v28  ;;  %v8168_v23 = vpop.f32.mrb[37].mxu1  ;;  %v8058_v51 = vpop.f32.mrb[38].mxu0 }
 0x1a7   : > { %v8169_v31 = vadd.f32 %v8168_v23, %v8167_v9  ;;  %v8170_v2 = vpop.f32.mrb[38].mxu1  ;;  %v8059_v55 = vpop.f32.mrb[39].mxu0  ;;  %8672 = vmatpush3.bf16.msra.mxu0 %v9086_v54  ;;  %v513_v9 = vld [vmem:[%s9418_s23 + $0x360] sm:$0xff]  ;;  %v506_v23 = vld [vmem:[%s9418_s23 + $0x328] sm:$0xff] }
 0x1a8   : > { %v8060_v36 = vadd.f32 %v8059_v55, %v8058_v51  ;;  %v8171_v44 = vpop.f32.mrb[39].mxu1  ;;  %8784 = vmatpush3.bf16.msra.mxu1 %v9088_v53  ;;  %v10168_v35 = vpop.permute.xlu0 %4621  ;;  %v514_v51 = vld [vmem:[%s9418_s23 + $0x368] sm:$0xff]  ;;  %v7686_v55 = vcombine.low %v490_v11, %v498_v49  ;;  %v529_v49 = vld [vmem:[%s9418_s23 + $0x3e0] sm:$0xff] }
 0x1a9   : > { %v10162_v19 = vadd.f32 %v8169_v31, %v8057_v47  ;;  %v8172_v28 = vadd.f32 %v8171_v44, %v8170_v2  ;;  %3674 = vmatmul.mubr.bf16.gmra.mrb[144].mxu0 %v7668_v39  ;;  %13091 = vst [vmem:[#allocation40_spill] sm:$0xff] %v10168_v35  ;;  %v10174_v53 = vpop.permute.xlu1 %4631  ;;  %v7684_v39 = vcombine.low %v489_v52, %v497_v4  ;;  %v521_v4 = vld [vmem:[%s9418_s23 + $0x3a0] sm:$0xff] }
 0x1aa   : > { %3835 = vmatmul.mubr.bf16.gmra.mrb[144].mxu1 %v7670_v12  ;;  %3681 = vmatprep.mubr.bf16.mxu0 %v7685_v59  ;;  %13092 = vst [vmem:[#allocation41_spill] sm:$0xff] %v10174_v53  ;;  %v7703_v35 = vcombine.high %v506_v23, %v514_v51 }
 0x1ab   : > { %v10164_v60 = vadd.f32 %v8172_v28, %v8060_v36  ;;  %3842 = vmatprep.mubr.bf16.mxu1 %v7687_v17  ;;  %v7701_v17 = vcombine.high %v505_v15, %v513_v9  ;;  %5406 = vrot.lane.b32.xlu0 %v10073_v24, %s9234_s12 }
 0x1ac   : > { %v8061_v54 = vpop.f32.mrb[40].mxu0 }
 0x1ad   : > { %v8173_v47 = vpop.f32.mrb[40].mxu1  ;;  %v8062_v31 = vpop.f32.mrb[41].mxu0 }
 0x1ae   : > { %v8063_v12 = vadd.f32 %v8062_v31, %v8061_v54  ;;  %v8174_v59 = vpop.f32.mrb[41].mxu1  ;;  %v8064_v2 = vpop.f32.mrb[42].mxu0  ;;  %v522_v31 = vld [vmem:[%s9418_s23 + $0x3a8] sm:$0xff] }
 0x1af   : > { %v8175_v36 = vadd.f32 %v8174_v59, %v8173_v47  ;;  %v8176_v44 = vpop.f32.mrb[42].mxu1  ;;  %v8065_v28 = vpop.f32.mrb[43].mxu0  ;;  %5410 = vrot.lane.b32.xlu0 %v10073_v24, %s9234_s12  ;;  %v530_v59 = vld [vmem:[%s9418_s23 + $0x3e8] sm:$0xff] }
 0x1b0   : > { %v8066_v53 = vadd.f32 %v8065_v28, %v8064_v2  ;;  %v8177_v34 = vpop.f32.mrb[43].mxu1  ;;  %v10184_v54 = vpop.permute.xlu0 %4625 }
 0x1b1   : > { %v10178_v38 = vadd.f32 %v8175_v36, %v8063_v12  ;;  %v8178_v52 = vadd.f32 %v8177_v34, %v8176_v44  ;;  %3682 = vmatmul.mubr.bf16.gmra.mrb[148].mxu0 %v7684_v39  ;;  %13093 = vst [vmem:[#allocation42_spill] sm:$0xff] %v10184_v54  ;;  %v10190_v2 = vpop.permute.xlu1 %4635  ;;  %v7700_v39 = vcombine.low %v505_v15, %v513_v9 }
 0x1b2   : > { %3843 = vmatmul.mubr.bf16.gmra.mrb[148].mxu1 %v7686_v55  ;;  %3689 = vmatprep.mubr.bf16.mxu0 %v7701_v17  ;;  %13094 = vst [vmem:[#allocation43_spill] sm:$0xff] %v10190_v2  ;;  %v7702_v36 = vcombine.low %v506_v23, %v514_v51  ;;  %v7719_v54 = vcombine.high %v522_v31, %v530_v59  ;;  %v537_v23 = vld [vmem:[%s9418_s23 + $0x420] sm:$0xff] }
 0x1b3   : > { %v10180_v11 = vadd.f32 %v8178_v52, %v8066_v53  ;;  %3850 = vmatprep.mubr.bf16.mxu1 %v7703_v35  ;;  %v7717_v35 = vcombine.high %v521_v4, %v529_v49  ;;  %5414 = vrot.lane.b32.xlu0 %v10073_v24, %s9234_s12  ;;  %v545_v51 = vld [vmem:[%s9418_s23 + $0x460] sm:$0xff] }
 0x1b4   : > { %v8067_v47 = vpop.f32.mrb[44].mxu0 }
 0x1b5   : > { %v8179_v12 = vpop.f32.mrb[44].mxu1  ;;  %v8068_v34 = vpop.f32.mrb[45].mxu0 }
 0x1b6   : > { %v8069_v55 = vadd.f32 %v8068_v34, %v8067_v47  ;;  %v8180_v17 = vpop.f32.mrb[45].mxu1  ;;  %v8070_v53 = vpop.f32.mrb[46].mxu0  ;;  %v538_v34 = vld [vmem:[%s9418_s23 + $0x428] sm:$0xff] }
 0x1b7   : > { %v8181_v44 = vadd.f32 %v8180_v17, %v8179_v12  ;;  %v8182_v28 = vpop.f32.mrb[46].mxu1  ;;  %v8071_v52 = vpop.f32.mrb[47].mxu0  ;;  %5418 = vrot.lane.b32.xlu0 %v10073_v24, %s9234_s12  ;;  %v546_v17 = vld [vmem:[%s9418_s23 + $0x468] sm:$0xff] }
 0x1b8   : > { %v8072_v2 = vadd.f32 %v8071_v52, %v8070_v53  ;;  %v8183_v26 = vpop.f32.mrb[47].mxu1  ;;  %v10200_v47 = vpop.permute.xlu0 %4629 }
 0x1b9   : > { %v10194_v0 = vadd.f32 %v8181_v44, %v8069_v55  ;;  %v8184_v15 = vadd.f32 %v8183_v26, %v8182_v28  ;;  %3690 = vmatmul.mubr.bf16.gmra.mrb[152].mxu0 %v7700_v39  ;;  %13095 = vst [vmem:[#allocation44_spill] sm:$0xff] %v10200_v47  ;;  %v10206_v53 = vpop.permute.xlu1 %4639  ;;  %v7716_v39 = vcombine.low %v521_v4, %v529_v49 }
 0x1ba   : > { %3851 = vmatmul.mubr.bf16.gmra.mrb[152].mxu1 %v7702_v36  ;;  %3697 = vmatprep.mubr.bf16.mxu0 %v7717_v35  ;;  %13096 = vst [vmem:[#allocation45_spill] sm:$0xff] %v10206_v53  ;;  %v7718_v44 = vcombine.low %v522_v31, %v530_v59  ;;  %v7735_v47 = vcombine.high %v538_v34, %v546_v17  ;;  %v553_v31 = vld [vmem:[%s9418_s23 + $0x4a0] sm:$0xff] }
 0x1bb   : > { %v10196_v9 = vadd.f32 %v8184_v15, %v8072_v2  ;;  %3858 = vmatprep.mubr.bf16.mxu1 %v7719_v54  ;;  %v7733_v54 = vcombine.high %v537_v23, %v545_v51  ;;  %5422 = vrot.lane.b32.xlu0 %v10073_v24, %s9234_s12  ;;  %v561_v59 = vld [vmem:[%s9418_s23 + $0x4e0] sm:$0xff] }
 0x1bc   : > { %v8073_v12 = vpop.f32.mrb[48].mxu0 }
 0x1bd   : > { %v8185_v55 = vpop.f32.mrb[48].mxu1  ;;  %v8074_v26 = vpop.f32.mrb[49].mxu0 }
 0x1be   : > { %v8075_v36 = vadd.f32 %v8074_v26, %v8073_v12  ;;  %v8186_v35 = vpop.f32.mrb[49].mxu1  ;;  %v8076_v2 = vpop.f32.mrb[50].mxu0  ;;  %v554_v26 = vld [vmem:[%s9418_s23 + $0x4a8] sm:$0xff] }
 0x1bf   : > { %v8187_v28 = vadd.f32 %v8186_v35, %v8185_v55  ;;  %v8188_v52 = vpop.f32.mrb[50].mxu1  ;;  %v8077_v15 = vpop.f32.mrb[51].mxu0  ;;  %5426 = vrot.lane.b32.xlu0 %v10073_v24, %s9234_s12  ;;  %v562_v35 = vld [vmem:[%s9418_s23 + $0x4e8] sm:$0xff] }
 0x1c0   : > { %v8078_v53 = vadd.f32 %v8077_v15, %v8076_v2  ;;  %v8189_v46 = vpop.f32.mrb[51].mxu1  ;;  %v10216_v12 = vpop.permute.xlu0 %4633 }
 0x1c1   : > { %v10210_v8 = vadd.f32 %v8187_v28, %v8075_v36  ;;  %v8190_v4 = vadd.f32 %v8189_v46, %v8188_v52  ;;  %3698 = vmatmul.mubr.bf16.gmra.mrb[156].mxu0 %v7716_v39  ;;  %13097 = vst [vmem:[#allocation46_spill] sm:$0xff] %v10216_v12  ;;  %v10222_v2 = vpop.permute.xlu1 %4643  ;;  %v7732_v39 = vcombine.low %v537_v23, %v545_v51 }
 0x1c2   : > { %3859 = vmatmul.mubr.bf16.gmra.mrb[156].mxu1 %v7718_v44  ;;  %3705 = vmatprep.mubr.bf16.mxu0 %v7733_v54  ;;  %13098 = vst [vmem:[#allocation47_spill] sm:$0xff] %v10222_v2  ;;  %v7734_v28 = vcombine.low %v538_v34, %v546_v17  ;;  %v7751_v12 = vcombine.high %v554_v26, %v562_v35  ;;  %v569_v34 = vld [vmem:[%s9418_s23 + $0x520] sm:$0xff] }
 0x1c3   : > { %v10212_v49 = vadd.f32 %v8190_v4, %v8078_v53  ;;  %3866 = vmatprep.mubr.bf16.mxu1 %v7735_v47  ;;  %v7749_v47 = vcombine.high %v553_v31, %v561_v59  ;;  %5430 = vrot.lane.b32.xlu0 %v10073_v24, %s9234_s12  ;;  %v577_v17 = vld [vmem:[%s9418_s23 + $0x560] sm:$0xff] }
 0x1c4   : > { %v8079_v55 = vpop.f32.mrb[52].mxu0 }
 0x1c5   : > { %v8191_v36 = vpop.f32.mrb[52].mxu1  ;;  %v8080_v46 = vpop.f32.mrb[53].mxu0 }
 0x1c6   : > { %v8081_v44 = vadd.f32 %v8080_v46, %v8079_v55  ;;  %v8192_v54 = vpop.f32.mrb[53].mxu1  ;;  %v8082_v53 = vpop.f32.mrb[54].mxu0  ;;  %v570_v46 = vld [vmem:[%s9418_s23 + $0x528] sm:$0xff] }
 0x1c7   : > { %v8193_v52 = vadd.f32 %v8192_v54, %v8191_v36  ;;  %v8194_v15 = vpop.f32.mrb[54].mxu1  ;;  %v8083_v4 = vpop.f32.mrb[55].mxu0  ;;  %5434 = vrot.lane.b32.xlu0 %v10073_v24, %s9234_s12  ;;  %v578_v54 = vld [vmem:[%s9418_s23 + $0x568] sm:$0xff] }
 0x1c8   : > { %v8084_v2 = vadd.f32 %v8083_v4, %v8082_v53  ;;  %v8195_v37 = vpop.f32.mrb[55].mxu1  ;;  %v10232_v55 = vpop.permute.xlu0 %4637  ;;  %v7767_v24 = vcombine.high %v570_v46, %v578_v54 }
 0x1c9   : > { %v10226_v30 = vadd.f32 %v8193_v52, %v8081_v44  ;;  %v8196_v23 = vadd.f32 %v8195_v37, %v8194_v15  ;;  %3706 = vmatmul.mubr.bf16.gmra.mrb[160].mxu0 %v7732_v39  ;;  %13099 = vst [vmem:[#allocation48_spill] sm:$0xff] %v10232_v55  ;;  %v10238_v53 = vpop.permute.xlu1 %4647  ;;  %v7748_v39 = vcombine.low %v553_v31, %v561_v59  ;;  %v585_v59 = vld [vmem:[%s9418_s23 + $0x5a0] sm:$0xff] }
 0x1ca   : > { %3867 = vmatmul.mubr.bf16.gmra.mrb[160].mxu1 %v7734_v28  ;;  %3713 = vmatprep.mubr.bf16.mxu0 %v7749_v47  ;;  %13100 = vst [vmem:[#allocation49_spill] sm:$0xff] %v10238_v53  ;;  %v7765_v52 = vcombine.high %v569_v34, %v577_v17 }
 0x1cb   : > { %v10228_v51 = vadd.f32 %v8196_v23, %v8084_v2  ;;  %3874 = vmatprep.mubr.bf16.mxu1 %v7751_v12  ;;  %v7750_v12 = vcombine.low %v554_v26, %v562_v35  ;;  %v593_v26 = vld [vmem:[%s9418_s23 + $0x5e0] sm:$0xff] }
 0x1cc   : > { %v8085_v36 = vpop.f32.mrb[56].mxu0  ;;  %v10246_v35 = vpop.permute.xlu0 %4641 }
 0x1cd   : > { %v8197_v44 = vpop.f32.mrb[56].mxu1  ;;  %v8086_v37 = vpop.f32.mrb[57].mxu0  ;;  %13101 = vst [vmem:[#allocation50_spill] sm:$0xff] %v10246_v35 }
 0x1ce   : > { %v8087_v28 = vadd.f32 %v8086_v37, %v8085_v36  ;;  %v8198_v47 = vpop.f32.mrb[57].mxu1  ;;  %v8088_v2 = vpop.f32.mrb[58].mxu0  ;;  %v594_v37 = vld [vmem:[%s9418_s23 + $0x5e8] sm:$0xff] }
 0x1cf   : > { %v8199_v15 = vadd.f32 %v8198_v47, %v8197_v44  ;;  %v8200_v4 = vpop.f32.mrb[58].mxu1  ;;  %v8089_v23 = vpop.f32.mrb[59].mxu0  ;;  %v586_v44 = vld [vmem:[%s9418_s23 + $0x5a8] sm:$0xff] }
 0x1d0   : > { %v8090_v55 = vadd.f32 %v8089_v23, %v8088_v2  ;;  %v8201_v3 = vpop.f32.mrb[59].mxu1  ;;  %v10250_v47 = vpop.permute.xlu1 %4651 }
 0x1d1   : > { %v10240_v56 = vadd.f32 %v8199_v15, %v8087_v28  ;;  %v8202_v53 = vadd.f32 %v8201_v3, %v8200_v4  ;;  %3714 = vmatmul.mubr.bf16.gmra.mrb[164].mxu0 %v7748_v39  ;;  %13102 = vst [vmem:[#allocation51_spill] sm:$0xff] %v10250_v47  ;;  %v7764_v28 = vcombine.low %v569_v34, %v577_v17  ;;  %v601_v17 = vld [vmem:[%s9418_s23 + $0x620] sm:$0xff] }
 0x1d2   : > { %3875 = vmatmul.mubr.bf16.gmra.mrb[164].mxu1 %v7750_v12  ;;  %3721 = vmatprep.mubr.bf16.mxu0 %v7765_v52  ;;  %v7766_v12 = vcombine.low %v570_v46, %v578_v54  ;;  %v609_v46 = vld [vmem:[%s9418_s23 + $0x660] sm:$0xff]  ;;  %v10258_v54 = vpop.permute.xlu0 %4645 }
 0x1d3   : > { %v10242_v31 = vadd.f32 %v8202_v53, %v8090_v55  ;;  %3882 = vmatprep.mubr.bf16.mxu1 %v7767_v24  ;;  %v7781_v55 = vcombine.high %v585_v59, %v593_v26  ;;  %v7783_v24 = vcombine.high %v586_v44, %v594_v37  ;;  %13103 = vst [vmem:[#allocation52_spill] sm:$0xff] %v10258_v54 }
 0x1d4   : > { %v8091_v36 = vpop.f32.mrb[60].mxu0 }
 0x1d5   : > { %v8203_v2 = vpop.f32.mrb[60].mxu1  ;;  %v8092_v23 = vpop.f32.mrb[61].mxu0 }
 0x1d6   : > { %v8093_v15 = vadd.f32 %v8092_v23, %v8091_v36  ;;  %v8204_v3 = vpop.f32.mrb[61].mxu1  ;;  %v8094_v39 = vpop.f32.mrb[62].mxu0  ;;  %v610_v23 = vld [vmem:[%s9418_s23 + $0x668] sm:$0xff] }
 0x1d7   : > { %v8205_v53 = vadd.f32 %v8204_v3, %v8203_v2  ;;  %v8206_v52 = vpop.f32.mrb[62].mxu1  ;;  %v8095_v4 = vpop.f32.mrb[63].mxu0  ;;  %v602_v2 = vld [vmem:[%s9418_s23 + $0x628] sm:$0xff] }
 0x1d8   : > { %v8096_v35 = vadd.f32 %v8095_v4, %v8094_v39  ;;  %v8207_v61 = vpop.f32.mrb[63].mxu1  ;;  %v10262_v3 = vpop.permute.xlu1 %4655 }
 0x1d9   : > { %v10252_v57 = vadd.f32 %v8205_v53, %v8093_v15  ;;  %v8208_v47 = vadd.f32 %v8207_v61, %v8206_v52  ;;  %3722 = vmatmul.mubr.bf16.gmra.mrb[168].mxu0 %v7764_v28  ;;  %13104 = vst [vmem:[#allocation53_spill] sm:$0xff] %v10262_v3  ;;  %v7780_v15 = vcombine.low %v585_v59, %v593_v26 }
 0x1da   : > { %3883 = vmatmul.mubr.bf16.gmra.mrb[168].mxu1 %v7766_v12  ;;  %3729 = vmatprep.mubr.bf16.mxu0 %v7781_v55  ;;  %v7782_v12 = vcombine.low %v586_v44, %v594_v37  ;;  %v617_v44 = vld [vmem:[%s9418_s23 + $0x6a0] sm:$0xff] }
 0x1db   : > { %v10254_v34 = vadd.f32 %v8208_v47, %v8096_v35  ;;  %3890 = vmatprep.mubr.bf16.mxu1 %v7783_v24  ;;  %v7797_v35 = vcombine.high %v601_v17, %v609_v46  ;;  %v7799_v24 = vcombine.high %v602_v2, %v610_v23  ;;  %v625_v37 = vld [vmem:[%s9418_s23 + $0x6e0] sm:$0xff] }
 0x1dc   : > { %v8225_v36 = vpop.f32.mrb[64].mxu0 }
 0x1dd   : > { %v8337_v39 = vpop.f32.mrb[64].mxu1  ;;  %v8226_v4 = vpop.f32.mrb[65].mxu0 }
 0x1de   : > { %v8227_v53 = vadd.f32 %v8226_v4, %v8225_v36  ;;  %v8338_v61 = vpop.f32.mrb[65].mxu1  ;;  %v8228_v28 = vpop.f32.mrb[66].mxu0 }
 0x1df   : > { %v8339_v47 = vadd.f32 %v8338_v61, %v8337_v39  ;;  %v8340_v55 = vpop.f32.mrb[66].mxu1  ;;  %v8229_v52 = vpop.f32.mrb[67].mxu0 }
 0x1e0   : > { %v3322_v54 = vadd.f32 %v8227_v53, %v9887_v21  ;;  %v8230_v48 = vadd.f32 %v8229_v52, %v8228_v28  ;;  %v8341_v3 = vpop.f32.mrb[67].mxu1  ;;  %v10270_v36 = vpop.permute.xlu0 %4649  ;;  %v618_v21 = vld [vmem:[%s9418_s23 + $0x6a8] sm:$0xff] }
 0x1e1   : > { %v8342_v45 = vadd.f32 %v8341_v3, %v8340_v55  ;;  %3730 = vmatmul.mubr.bf16.gmra.mrb[172].mxu0 %v7780_v15  ;;  %13105 = vst [vmem:[#allocation54_spill] sm:$0xff] %v10270_v36  ;;  %v626_v53 = vld [vmem:[%s9418_s23 + $0x6e8] sm:$0xff]  ;;  %v10276_v61 = vpop.permute.xlu1 %4659 }
 0x1e2   : > { %v10265_v59 = vadd.f32 %v8339_v47, %v3322_v54  ;;  %v3325_v26 = vadd.f32 %v8230_v48, %v9890_v25  ;;  %3891 = vmatmul.mubr.bf16.gmra.mrb[172].mxu1 %v7782_v12  ;;  %3737 = vmatprep.mubr.bf16.mxu0 %v7797_v35  ;;  %13106 = vst [vmem:[#allocation55_spill] sm:$0xff] %v10276_v61 }
 0x1e3   : > { %3898 = vmatprep.mubr.bf16.mxu1 %v7799_v24  ;;  %v7796_v54 = vcombine.low %v601_v17, %v609_v46  ;;  %v7798_v25 = vcombine.low %v602_v2, %v610_v23  ;;  %v7813_v12 = vcombine.high %v617_v44, %v625_v37  ;;  %v633_v2 = vld [vmem:[%s9418_s23 + $0x720] sm:$0xff] }
 0x1e4   : > { %v10272_v39 = vadd.f32 %v8342_v45, %v3325_v26  ;;  %v8231_v4 = vpop.f32.mrb[68].mxu0  ;;  %v7815_v45 = vcombine.high %v618_v21, %v626_v53  ;;  %v641_v23 = vld [vmem:[%s9418_s23 + $0x760] sm:$0xff] }
 0x1e5   : > { %v8343_v3 = vpop.f32.mrb[68].mxu1  ;;  %v8232_v15 = vpop.f32.mrb[69].mxu0 }
 0x1e6   : > { %v8233_v28 = vadd.f32 %v8232_v15, %v8231_v4  ;;  %v8344_v47 = vpop.f32.mrb[69].mxu1  ;;  %v8234_v48 = vpop.f32.mrb[70].mxu0 }
 0x1e7   : > { %v8345_v35 = vadd.f32 %v8344_v47, %v8343_v3  ;;  %v8346_v55 = vpop.f32.mrb[70].mxu1  ;;  %v8235_v52 = vpop.f32.mrb[71].mxu0 }
 0x1e8   : > { %v3330_v24 = vadd.f32 %v8233_v28, %v9918_v63  ;;  %v8236_v26 = vadd.f32 %v8235_v52, %v8234_v48  ;;  %v8347_v61 = vpop.f32.mrb[71].mxu1  ;;  %v10284_v4 = vpop.permute.xlu0 %4798  ;;  %v634_v63 = vld [vmem:[%s9418_s23 + $0x728] sm:$0xff]  ;;  %v7812_v48 = vcombine.low %v617_v44, %v625_v37 }
 0x1e9   : > { %v8348_v36 = vadd.f32 %v8347_v61, %v8346_v55  ;;  %3738 = vmatmul.mubr.bf16.gmra.mrb[176].mxu0 %v7796_v54  ;;  %13107 = vst [vmem:[#allocation56_spill] sm:$0xff] %v10284_v4  ;;  %v642_v28 = vld [vmem:[%s9418_s23 + $0x768] sm:$0xff]  ;;  %v10290_v47 = vpop.permute.xlu1 %4663 }
 0x1ea   : > { %v10279_v17 = vadd.f32 %v8345_v35, %v3330_v24  ;;  %v3333_v46 = vadd.f32 %v8236_v26, %v9923_v1  ;;  %3899 = vmatmul.mubr.bf16.gmra.mrb[176].mxu1 %v7798_v25  ;;  %3745 = vmatprep.mubr.bf16.mxu0 %v7813_v12  ;;  %13108 = vst [vmem:[#allocation57_spill] sm:$0xff] %v10290_v47 }
 0x1eb   : > { %3906 = vmatprep.mubr.bf16.mxu1 %v7815_v45  ;;  %v7814_v25 = vcombine.low %v618_v21, %v626_v53  ;;  %v7829_v12 = vcombine.high %v633_v2, %v641_v23  ;;  %v649_v21 = vld [vmem:[%s9418_s23 + $0x7a0] sm:$0xff] }
 0x1ec   : > { %v10286_v3 = vadd.f32 %v8348_v36, %v3333_v46  ;;  %v8237_v15 = vpop.f32.mrb[72].mxu0  ;;  %v7831_v36 = vcombine.high %v634_v63, %v642_v28  ;;  %v657_v53 = vld [vmem:[%s9418_s23 + $0x7e0] sm:$0xff] }
 0x1ed   : > { %v8349_v61 = vpop.f32.mrb[72].mxu1  ;;  %v8238_v54 = vpop.f32.mrb[73].mxu0 }
 0x1ee   : > { %v8239_v35 = vadd.f32 %v8238_v54, %v8237_v15  ;;  %v8350_v55 = vpop.f32.mrb[73].mxu1  ;;  %v8240_v1 = vpop.f32.mrb[74].mxu0 }
 0x1ef   : > { %v8351_v52 = vadd.f32 %v8350_v55, %v8349_v61  ;;  %v8352_v45 = vpop.f32.mrb[74].mxu1  ;;  %v8241_v24 = vpop.f32.mrb[75].mxu0 }
 0x1f0   : > { %v3338_v26 = vadd.f32 %v8239_v35, %v9949_v32  ;;  %v8242_v46 = vadd.f32 %v8241_v24, %v8240_v1  ;;  %v8353_v47 = vpop.f32.mrb[75].mxu1  ;;  %v10298_v15 = vpop.permute.xlu0 %4802  ;;  %v650_v32 = vld [vmem:[%s9418_s23 + $0x7a8] sm:$0xff]  ;;  %v7828_v1 = vcombine.low %v633_v2, %v641_v23 }
 0x1f1   : > { %v8354_v4 = vadd.f32 %v8353_v47, %v8352_v45  ;;  %3746 = vmatmul.mubr.bf16.gmra.mrb[180].mxu0 %v7812_v48  ;;  %13109 = vst [vmem:[#allocation58_spill] sm:$0xff] %v10298_v15  ;;  %v658_v35 = vld [vmem:[%s9418_s23 + $0x7e8] sm:$0xff]  ;;  %v10304_v55 = vpop.permute.xlu1 %4667 }
 0x1f2   : > { %v10293_v44 = vadd.f32 %v8351_v52, %v3338_v26  ;;  %v3341_v37 = vadd.f32 %v8242_v46, %v9952_v41  ;;  %3907 = vmatmul.mubr.bf16.gmra.mrb[180].mxu1 %v7814_v25  ;;  %3753 = vmatprep.mubr.bf16.mxu0 %v7829_v12  ;;  %v7830_v25 = vcombine.low %v634_v63, %v642_v28  ;;  %v411_v63 = vld [vmem:[%s9418_s23 + $0x30] sm:$0xff] }
 0x1f3   : > { %3914 = vmatprep.mubr.bf16.mxu1 %v7831_v36  ;;  %v7845_v12 = vcombine.high %v649_v21, %v657_v53  ;;  %v419_v28 = vld [vmem:[%s9418_s23 + $0x70] sm:$0xff] }
 0x1f4   : > { %v10300_v61 = vadd.f32 %v8354_v4, %v3341_v37  ;;  %v8243_v54 = vpop.f32.mrb[76].mxu0  ;;  %v7847_v4 = vcombine.high %v650_v32, %v658_v35 }
 0x1f5   : > { %v8355_v47 = vpop.f32.mrb[76].mxu1  ;;  %v8244_v48 = vpop.f32.mrb[77].mxu0 }
 0x1f6   : > { %v8245_v52 = vadd.f32 %v8244_v48, %v8243_v54  ;;  %v8356_v45 = vpop.f32.mrb[77].mxu1  ;;  %v8246_v41 = vpop.f32.mrb[78].mxu0 }
 0x1f7   : > { %v8357_v24 = vadd.f32 %v8356_v45, %v8355_v47  ;;  %v8358_v36 = vpop.f32.mrb[78].mxu1  ;;  %v8247_v26 = vpop.f32.mrb[79].mxu0 }
 0x1f8   : > { %v3346_v46 = vadd.f32 %v8245_v52, %v9977_v16  ;;  %v8248_v37 = vadd.f32 %v8247_v26, %v8246_v41  ;;  %v8359_v15 = vpop.f32.mrb[79].mxu1  ;;  %v10312_v54 = vpop.permute.xlu0 %4806  ;;  %v412_v16 = vld [vmem:[%s9418_s23 + $0x38] sm:$0xff]  ;;  %v7609_v26 = vcombine.high %v411_v63, %v419_v28 }
 0x1f9   : > { %v8360_v43 = vadd.f32 %v8359_v15, %v8358_v36  ;;  %3754 = vmatmul.mubr.bf16.gmra.mrb[184].mxu0 %v7828_v1  ;;  %13110 = vst [vmem:[#allocation59_spill] sm:$0xff] %v10312_v54  ;;  %v420_v52 = vld [vmem:[%s9418_s23 + $0x78] sm:$0xff]  ;;  %v10318_v45 = vpop.permute.xlu1 %4800  ;;  %v6079_v15 = vld [vmem:[#allocation2 + $0x200] sm:$0xff]  ;;  %v7846_v36 = vcombine.low %v650_v32, %v658_v35  ;;  %v427_v35 = vld [vmem:[%s9418_s23 + $0xb0] sm:$0xff] }
 0x1fa   : > { %v10307_v2 = vadd.f32 %v8357_v24, %v3346_v46  ;;  %v3349_v23 = vadd.f32 %v8248_v37, %v9982_v18  ;;  %3915 = vmatmul.mubr.bf16.gmra.mrb[184].mxu1 %v7830_v25  ;;  %3761 = vmatprep.mubr.bf16.mxu0 %v7845_v12  ;;  %13111 = vst [vmem:[#allocation60_spill] sm:$0xff] %v10318_v45 }
 0x1fb   : > { %3922 = vmatprep.mubr.bf16.mxu1 %v7847_v4  ;;  %v7844_v24 = vcombine.low %v649_v21, %v657_v53  ;;  %6144 = vrot.lane.b32.xlu1 %v6079_v15, %s9235_s15  ;;  %v7611_v37 = vcombine.high %v412_v16, %v420_v52  ;;  %v6081_v21 = vld [vmem:[#allocation2 + $0x228] sm:$0xff]  ;;  %v435_v15 = vld [vmem:[%s9418_s23 + $0xf0] sm:$0xff] }
 0x1fc   : > { %v10314_v47 = vadd.f32 %v8360_v43, %v3349_v23  ;;  %v8249_v48 = vpop.f32.mrb[80].mxu0 }
 0x1fd   : > { %v8361_v1 = vpop.f32.mrb[80].mxu1  ;;  %v8250_v41 = vpop.f32.mrb[81].mxu0 }
 0x1fe   : > { %v8251_v18 = vadd.f32 %v8250_v41, %v8249_v48  ;;  %v8362_v25 = vpop.f32.mrb[81].mxu1  ;;  %v8252_v12 = vpop.f32.mrb[82].mxu0 }
 0x1ff   : > { %v8363_v4 = vadd.f32 %v8362_v25, %v8361_v1  ;;  %v8364_v43 = vpop.f32.mrb[82].mxu1  ;;  %v8253_v46 = vpop.f32.mrb[83].mxu0  ;;  %6148 = vrot.lane.b32.xlu1 %v6081_v21, %s9235_s15  ;;  %v436_v25 = vld [vmem:[%s9418_s23 + $0xf8] sm:$0xff] }
 0x200   : > { %v3354_v23 = vadd.f32 %v8251_v18, %v10010_v10  ;;  %v8254_v45 = vadd.f32 %v8253_v46, %v8252_v12  ;;  %v8365_v54 = vpop.f32.mrb[83].mxu1  ;;  %v10328_v1 = vpop.permute.xlu0 %4810  ;;  %v428_v18 = vld [vmem:[%s9418_s23 + $0xb8] sm:$0xff]  ;;  %v7625_v46 = vcombine.high %v427_v35, %v435_v15 }
 0x201   : > { %v8366_v53 = vadd.f32 %v8365_v54, %v8364_v43  ;;  %3762 = vmatmul.mubr.bf16.gmra.mrb[188].mxu0 %v7844_v24  ;;  %13112 = vst [vmem:[#allocation61_spill] sm:$0xff] %v10328_v1  ;;  %v10334_v54 = vpop.permute.xlu1 %4804  ;;  %v6083_v24 = vld [vmem:[#allocation2 + $0x250] sm:$0xff]  ;;  %v7608_v43 = vcombine.low %v411_v63, %v419_v28  ;;  %v6085_v63 = vld [vmem:[#allocation2 + $0x278] sm:$0xff] }
 0x202   : > { %v10323_v48 = vadd.f32 %v8363_v4, %v3354_v23  ;;  %v3357_v32 = vadd.f32 %v8254_v45, %v10014_v50  ;;  %3923 = vmatmul.mubr.bf16.gmra.mrb[188].mxu1 %v7846_v36  ;;  %3963 = vmatprep.mubr.bf16.mxu0 %v7609_v26  ;;  %13113 = vst [vmem:[#allocation62_spill] sm:$0xff] %v10334_v54 }
 0x203   : > { %4124 = vmatprep.mubr.bf16.mxu1 %v7611_v37  ;;  %6152 = vrot.lane.b32.xlu1 %v6083_v24, %s9235_s15  ;;  %v7610_v26 = vcombine.low %v412_v16, %v420_v52  ;;  %v443_v24 = vld [vmem:[%s9418_s23 + $0x130] sm:$0xff] }
 0x204   : > { %v10330_v10 = vadd.f32 %v8366_v53, %v3357_v32  ;;  %v8255_v41 = vpop.f32.mrb[84].mxu0  ;;  %v7627_v53 = vcombine.high %v428_v18, %v436_v25  ;;  %v10342_v52 = vpop.permute.xlu0 %4814 }
 0x205   : > { %v8367_v12 = vpop.f32.mrb[84].mxu1  ;;  %v8256_v4 = vpop.f32.mrb[85].mxu0  ;;  %13114 = vst [vmem:[#allocation63_spill] sm:$0xff] %v10342_v52 }
 0x206   : > { %v8257_v50 = vadd.f32 %v8256_v4, %v8255_v41  ;;  %v8368_v45 = vpop.f32.mrb[85].mxu1  ;;  %v8258_v36 = vpop.f32.mrb[86].mxu0 }
 0x207   : > { %v8369_v37 = vadd.f32 %v8368_v45, %v8367_v12  ;;  %v8370_v23 = vpop.f32.mrb[86].mxu1  ;;  %v8259_v21 = vpop.f32.mrb[87].mxu0  ;;  %6156 = vrot.lane.b32.xlu1 %v6085_v63, %s9235_s15  ;;  %v452_v45 = vld [vmem:[%s9418_s23 + $0x178] sm:$0xff] }
 0x208   : > { %v3362_v32 = vadd.f32 %v8257_v50, %v10044_v42  ;;  %v8260_v54 = vadd.f32 %v8259_v21, %v8258_v36  ;;  %v8371_v1 = vpop.f32.mrb[87].mxu1  ;;  %v451_v42 = vld [vmem:[%s9418_s23 + $0x170] sm:$0xff]  ;;  %v444_v50 = vld [vmem:[%s9418_s23 + $0x138] sm:$0xff] }
 0x209   : > { %v8372_v28 = vadd.f32 %v8371_v1, %v8370_v23  ;;  %3964 = vmatmul.mubr.bf16.vlgmr.msra.gmra.mrb[192].mxu0 %v7608_v43  ;;  %v10350_v1 = vpop.permute.xlu1 %4808  ;;  %v6087_v43 = vld [vmem:[#allocation2 + $0x2a0] sm:$0xff]  ;;  %v7624_v23 = vcombine.low %v427_v35, %v435_v15  ;;  %v7641_v21 = vcombine.high %v443_v24, %v451_v42  ;;  %v6089_v35 = vld [vmem:[#allocation2 + $0x2c8] sm:$0xff] }
 0x20a   : > { %v10339_v41 = vadd.f32 %v8369_v37, %v3362_v32  ;;  %v3365_v16 = vadd.f32 %v8260_v54, %v10053_v6  ;;  %4125 = vmatmul.mubr.bf16.vlgmr.msra.gmra.mrb[192].mxu1 %v7610_v26  ;;  %3971 = vmatprep.mubr.bf16.mxu0 %v7625_v46  ;;  %13115 = vst [vmem:[#allocation64_spill] sm:$0xff] %v10350_v1 }
 0x20b   : > { %4132 = vmatprep.mubr.bf16.mxu1 %v7627_v53  ;;  %6160 = vrot.lane.b32.xlu1 %v6087_v43, %s9235_s15  ;;  %v7626_v46 = vcombine.low %v428_v18, %v436_v25  ;;  %v10358_v25 = vpop.permute.xlu0 %4818  ;;  %v459_v43 = vld [vmem:[%s9418_s23 + $0x1b0] sm:$0xff] }
 0x20c   : > { %v10346_v12 = vadd.f32 %v8372_v28, %v3365_v16  ;;  %v8261_v4 = vpop.f32.mrb[88].mxu0  ;;  %v7643_v28 = vcombine.high %v444_v50, %v452_v45  ;;  %13116 = vst [vmem:[#allocation65_spill] sm:$0xff] %v10358_v25 }
 0x20d   : > { %v8373_v36 = vpop.f32.mrb[88].mxu1  ;;  %v8262_v37 = vpop.f32.mrb[89].mxu0 }
 0x20e   : > { %v8263_v6 = vadd.f32 %v8262_v37, %v8261_v4  ;;  %v8374_v54 = vpop.f32.mrb[89].mxu1  ;;  %v8264_v26 = vpop.f32.mrb[90].mxu0 }
 0x20f   : > { %v8375_v53 = vadd.f32 %v8374_v54, %v8373_v36  ;;  %v8376_v32 = vpop.f32.mrb[90].mxu1  ;;  %v8265_v63 = vpop.f32.mrb[91].mxu0  ;;  %6164 = vrot.lane.b32.xlu1 %v6089_v35, %s9235_s15  ;;  %v468_v54 = vld [vmem:[%s9418_s23 + $0x1f8] sm:$0xff] }
 0x210   : > { %v3370_v16 = vadd.f32 %v8263_v6, %v10081_v5  ;;  %v8266_v1 = vadd.f32 %v8265_v63, %v8264_v26  ;;  %v8377_v52 = vpop.f32.mrb[91].mxu1  ;;  %v467_v5 = vld [vmem:[%s9418_s23 + $0x1f0] sm:$0xff]  ;;  %v460_v6 = vld [vmem:[%s9418_s23 + $0x1b8] sm:$0xff] }
 0x211   : > { %v8378_v15 = vadd.f32 %v8377_v52, %v8376_v32  ;;  %3972 = vmatmul.mubr.bf16.gmra.mrb[196].mxu0 %v7624_v23  ;;  %v10366_v52 = vpop.permute.xlu1 %4812  ;;  %v6091_v23 = vld [vmem:[#allocation2 + $0x2f0] sm:$0xff]  ;;  %v7640_v32 = vcombine.low %v443_v24, %v451_v42  ;;  %v7657_v63 = vcombine.high %v459_v43, %v467_v5  ;;  %v6093_v24 = vld [vmem:[#allocation2 + $0x318] sm:$0xff] }
 0x212   : > { %v10355_v4 = vadd.f32 %v8375_v53, %v3370_v16  ;;  %v3373_v18 = vadd.f32 %v8266_v1, %v10087_v20  ;;  %4133 = vmatmul.mubr.bf16.gmra.mrb[196].mxu1 %v7626_v46  ;;  %3979 = vmatprep.mubr.bf16.mxu0 %v7641_v21  ;;  %13117 = vst [vmem:[#allocation66_spill] sm:$0xff] %v10366_v52 }
 0x213   : > { %4140 = vmatprep.mubr.bf16.mxu1 %v7643_v28  ;;  %6168 = vrot.lane.b32.xlu1 %v6091_v23, %s9235_s15  ;;  %v7642_v21 = vcombine.low %v444_v50, %v452_v45  ;;  %v10374_v45 = vpop.permute.xlu0 %4990  ;;  %v475_v23 = vld [vmem:[%s9418_s23 + $0x230] sm:$0xff] }
 0x214   : > { %v10362_v36 = vadd.f32 %v8378_v15, %v3373_v18  ;;  %v8267_v37 = vpop.f32.mrb[92].mxu0  ;;  %v7659_v15 = vcombine.high %v460_v6, %v468_v54  ;;  %13118 = vst [vmem:[#allocation67_spill] sm:$0xff] %v10374_v45 }
 0x215   : > { %v8379_v26 = vpop.f32.mrb[92].mxu1  ;;  %v8268_v53 = vpop.f32.mrb[93].mxu0 }
 0x216   : > { %v8269_v20 = vadd.f32 %v8268_v53, %v8267_v37  ;;  %v8380_v1 = vpop.f32.mrb[93].mxu1  ;;  %v8270_v46 = vpop.f32.mrb[94].mxu0 }
 0x217   : > { %v8381_v28 = vadd.f32 %v8380_v1, %v8379_v26  ;;  %v8382_v16 = vpop.f32.mrb[94].mxu1  ;;  %v8271_v35 = vpop.f32.mrb[95].mxu0  ;;  %6172 = vrot.lane.b32.xlu1 %v6093_v24, %s9235_s15  ;;  %v484_v1 = vld [vmem:[%s9418_s23 + $0x278] sm:$0xff] }
 0x218   : > { %v3378_v18 = vadd.f32 %v8269_v20, %v10113_v58  ;;  %v8272_v52 = vadd.f32 %v8271_v35, %v8270_v46  ;;  %v8383_v25 = vpop.f32.mrb[95].mxu1  ;;  %v483_v58 = vld [vmem:[%s9418_s23 + $0x270] sm:$0xff]  ;;  %v476_v20 = vld [vmem:[%s9418_s23 + $0x238] sm:$0xff] }
 0x219   : > { %v8384_v42 = vadd.f32 %v8383_v25, %v8382_v16  ;;  %3980 = vmatmul.mubr.bf16.gmra.mrb[200].mxu0 %v7640_v32  ;;  %v10382_v25 = vpop.permute.xlu1 %4816  ;;  %v6095_v32 = vld [vmem:[#allocation2 + $0x340] sm:$0xff]  ;;  %v7656_v16 = vcombine.low %v459_v43, %v467_v5  ;;  %v7673_v35 = vcombine.high %v475_v23, %v483_v58  ;;  %v6097_v43 = vld [vmem:[#allocation2 + $0x368] sm:$0xff] }
 0x21a   : > { %v10371_v37 = vadd.f32 %v8381_v28, %v3378_v18  ;;  %v3381_v50 = vadd.f32 %v8272_v52, %v10118_v7  ;;  %4141 = vmatmul.mubr.bf16.gmra.mrb[200].mxu1 %v7642_v21  ;;  %3987 = vmatprep.mubr.bf16.mxu0 %v7657_v63  ;;  %13119 = vst [vmem:[#allocation68_spill] sm:$0xff] %v10382_v25 }
 0x21b   : > { %4148 = vmatprep.mubr.bf16.mxu1 %v7659_v15  ;;  %6176 = vrot.lane.b32.xlu1 %v6095_v32, %s9235_s15  ;;  %v7658_v63 = vcombine.low %v460_v6, %v468_v54  ;;  %v10390_v54 = vpop.permute.xlu0 %4994  ;;  %v491_v32 = vld [vmem:[%s9418_s23 + $0x2b0] sm:$0xff] }
 0x21c   : > { %v10378_v26 = vadd.f32 %v8384_v42, %v3381_v50  ;;  %v8273_v53 = vpop.f32.mrb[96].mxu0  ;;  %v7675_v42 = vcombine.high %v476_v20, %v484_v1  ;;  %13120 = vst [vmem:[#allocation69_spill] sm:$0xff] %v10390_v54 }
 0x21d   : > { %v8385_v46 = vpop.f32.mrb[96].mxu1  ;;  %v8274_v28 = vpop.f32.mrb[97].mxu0 }
 0x21e   : > { %v8275_v7 = vadd.f32 %v8274_v28, %v8273_v53  ;;  %v8386_v52 = vpop.f32.mrb[97].mxu1  ;;  %v8276_v21 = vpop.f32.mrb[98].mxu0 }
 0x21f   : > { %v8387_v15 = vadd.f32 %v8386_v52, %v8385_v46  ;;  %v8388_v18 = vpop.f32.mrb[98].mxu1  ;;  %v8277_v24 = vpop.f32.mrb[99].mxu0  ;;  %6180 = vrot.lane.b32.xlu1 %v6097_v43, %s9235_s15  ;;  %v500_v52 = vld [vmem:[%s9418_s23 + $0x2f8] sm:$0xff] }
 0x220   : > { %v3386_v50 = vadd.f32 %v8275_v7, %v10144_v13  ;;  %v8278_v25 = vadd.f32 %v8277_v24, %v8276_v21  ;;  %v8389_v45 = vpop.f32.mrb[99].mxu1  ;;  %v499_v13 = vld [vmem:[%s9418_s23 + $0x2f0] sm:$0xff]  ;;  %v492_v7 = vld [vmem:[%s9418_s23 + $0x2b8] sm:$0xff] }
 0x221   : > { %v8390_v5 = vadd.f32 %v8389_v45, %v8388_v18  ;;  %3988 = vmatmul.mubr.bf16.gmra.mrb[204].mxu0 %v7656_v16  ;;  %v10398_v45 = vpop.permute.xlu1 %4820  ;;  %v6099_v16 = vld [vmem:[#allocation2 + $0x390] sm:$0xff]  ;;  %v7672_v18 = vcombine.low %v475_v23, %v483_v58  ;;  %v7689_v24 = vcombine.high %v491_v32, %v499_v13 }
 0x222   : > { %v10387_v53 = vadd.f32 %v8387_v15, %v3386_v50  ;;  %v3389_v6 = vadd.f32 %v8278_v25, %v10146_v62  ;;  %4149 = vmatmul.mubr.bf16.gmra.mrb[204].mxu1 %v7658_v63  ;;  %3995 = vmatprep.mubr.bf16.mxu0 %v7673_v35  ;;  %13121 = vst [vmem:[#allocation70_spill] sm:$0xff] %v10398_v45 }
 0x223   : > { %4156 = vmatprep.mubr.bf16.mxu1 %v7675_v42  ;;  %6184 = vrot.lane.b32.xlu1 %v6099_v16, %s9235_s15  ;;  %v7674_v35 = vcombine.low %v476_v20, %v484_v1  ;;  %v10406_v1 = vpop.permute.xlu0 %4998 }
 0x224   : > { %v10394_v46 = vadd.f32 %v8390_v5, %v3389_v6  ;;  %v8279_v28 = vpop.f32.mrb[100].mxu0  ;;  %v7691_v5 = vcombine.high %v492_v7, %v500_v52  ;;  %13122 = vst [vmem:[#allocation71_spill] sm:$0xff] %v10406_v1 }
 0x225   : > { %v8391_v21 = vpop.f32.mrb[100].mxu1  ;;  %v8280_v15 = vpop.f32.mrb[101].mxu0 }
 0x226   : > { %v8281_v62 = vadd.f32 %v8280_v15, %v8279_v28  ;;  %v8392_v25 = vpop.f32.mrb[101].mxu1  ;;  %v8282_v63 = vpop.f32.mrb[102].mxu0  ;;  %v10409_v28 = vld [vmem:[%s9418_s23 + $0x330] sm:$0xff]  ;;  %v10419_v15 = vld [vmem:[%s9418_s23 + $0x338] sm:$0xff] }
 0x227   : > { %v8393_v42 = vadd.f32 %v8392_v25, %v8391_v21  ;;  %v8394_v50 = vpop.f32.mrb[102].mxu1  ;;  %v8283_v43 = vpop.f32.mrb[103].mxu0  ;;  %6188 = vrot.lane.b32.xlu1 %v6101_v33, %s9235_s15  ;;  %v516_v33 = vld [vmem:[%s9418_s23 + $0x378] sm:$0xff] }
 0x228   : > { %v3394_v6 = vadd.f32 %v8281_v62, %v10162_v19  ;;  %v8284_v45 = vadd.f32 %v8283_v43, %v8282_v63  ;;  %v8395_v54 = vpop.f32.mrb[103].mxu1  ;;  %v10412_v19 = vld [vmem:[%s9418_s23 + $0x370] sm:$0xff] }
 0x229   : > { %v8396_v23 = vadd.f32 %v8395_v54, %v8394_v50  ;;  %3996 = vmatmul.mubr.bf16.gmra.mrb[208].mxu0 %v7672_v18  ;;  %v10416_v54 = vpop.permute.xlu1 %4992  ;;  %v6103_v18 = vld [vmem:[#allocation2 + $0x3e0] sm:$0xff] }
 0x22a   : > { %v10403_v58 = vadd.f32 %v8393_v42, %v3394_v6  ;;  %v3397_v20 = vadd.f32 %v8284_v45, %v10164_v60  ;;  %4157 = vmatmul.mubr.bf16.gmra.mrb[208].mxu1 %v7674_v35  ;;  %4003 = vmatprep.mubr.bf16.mxu0 %v7689_v24  ;;  %13123 = vst [vmem:[#allocation72_spill] sm:$0xff] %v10416_v54 }
 0x22b   : > { %4164 = vmatprep.mubr.bf16.mxu1 %v7691_v5  ;;  %v7688_v45 = vcombine.low %v491_v32, %v499_v13  ;;  %6192 = vrot.lane.b32.xlu1 %v6103_v18, %s9235_s15  ;;  %v7690_v24 = vcombine.low %v492_v7, %v500_v52  ;;  %v7705_v42 = vcombine.high %v10409_v28, %v10412_v19  ;;  %v10431_v18 = vpop.permute.xlu0 %5002 }
 0x22c   : > { %v10414_v16 = vadd.f32 %v8396_v23, %v3397_v20  ;;  %v8285_v21 = vpop.f32.mrb[104].mxu0  ;;  %v7707_v6 = vcombine.high %v10419_v15, %v516_v33  ;;  %v6105_v20 = vld [vmem:[#allocation2 + $0x408] sm:$0xff]  ;;  %13124 = vst [vmem:[#allocation73_spill] sm:$0xff] %v10431_v18 }
 0x22d   : > { %v8397_v62 = vpop.f32.mrb[104].mxu1  ;;  %v8286_v60 = vpop.f32.mrb[105].mxu0 }
 0x22e   : > { %v8287_v25 = vadd.f32 %v8286_v60, %v8285_v21  ;;  %v8398_v63 = vpop.f32.mrb[105].mxu1  ;;  %v8288_v35 = vpop.f32.mrb[106].mxu0  ;;  %v10440_v60 = vld [vmem:[%s9418_s23 + $0x3b8] sm:$0xff] }
 0x22f   : > { %v8399_v50 = vadd.f32 %v8398_v63, %v8397_v62  ;;  %v8400_v43 = vpop.f32.mrb[106].mxu1  ;;  %v8289_v5 = vpop.f32.mrb[107].mxu0  ;;  %6196 = vrot.lane.b32.xlu1 %v6105_v20, %s9235_s15  ;;  %v10434_v62 = vld [vmem:[%s9418_s23 + $0x3b0] sm:$0xff] }
 0x230   : > { %v3402_v23 = vadd.f32 %v8287_v25, %v10178_v38  ;;  %v8290_v32 = vadd.f32 %v8289_v5, %v8288_v35  ;;  %v8401_v13 = vpop.f32.mrb[107].mxu1  ;;  %v10437_v38 = vld [vmem:[%s9418_s23 + $0x3f0] sm:$0xff]  ;;  %v10444_v63 = vpop.permute.xlu1 %4996  ;;  %v10447_v35 = vld [vmem:[%s9418_s23 + $0x3f8] sm:$0xff] }
 0x231   : > { %v8402_v21 = vadd.f32 %v8401_v13, %v8400_v43  ;;  %4004 = vmatmul.mubr.bf16.gmra.mrb[212].mxu0 %v7688_v45  ;;  %13125 = vst [vmem:[#allocation74_spill] sm:$0xff] %v10444_v63  ;;  %v7704_v43 = vcombine.low %v10409_v28, %v10412_v19  ;;  %v7721_v13 = vcombine.high %v10434_v62, %v10437_v38 }
 0x232   : > { %v10428_v7 = vadd.f32 %v8399_v50, %v3402_v23  ;;  %v3405_v52 = vadd.f32 %v8290_v32, %v10180_v11  ;;  %4165 = vmatmul.mubr.bf16.gmra.mrb[212].mxu1 %v7690_v24  ;;  %4011 = vmatprep.mubr.bf16.mxu0 %v7705_v42  ;;  %v6107_v50 = vld [vmem:[#allocation2 + $0x430] sm:$0xff]  ;;  %v6291_v11 = vld [vmem:[#allocation2 + $0x466] sm:$0xff]  ;;  %v7706_v32 = vcombine.low %v10419_v15, %v516_v33 }
 0x233   : > { %4172 = vmatprep.mubr.bf16.mxu1 %v7707_v6  ;;  %6200 = vrot.lane.b32.xlu1 %v6107_v50, %s9235_s15  ;;  %v7723_v28 = vcombine.high %v10440_v60, %v10447_v35 }
 0x234   : > { %v10442_v25 = vadd.f32 %v8402_v21, %v3405_v52  ;;  %v8291_v45 = vpop.f32.mrb[108].mxu0  ;;  %6375 = vrot.lane.b32.xlu0 %v6291_v11, %s9236_s19  ;;  %v6109_v11 = vld [vmem:[#allocation2 + $0x458] sm:$0xff] }
 0x235   : > { %v8403_v24 = vpop.f32.mrb[108].mxu1  ;;  %v8292_v42 = vpop.f32.mrb[109].mxu0 }
 0x236   : > { %v8293_v5 = vadd.f32 %v8292_v42, %v8291_v45  ;;  %v8404_v6 = vpop.f32.mrb[109].mxu1  ;;  %v8294_v23 = vpop.f32.mrb[110].mxu0  ;;  %v6293_v42 = vld [vmem:[#allocation2 + $0x48e] sm:$0xff] }
 0x237   : > { %v8405_v20 = vadd.f32 %v8404_v6, %v8403_v24  ;;  %v8406_v21 = vpop.f32.mrb[110].mxu1  ;;  %v8295_v52 = vpop.f32.mrb[111].mxu0  ;;  %6204 = vrot.lane.b32.xlu1 %v6109_v11, %s9235_s15  ;;  %v10472_v6 = vld [vmem:[%s9418_s23 + $0x438] sm:$0xff] }
 0x238   : > { %v3410_v19 = vadd.f32 %v8293_v5, %v10194_v0  ;;  %v8296_v50 = vadd.f32 %v8295_v52, %v8294_v23  ;;  %v8407_v45 = vpop.f32.mrb[111].mxu1  ;;  %v10463_v24 = vpop.permute.xlu0 %5006  ;;  %v10466_v0 = vld [vmem:[%s9418_s23 + $0x430] sm:$0xff]  ;;  %6379 = vrot.lane.b32.xlu0 %v6293_v42, %s9236_s19 }
 0x239   : > { %v8408_v63 = vadd.f32 %v8407_v45, %v8406_v21  ;;  %4012 = vmatmul.mubr.bf16.gmra.mrb[216].mxu0 %v7704_v43  ;;  %13126 = vst [vmem:[#allocation75_spill] sm:$0xff] %v10463_v24  ;;  %v10469_v5 = vld [vmem:[%s9418_s23 + $0x470] sm:$0xff]  ;;  %v10480_v21 = vld [vmem:[%s9418_s23 + $0x478] sm:$0xff] }
 0x23a   : > { %v10460_v15 = vadd.f32 %v8405_v20, %v3410_v19  ;;  %v3413_v33 = vadd.f32 %v8296_v50, %v10196_v9  ;;  %4173 = vmatmul.mubr.bf16.gmra.mrb[216].mxu1 %v7706_v32  ;;  %4019 = vmatprep.mubr.bf16.mxu0 %v7721_v13  ;;  %v10477_v20 = vpop.permute.xlu1 %5000  ;;  %v6292_v9 = vld [vmem:[#allocation2 + $0x46e] sm:$0xff]  ;;  %v6295_v32 = vld [vmem:[#allocation2 + $0x4b6] sm:$0xff]  ;;  %v7737_v11 = vcombine.high %v10466_v0, %v10469_v5 }
 0x23b   : > { %4180 = vmatprep.mubr.bf16.mxu1 %v7723_v28  ;;  %13127 = vst [vmem:[#allocation76_spill] sm:$0xff] %v10477_v20  ;;  %v7720_v28 = vcombine.low %v10434_v62, %v10437_v38  ;;  %6377 = vrot.lane.b32.xlu1 %v6292_v9, %s9236_s19  ;;  %v7739_v24 = vcombine.high %v10472_v6, %v10480_v21  ;;  %v6294_v9 = vld [vmem:[#allocation2 + $0x496] sm:$0xff] }
 0x23c   : > { %v10475_v43 = vadd.f32 %v8408_v63, %v3413_v33  ;;  %v8297_v23 = vpop.f32.mrb[112].mxu0  ;;  %v7722_v63 = vcombine.low %v10440_v60, %v10447_v35  ;;  %6383 = vrot.lane.b32.xlu0 %v6295_v32, %s9236_s19  ;;  %v6297_v60 = vld [vmem:[#allocation2 + $0x4de] sm:$0xff]  ;;  %v10497_v32 = vpop.permute.xlu0 %5010 }
 0x23d   : > { %v8409_v13 = vpop.f32.mrb[112].mxu1  ;;  %v8298_v52 = vpop.f32.mrb[113].mxu0  ;;  %13128 = vst [vmem:[#allocation77_spill] sm:$0xff] %v10497_v32 }
 0x23e   : > { %v8299_v19 = vadd.f32 %v8298_v52, %v8297_v23  ;;  %v8410_v50 = vpop.f32.mrb[113].mxu1  ;;  %v8300_v45 = vpop.f32.mrb[114].mxu0 }
 0x23f   : > { %v8411_v42 = vadd.f32 %v8410_v50, %v8409_v13  ;;  %v8412_v33 = vpop.f32.mrb[114].mxu1  ;;  %v8301_v20 = vpop.f32.mrb[115].mxu0  ;;  %6381 = vrot.lane.b32.xlu1 %v6294_v9, %s9236_s19  ;;  %v7738_v9 = vcombine.low %v10472_v6, %v10480_v21  ;;  %v6301_v6 = vld [vmem:[#allocation2 + $0x52e] sm:$0xff] }
 0x240   : > { %v3418_v62 = vadd.f32 %v8299_v19, %v10210_v8  ;;  %v8302_v38 = vadd.f32 %v8301_v20, %v8300_v45  ;;  %v8413_v23 = vpop.f32.mrb[115].mxu1  ;;  %v10500_v8 = vld [vmem:[%s9418_s23 + $0x4b0] sm:$0xff]  ;;  %v10506_v19 = vld [vmem:[%s9418_s23 + $0x4b8] sm:$0xff]  ;;  %6387 = vrot.lane.b32.xlu0 %v6297_v60, %s9236_s19  ;;  %v10511_v50 = vpop.permute.xlu1 %5004 }
 0x241   : > { %v8414_v35 = vadd.f32 %v8413_v23, %v8412_v33  ;;  %4020 = vmatmul.mubr.bf16.gmra.mrb[220].mxu0 %v7720_v28  ;;  %v10503_v20 = vld [vmem:[%s9418_s23 + $0x4f0] sm:$0xff]  ;;  %13129 = vst [vmem:[#allocation78_spill] sm:$0xff] %v10511_v50 }
 0x242   : > { %v10494_v13 = vadd.f32 %v8411_v42, %v3418_v62  ;;  %v3421_v52 = vadd.f32 %v8302_v38, %v10212_v49  ;;  %4181 = vmatmul.mubr.bf16.gmra.mrb[220].mxu1 %v7722_v63  ;;  %4027 = vmatprep.mubr.bf16.mxu0 %v7737_v11  ;;  %v10514_v42 = vld [vmem:[%s9418_s23 + $0x4f8] sm:$0xff]  ;;  %v6299_v63 = vld [vmem:[#allocation2 + $0x506] sm:$0xff]  ;;  %v7753_v60 = vcombine.high %v10500_v8, %v10503_v20 }
 0x243   : > { %4188 = vmatprep.mubr.bf16.mxu1 %v7739_v24  ;;  %v6296_v49 = vld [vmem:[#allocation2 + $0x4be] sm:$0xff]  ;;  %v7736_v24 = vcombine.low %v10466_v0, %v10469_v5  ;;  %v7755_v32 = vcombine.high %v10506_v19, %v10514_v42 }
 0x244   : > { %v10509_v28 = vadd.f32 %v8414_v35, %v3421_v52  ;;  %v8303_v45 = vpop.f32.mrb[116].mxu0  ;;  %6385 = vrot.lane.b32.xlu1 %v6296_v49, %s9236_s19  ;;  %6391 = vrot.lane.b32.xlu0 %v6299_v63, %s9236_s19  ;;  %v6298_v49 = vld [vmem:[#allocation2 + $0x4e6] sm:$0xff]  ;;  %v10531_v63 = vpop.permute.xlu0 %5182 }
 0x245   : > { %v8415_v11 = vpop.f32.mrb[116].mxu1  ;;  %v8304_v33 = vpop.f32.mrb[117].mxu0  ;;  %13130 = vst [vmem:[#allocation79_spill] sm:$0xff] %v10531_v63 }
 0x246   : > { %v8305_v62 = vadd.f32 %v8304_v33, %v8303_v45  ;;  %v8416_v38 = vpop.f32.mrb[117].mxu1  ;;  %v8306_v23 = vpop.f32.mrb[118].mxu0 }
 0x247   : > { %v8417_v35 = vadd.f32 %v8416_v38, %v8415_v11  ;;  %v8418_v52 = vpop.f32.mrb[118].mxu1  ;;  %v8307_v50 = vpop.f32.mrb[119].mxu0 }
 0x248   : > { %v3426_v0 = vadd.f32 %v8305_v62, %v10226_v30  ;;  %v8308_v5 = vadd.f32 %v8307_v50, %v8306_v23  ;;  %v8419_v45 = vpop.f32.mrb[119].mxu1  ;;  %6389 = vrot.lane.b32.xlu1 %v6298_v49, %s9236_s19  ;;  %v10534_v30 = vld [vmem:[%s9418_s23 + $0x530] sm:$0xff]  ;;  %v10540_v62 = vld [vmem:[%s9418_s23 + $0x538] sm:$0xff]  ;;  %6395 = vrot.lane.b32.xlu0 %v6301_v6, %s9236_s19  ;;  %v10545_v38 = vpop.permute.xlu1 %5008  ;;  %v7754_v49 = vcombine.low %v10506_v19, %v10514_v42 }
 0x249   : > { %v8420_v21 = vadd.f32 %v8419_v45, %v8418_v52  ;;  %4028 = vmatmul.mubr.bf16.gmra.mrb[224].mxu0 %v7736_v24  ;;  %v10537_v50 = vld [vmem:[%s9418_s23 + $0x570] sm:$0xff]  ;;  %13131 = vst [vmem:[#allocation80_spill] sm:$0xff] %v10545_v38 }
 0x24a   : > { %v10528_v11 = vadd.f32 %v8417_v35, %v3426_v0  ;;  %v3429_v33 = vadd.f32 %v8308_v5, %v10228_v51  ;;  %4189 = vmatmul.mubr.bf16.gmra.mrb[224].mxu1 %v7738_v9  ;;  %4035 = vmatprep.mubr.bf16.mxu0 %v7753_v60  ;;  %v10548_v35 = vld [vmem:[%s9418_s23 + $0x578] sm:$0xff]  ;;  %v6300_v51 = vld [vmem:[#allocation2 + $0x50e] sm:$0xff]  ;;  %v7769_v6 = vcombine.high %v10534_v30, %v10537_v50 }
 0x24b   : > { %4196 = vmatprep.mubr.bf16.mxu1 %v7755_v32  ;;  %v6483_v9 = vld [vmem:[#allocation2 + $0x46c] sm:$0xff]  ;;  %v7752_v32 = vcombine.low %v10500_v8, %v10503_v20  ;;  %v7771_v63 = vcombine.high %v10540_v62, %v10548_v35  ;;  %v6302_v19 = vld [vmem:[#allocation2 + $0x536] sm:$0xff] }
 0x24c   : > { %v10543_v24 = vadd.f32 %v8420_v21, %v3429_v33  ;;  %v8309_v23 = vpop.f32.mrb[120].mxu0  ;;  %6393 = vrot.lane.b32.xlu1 %v6300_v51, %s9236_s19  ;;  %6567 = vrot.lane.b32.xlu0 %v6483_v9, %s9237_s22  ;;  %v6485_v42 = vld [vmem:[#allocation2 + $0x494] sm:$0xff]  ;;  %v10565_v9 = vpop.permute.xlu0 %5186 }
 0x24d   : > { %v8421_v60 = vpop.f32.mrb[120].mxu1  ;;  %v8310_v52 = vpop.f32.mrb[121].mxu0  ;;  %13132 = vst [vmem:[#allocation81_spill] sm:$0xff] %v10565_v9 }
 0x24e   : > { %v8311_v0 = vadd.f32 %v8310_v52, %v8309_v23  ;;  %v8422_v5 = vpop.f32.mrb[121].mxu1  ;;  %v8312_v45 = vpop.f32.mrb[122].mxu0 }
 0x24f   : > { %v8423_v21 = vadd.f32 %v8422_v5, %v8421_v60  ;;  %v8424_v33 = vpop.f32.mrb[122].mxu1  ;;  %v8313_v38 = vpop.f32.mrb[123].mxu0 }
 0x250   : > { %v3434_v8 = vadd.f32 %v8311_v0, %v10240_v56  ;;  %v8314_v20 = vadd.f32 %v8313_v38, %v8312_v45  ;;  %v8425_v23 = vpop.f32.mrb[123].mxu1  ;;  %6397 = vrot.lane.b32.xlu1 %v6302_v19, %s9236_s19  ;;  %v10568_v56 = vld [vmem:[%s9418_s23 + $0x5b0] sm:$0xff]  ;;  %v10574_v0 = vld [vmem:[%s9418_s23 + $0x5b8] sm:$0xff]  ;;  %6571 = vrot.lane.b32.xlu0 %v6485_v42, %s9237_s22  ;;  %v7770_v19 = vcombine.low %v10540_v62, %v10548_v35  ;;  %v6489_v62 = vld [vmem:[#allocation2 + $0x4e4] sm:$0xff] }
 0x251   : > { %v8426_v51 = vadd.f32 %v8425_v23, %v8424_v33  ;;  %4036 = vmatmul.mubr.bf16.gmra.mrb[228].mxu0 %v7752_v32  ;;  %v10571_v38 = vld [vmem:[%s9418_s23 + $0x5f0] sm:$0xff]  ;;  %v10577_v32 = vpop.permute.xlu1 %5012 }
 0x252   : > { %v10562_v60 = vadd.f32 %v8423_v21, %v3434_v8  ;;  %v3437_v52 = vadd.f32 %v8314_v20, %v10242_v31  ;;  %4197 = vmatmul.mubr.bf16.gmra.mrb[228].mxu1 %v7754_v49  ;;  %4043 = vmatprep.mubr.bf16.mxu0 %v7769_v6  ;;  %13133 = vst [vmem:[#allocation82_spill] sm:$0xff] %v10577_v32  ;;  %v10582_v21 = vld [vmem:[%s9418_s23 + $0x5f8] sm:$0xff] }
 0x253   : > { %4204 = vmatprep.mubr.bf16.mxu1 %v7771_v63  ;;  %v6484_v31 = vld [vmem:[#allocation2 + $0x474] sm:$0xff]  ;;  %v6487_v49 = vld [vmem:[#allocation2 + $0x4bc] sm:$0xff]  ;;  %v7768_v63 = vcombine.low %v10534_v30, %v10537_v50  ;;  %v7785_v42 = vcombine.high %v10568_v56, %v10571_v38  ;;  %v7787_v9 = vcombine.high %v10574_v0, %v10582_v21 }
 0x254   : > { %v10579_v5 = vadd.f32 %v8426_v51, %v3437_v52  ;;  %v8315_v45 = vpop.f32.mrb[124].mxu0  ;;  %6569 = vrot.lane.b32.xlu1 %v6484_v31, %s9237_s22  ;;  %6575 = vrot.lane.b32.xlu0 %v6487_v49, %s9237_s22  ;;  %v6486_v31 = vld [vmem:[#allocation2 + $0x49c] sm:$0xff]  ;;  %v10599_v49 = vpop.permute.xlu0 %5190 }
 0x255   : > { %v8427_v6 = vpop.f32.mrb[124].mxu1  ;;  %v8316_v33 = vpop.f32.mrb[125].mxu0  ;;  %13134 = vst [vmem:[#allocation83_spill] sm:$0xff] %v10599_v49 }
 0x256   : > { %v8317_v8 = vadd.f32 %v8316_v33, %v8315_v45  ;;  %v8428_v20 = vpop.f32.mrb[125].mxu1  ;;  %v8318_v23 = vpop.f32.mrb[126].mxu0 }
 0x257   : > { %v8429_v51 = vadd.f32 %v8428_v20, %v8427_v6  ;;  %v8430_v52 = vpop.f32.mrb[126].mxu1  ;;  %v8319_v32 = vpop.f32.mrb[127].mxu0 }
 0x258   : > { %v3442_v30 = vadd.f32 %v8317_v8, %v10252_v57  ;;  %v8320_v50 = vadd.f32 %v8319_v32, %v8318_v23  ;;  %v8431_v45 = vpop.f32.mrb[127].mxu1  ;;  %6573 = vrot.lane.b32.xlu1 %v6486_v31, %s9237_s22  ;;  %v10602_v57 = vld [vmem:[%s9418_s23 + $0x630] sm:$0xff]  ;;  %v10608_v8 = vld [vmem:[%s9418_s23 + $0x638] sm:$0xff]  ;;  %6579 = vrot.lane.b32.xlu0 %v6489_v62, %s9237_s22  ;;  %v7786_v31 = vcombine.low %v10574_v0, %v10582_v21 }
 0x259   : > { %v8432_v35 = vadd.f32 %v8431_v45, %v8430_v52  ;;  %4044 = vmatmul.mubr.bf16.gmra.mrb[232].mxu0 %v7768_v63  ;;  %v10605_v32 = vld [vmem:[%s9418_s23 + $0x670] sm:$0xff]  ;;  %v10611_v63 = vpop.permute.xlu1 %5184 }
 0x25a   : > { %v10596_v6 = vadd.f32 %v8429_v51, %v3442_v30  ;;  %v3445_v33 = vadd.f32 %v8320_v50, %v10254_v34  ;;  %4205 = vmatmul.mubr.bf16.gmra.mrb[232].mxu1 %v7770_v19  ;;  %4051 = vmatprep.mubr.bf16.mxu0 %v7785_v42  ;;  %13135 = vst [vmem:[#allocation84_spill] sm:$0xff] %v10611_v63  ;;  %v612_v51 = vld [vmem:[%s9418_s23 + $0x678] sm:$0xff]  ;;  %v6488_v34 = vld [vmem:[#allocation2 + $0x4c4] sm:$0xff]  ;;  %v6491_v19 = vld [vmem:[#allocation2 + $0x50c] sm:$0xff] }
 0x25b   : > { %4212 = vmatprep.mubr.bf16.mxu1 %v7787_v9  ;;  %v7784_v9 = vcombine.low %v10568_v56, %v10571_v38  ;;  %v7801_v62 = vcombine.high %v10602_v57, %v10605_v32  ;;  %v7803_v49 = vcombine.high %v10608_v8, %v612_v51 }
 0x25c   : > { %v10613_v20 = vadd.f32 %v8432_v35, %v3445_v33  ;;  %v8449_v23 = vpop.f32.mrb[128].mxu0  ;;  %6577 = vrot.lane.b32.xlu1 %v6488_v34, %s9237_s22  ;;  %6583 = vrot.lane.b32.xlu0 %v6491_v19, %s9237_s22  ;;  %v6490_v34 = vld [vmem:[#allocation2 + $0x4ec] sm:$0xff]  ;;  %v10630_v19 = vpop.permute.xlu0 %5194 }
 0x25d   : > { %v8561_v42 = vpop.f32.mrb[128].mxu1  ;;  %v8450_v52 = vpop.f32.mrb[129].mxu0  ;;  %13136 = vst [vmem:[#allocation85_spill] sm:$0xff] %v10630_v19 }
 0x25e   : > { %v8451_v30 = vadd.f32 %v8450_v52, %v8449_v23  ;;  %v8562_v50 = vpop.f32.mrb[129].mxu1  ;;  %v8452_v45 = vpop.f32.mrb[130].mxu0  ;;  %v6493_v52 = vld [vmem:[#allocation2 + $0x534] sm:$0xff] }
 0x25f   : > { %v8563_v35 = vadd.f32 %v8562_v50, %v8561_v42  ;;  %v8564_v33 = vpop.f32.mrb[130].mxu1  ;;  %v8453_v63 = vpop.f32.mrb[131].mxu0 }
 0x260   : > { %v3644_v56 = vadd.f32 %v8451_v30, %v10265_v59  ;;  %v8454_v38 = vadd.f32 %v8453_v63, %v8452_v45  ;;  %v8565_v23 = vpop.f32.mrb[131].mxu1  ;;  %6581 = vrot.lane.b32.xlu1 %v6490_v34, %s9237_s22  ;;  %v619_v59 = vld [vmem:[%s9418_s23 + $0x6b0] sm:$0xff]  ;;  %6587 = vrot.lane.b32.xlu0 %v6493_v52, %s9237_s22  ;;  %v10635_v30 = vpop.permute.xlu1 %5188  ;;  %v620_v45 = vld [vmem:[%s9418_s23 + $0x6b8] sm:$0xff] }
 0x261   : > { %v8566_v0 = vadd.f32 %v8565_v23, %v8564_v33  ;;  %4052 = vmatmul.mubr.bf16.gmra.mrb[236].mxu0 %v7784_v9  ;;  %v627_v63 = vld [vmem:[%s9418_s23 + $0x6f0] sm:$0xff]  ;;  %13137 = vst [vmem:[#allocation86_spill] sm:$0xff] %v10635_v30  ;;  %v628_v33 = vld [vmem:[%s9418_s23 + $0x6f8] sm:$0xff] }
 0x262   : > { %v10627_v21 = vadd.f32 %v8563_v35, %v3644_v56  ;;  %v3647_v42 = vadd.f32 %v8454_v38, %v10272_v39  ;;  %4213 = vmatmul.mubr.bf16.gmra.mrb[236].mxu1 %v7786_v31  ;;  %4059 = vmatprep.mubr.bf16.mxu0 %v7801_v62  ;;  %v6492_v35 = vld [vmem:[#allocation2 + $0x514] sm:$0xff]  ;;  %v7800_v39 = vcombine.low %v10602_v57, %v10605_v32  ;;  %v6494_v57 = vld [vmem:[#allocation2 + $0x53c] sm:$0xff] }
 0x263   : > { %4220 = vmatprep.mubr.bf16.mxu1 %v7803_v49  ;;  %v7802_v38 = vcombine.low %v10608_v8, %v612_v51  ;;  %v7817_v34 = vcombine.high %v619_v59, %v627_v63  ;;  %v7819_v30 = vcombine.high %v620_v45, %v628_v33  ;;  %v10650_v51 = vpop.permute.xlu0 %5198 }
 0x264   : > { %v10637_v50 = vadd.f32 %v8566_v0, %v3647_v42  ;;  %v8455_v9 = vpop.f32.mrb[132].mxu0  ;;  %6585 = vrot.lane.b32.xlu1 %v6492_v35, %s9237_s22  ;;  %13138 = vst [vmem:[#allocation87_spill] sm:$0xff] %v10650_v51  ;;  %v635_v35 = vld [vmem:[%s9418_s23 + $0x730] sm:$0xff] }
 0x265   : > { %v8567_v56 = vpop.f32.mrb[132].mxu1  ;;  %v8456_v23 = vpop.f32.mrb[133].mxu0 }
 0x266   : > { %v8457_v49 = vadd.f32 %v8456_v23, %v8455_v9  ;;  %v8568_v31 = vpop.f32.mrb[133].mxu1  ;;  %v8458_v62 = vpop.f32.mrb[134].mxu0 }
 0x267   : > { %v8569_v52 = vadd.f32 %v8568_v31, %v8567_v56  ;;  %v8570_v0 = vpop.f32.mrb[134].mxu1  ;;  %v8459_v42 = vpop.f32.mrb[135].mxu0 }
 0x268   : > { %v3652_v19 = vadd.f32 %v8457_v49, %v10279_v17  ;;  %v8460_v18 = vadd.f32 %v8459_v42, %v8458_v62  ;;  %v8571_v54 = vpop.f32.mrb[135].mxu1  ;;  %6589 = vrot.lane.b32.xlu1 %v6494_v57, %s9237_s22  ;;  %v643_v17 = vld [vmem:[%s9418_s23 + $0x770] sm:$0xff]  ;;  %v10654_v56 = vpop.permute.xlu1 %5192 }
 0x269   : > { %v8572_v32 = vadd.f32 %v8571_v54, %v8570_v0  ;;  %4060 = vmatmul.mubr.bf16.gmra.mrb[240].mxu0 %v7800_v39  ;;  %13139 = vst [vmem:[#allocation88_spill] sm:$0xff] %v10654_v56  ;;  %v636_v54 = vld [vmem:[%s9418_s23 + $0x738] sm:$0xff] }
 0x26a   : > { %v10647_v9 = vadd.f32 %v8569_v52, %v3652_v19  ;;  %v3655_v8 = vadd.f32 %v8460_v18, %v10286_v3  ;;  %4221 = vmatmul.mubr.bf16.gmra.mrb[240].mxu1 %v7802_v38  ;;  %4067 = vmatprep.mubr.bf16.mxu0 %v7817_v34  ;;  %v644_v39 = vld [vmem:[%s9418_s23 + $0x778] sm:$0xff]  ;;  %v7816_v19 = vcombine.low %v619_v59, %v627_v63 }
 0x26b   : > { %4228 = vmatprep.mubr.bf16.mxu1 %v7819_v30  ;;  %v7818_v18 = vcombine.low %v620_v45, %v628_v33  ;;  %v7833_v38 = vcombine.high %v635_v35, %v643_v17  ;;  %v7835_v57 = vcombine.high %v636_v54, %v644_v39  ;;  %v10664_v45 = vpop.permute.xlu0 %5202  ;;  %v651_v33 = vld [vmem:[%s9418_s23 + $0x7b0] sm:$0xff] }
 0x26c   : > { %v10656_v23 = vadd.f32 %v8572_v32, %v3655_v8  ;;  %v8461_v49 = vpop.f32.mrb[136].mxu0  ;;  %13140 = vst [vmem:[#allocation89_spill] sm:$0xff] %v10664_v45 }
 0x26d   : > { %v8573_v31 = vpop.f32.mrb[136].mxu1  ;;  %v8462_v62 = vpop.f32.mrb[137].mxu0 }
 0x26e   : > { %v8463_v52 = vadd.f32 %v8462_v62, %v8461_v49  ;;  %v8574_v0 = vpop.f32.mrb[137].mxu1  ;;  %v8464_v3 = vpop.f32.mrb[138].mxu0  ;;  %v659_v49 = vld [vmem:[%s9418_s23 + $0x7f0] sm:$0xff] }
 0x26f   : > { %v8575_v34 = vadd.f32 %v8574_v0, %v8573_v31  ;;  %v8576_v30 = vpop.f32.mrb[138].mxu1  ;;  %v8465_v42 = vpop.f32.mrb[139].mxu0  ;;  %v660_v0 = vld [vmem:[%s9418_s23 + $0x7f8] sm:$0xff] }
 0x270   : > { %v3660_v32 = vadd.f32 %v8463_v52, %v10293_v44  ;;  %v8466_v8 = vadd.f32 %v8465_v42, %v8464_v3  ;;  %v8577_v56 = vpop.f32.mrb[139].mxu1  ;;  %v10668_v31 = vpop.permute.xlu1 %5196  ;;  %v652_v52 = vld [vmem:[%s9418_s23 + $0x7b8] sm:$0xff]  ;;  %v7832_v3 = vcombine.low %v635_v35, %v643_v17 }
 0x271   : > { %v8578_v51 = vadd.f32 %v8577_v56, %v8576_v30  ;;  %4068 = vmatmul.mubr.bf16.gmra.mrb[244].mxu0 %v7816_v19  ;;  %13141 = vst [vmem:[#allocation90_spill] sm:$0xff] %v10668_v31  ;;  %v10680_v17 = vpop.permute.xlu0 %5374 }
 0x272   : > { %v10661_v59 = vadd.f32 %v8575_v34, %v3660_v32  ;;  %v3663_v63 = vadd.f32 %v8466_v8, %v10300_v61  ;;  %4229 = vmatmul.mubr.bf16.gmra.mrb[244].mxu1 %v7818_v18  ;;  %4075 = vmatprep.mubr.bf16.mxu0 %v7833_v38  ;;  %v7834_v18 = vcombine.low %v636_v54, %v644_v39 }
 0x273   : > { %4236 = vmatprep.mubr.bf16.mxu1 %v7835_v57  ;;  %v7849_v38 = vcombine.high %v651_v33, %v659_v49  ;;  %v7851_v8 = vcombine.high %v652_v52, %v660_v0 }
 0x274   : > { %v10670_v44 = vadd.f32 %v8578_v51, %v3663_v63  ;;  %v8467_v62 = vpop.f32.mrb[140].mxu0  ;;  %v10675_v1 = vpop.permute.xlu1 %5200 }
 0x275   : > { %v8579_v56 = vpop.f32.mrb[140].mxu1  ;;  %v8468_v19 = vpop.f32.mrb[141].mxu0 }
 0x276   : > { %v8469_v34 = vadd.f32 %v8468_v19, %v8467_v62  ;;  %v8580_v30 = vpop.f32.mrb[141].mxu1  ;;  %v8470_v61 = vpop.f32.mrb[142].mxu0 }
 0x277   : > { %v8581_v42 = vadd.f32 %v8580_v30, %v8579_v56  ;;  %v8582_v32 = vpop.f32.mrb[142].mxu1  ;;  %v8471_v57 = vpop.f32.mrb[143].mxu0  ;;  %v7848_v56 = vcombine.low %v651_v33, %v659_v49  ;;  %v7850_v30 = vcombine.low %v652_v52, %v660_v0 }
 0x278   : > { %v3668_v45 = vadd.f32 %v8469_v34, %v10307_v2  ;;  %v8472_v31 = vadd.f32 %v8471_v57, %v8470_v61  ;;  %v8583_v51 = vpop.f32.mrb[143].mxu1  ;;  %v10690_v33 = vpop.permute.xlu0 %5378 }
 0x279   : > { %v8584_v63 = vadd.f32 %v8583_v51, %v8582_v32  ;;  %4076 = vmatmul.mubr.bf16.gmra.mrb[248].mxu0 %v7832_v3  ;;  %v10684_v32 = vpop.permute.xlu1 %5204 }
 0x27a   : > { %v10677_v40 = vadd.f32 %v8581_v42, %v3668_v45  ;;  %v3671_v35 = vadd.f32 %v8472_v31, %v10314_v47  ;;  %4237 = vmatmul.mubr.bf16.gmra.mrb[248].mxu1 %v7834_v18  ;;  %4083 = vmatprep.mubr.bf16.mxu0 %v7849_v38  ;;  %13142 = vst [vmem:[#allocation91_spill] sm:$0xff] %v10684_v32 }
 0x27b   : > { %4244 = vmatprep.mubr.bf16.mxu1 %v7851_v8 }
 0x27c   : > { %v10682_v54 = vadd.f32 %v8584_v63, %v3671_v35  ;;  %v8473_v39 = vpop.f32.mrb[144].mxu0 }
 0x27d   : > { %v8585_v62 = vpop.f32.mrb[144].mxu1  ;;  %v8474_v2 = vpop.f32.mrb[145].mxu0 }
 0x27e   : > { %v8475_v19 = vadd.f32 %v8474_v2, %v8473_v39  ;;  %v8586_v34 = vpop.f32.mrb[145].mxu1  ;;  %v8476_v3 = vpop.f32.mrb[146].mxu0 }
 0x27f   : > { %v8587_v61 = vadd.f32 %v8586_v34, %v8585_v62  ;;  %v8588_v45 = vpop.f32.mrb[146].mxu1  ;;  %v8477_v42 = vpop.f32.mrb[147].mxu0 }
 0x280   : > { %v3676_v47 = vadd.f32 %v8475_v19, %v10323_v48  ;;  %v8478_v31 = vadd.f32 %v8477_v42, %v8476_v3  ;;  %v8589_v18 = vpop.f32.mrb[147].mxu1  ;;  %v10694_v0 = vpop.permute.xlu1 %6144 }
 0x281   : > { %v8590_v38 = vadd.f32 %v8589_v18, %v8588_v45  ;;  %4084 = vmatmul.mubr.bf16.gmra.mrb[252].mxu0 %v7848_v56  ;;  %13143 = vst [vmem:[#allocation92_spill] sm:$0xff] %v10694_v0  ;;  %v10700_v45 = vpop.permute.xlu0 %5382 }
 0x282   : > { %v10687_v57 = vadd.f32 %v8587_v61, %v3676_v47  ;;  %v3679_v8 = vadd.f32 %v8478_v31, %v10330_v10  ;;  %4245 = vmatmul.mubr.bf16.gmra.mrb[252].mxu1 %v7850_v30 }
 0x284   : > { %v10692_v49 = vadd.f32 %v8590_v38, %v3679_v8  ;;  %v8479_v52 = vpop.f32.mrb[148].mxu0  ;;  %v10704_v31 = vpop.permute.xlu1 %6148 }
 0x285   : > { %v8591_v51 = vpop.f32.mrb[148].mxu1  ;;  %v8480_v63 = vpop.f32.mrb[149].mxu0  ;;  %13144 = vst [vmem:[#allocation93_spill] sm:$0xff] %v10704_v31 }
 0x286   : > { %v8481_v35 = vadd.f32 %v8480_v63, %v8479_v52  ;;  %v8592_v48 = vpop.f32.mrb[149].mxu1  ;;  %v8482_v39 = vpop.f32.mrb[150].mxu0 }
 0x287   : > { %v8593_v62 = vadd.f32 %v8592_v48, %v8591_v51  ;;  %v8594_v2 = vpop.f32.mrb[150].mxu1  ;;  %v8483_v56 = vpop.f32.mrb[151].mxu0 }
 0x288   : > { %v3684_v19 = vadd.f32 %v8481_v35, %v10339_v41  ;;  %v8484_v34 = vadd.f32 %v8483_v56, %v8482_v39  ;;  %v8595_v10 = vpop.f32.mrb[151].mxu1 }
 0x289   : > { %v8596_v3 = vadd.f32 %v8595_v10, %v8594_v2 }
 0x28a   : > { %v10697_v30 = vadd.f32 %v8593_v62, %v3684_v19  ;;  %v3687_v61 = vadd.f32 %v8484_v34, %v10346_v12  ;;  %v10710_v19 = vpop.permute.xlu0 %5386 }
 0x28c   : > { %v10702_v42 = vadd.f32 %v8596_v3, %v3687_v61  ;;  %v8485_v47 = vpop.f32.mrb[152].mxu0  ;;  %v10714_v3 = vpop.permute.xlu1 %6152 }
 0x28d   : > { %v8597_v18 = vpop.f32.mrb[152].mxu1  ;;  %v8486_v38 = vpop.f32.mrb[153].mxu0  ;;  %13145 = vst [vmem:[#allocation94_spill] sm:$0xff] %v10714_v3 }
 0x28e   : > { %v8487_v8 = vadd.f32 %v8486_v38, %v8485_v47  ;;  %v8598_v52 = vpop.f32.mrb[153].mxu1  ;;  %v8488_v51 = vpop.f32.mrb[154].mxu0 }
 0x28f   : > { %v8599_v41 = vadd.f32 %v8598_v52, %v8597_v18  ;;  %v8600_v63 = vpop.f32.mrb[154].mxu1  ;;  %v8489_v35 = vpop.f32.mrb[155].mxu0 }
 0x290   : > { %v3692_v48 = vadd.f32 %v8487_v8, %v10355_v4  ;;  %v8490_v39 = vadd.f32 %v8489_v35, %v8488_v51  ;;  %v8601_v62 = vpop.f32.mrb[155].mxu1 }
 0x291   : > { %v8602_v12 = vadd.f32 %v8601_v62, %v8600_v63  ;;  %v10720_v62 = vpop.permute.xlu0 %5390 }
 0x292   : > { %v10707_v2 = vadd.f32 %v8599_v41, %v3692_v48  ;;  %v3695_v56 = vadd.f32 %v8490_v39, %v10362_v36  ;;  %13146 = vst [vmem:[#allocation95_spill] sm:$0xff] %v10720_v62 }
 0x294   : > { %v10712_v34 = vadd.f32 %v8602_v12, %v3695_v56  ;;  %v8491_v10 = vpop.f32.mrb[156].mxu0 }
 0x295   : > { %v8603_v61 = vpop.f32.mrb[156].mxu1  ;;  %v8492_v47 = vpop.f32.mrb[157].mxu0 }
 0x296   : > { %v8493_v18 = vadd.f32 %v8492_v47, %v8491_v10  ;;  %v8604_v38 = vpop.f32.mrb[157].mxu1  ;;  %v8494_v52 = vpop.f32.mrb[158].mxu0 }
 0x297   : > { %v8605_v4 = vadd.f32 %v8604_v38, %v8603_v61  ;;  %v8606_v8 = vpop.f32.mrb[158].mxu1  ;;  %v8495_v51 = vpop.f32.mrb[159].mxu0 }
 0x298   : > { %v3700_v41 = vadd.f32 %v8493_v18, %v10371_v37  ;;  %v8496_v63 = vadd.f32 %v8495_v51, %v8494_v52  ;;  %v8607_v35 = vpop.f32.mrb[159].mxu1  ;;  %v10724_v10 = vpop.permute.xlu1 %6156 }
 0x299   : > { %v8608_v36 = vadd.f32 %v8607_v35, %v8606_v8  ;;  %13147 = vst [vmem:[#allocation96_spill] sm:$0xff] %v10724_v10  ;;  %v10730_v35 = vpop.permute.xlu0 %5394 }
 0x29a   : > { %v10717_v48 = vadd.f32 %v8605_v4, %v3700_v41  ;;  %v3703_v39 = vadd.f32 %v8496_v63, %v10378_v26  ;;  %13148 = vst [vmem:[#allocation97_spill] sm:$0xff] %v10730_v35 }
 0x29c   : > { %v10722_v12 = vadd.f32 %v8608_v36, %v3703_v39  ;;  %v8497_v56 = vpop.f32.mrb[160].mxu0 }
 0x29d   : > { %v8609_v47 = vpop.f32.mrb[160].mxu1  ;;  %v8498_v61 = vpop.f32.mrb[161].mxu0 }
 0x29e   : > { %v8499_v38 = vadd.f32 %v8498_v61, %v8497_v56  ;;  %v8610_v3 = vpop.f32.mrb[161].mxu1  ;;  %v8500_v31 = vpop.f32.mrb[162].mxu0 }
 0x29f   : > { %v8611_v37 = vadd.f32 %v8610_v3, %v8609_v47  ;;  %v8612_v18 = vpop.f32.mrb[162].mxu1  ;;  %v8501_v52 = vpop.f32.mrb[163].mxu0 }
 0x2a0   : > { %v3708_v4 = vadd.f32 %v8499_v38, %v10387_v53  ;;  %v8502_v8 = vadd.f32 %v8501_v52, %v8500_v31  ;;  %v8613_v51 = vpop.f32.mrb[163].mxu1  ;;  %v10734_v56 = vpop.permute.xlu1 %6160 }
 0x2a1   : > { %v8614_v26 = vadd.f32 %v8613_v51, %v8612_v18  ;;  %13149 = vst [vmem:[#allocation98_spill] sm:$0xff] %v10734_v56  ;;  %v10740_v51 = vpop.permute.xlu0 %5398 }
 0x2a2   : > { %v10727_v41 = vadd.f32 %v8611_v37, %v3708_v4  ;;  %v3711_v63 = vadd.f32 %v8502_v8, %v10394_v46  ;;  %13150 = vst [vmem:[#allocation99_spill] sm:$0xff] %v10740_v51 }
 0x2a4   : > { %v10732_v36 = vadd.f32 %v8614_v26, %v3711_v63  ;;  %v8503_v39 = vpop.f32.mrb[164].mxu0 }
 0x2a5   : > { %v8615_v61 = vpop.f32.mrb[164].mxu1  ;;  %v8504_v3 = vpop.f32.mrb[165].mxu0 }
 0x2a6   : > { %v8505_v47 = vadd.f32 %v8504_v3, %v8503_v39  ;;  %v8616_v10 = vpop.f32.mrb[165].mxu1  ;;  %v8506_v0 = vpop.f32.mrb[166].mxu0 }
 0x2a7   : > { %v8617_v53 = vadd.f32 %v8616_v10, %v8615_v61  ;;  %v8618_v31 = vpop.f32.mrb[166].mxu1  ;;  %v8507_v38 = vpop.f32.mrb[167].mxu0 }
 0x2a8   : > { %v3716_v37 = vadd.f32 %v8505_v47, %v10403_v58  ;;  %v8508_v18 = vadd.f32 %v8507_v38, %v8506_v0  ;;  %v8619_v52 = vpop.f32.mrb[167].mxu1  ;;  %v10744_v39 = vpop.permute.xlu1 %6164 }
 0x2a9   : > { %v8620_v46 = vadd.f32 %v8619_v52, %v8618_v31  ;;  %13151 = vst [vmem:[#allocation100_spill] sm:$0xff] %v10744_v39 }
 0x2aa   : > { %v10737_v4 = vadd.f32 %v8617_v53, %v3716_v37  ;;  %v3719_v8 = vadd.f32 %v8508_v18, %v10414_v16 }
 0x2ac   : > { %v10742_v26 = vadd.f32 %v8620_v46, %v3719_v8  ;;  %v8509_v63 = vpop.f32.mrb[168].mxu0  ;;  %v10750_v52 = vpop.permute.xlu1 %6168 }
 0x2ad   : > { %v8621_v3 = vpop.f32.mrb[168].mxu1  ;;  %v8510_v10 = vpop.f32.mrb[169].mxu0  ;;  %13152 = vst [vmem:[#allocation101_spill] sm:$0xff] %v10750_v52 }
 0x2ae   : > { %v8511_v61 = vadd.f32 %v8510_v10, %v8509_v63  ;;  %v8622_v56 = vpop.f32.mrb[169].mxu1  ;;  %v8512_v35 = vpop.f32.mrb[170].mxu0 }
 0x2af   : > { %v8623_v58 = vadd.f32 %v8622_v56, %v8621_v3  ;;  %v8624_v0 = vpop.f32.mrb[170].mxu1  ;;  %v8513_v47 = vpop.f32.mrb[171].mxu0 }
 0x2b0   : > { %v3724_v53 = vadd.f32 %v8511_v61, %v10428_v7  ;;  %v8514_v31 = vadd.f32 %v8513_v47, %v8512_v35  ;;  %v8625_v38 = vpop.f32.mrb[171].mxu1  ;;  %v10754_v63 = vpop.permute.xlu0 %5402 }
 0x2b1   : > { %v8626_v16 = vadd.f32 %v8625_v38, %v8624_v0  ;;  %13153 = vst [vmem:[#allocation102_spill] sm:$0xff] %v10754_v63  ;;  %v10760_v38 = vpop.permute.xlu1 %6172 }
 0x2b2   : > { %v10747_v37 = vadd.f32 %v8623_v58, %v3724_v53  ;;  %v3727_v18 = vadd.f32 %v8514_v31, %v10442_v25  ;;  %13154 = vst [vmem:[#allocation103_spill] sm:$0xff] %v10760_v38 }
 0x2b4   : > { %v10752_v46 = vadd.f32 %v8626_v16, %v3727_v18  ;;  %v8515_v8 = vpop.f32.mrb[172].mxu0 }
 0x2b5   : > { %v8627_v10 = vpop.f32.mrb[172].mxu1  ;;  %v8516_v56 = vpop.f32.mrb[173].mxu0 }
 0x2b6   : > { %v8517_v3 = vadd.f32 %v8516_v56, %v8515_v8  ;;  %v8628_v39 = vpop.f32.mrb[173].mxu1  ;;  %v8518_v51 = vpop.f32.mrb[174].mxu0 }
 0x2b7   : > { %v8629_v7 = vadd.f32 %v8628_v39, %v8627_v10  ;;  %v8630_v35 = vpop.f32.mrb[174].mxu1  ;;  %v8519_v61 = vpop.f32.mrb[175].mxu0 }
 0x2b8   : > { %v3732_v58 = vadd.f32 %v8517_v3, %v10460_v15  ;;  %v8520_v0 = vadd.f32 %v8519_v61, %v8518_v51  ;;  %v8631_v47 = vpop.f32.mrb[175].mxu1  ;;  %v10764_v8 = vpop.permute.xlu0 %5406 }
 0x2b9   : > { %v8632_v25 = vadd.f32 %v8631_v47, %v8630_v35  ;;  %13155 = vst [vmem:[#allocation104_spill] sm:$0xff] %v10764_v8  ;;  %v10770_v47 = vpop.permute.xlu1 %6176 }
 0x2ba   : > { %v10757_v53 = vadd.f32 %v8629_v7, %v3732_v58  ;;  %v3735_v31 = vadd.f32 %v8520_v0, %v10475_v43  ;;  %13156 = vst [vmem:[#allocation105_spill] sm:$0xff] %v10770_v47 }
 0x2bc   : > { %v10762_v16 = vadd.f32 %v8632_v25, %v3735_v31  ;;  %v8521_v18 = vpop.f32.mrb[176].mxu0 }
 0x2bd   : > { %v8633_v56 = vpop.f32.mrb[176].mxu1  ;;  %v8522_v39 = vpop.f32.mrb[177].mxu0 }
 0x2be   : > { %v8523_v10 = vadd.f32 %v8522_v39, %v8521_v18  ;;  %v8634_v52 = vpop.f32.mrb[177].mxu1  ;;  %v8524_v63 = vpop.f32.mrb[178].mxu0 }
 0x2bf   : > { %v8635_v15 = vadd.f32 %v8634_v52, %v8633_v56  ;;  %v8636_v51 = vpop.f32.mrb[178].mxu1  ;;  %v8525_v3 = vpop.f32.mrb[179].mxu0 }
 0x2c0   : > { %v3740_v7 = vadd.f32 %v8523_v10, %v10494_v13  ;;  %v8526_v35 = vadd.f32 %v8525_v3, %v8524_v63  ;;  %v8637_v61 = vpop.f32.mrb[179].mxu1  ;;  %v10774_v18 = vpop.permute.xlu0 %5410 }
 0x2c1   : > { %v8638_v43 = vadd.f32 %v8637_v61, %v8636_v51  ;;  %13157 = vst [vmem:[#allocation106_spill] sm:$0xff] %v10774_v18  ;;  %v10780_v61 = vpop.permute.xlu1 %6180 }
 0x2c2   : > { %v10767_v58 = vadd.f32 %v8635_v15, %v3740_v7  ;;  %v3743_v0 = vadd.f32 %v8526_v35, %v10509_v28  ;;  %13158 = vst [vmem:[#allocation107_spill] sm:$0xff] %v10780_v61 }
 0x2c4   : > { %v10772_v25 = vadd.f32 %v8638_v43, %v3743_v0  ;;  %v8527_v31 = vpop.f32.mrb[180].mxu0 }
 0x2c5   : > { %v8639_v39 = vpop.f32.mrb[180].mxu1  ;;  %v8528_v52 = vpop.f32.mrb[181].mxu0 }
 0x2c6   : > { %v8529_v56 = vadd.f32 %v8528_v52, %v8527_v31  ;;  %v8640_v38 = vpop.f32.mrb[181].mxu1  ;;  %v8530_v8 = vpop.f32.mrb[182].mxu0 }
 0x2c7   : > { %v8641_v13 = vadd.f32 %v8640_v38, %v8639_v39  ;;  %v8642_v63 = vpop.f32.mrb[182].mxu1  ;;  %v8531_v10 = vpop.f32.mrb[183].mxu0 }
 0x2c8   : > { %v3748_v15 = vadd.f32 %v8529_v56, %v10528_v11  ;;  %v8532_v51 = vadd.f32 %v8531_v10, %v8530_v8  ;;  %v8643_v3 = vpop.f32.mrb[183].mxu1  ;;  %v10784_v31 = vpop.permute.xlu0 %5414 }
 0x2c9   : > { %v8644_v28 = vadd.f32 %v8643_v3, %v8642_v63  ;;  %13159 = vst [vmem:[#allocation108_spill] sm:$0xff] %v10784_v31  ;;  %v10790_v3 = vpop.permute.xlu1 %6184 }
 0x2ca   : > { %v10777_v7 = vadd.f32 %v8641_v13, %v3748_v15  ;;  %v3751_v35 = vadd.f32 %v8532_v51, %v10543_v24  ;;  %13160 = vst [vmem:[#allocation109_spill] sm:$0xff] %v10790_v3 }
 0x2cc   : > { %v10782_v43 = vadd.f32 %v8644_v28, %v3751_v35  ;;  %v8533_v0 = vpop.f32.mrb[184].mxu0 }
 0x2cd   : > { %v8645_v52 = vpop.f32.mrb[184].mxu1  ;;  %v8534_v38 = vpop.f32.mrb[185].mxu0 }
 0x2ce   : > { %v8535_v39 = vadd.f32 %v8534_v38, %v8533_v0  ;;  %v8646_v47 = vpop.f32.mrb[185].mxu1  ;;  %v8536_v18 = vpop.f32.mrb[186].mxu0 }
 0x2cf   : > { %v8647_v11 = vadd.f32 %v8646_v47, %v8645_v52  ;;  %v8648_v8 = vpop.f32.mrb[186].mxu1  ;;  %v8537_v56 = vpop.f32.mrb[187].mxu0 }
 0x2d0   : > { %v3756_v13 = vadd.f32 %v8535_v39, %v10562_v60  ;;  %v8538_v63 = vadd.f32 %v8537_v56, %v8536_v18  ;;  %v8649_v10 = vpop.f32.mrb[187].mxu1  ;;  %v10794_v0 = vpop.permute.xlu0 %5418 }
 0x2d1   : > { %v8650_v24 = vadd.f32 %v8649_v10, %v8648_v8  ;;  %13161 = vst [vmem:[#allocation110_spill] sm:$0xff] %v10794_v0  ;;  %v10800_v10 = vpop.permute.xlu1 %6188 }
 0x2d2   : > { %v10787_v15 = vadd.f32 %v8647_v11, %v3756_v13  ;;  %v3759_v51 = vadd.f32 %v8538_v63, %v10579_v5  ;;  %13162 = vst [vmem:[#allocation111_spill] sm:$0xff] %v10800_v10 }
 0x2d4   : > { %v10792_v28 = vadd.f32 %v8650_v24, %v3759_v51  ;;  %v8539_v35 = vpop.f32.mrb[188].mxu0 }
 0x2d5   : > { %v8651_v38 = vpop.f32.mrb[188].mxu1  ;;  %v8540_v47 = vpop.f32.mrb[189].mxu0 }
 0x2d6   : > { %v8541_v52 = vadd.f32 %v8540_v47, %v8539_v35  ;;  %v8652_v61 = vpop.f32.mrb[189].mxu1  ;;  %v8542_v31 = vpop.f32.mrb[190].mxu0 }
 0x2d7   : > { %v8653_v60 = vadd.f32 %v8652_v61, %v8651_v38  ;;  %v8654_v18 = vpop.f32.mrb[190].mxu1  ;;  %v8543_v39 = vpop.f32.mrb[191].mxu0 }
 0x2d8   : > { %v3764_v11 = vadd.f32 %v8541_v52, %v10596_v6  ;;  %v8544_v8 = vadd.f32 %v8543_v39, %v8542_v31  ;;  %v8655_v56 = vpop.f32.mrb[191].mxu1  ;;  %v10804_v35 = vpop.permute.xlu0 %5422 }
 0x2d9   : > { %v8656_v5 = vadd.f32 %v8655_v56, %v8654_v18  ;;  %13163 = vst [vmem:[#allocation112_spill] sm:$0xff] %v10804_v35  ;;  %v10810_v56 = vpop.permute.xlu1 %6192 }
 0x2da   : > { %v10797_v13 = vadd.f32 %v8653_v60, %v3764_v11  ;;  %v3767_v63 = vadd.f32 %v8544_v8, %v10613_v20  ;;  %13164 = vst [vmem:[#allocation113_spill] sm:$0xff] %v10810_v56 }
 0x2dc   : > { %v10802_v24 = vadd.f32 %v8656_v5, %v3767_v63  ;;  %v8673_v51 = vpop.f32.mrb[192].mxu0 }
 0x2dd   : > { %v8785_v47 = vpop.f32.mrb[192].mxu1  ;;  %v8674_v61 = vpop.f32.mrb[193].mxu0 }
 0x2de   : > { %v8675_v38 = vadd.f32 %v8674_v61, %v8673_v51  ;;  %v8786_v3 = vpop.f32.mrb[193].mxu1  ;;  %v8676_v0 = vpop.f32.mrb[194].mxu0 }
 0x2df   : > { %v8787_v6 = vadd.f32 %v8786_v3, %v8785_v47  ;;  %v8788_v31 = vpop.f32.mrb[194].mxu1  ;;  %v8677_v52 = vpop.f32.mrb[195].mxu0 }
 0x2e0   : > { %v3966_v60 = vadd.f32 %v8675_v38, %v10627_v21  ;;  %v8678_v18 = vadd.f32 %v8677_v52, %v8676_v0  ;;  %v8789_v39 = vpop.f32.mrb[195].mxu1  ;;  %v10817_v3 = vpop.permute.xlu0 %5426 }
 0x2e1   : > { %v8790_v20 = vadd.f32 %v8789_v39, %v8788_v31  ;;  %13165 = vst [vmem:[#allocation114_spill] sm:$0xff] %v10817_v3  ;;  %v10824_v10 = vpop.permute.xlu1 %6196 }
 0x2e2   : > { %v10807_v11 = vadd.f32 %v8787_v6, %v3966_v60  ;;  %v3969_v8 = vadd.f32 %v8678_v18, %v10637_v50  ;;  %13166 = vst [vmem:[#allocation115_spill] sm:$0xff] %v10824_v10 }
 0x2e4   : > { %4253 = vst [vmem:[#allocation2 + $0x1ec] sm:$0xff] %v10807_v11  ;;  %v10813_v5 = vadd.f32 %v8790_v20, %v3969_v8  ;;  %v8679_v63 = vpop.f32.mrb[196].mxu0  ;;  %4461 = vrot.lane.b32.xlu0 %v10807_v11, %s9229_s17 }
 0x2e5   : > { %v8680_v21 = vpop.f32.mrb[197].mxu0  ;;  %v8791_v0 = vpop.f32.mrb[196].mxu1 }
 0x2e6   : > { %4254 = vst [vmem:[#allocation2 + $0x1f4] sm:$0xff] %v10813_v5  ;;  %v8681_v51 = vadd.f32 %v8680_v21, %v8679_v63  ;;  %v8682_v47 = vpop.f32.mrb[198].mxu0  ;;  %v8792_v61 = vpop.f32.mrb[197].mxu1 }
 0x2e7   : > { %v8683_v50 = vpop.f32.mrb[199].mxu0  ;;  %v8793_v38 = vadd.f32 %v8792_v61, %v8791_v0  ;;  %v8794_v6 = vpop.f32.mrb[198].mxu1 }
 0x2e8   : > { %v3974_v31 = vadd.f32 %v8681_v51, %v10647_v9  ;;  %v8684_v52 = vadd.f32 %v8683_v50, %v8682_v47  ;;  %v8795_v60 = vpop.f32.mrb[199].mxu1  ;;  %v10831_v9 = vpop.permute.xlu0 %5430 }
 0x2e9   : > { %v8796_v18 = vadd.f32 %v8795_v60, %v8794_v6  ;;  %13167 = vst [vmem:[#allocation116_spill] sm:$0xff] %v10831_v9 }
 0x2ea   : > { %v3977_v39 = vadd.f32 %v8684_v52, %v10656_v23  ;;  %v10822_v20 = vadd.f32 %v8793_v38, %v3974_v31 }
 0x2eb   : > { %v5311_v8 = vld [vmem:[#allocation2 + $0x1e8] sm:$0xff] }
 0x2ec   : > { %v4746_v56 = vld [vmem:[#allocation2 + $0x1e6] sm:$0xff]  ;;  %4255 = vst [vmem:[#allocation2 + $0x214] sm:$0xff] %v10822_v20  ;;  %v10827_v63 = vadd.f32 %v8796_v18, %v3977_v39  ;;  %v8685_v21 = vpop.f32.mrb[200].mxu0  ;;  %5376 = vrot.lane.b32.xlu1 %v5311_v8, %s9234_s12 }
 0x2ed   : > { %4822 = vrot.lane.b32.xlu0 %v4746_v56, %s9231_s5  ;;  %v8686_v0 = vpop.f32.mrb[201].mxu0  ;;  %v8797_v51 = vpop.f32.mrb[200].mxu1  ;;  %v4565_v10 = vld [vmem:[#allocation2 + $0x1f8] sm:$0xff] }
 0x2ee   : > { %4256 = vst [vmem:[#allocation2 + $0x21c] sm:$0xff] %v10827_v63  ;;  %v8687_v23 = vadd.f32 %v8686_v0, %v8685_v21  ;;  %v8688_v47 = vpop.f32.mrb[202].mxu0  ;;  %v8798_v61 = vpop.f32.mrb[201].mxu1  ;;  %v4747_v21 = vld [vmem:[#allocation2 + $0x1ee] sm:$0xff] }
 0x2ef   : > { %v8689_v50 = vpop.f32.mrb[203].mxu0  ;;  %v8799_v38 = vadd.f32 %v8798_v61, %v8797_v51  ;;  %v8800_v6 = vpop.f32.mrb[202].mxu1 }
 0x2f0   : > { %v3982_v31 = vadd.f32 %v8687_v23, %v10661_v59  ;;  %v8690_v52 = vadd.f32 %v8689_v50, %v8688_v47  ;;  %4463 = vrot.lane.b32.xlu1 %v10813_v5, %s9229_s17  ;;  %v8801_v60 = vpop.f32.mrb[203].mxu1  ;;  %v10842_v0 = vpop.permute.xlu1 %6200 }
 0x2f1   : > { %5014 = vrot.lane.b32.xlu0 %v10807_v11, %s9232_s10  ;;  %v8802_v18 = vadd.f32 %v8801_v60, %v8800_v6  ;;  %13168 = vst [vmem:[#allocation117_spill] sm:$0xff] %v10842_v0  ;;  %v10849_v23 = vpop.permute.xlu0 %5434 }
 0x2f2   : > { %v3985_v39 = vadd.f32 %v8690_v52, %v10670_v44  ;;  %v10840_v8 = vadd.f32 %v8799_v38, %v3982_v31 }
 0x2f4   : > { %4257 = vst [vmem:[#allocation2 + $0x23c] sm:$0xff] %v10840_v8  ;;  %v10845_v51 = vadd.f32 %v8802_v18, %v3985_v39  ;;  %v8691_v59 = vpop.f32.mrb[204].mxu0  ;;  %4824 = vrot.lane.b32.xlu1 %v4747_v21, %s9231_s5 }
 0x2f5   : > { %5566 = vrot.lane.b32.xlu0 %v4746_v56, %s9238_s24  ;;  %v8692_v47 = vpop.f32.mrb[205].mxu0  ;;  %v8803_v61 = vpop.f32.mrb[204].mxu1 }
 0x2f6   : > { %4258 = vst [vmem:[#allocation2 + $0x244] sm:$0xff] %v10845_v51  ;;  %v8693_v44 = vadd.f32 %v8692_v47, %v8691_v59  ;;  %v8694_v50 = vpop.f32.mrb[206].mxu0  ;;  %v8804_v38 = vpop.f32.mrb[205].mxu1  ;;  %v5131_v47 = vld [vmem:[#allocation2 + $0x1fa] sm:$0xff] }
 0x2f7   : > { %v8695_v6 = vpop.f32.mrb[207].mxu0  ;;  %v8805_v31 = vadd.f32 %v8804_v38, %v8803_v61  ;;  %v8806_v52 = vpop.f32.mrb[206].mxu1 }
 0x2f8   : > { %v3990_v60 = vadd.f32 %v8693_v44, %v10677_v40  ;;  %v8696_v18 = vadd.f32 %v8695_v6, %v8694_v50  ;;  %5016 = vrot.lane.b32.xlu1 %v10813_v5, %s9232_s10  ;;  %v8807_v39 = vpop.f32.mrb[207].mxu1  ;;  %v10860_v61 = vpop.permute.xlu1 %6204 }
 0x2f9   : > { %5758 = vrot.lane.b32.xlu0 %v10807_v11, %s9239_s20  ;;  %v8808_v56 = vadd.f32 %v8807_v39, %v8806_v52  ;;  %v10867_v50 = vpop.permute.xlu0 %6375  ;;  %v5130_v39 = vld [vmem:[#allocation2 + $0x1f2] sm:$0xff] }
 0x2fa   : > { %v3993_v0 = vadd.f32 %v8696_v18, %v10682_v54  ;;  %v10858_v59 = vadd.f32 %v8805_v31, %v3990_v60  ;;  %13169 = vst [vmem:[#allocation118_spill] sm:$0xff] %v10867_v50 }
 0x2fc   : > { %4259 = vst [vmem:[#allocation2 + $0x264] sm:$0xff] %v10858_v59  ;;  %v10863_v40 = vadd.f32 %v8808_v56, %v3993_v0  ;;  %v8697_v44 = vpop.f32.mrb[208].mxu0  ;;  %5208 = vrot.lane.b32.xlu1 %v5131_v47, %s9233_s11 }
 0x2fd   : > { %4653 = vrot.lane.b32.xlu0 %v4565_v10, %s9230_s18  ;;  %v8698_v11 = vpop.f32.mrb[209].mxu0  ;;  %v8809_v38 = vpop.f32.mrb[208].mxu1 }
 0x2fe   : > { %4260 = vst [vmem:[#allocation2 + $0x26c] sm:$0xff] %v10863_v40  ;;  %v8699_v54 = vadd.f32 %v8698_v11, %v8697_v44  ;;  %v8700_v6 = vpop.f32.mrb[210].mxu0  ;;  %v8810_v31 = vpop.f32.mrb[209].mxu1 }
 0x2ff   : > { %v8701_v52 = vpop.f32.mrb[211].mxu0  ;;  %v8811_v60 = vadd.f32 %v8810_v31, %v8809_v38  ;;  %v8812_v18 = vpop.f32.mrb[210].mxu1 }
 0x300   : > { %v3998_v0 = vadd.f32 %v8699_v54, %v10687_v57  ;;  %v8702_v56 = vadd.f32 %v8701_v52, %v8700_v6  ;;  %5568 = vrot.lane.b32.xlu1 %v4747_v21, %s9238_s24  ;;  %v8813_v9 = vpop.f32.mrb[211].mxu1  ;;  %v10876_v44 = vpop.permute.xlu1 %6377 }
 0x301   : > { %5206 = vrot.lane.b32.xlu0 %v5130_v39, %s9233_s11  ;;  %v8814_v50 = vadd.f32 %v8813_v9, %v8812_v18  ;;  %13170 = vst [vmem:[#allocation119_spill] sm:$0xff] %v10876_v44  ;;  %v10884_v57 = vpop.permute.xlu0 %6379 }
 0x302   : > { %v4001_v3 = vadd.f32 %v8702_v56, %v10692_v49  ;;  %v10874_v35 = vadd.f32 %v8811_v60, %v3998_v0  ;;  %13171 = vst [vmem:[#allocation120_spill] sm:$0xff] %v10884_v57  ;;  %v5313_v56 = vld [vmem:[#allocation2 + $0x210] sm:$0xff]  ;;  %v5133_v57 = vld [vmem:[#allocation2 + $0x222] sm:$0xff] }
 0x304   : > { %4261 = vst [vmem:[#allocation2 + $0x28c] sm:$0xff] %v10874_v35  ;;  %v10879_v11 = vadd.f32 %v8814_v50, %v4001_v3  ;;  %v8703_v38 = vpop.f32.mrb[212].mxu0  ;;  %5760 = vrot.lane.b32.xlu1 %v10813_v5, %s9239_s20 }
 0x305   : > { %5950 = vrot.lane.b32.xlu0 %v5130_v39, %s9240_s25  ;;  %v8704_v9 = vpop.f32.mrb[213].mxu0  ;;  %v8815_v21 = vpop.f32.mrb[212].mxu1 }
 0x306   : > { %4262 = vst [vmem:[#allocation2 + $0x294] sm:$0xff] %v10879_v11  ;;  %v8705_v49 = vadd.f32 %v8704_v9, %v8703_v38  ;;  %v8706_v54 = vpop.f32.mrb[214].mxu0  ;;  %v8816_v6 = vpop.f32.mrb[213].mxu1 }
 0x307   : > { %v8707_v31 = vpop.f32.mrb[215].mxu0  ;;  %v8817_v52 = vadd.f32 %v8816_v6, %v8815_v21  ;;  %v8818_v3 = vpop.f32.mrb[214].mxu1 }
 0x308   : > { %v4006_v50 = vadd.f32 %v8705_v49, %v10697_v30  ;;  %v8708_v60 = vadd.f32 %v8707_v31, %v8706_v54  ;;  %5952 = vrot.lane.b32.xlu1 %v5131_v47, %s9240_s25  ;;  %v8819_v5 = vpop.f32.mrb[215].mxu1  ;;  %v10893_v38 = vpop.permute.xlu1 %6381 }
 0x309   : > { %6142 = vrot.lane.b32.xlu0 %v4565_v10, %s9235_s15  ;;  %v8820_v18 = vadd.f32 %v8819_v5, %v8818_v3  ;;  %13172 = vst [vmem:[#allocation121_spill] sm:$0xff] %v10893_v38  ;;  %v10901_v30 = vpop.permute.xlu0 %6383  ;;  %v4748_v3 = vld [vmem:[#allocation2 + $0x20e] sm:$0xff] }
 0x30a   : > { %v4009_v39 = vadd.f32 %v8708_v60, %v10702_v42  ;;  %v10891_v0 = vadd.f32 %v8817_v52, %v4006_v50  ;;  %13173 = vst [vmem:[#allocation122_spill] sm:$0xff] %v10901_v30 }
 0x30c   : > { %4263 = vst [vmem:[#allocation2 + $0x2b4] sm:$0xff] %v10891_v0  ;;  %v10896_v9 = vadd.f32 %v8820_v18, %v4009_v39  ;;  %v8709_v21 = vpop.f32.mrb[216].mxu0  ;;  %5380 = vrot.lane.b32.xlu1 %v5313_v56, %s9234_s12 }
 0x30d   : > { %4465 = vrot.lane.b32.xlu0 %v10822_v20, %s9229_s17  ;;  %v8710_v10 = vpop.f32.mrb[217].mxu0  ;;  %v8821_v47 = vpop.f32.mrb[216].mxu1 }
 0x30e   : > { %4264 = vst [vmem:[#allocation2 + $0x2bc] sm:$0xff] %v10896_v9  ;;  %v8711_v42 = vadd.f32 %v8710_v10, %v8709_v21  ;;  %v8712_v49 = vpop.f32.mrb[218].mxu0  ;;  %v8822_v54 = vpop.f32.mrb[217].mxu1  ;;  %v4749_v21 = vld [vmem:[#allocation2 + $0x216] sm:$0xff] }
 0x30f   : > { %v8713_v6 = vpop.f32.mrb[219].mxu0  ;;  %v8823_v31 = vadd.f32 %v8822_v54, %v8821_v47  ;;  %v8824_v52 = vpop.f32.mrb[218].mxu1 }
 0x310   : > { %v4014_v50 = vadd.f32 %v8711_v42, %v10707_v2  ;;  %v8714_v60 = vadd.f32 %v8713_v6, %v8712_v49  ;;  %4467 = vrot.lane.b32.xlu1 %v10827_v63, %s9229_s17  ;;  %v8825_v5 = vpop.f32.mrb[219].mxu1  ;;  %v10911_v10 = vpop.permute.xlu1 %6385 }
 0x311   : > { %4826 = vrot.lane.b32.xlu0 %v4748_v3, %s9231_s5  ;;  %v8826_v18 = vadd.f32 %v8825_v5, %v8824_v52  ;;  %13174 = vst [vmem:[#allocation123_spill] sm:$0xff] %v10911_v10  ;;  %v10919_v42 = vpop.permute.xlu0 %6387 }
 0x312   : > { %v4017_v39 = vadd.f32 %v8714_v60, %v10712_v34  ;;  %v10909_v56 = vadd.f32 %v8823_v31, %v4014_v50  ;;  %13175 = vst [vmem:[#allocation124_spill] sm:$0xff] %v10919_v42 }
 0x314   : > { %4265 = vst [vmem:[#allocation2 + $0x2dc] sm:$0xff] %v10909_v56  ;;  %v10914_v47 = vadd.f32 %v8826_v18, %v4017_v39  ;;  %v8715_v2 = vpop.f32.mrb[220].mxu0  ;;  %4828 = vrot.lane.b32.xlu1 %v4749_v21, %s9231_s5 }
 0x315   : > { %5018 = vrot.lane.b32.xlu0 %v10822_v20, %s9232_s10  ;;  %v8716_v49 = vpop.f32.mrb[221].mxu0  ;;  %v8827_v54 = vpop.f32.mrb[220].mxu1  ;;  %v5140_v44 = vld [vmem:[#allocation2 + $0x2ba] sm:$0xff] }
 0x316   : > { %4266 = vst [vmem:[#allocation2 + $0x2e4] sm:$0xff] %v10914_v47  ;;  %v8717_v34 = vadd.f32 %v8716_v49, %v8715_v2  ;;  %v8718_v6 = vpop.f32.mrb[222].mxu0  ;;  %v8828_v31 = vpop.f32.mrb[221].mxu1 }
 0x317   : > { %v8719_v52 = vpop.f32.mrb[223].mxu0  ;;  %v8829_v50 = vadd.f32 %v8828_v31, %v8827_v54  ;;  %v8830_v60 = vpop.f32.mrb[222].mxu1 }
 0x318   : > { %v4022_v5 = vadd.f32 %v8717_v34, %v10717_v48  ;;  %v8720_v18 = vadd.f32 %v8719_v52, %v8718_v6  ;;  %5020 = vrot.lane.b32.xlu1 %v10827_v63, %s9232_s10  ;;  %v8831_v39 = vpop.f32.mrb[223].mxu1  ;;  %v10927_v2 = vpop.permute.xlu1 %6389 }
 0x319   : > { %5570 = vrot.lane.b32.xlu0 %v4748_v3, %s9238_s24  ;;  %v8832_v42 = vadd.f32 %v8831_v39, %v8830_v60  ;;  %13176 = vst [vmem:[#allocation125_spill] sm:$0xff] %v10927_v2  ;;  %v10934_v48 = vpop.permute.xlu0 %6391  ;;  %v4756_v2 = vld [vmem:[#allocation2 + $0x2ae] sm:$0xff] }
 0x31a   : > { %v4025_v30 = vadd.f32 %v8720_v18, %v10722_v12  ;;  %v4183_v10 = vadd.f32 %v8829_v50, %v4022_v5  ;;  %13177 = vst [vmem:[#allocation126_spill] sm:$0xff] %v10934_v48  ;;  %v5132_v48 = vld [vmem:[#allocation2 + $0x21a] sm:$0xff] }
 0x31b   : > { %v5323_v38 = vld [vmem:[#allocation2 + $0x2d8] sm:$0xff] }
 0x31c   : > { %4267 = vst [vmem:[#allocation2 + $0x304] sm:$0xff] %v4183_v10  ;;  %v10929_v49 = vadd.f32 %v8832_v42, %v4025_v30  ;;  %v8721_v54 = vpop.f32.mrb[224].mxu0  ;;  %5212 = vrot.lane.b32.xlu1 %v5133_v57, %s9233_s11  ;;  %v4567_v30 = vld [vmem:[#allocation2 + $0x220] sm:$0xff] }
 0x31d   : > { %5762 = vrot.lane.b32.xlu0 %v10822_v20, %s9239_s20  ;;  %v8722_v34 = vpop.f32.mrb[225].mxu0  ;;  %v8833_v3 = vpop.f32.mrb[224].mxu1 }
 0x31e   : > { %4268 = vst [vmem:[#allocation2 + $0x30c] sm:$0xff] %v10929_v49  ;;  %v8723_v12 = vadd.f32 %v8722_v34, %v8721_v54  ;;  %v8724_v6 = vpop.f32.mrb[226].mxu0  ;;  %v8834_v31 = vpop.f32.mrb[225].mxu1 }
 0x31f   : > { %v8725_v52 = vpop.f32.mrb[227].mxu0  ;;  %v8835_v50 = vadd.f32 %v8834_v31, %v8833_v3  ;;  %v8836_v10 = vpop.f32.mrb[226].mxu1 }
 0x320   : > { %v4030_v42 = vadd.f32 %v8723_v12, %v10727_v41  ;;  %v8726_v60 = vadd.f32 %v8725_v52, %v8724_v6  ;;  %5572 = vrot.lane.b32.xlu1 %v4749_v21, %s9238_s24  ;;  %v8837_v5 = vpop.f32.mrb[227].mxu1  ;;  %v10941_v54 = vpop.permute.xlu1 %6393 }
 0x321   : > { %4657 = vrot.lane.b32.xlu0 %v4567_v30, %s9230_s18  ;;  %v8838_v20 = vadd.f32 %v8837_v5, %v8836_v10  ;;  %13178 = vst [vmem:[#allocation127_spill] sm:$0xff] %v10941_v54  ;;  %v10946_v41 = vpop.permute.xlu0 %6395 }
 0x322   : > { %v4033_v18 = vadd.f32 %v8726_v60, %v10732_v36  ;;  %v4191_v39 = vadd.f32 %v8835_v50, %v4030_v42 }
 0x324   : > { %4269 = vst [vmem:[#allocation2 + $0x32c] sm:$0xff] %v4191_v39  ;;  %v4194_v34 = vadd.f32 %v8838_v20, %v4033_v18  ;;  %v8727_v3 = vpop.f32.mrb[228].mxu0  ;;  %5764 = vrot.lane.b32.xlu1 %v10827_v63, %s9239_s20  ;;  %v5315_v39 = vld [vmem:[#allocation2 + $0x238] sm:$0xff] }
 0x325   : > { %5210 = vrot.lane.b32.xlu0 %v5132_v48, %s9233_s11  ;;  %v8728_v21 = vpop.f32.mrb[229].mxu0  ;;  %v8839_v12 = vpop.f32.mrb[228].mxu1 }
 0x326   : > { %4270 = vst [vmem:[#allocation2 + $0x334] sm:$0xff] %v4194_v34  ;;  %v8729_v6 = vadd.f32 %v8728_v21, %v8727_v3  ;;  %v8730_v31 = vpop.f32.mrb[230].mxu0  ;;  %v8840_v36 = vpop.f32.mrb[229].mxu1 }
 0x327   : > { %v8731_v52 = vpop.f32.mrb[231].mxu0  ;;  %v8841_v50 = vadd.f32 %v8840_v36, %v8839_v12  ;;  %v8842_v10 = vpop.f32.mrb[230].mxu1 }
 0x328   : > { %v4038_v42 = vadd.f32 %v8729_v6, %v10737_v4  ;;  %v8732_v60 = vadd.f32 %v8731_v52, %v8730_v31  ;;  %5956 = vrot.lane.b32.xlu1 %v5133_v57, %s9240_s25  ;;  %v8843_v5 = vpop.f32.mrb[231].mxu1  ;;  %v10952_v34 = vpop.permute.xlu1 %6397 }
 0x329   : > { %5954 = vrot.lane.b32.xlu0 %v5132_v48, %s9240_s25  ;;  %v8844_v63 = vadd.f32 %v8843_v5, %v8842_v10  ;;  %v10956_v4 = vpop.permute.xlu0 %6567 }
 0x32a   : > { %v4041_v20 = vadd.f32 %v8732_v60, %v10742_v26  ;;  %v4199_v18 = vadd.f32 %v8841_v50, %v4038_v42  ;;  %13179 = vst [vmem:[#allocation128_spill] sm:$0xff] %v10956_v4 }
 0x32c   : > { %4271 = vst [vmem:[#allocation2 + $0x354] sm:$0xff] %v4199_v18  ;;  %v4202_v3 = vadd.f32 %v8844_v63, %v4041_v20  ;;  %v8733_v21 = vpop.f32.mrb[232].mxu0  ;;  %5384 = vrot.lane.b32.xlu1 %v5315_v39, %s9234_s12  ;;  %v4751_v63 = vld [vmem:[#allocation2 + $0x23e] sm:$0xff]  ;;  %v4750_v20 = vld [vmem:[#allocation2 + $0x236] sm:$0xff]  ;;  %v10964_v18 = vpop.permute.xlu1 %6569 }
 0x32d   : > { %6146 = vrot.lane.b32.xlu0 %v4567_v30, %s9235_s15  ;;  %v8734_v57 = vpop.f32.mrb[233].mxu0  ;;  %v8845_v12 = vpop.f32.mrb[232].mxu1  ;;  %13180 = vst [vmem:[#allocation129_spill] sm:$0xff] %v10964_v18 }
 0x32e   : > { %4272 = vst [vmem:[#allocation2 + $0x35c] sm:$0xff] %v4202_v3  ;;  %v8735_v48 = vadd.f32 %v8734_v57, %v8733_v21  ;;  %v8736_v6 = vpop.f32.mrb[234].mxu0  ;;  %v8846_v31 = vpop.f32.mrb[233].mxu1 }
 0x32f   : > { %v8737_v26 = vpop.f32.mrb[235].mxu0  ;;  %v8847_v36 = vadd.f32 %v8846_v31, %v8845_v12  ;;  %v8848_v52 = vpop.f32.mrb[234].mxu1 }
 0x330   : > { %v4046_v50 = vadd.f32 %v8735_v48, %v10747_v37  ;;  %v8738_v10 = vadd.f32 %v8737_v26, %v8736_v6  ;;  %4471 = vrot.lane.b32.xlu1 %v10845_v51, %s9229_s17  ;;  %v8849_v42 = vpop.f32.mrb[235].mxu1  ;;  %v10968_v37 = vpop.permute.xlu0 %6571 }
 0x331   : > { %4469 = vrot.lane.b32.xlu0 %v10840_v8, %s9229_s17  ;;  %v8850_v30 = vadd.f32 %v8849_v42, %v8848_v52  ;;  %13181 = vst [vmem:[#allocation130_spill] sm:$0xff] %v10968_v37 }
 0x332   : > { %v4049_v60 = vadd.f32 %v8738_v10, %v10752_v46  ;;  %v4207_v5 = vadd.f32 %v8847_v36, %v4046_v50 }
 0x334   : > { %4273 = vst [vmem:[#allocation2 + $0x37c] sm:$0xff] %v4207_v5  ;;  %v4210_v39 = vadd.f32 %v8850_v30, %v4049_v60  ;;  %v8739_v3 = vpop.f32.mrb[236].mxu0  ;;  %4832 = vrot.lane.b32.xlu1 %v4751_v63, %s9231_s5  ;;  %v5135_v60 = vld [vmem:[#allocation2 + $0x24a] sm:$0xff]  ;;  %v10976_v5 = vpop.permute.xlu1 %6573 }
 0x335   : > { %4830 = vrot.lane.b32.xlu0 %v4750_v20, %s9231_s5  ;;  %v8740_v21 = vpop.f32.mrb[237].mxu0  ;;  %v8851_v57 = vpop.f32.mrb[236].mxu1  ;;  %13182 = vst [vmem:[#allocation131_spill] sm:$0xff] %v10976_v5 }
 0x336   : > { %4274 = vst [vmem:[#allocation2 + $0x384] sm:$0xff] %v4210_v39  ;;  %v8741_v12 = vadd.f32 %v8740_v21, %v8739_v3  ;;  %v8742_v48 = vpop.f32.mrb[238].mxu0  ;;  %v8852_v46 = vpop.f32.mrb[237].mxu1 }
 0x337   : > { %v8743_v6 = vpop.f32.mrb[239].mxu0  ;;  %v8853_v31 = vadd.f32 %v8852_v46, %v8851_v57  ;;  %v8854_v26 = vpop.f32.mrb[238].mxu1 }
 0x338   : > { %v4054_v36 = vadd.f32 %v8741_v12, %v10757_v53  ;;  %v8744_v52 = vadd.f32 %v8743_v6, %v8742_v48  ;;  %5024 = vrot.lane.b32.xlu1 %v10845_v51, %s9232_s10  ;;  %v8855_v50 = vpop.f32.mrb[239].mxu1  ;;  %v10980_v53 = vpop.permute.xlu0 %6575 }
 0x339   : > { %5022 = vrot.lane.b32.xlu0 %v10840_v8, %s9232_s10  ;;  %v8856_v10 = vadd.f32 %v8855_v50, %v8854_v26  ;;  %13183 = vst [vmem:[#allocation132_spill] sm:$0xff] %v10980_v53  ;;  %v4757_v53 = vld [vmem:[#allocation2 + $0x2b6] sm:$0xff] }
 0x33a   : > { %v4057_v42 = vadd.f32 %v8744_v52, %v10762_v16  ;;  %v4215_v30 = vadd.f32 %v8853_v31, %v4054_v36 }
 0x33c   : > { %4275 = vst [vmem:[#allocation2 + $0x3a4] sm:$0xff] %v4215_v30  ;;  %v4218_v39 = vadd.f32 %v8856_v10, %v4057_v42  ;;  %v8745_v3 = vpop.f32.mrb[240].mxu0  ;;  %5216 = vrot.lane.b32.xlu1 %v5135_v60, %s9233_s11  ;;  %v4569_v42 = vld [vmem:[#allocation2 + $0x248] sm:$0xff]  ;;  %v10987_v30 = vpop.permute.xlu1 %6577 }
 0x33d   : > { %5574 = vrot.lane.b32.xlu0 %v4750_v20, %s9238_s24  ;;  %v8746_v21 = vpop.f32.mrb[241].mxu0  ;;  %v8857_v57 = vpop.f32.mrb[240].mxu1  ;;  %13184 = vst [vmem:[#allocation133_spill] sm:$0xff] %v10987_v30 }
 0x33e   : > { %4276 = vst [vmem:[#allocation2 + $0x3ac] sm:$0xff] %v4218_v39  ;;  %v8747_v12 = vadd.f32 %v8746_v21, %v8745_v3  ;;  %v8748_v48 = vpop.f32.mrb[242].mxu0  ;;  %v8858_v46 = vpop.f32.mrb[241].mxu1 }
 0x33f   : > { %v8749_v16 = vpop.f32.mrb[243].mxu0  ;;  %v8859_v6 = vadd.f32 %v8858_v46, %v8857_v57  ;;  %v8860_v31 = vpop.f32.mrb[242].mxu1 }
 0x340   : > { %v4062_v26 = vadd.f32 %v8747_v12, %v10767_v58  ;;  %v8750_v36 = vadd.f32 %v8749_v16, %v8748_v48  ;;  %5576 = vrot.lane.b32.xlu1 %v4751_v63, %s9238_s24  ;;  %v8861_v52 = vpop.f32.mrb[243].mxu1  ;;  %v10992_v58 = vpop.permute.xlu0 %6579  ;;  %v5134_v16 = vld [vmem:[#allocation2 + $0x242] sm:$0xff] }
 0x341   : > { %5766 = vrot.lane.b32.xlu0 %v10840_v8, %s9239_s20  ;;  %v8862_v20 = vadd.f32 %v8861_v52, %v8860_v31  ;;  %13185 = vst [vmem:[#allocation134_spill] sm:$0xff] %v10992_v58  ;;  %v5138_v58 = vld [vmem:[#allocation2 + $0x292] sm:$0xff] }
 0x342   : > { %v4065_v50 = vadd.f32 %v8750_v36, %v10772_v25  ;;  %v4223_v10 = vadd.f32 %v8859_v6, %v4062_v26 }
 0x344   : > { %4277 = vst [vmem:[#allocation2 + $0x3cc] sm:$0xff] %v4223_v10  ;;  %v4226_v39 = vadd.f32 %v8862_v20, %v4065_v50  ;;  %v8751_v3 = vpop.f32.mrb[244].mxu0  ;;  %5768 = vrot.lane.b32.xlu1 %v10845_v51, %s9239_s20  ;;  %v5317_v20 = vld [vmem:[#allocation2 + $0x260] sm:$0xff]  ;;  %v10998_v50 = vpop.permute.xlu1 %6581 }
 0x345   : > { %4661 = vrot.lane.b32.xlu0 %v4569_v42, %s9230_s18  ;;  %v8752_v63 = vpop.f32.mrb[245].mxu0  ;;  %v8863_v21 = vpop.f32.mrb[244].mxu1  ;;  %13186 = vst [vmem:[#allocation135_spill] sm:$0xff] %v10998_v50  ;;  %v5141_v50 = vld [vmem:[#allocation2 + $0x2c2] sm:$0xff] }
 0x346   : > { %4278 = vst [vmem:[#allocation2 + $0x3d4] sm:$0xff] %v4226_v39  ;;  %v8753_v8 = vadd.f32 %v8752_v63, %v8751_v3  ;;  %v8754_v57 = vpop.f32.mrb[246].mxu0  ;;  %v8864_v25 = vpop.f32.mrb[245].mxu1 }
 0x347   : > { %v8755_v12 = vpop.f32.mrb[247].mxu0  ;;  %v8865_v48 = vadd.f32 %v8864_v25, %v8863_v21  ;;  %v8866_v46 = vpop.f32.mrb[246].mxu1 }
 0x348   : > { %v4070_v6 = vadd.f32 %v8753_v8, %v10777_v7  ;;  %v8756_v31 = vadd.f32 %v8755_v12, %v8754_v57  ;;  %5960 = vrot.lane.b32.xlu1 %v5135_v60, %s9240_s25  ;;  %v8867_v51 = vpop.f32.mrb[247].mxu1  ;;  %v11002_v7 = vpop.permute.xlu0 %6583 }
 0x349   : > { %5214 = vrot.lane.b32.xlu0 %v5134_v16, %s9233_s11  ;;  %v8868_v26 = vadd.f32 %v8867_v51, %v8866_v46  ;;  %13187 = vst [vmem:[#allocation136_spill] sm:$0xff] %v11002_v7  ;;  %v11009_v51 = vpop.permute.xlu1 %6585  ;;  %v5321_v7 = vld [vmem:[#allocation2 + $0x2b0] sm:$0xff] }
 0x34a   : > { %v4073_v36 = vadd.f32 %v8756_v31, %v10782_v43  ;;  %v4231_v52 = vadd.f32 %v8865_v48, %v4070_v6  ;;  %13188 = vst [vmem:[#allocation137_spill] sm:$0xff] %v11009_v51  ;;  %v6086_v51 = vld [vmem:[#allocation2 + $0x298] sm:$0xff] }
 0x34c   : > { %4279 = vst [vmem:[#allocation2 + $0x3f4] sm:$0xff] %v4231_v52  ;;  %v4234_v10 = vadd.f32 %v8868_v26, %v4073_v36  ;;  %v8757_v39 = vpop.f32.mrb[248].mxu0  ;;  %5388 = vrot.lane.b32.xlu1 %v5317_v20, %s9234_s12  ;;  %v4753_v26 = vld [vmem:[#allocation2 + $0x266] sm:$0xff] }
 0x34d   : > { %5958 = vrot.lane.b32.xlu0 %v5134_v16, %s9240_s25  ;;  %v8758_v60 = vpop.f32.mrb[249].mxu0  ;;  %v8869_v3 = vpop.f32.mrb[248].mxu1 }
 0x34e   : > { %4280 = vst [vmem:[#allocation2 + $0x3fc] sm:$0xff] %v4234_v10  ;;  %v8759_v63 = vadd.f32 %v8758_v60, %v8757_v39  ;;  %v8760_v21 = vpop.f32.mrb[250].mxu0  ;;  %v8870_v8 = vpop.f32.mrb[249].mxu1 }
 0x34f   : > { %v8761_v43 = vpop.f32.mrb[251].mxu0  ;;  %v8871_v57 = vadd.f32 %v8870_v8, %v8869_v3  ;;  %v8872_v25 = vpop.f32.mrb[250].mxu1 }
 0x350   : > { %v4078_v12 = vadd.f32 %v8759_v63, %v10787_v15  ;;  %v8762_v48 = vadd.f32 %v8761_v43, %v8760_v21  ;;  %4475 = vrot.lane.b32.xlu1 %v10863_v40, %s9229_s17  ;;  %v8873_v46 = vpop.f32.mrb[251].mxu1  ;;  %v11014_v15 = vpop.permute.xlu0 %6587  ;;  %v4752_v21 = vld [vmem:[#allocation2 + $0x25e] sm:$0xff] }
 0x351   : > { %6150 = vrot.lane.b32.xlu0 %v4569_v42, %s9235_s15  ;;  %v8874_v16 = vadd.f32 %v8873_v46, %v8872_v25  ;;  %v11019_v25 = vpop.permute.xlu1 %6589 }
 0x352   : > { %v4081_v6 = vadd.f32 %v8762_v48, %v10792_v28  ;;  %v4239_v31 = vadd.f32 %v8871_v57, %v4078_v12 }
 0x354   : > { %4281 = vst [vmem:[#allocation2 + $0x41c] sm:$0xff] %v4239_v31  ;;  %v4242_v36 = vadd.f32 %v8874_v16, %v4081_v6  ;;  %v8763_v52 = vpop.f32.mrb[252].mxu0  ;;  %4836 = vrot.lane.b32.xlu1 %v4753_v26, %s9231_s5  ;;  %v5137_v6 = vld [vmem:[#allocation2 + $0x272] sm:$0xff] }
 0x355   : > { %4473 = vrot.lane.b32.xlu0 %v10858_v59, %s9229_s17  ;;  %v8764_v20 = vpop.f32.mrb[253].mxu0  ;;  %v8875_v10 = vpop.f32.mrb[252].mxu1 }
 0x356   : > { %4282 = vst [vmem:[#allocation2 + $0x424] sm:$0xff] %v4242_v36  ;;  %v8765_v42 = vadd.f32 %v8764_v20, %v8763_v52  ;;  %v8766_v39 = vpop.f32.mrb[254].mxu0  ;;  %v8876_v28 = vpop.f32.mrb[253].mxu1 }
 0x357   : > { %v8767_v60 = vpop.f32.mrb[255].mxu0  ;;  %v8877_v3 = vadd.f32 %v8876_v28, %v8875_v10  ;;  %v8878_v63 = vpop.f32.mrb[254].mxu1  ;;  %v5319_v28 = vld [vmem:[#allocation2 + $0x288] sm:$0xff] }
 0x358   : > { %v4086_v8 = vadd.f32 %v8765_v42, %v10797_v13  ;;  %v8768_v43 = vadd.f32 %v8767_v60, %v8766_v39  ;;  %5028 = vrot.lane.b32.xlu1 %v10863_v40, %s9232_s10  ;;  %v8879_v57 = vpop.f32.mrb[255].mxu1  ;;  %v11023_v16 = vpop.permute.xlu0 %4461  ;;  %v4571_v42 = vld [vmem:[#allocation2 + $0x270] sm:$0xff] }
 0x359   : > { %4834 = vrot.lane.b32.xlu0 %v4752_v21, %s9231_s5  ;;  %v8880_v12 = vadd.f32 %v8879_v57, %v8878_v63  ;;  %13189 = vst [vmem:[#allocation138_spill] sm:$0xff] %v11023_v16  ;;  %v5136_v60 = vld [vmem:[#allocation2 + $0x26a] sm:$0xff]  ;;  %v5139_v57 = vld [vmem:[#allocation2 + $0x29a] sm:$0xff] }
 0x35a   : > { %v4089_v48 = vadd.f32 %v8768_v43, %v10802_v24  ;;  %v4247_v46 = vadd.f32 %v8877_v3, %v4086_v8  ;;  %v4755_v3 = vld [vmem:[#allocation2 + $0x28e] sm:$0xff]  ;;  %v11591_v16 = vld [vmem:[#allocation2 + $0x3fa] sm:$0xff] }
 0x35c   : > { %4283 = vst [vmem:[#allocation2 + $0x444] sm:$0xff] %v4247_v46  ;;  %v4250_v31 = vadd.f32 %v8880_v12, %v4089_v48  ;;  %5220 = vrot.lane.b32.xlu1 %v5137_v6, %s9233_s11  ;;  %v4754_v12 = vld [vmem:[#allocation2 + $0x286] sm:$0xff] }
 0x35d   : > { %5026 = vrot.lane.b32.xlu0 %v10858_v59, %s9232_s10  ;;  %v11644_v32 = vld [vmem:[#allocation2 + $0x422] sm:$0xff] }
 0x35e   : > { %4284 = vst [vmem:[#allocation2 + $0x44c] sm:$0xff] %v4250_v31  ;;  %v11028_v13 = vpop.permute.xlu1 %5376  ;;  %v11655_v62 = vld [vmem:[#allocation2 + $0x428] sm:$0xff] }
 0x35f   : > { %v11030_v36 = vpop.permute.xlu0 %4822 }
 0x360   : > { %5580 = vrot.lane.b32.xlu1 %v4753_v26, %s9238_s24 }
 0x361   : > { %5578 = vrot.lane.b32.xlu0 %v4752_v21, %s9238_s24 }
 0x362   : > { %v11034_v24 = vpop.permute.xlu1 %4463 }
 0x363   : > { %v11036_v52 = vpop.permute.xlu0 %5014 }
 0x364   : > { %13190 = vst [vmem:[#allocation139_spill] sm:$0xff] %v11036_v52  ;;  %5772 = vrot.lane.b32.xlu1 %v10863_v40, %s9239_s20  ;;  %v11671_v52 = vld [vmem:[#allocation2 + $0x444] sm:$0xff] }
 0x365   : > { %5770 = vrot.lane.b32.xlu0 %v10858_v59, %s9239_s20 }
 0x366   : > { %v11042_v20 = vpop.permute.xlu1 %4824 }
 0x367   : > { %13191 = vst [vmem:[#allocation140_spill] sm:$0xff] %v11042_v20  ;;  %v11044_v10 = vpop.permute.xlu0 %5566 }
 0x368   : > { %13192 = vst [vmem:[#allocation141_spill] sm:$0xff] %v11044_v10  ;;  %5964 = vrot.lane.b32.xlu1 %v5137_v6, %s9240_s25  ;;  %v5532_v10 = vld [vmem:[#allocation2 + $0x43e] sm:$0xff] }
 0x369   : > { %4665 = vrot.lane.b32.xlu0 %v4571_v42, %s9230_s18 }
 0x36a   : > { %v11048_v26 = vpop.permute.xlu1 %5016 }
 0x36b   : > { %13193 = vst [vmem:[#allocation142_spill] sm:$0xff] %v11048_v26  ;;  %v11050_v39 = vpop.permute.xlu0 %5758  ;;  %v5530_v26 = vld [vmem:[#allocation2 + $0x416] sm:$0xff] }
 0x36c   : > { %13194 = vst [vmem:[#allocation143_spill] sm:$0xff] %v11050_v39  ;;  %5392 = vrot.lane.b32.xlu1 %v5319_v28, %s9234_s12  ;;  %v11609_v39 = vld [vmem:[#allocation2 + $0x42a] sm:$0xff] }
 0x36d   : > { %5218 = vrot.lane.b32.xlu0 %v5136_v60, %s9233_s11 }
 0x36e   : > { %v11054_v59 = vpop.permute.xlu1 %5208 }
 0x36f   : > { %13195 = vst [vmem:[#allocation144_spill] sm:$0xff] %v11054_v59  ;;  %v11056_v40 = vpop.permute.xlu0 %4653 }
 0x370   : > { %13196 = vst [vmem:[#allocation145_spill] sm:$0xff] %v11056_v40  ;;  %4840 = vrot.lane.b32.xlu1 %v4755_v3, %s9231_s5  ;;  %v5528_v40 = vld [vmem:[#allocation2 + $0x3ee] sm:$0xff] }
 0x371   : > { %5962 = vrot.lane.b32.xlu0 %v5136_v60, %s9240_s25 }
 0x372   : > { %v11060_v63 = vpop.permute.xlu1 %5568 }
 0x373   : > { %v11062_v21 = vpop.permute.xlu0 %5206 }
 0x374   : > { %13197 = vst [vmem:[#allocation146_spill] sm:$0xff] %v11062_v21  ;;  %5032 = vrot.lane.b32.xlu1 %v10879_v11, %s9232_s10  ;;  %v6104_v21 = vld [vmem:[#allocation2 + $0x400] sm:$0xff] }
 0x375   : > { %6154 = vrot.lane.b32.xlu0 %v4571_v42, %s9235_s15 }
 0x376   : > { %v11067_v8 = vpop.permute.xlu1 %5760 }
 0x377   : > { %13198 = vst [vmem:[#allocation147_spill] sm:$0xff] %v11067_v8  ;;  %v11069_v43 = vpop.permute.xlu0 %5950  ;;  %v5917_v8 = vld [vmem:[#allocation2 + $0x452] sm:$0xff] }
 0x378   : > { %13199 = vst [vmem:[#allocation148_spill] sm:$0xff] %v11069_v43  ;;  %5224 = vrot.lane.b32.xlu1 %v5139_v57, %s9233_s11 }
 0x379   : > { %4838 = vrot.lane.b32.xlu0 %v4754_v12, %s9231_s5 }
 0x37a   : > { %v11073_v48 = vpop.permute.xlu1 %5952 }
 0x37b   : > { %13200 = vst [vmem:[#allocation149_spill] sm:$0xff] %v11073_v48  ;;  %v11075_v46 = vpop.permute.xlu0 %6142  ;;  %v11600_v48 = vld [vmem:[#allocation2 + $0x424] sm:$0xff] }
 0x37c   : > { %13201 = vst [vmem:[#allocation150_spill] sm:$0xff] %v11075_v46  ;;  %5584 = vrot.lane.b32.xlu1 %v4755_v3, %s9238_s24  ;;  %v11512_v46 = vld [vmem:[#allocation2 + $0x3cc] sm:$0xff] }
 0x37d   : > { %5030 = vrot.lane.b32.xlu0 %v10874_v35, %s9232_s10 }
 0x37e   : > { %v11080_v6 = vpop.permute.xlu1 %5380 }
 0x37f   : > { %13202 = vst [vmem:[#allocation151_spill] sm:$0xff] %v11080_v6  ;;  %v11082_v31 = vpop.permute.xlu0 %4465  ;;  %v5533_v6 = vld [vmem:[#allocation2 + $0x446] sm:$0xff] }
 0x380   : > { %13203 = vst [vmem:[#allocation152_spill] sm:$0xff] %v11082_v31  ;;  %5776 = vrot.lane.b32.xlu1 %v10879_v11, %s9239_s20 }
 0x381   : > { %5582 = vrot.lane.b32.xlu0 %v4754_v12, %s9238_s24 }
 0x382   : > { %v11087_v42 = vpop.permute.xlu1 %4467 }
 0x383   : > { %13204 = vst [vmem:[#allocation153_spill] sm:$0xff] %v11087_v42  ;;  %v11089_v28 = vpop.permute.xlu0 %4826  ;;  %v11565_v42 = vld [vmem:[#allocation2 + $0x3f4] sm:$0xff] }
 0x384   : > { %13205 = vst [vmem:[#allocation154_spill] sm:$0xff] %v11089_v28  ;;  %5968 = vrot.lane.b32.xlu1 %v5139_v57, %s9240_s25  ;;  %v11618_v28 = vld [vmem:[#allocation2 + $0x41c] sm:$0xff] }
 0x385   : > { %5774 = vrot.lane.b32.xlu0 %v10874_v35, %s9239_s20 }
 0x386   : > { %v11094_v60 = vpop.permute.xlu1 %4828 }
 0x387   : > { %13206 = vst [vmem:[#allocation155_spill] sm:$0xff] %v11094_v60  ;;  %v11096_v3 = vpop.permute.xlu0 %5018  ;;  %v11556_v60 = vld [vmem:[#allocation2 + $0x402] sm:$0xff] }
 0x388   : > { %13207 = vst [vmem:[#allocation156_spill] sm:$0xff] %v11096_v3  ;;  %5396 = vrot.lane.b32.xlu1 %v5321_v7, %s9234_s12  ;;  %v5531_v3 = vld [vmem:[#allocation2 + $0x41e] sm:$0xff] }
 0x389   : > { %5222 = vrot.lane.b32.xlu0 %v5138_v58, %s9233_s11 }
 0x38a   : > { %v11100_v11 = vpop.permute.xlu1 %5020 }
 0x38b   : > { %13208 = vst [vmem:[#allocation157_spill] sm:$0xff] %v11100_v11  ;;  %v11102_v12 = vpop.permute.xlu0 %5570  ;;  %v11440_v11 = vld [vmem:[#allocation2 + $0x382] sm:$0xff] }
 0x38c   : > { %13209 = vst [vmem:[#allocation158_spill] sm:$0xff] %v11102_v12  ;;  %4844 = vrot.lane.b32.xlu1 %v4757_v53, %s9231_s5  ;;  %v5526_v12 = vld [vmem:[#allocation2 + $0x3c6] sm:$0xff] }
 0x38d   : > { %5966 = vrot.lane.b32.xlu0 %v5138_v58, %s9240_s25 }
 0x38e   : > { %v11106_v35 = vpop.permute.xlu1 %5212 }
 0x38f   : > { %13210 = vst [vmem:[#allocation159_spill] sm:$0xff] %v11106_v35  ;;  %v11108_v57 = vpop.permute.xlu0 %5762 }
 0x390   : > { %13211 = vst [vmem:[#allocation160_spill] sm:$0xff] %v11108_v57  ;;  %5036 = vrot.lane.b32.xlu1 %v10896_v9, %s9232_s10 }
 0x391   : > { %6158 = vrot.lane.b32.xlu0 %v6086_v51, %s9235_s15 }
 0x392   : > { %v11113_v7 = vpop.permute.xlu1 %5572 }
 0x393   : > { %13212 = vst [vmem:[#allocation161_spill] sm:$0xff] %v11113_v7  ;;  %v11115_v54 = vpop.permute.xlu0 %4657 }
 0x394   : > { %13213 = vst [vmem:[#allocation162_spill] sm:$0xff] %v11115_v54  ;;  %5228 = vrot.lane.b32.xlu1 %v5141_v50, %s9233_s11  ;;  %v5142_v54 = vld [vmem:[#allocation2 + $0x2e2] sm:$0xff] }
 0x395   : > { %4842 = vrot.lane.b32.xlu0 %v4756_v2, %s9231_s5 }
 0x396   : > { %v11119_v58 = vpop.permute.xlu1 %5764 }
 0x397   : > { %13214 = vst [vmem:[#allocation163_spill] sm:$0xff] %v11119_v58  ;;  %v11121_v30 = vpop.permute.xlu0 %5210  ;;  %v6102_v58 = vld [vmem:[#allocation2 + $0x3d8] sm:$0xff] }
 0x398   : > { %13215 = vst [vmem:[#allocation164_spill] sm:$0xff] %v11121_v30  ;;  %5588 = vrot.lane.b32.xlu1 %v4757_v53, %s9238_s24  ;;  %v11538_v30 = vld [vmem:[#allocation2 + $0x3d2] sm:$0xff] }
 0x399   : > { %5034 = vrot.lane.b32.xlu0 %v10891_v0, %s9232_s10 }
 0x39a   : > { %v11126_v51 = vpop.permute.xlu1 %5956 }
 0x39b   : > { %13216 = vst [vmem:[#allocation165_spill] sm:$0xff] %v11126_v51  ;;  %v11128_v37 = vpop.permute.xlu0 %5954 }
 0x39c   : > { %13217 = vst [vmem:[#allocation166_spill] sm:$0xff] %v11128_v37  ;;  %5780 = vrot.lane.b32.xlu1 %v10896_v9, %s9239_s20  ;;  %v4758_v37 = vld [vmem:[#allocation2 + $0x2d6] sm:$0xff] }
 0x39d   : > { %5586 = vrot.lane.b32.xlu0 %v4756_v2, %s9238_s24 }
 0x39e   : > { %v11133_v4 = vpop.permute.xlu1 %5384 }
 0x39f   : > { %13218 = vst [vmem:[#allocation167_spill] sm:$0xff] %v11133_v4  ;;  %v11135_v5 = vpop.permute.xlu0 %6146  ;;  %v5331_v4 = vld [vmem:[#allocation2 + $0x378] sm:$0xff] }
 0x3a0   : > { %13219 = vst [vmem:[#allocation168_spill] sm:$0xff] %v11135_v5  ;;  %5972 = vrot.lane.b32.xlu1 %v5141_v50, %s9240_s25  ;;  %v4759_v5 = vld [vmem:[#allocation2 + $0x2de] sm:$0xff] }
 0x3a1   : > { %5778 = vrot.lane.b32.xlu0 %v10891_v0, %s9239_s20 }
 0x3a2   : > { %v11140_v53 = vpop.permute.xlu1 %4471 }
 0x3a3   : > { %13220 = vst [vmem:[#allocation169_spill] sm:$0xff] %v11140_v53  ;;  %v11142_v18 = vpop.permute.xlu0 %4469  ;;  %v5143_v53 = vld [vmem:[#allocation2 + $0x2ea] sm:$0xff] }
 0x3a4   : > { %13221 = vst [vmem:[#allocation170_spill] sm:$0xff] %v11142_v18  ;;  %5400 = vrot.lane.b32.xlu1 %v5323_v38, %s9234_s12  ;;  %v6088_v18 = vld [vmem:[#allocation2 + $0x2c0] sm:$0xff] }
 0x3a5   : > { %5226 = vrot.lane.b32.xlu0 %v5140_v44, %s9233_s11 }
 0x3a6   : > { %v11146_v9 = vpop.permute.xlu1 %4832 }
 0x3a7   : > { %13222 = vst [vmem:[#allocation171_spill] sm:$0xff] %v11146_v9  ;;  %v11148_v2 = vpop.permute.xlu0 %4830 }
 0x3a8   : > { %13223 = vst [vmem:[#allocation172_spill] sm:$0xff] %v11148_v2  ;;  %4848 = vrot.lane.b32.xlu1 %v4759_v5, %s9231_s5  ;;  %v5144_v2 = vld [vmem:[#allocation2 + $0x30a] sm:$0xff] }
 0x3a9   : > { %5970 = vrot.lane.b32.xlu0 %v5140_v44, %s9240_s25 }
 0x3aa   : > { %v11152_v0 = vpop.permute.xlu1 %5024 }
 0x3ab   : > { %13224 = vst [vmem:[#allocation173_spill] sm:$0xff] %v11152_v0  ;;  %v11154_v50 = vpop.permute.xlu0 %5022 }
 0x3ac   : > { %13225 = vst [vmem:[#allocation174_spill] sm:$0xff] %v11154_v50  ;;  %5040 = vrot.lane.b32.xlu1 %v10914_v47, %s9232_s10 }
 0x3ad   : > { %6162 = vrot.lane.b32.xlu0 %v6088_v18, %s9235_s15 }
 0x3ae   : > { %v11159_v38 = vpop.permute.xlu1 %5216 }
 0x3af   : > { %13226 = vst [vmem:[#allocation175_spill] sm:$0xff] %v11159_v38  ;;  %v11161_v9 = vpop.permute.xlu0 %5574 }
 0x3b0   : > { %13227 = vst [vmem:[#allocation176_spill] sm:$0xff] %v11161_v9  ;;  %5232 = vrot.lane.b32.xlu1 %v5143_v53, %s9233_s11 }
 0x3b1   : > { %4846 = vrot.lane.b32.xlu0 %v4758_v37, %s9231_s5 }
 0x3b2   : > { %v11165_v44 = vpop.permute.xlu1 %5576 }
 0x3b3   : > { %13228 = vst [vmem:[#allocation177_spill] sm:$0xff] %v11165_v44  ;;  %v11167_v0 = vpop.permute.xlu0 %5766 }
 0x3b4   : > { %13229 = vst [vmem:[#allocation178_spill] sm:$0xff] %v11167_v0  ;;  %5592 = vrot.lane.b32.xlu1 %v4759_v5, %s9238_s24 }
 0x3b5   : > { %5038 = vrot.lane.b32.xlu0 %v10909_v56, %s9232_s10 }
 0x3b6   : > { %v11172_v18 = vpop.permute.xlu1 %5768 }
 0x3b7   : > { %13230 = vst [vmem:[#allocation179_spill] sm:$0xff] %v11172_v18  ;;  %v11174_v38 = vpop.permute.xlu0 %4661 }
 0x3b8   : > { %13231 = vst [vmem:[#allocation180_spill] sm:$0xff] %v11174_v38  ;;  %5784 = vrot.lane.b32.xlu1 %v10914_v47, %s9239_s20 }
 0x3b9   : > { %5590 = vrot.lane.b32.xlu0 %v4758_v37, %s9238_s24 }
 0x3ba   : > { %v11179_v9 = vpop.permute.xlu1 %5960 }
 0x3bb   : > { %13232 = vst [vmem:[#allocation181_spill] sm:$0xff] %v11179_v9  ;;  %v11181_v50 = vpop.permute.xlu0 %5214 }
 0x3bc   : > { %13233 = vst [vmem:[#allocation182_spill] sm:$0xff] %v11181_v50  ;;  %5976 = vrot.lane.b32.xlu1 %v5143_v53, %s9240_s25 }
 0x3bd   : > { %5782 = vrot.lane.b32.xlu0 %v10909_v56, %s9239_s20 }
 0x3be   : > { %v11186_v0 = vpop.permute.xlu1 %5388 }
 0x3bf   : > { %13234 = vst [vmem:[#allocation183_spill] sm:$0xff] %v11186_v0  ;;  %v11188_v44 = vpop.permute.xlu0 %5958 }
 0x3c0   : > { %13235 = vst [vmem:[#allocation184_spill] sm:$0xff] %v11188_v44  ;;  %6337 = vrot.lane.b32.xlu1 %v4759_v5, %s9236_s19  ;;  %v4761_v44 = vld [vmem:[#allocation2 + $0x306] sm:$0xff] }
 0x3c1   : > { %6335 = vrot.lane.b32.xlu0 %v4758_v37, %s9236_s19 }
 0x3c2   : > { %v11192_v38 = vpop.permute.xlu1 %4475 }
 0x3c3   : > { %v11194_v18 = vpop.permute.xlu0 %6150 }
 0x3c4   : > { %13236 = vst [vmem:[#allocation185_spill] sm:$0xff] %v11194_v18  ;;  %6529 = vrot.lane.b32.xlu1 %v10914_v47, %s9237_s22  ;;  %v5325_v18 = vld [vmem:[#allocation2 + $0x300] sm:$0xff] }
 0x3c5   : > { %6527 = vrot.lane.b32.xlu0 %v10909_v56, %s9237_s22 }
 0x3c6   : > { %v11200_v9 = vpop.permute.xlu1 %4836 }
 0x3c7   : > { %13237 = vst [vmem:[#allocation186_spill] sm:$0xff] %v11200_v9  ;;  %v11202_v50 = vpop.permute.xlu0 %4473  ;;  %v6090_v9 = vld [vmem:[#allocation2 + $0x2e8] sm:$0xff] }
 0x3c8   : > { %6721 = vrot.lane.b32.xlu1 %v5143_v53, %s9241_s26 }
 0x3c9   : > { %5230 = vrot.lane.b32.xlu0 %v5142_v54, %s9233_s11 }
 0x3ca   : > { %v11206_v37 = vpop.permute.xlu1 %5028 }
 0x3cb   : > { %13238 = vst [vmem:[#allocation187_spill] sm:$0xff] %v11206_v37  ;;  %v11208_v5 = vpop.permute.xlu0 %4834 }
 0x3cc   : > { %13239 = vst [vmem:[#allocation188_spill] sm:$0xff] %v11208_v5  ;;  %5404 = vrot.lane.b32.xlu1 %v5325_v18, %s9234_s12  ;;  %v4760_v5 = vld [vmem:[#allocation2 + $0x2fe] sm:$0xff] }
 0x3cd   : > { %5974 = vrot.lane.b32.xlu0 %v5142_v54, %s9240_s25 }
 0x3ce   : > { %v11212_v56 = vpop.permute.xlu1 %5220 }
 0x3cf   : > { %13240 = vst [vmem:[#allocation189_spill] sm:$0xff] %v11212_v56  ;;  %v11214_v47 = vpop.permute.xlu0 %5026 }
 0x3d0   : > { %13241 = vst [vmem:[#allocation190_spill] sm:$0xff] %v11214_v47  ;;  %4852 = vrot.lane.b32.xlu1 %v4761_v44, %s9231_s5  ;;  %v5145_v47 = vld [vmem:[#allocation2 + $0x312] sm:$0xff] }
 0x3d1   : > { %6166 = vrot.lane.b32.xlu0 %v6090_v9, %s9235_s15 }
 0x3d2   : > { %v11218_v53 = vpop.permute.xlu1 %5580 }
 0x3d3   : > { %13242 = vst [vmem:[#allocation191_spill] sm:$0xff] %v11218_v53  ;;  %v11220_v37 = vpop.permute.xlu0 %5578 }
 0x3d4   : > { %13243 = vst [vmem:[#allocation192_spill] sm:$0xff] %v11220_v37  ;;  %5044 = vrot.lane.b32.xlu1 %v10929_v49, %s9232_s10  ;;  %v4952_v37 = vld [vmem:[#allocation2 + $0x304] sm:$0xff] }
 0x3d5   : > { %6719 = vrot.lane.b32.xlu0 %v5142_v54, %s9241_s26 }
 0x3d6   : > { %v11225_v18 = vpop.permute.xlu1 %5772 }
 0x3d7   : > { %13244 = vst [vmem:[#allocation193_spill] sm:$0xff] %v11225_v18  ;;  %v11227_v56 = vpop.permute.xlu0 %5770 }
 0x3d8   : > { %13245 = vst [vmem:[#allocation194_spill] sm:$0xff] %v11227_v56  ;;  %5236 = vrot.lane.b32.xlu1 %v5145_v47, %s9233_s11  ;;  %v5709_v56 = vld [vmem:[#allocation2 + $0x30c] sm:$0xff] }
 0x3d9   : > { %4850 = vrot.lane.b32.xlu0 %v4760_v5, %s9231_s5 }
 0x3da   : > { %v11231_v9 = vpop.permute.xlu1 %5964 }
 0x3db   : > { %13246 = vst [vmem:[#allocation195_spill] sm:$0xff] %v11231_v9  ;;  %v11233_v53 = vpop.permute.xlu0 %4665 }
 0x3dc   : > { %5596 = vrot.lane.b32.xlu1 %v4761_v44, %s9238_s24 }
 0x3dd   : > { %5042 = vrot.lane.b32.xlu0 %v4952_v37, %s9232_s10 }
 0x3de   : > { %v11237_v49 = vpop.permute.xlu1 %5392 }
 0x3df   : > { %13247 = vst [vmem:[#allocation196_spill] sm:$0xff] %v11237_v49  ;;  %v11239_v54 = vpop.permute.xlu0 %5218 }
 0x3e0   : > { %13248 = vst [vmem:[#allocation197_spill] sm:$0xff] %v11239_v54  ;;  %5788 = vrot.lane.b32.xlu1 %v5709_v56, %s9239_s20 }
 0x3e1   : > { %5594 = vrot.lane.b32.xlu0 %v4760_v5, %s9238_s24 }
 0x3e2   : > { %v11243_v18 = vpop.permute.xlu1 %4840 }
 0x3e3   : > { %13249 = vst [vmem:[#allocation198_spill] sm:$0xff] %v11243_v18  ;;  %v11245_v35 = vpop.permute.xlu0 %5962 }
 0x3e4   : > { %13250 = vst [vmem:[#allocation199_spill] sm:$0xff] %v11245_v35  ;;  %5980 = vrot.lane.b32.xlu1 %v5145_v47, %s9240_s25 }
 0x3e5   : > { %5786 = vrot.lane.b32.xlu0 %v4952_v37, %s9239_s20 }
 0x3e6   : > { %v11249_v9 = vpop.permute.xlu1 %5032 }
 0x3e7   : > { %13251 = vst [vmem:[#allocation200_spill] sm:$0xff] %v11249_v9  ;;  %v11251_v0 = vpop.permute.xlu0 %6154  ;;  %v6092_v9 = vld [vmem:[#allocation2 + $0x310] sm:$0xff] }
 0x3e8   : > { %13252 = vst [vmem:[#allocation201_spill] sm:$0xff] %v11251_v0  ;;  %6341 = vrot.lane.b32.xlu1 %v4761_v44, %s9236_s19  ;;  %v5327_v0 = vld [vmem:[#allocation2 + $0x328] sm:$0xff] }
 0x3e9   : > { %6339 = vrot.lane.b32.xlu0 %v4760_v5, %s9236_s19 }
 0x3ea   : > { %v11255_v54 = vpop.permute.xlu1 %5224 }
 0x3eb   : > { %13253 = vst [vmem:[#allocation202_spill] sm:$0xff] %v11255_v54  ;;  %v11257_v49 = vpop.permute.xlu0 %4838  ;;  %v4763_v54 = vld [vmem:[#allocation2 + $0x32e] sm:$0xff] }
 0x3ec   : > { %13254 = vst [vmem:[#allocation203_spill] sm:$0xff] %v11257_v49  ;;  %6533 = vrot.lane.b32.xlu1 %v5709_v56, %s9237_s22 }
 0x3ed   : > { %6531 = vrot.lane.b32.xlu0 %v4952_v37, %s9237_s22 }
 0x3ee   : > { %v11261_v35 = vpop.permute.xlu1 %5584 }
 0x3ef   : > { %13255 = vst [vmem:[#allocation204_spill] sm:$0xff] %v11261_v35  ;;  %v11263_v18 = vpop.permute.xlu0 %5030  ;;  %v5329_v35 = vld [vmem:[#allocation2 + $0x350] sm:$0xff] }
 0x3f0   : > { %13256 = vst [vmem:[#allocation205_spill] sm:$0xff] %v11263_v18  ;;  %6725 = vrot.lane.b32.xlu1 %v5145_v47, %s9241_s26 }
 0x3f1   : > { %5234 = vrot.lane.b32.xlu0 %v5144_v2, %s9233_s11 }
 0x3f2   : > { %v11267_v44 = vpop.permute.xlu1 %5776 }
 0x3f3   : > { %13257 = vst [vmem:[#allocation206_spill] sm:$0xff] %v11267_v44  ;;  %v11269_v5 = vpop.permute.xlu0 %5582  ;;  %v4762_v44 = vld [vmem:[#allocation2 + $0x326] sm:$0xff] }
 0x3f4   : > { %13258 = vst [vmem:[#allocation207_spill] sm:$0xff] %v11269_v5  ;;  %5408 = vrot.lane.b32.xlu1 %v5327_v0, %s9234_s12  ;;  %v4955_v5 = vld [vmem:[#allocation2 + $0x334] sm:$0xff] }
 0x3f5   : > { %5978 = vrot.lane.b32.xlu0 %v5144_v2, %s9240_s25 }
 0x3f6   : > { %v11273_v56 = vpop.permute.xlu1 %5968 }
 0x3f7   : > { %13259 = vst [vmem:[#allocation208_spill] sm:$0xff] %v11273_v56  ;;  %v11275_v37 = vpop.permute.xlu0 %5774 }
 0x3f8   : > { %13260 = vst [vmem:[#allocation209_spill] sm:$0xff] %v11275_v37  ;;  %4856 = vrot.lane.b32.xlu1 %v4763_v54, %s9231_s5  ;;  %v11289_v37 = vld [vmem:[#allocation2 + $0x33a] sm:$0xff] }
 0x3f9   : > { %6170 = vrot.lane.b32.xlu0 %v6092_v9, %s9235_s15 }
 0x3fa   : > { %v11279_v47 = vpop.permute.xlu1 %5396 }
 0x3fb   : > { %13261 = vst [vmem:[#allocation210_spill] sm:$0xff] %v11279_v47  ;;  %v11281_v18 = vpop.permute.xlu0 %5222  ;;  %v4954_v47 = vld [vmem:[#allocation2 + $0x32c] sm:$0xff] }
 0x3fc   : > { %13262 = vst [vmem:[#allocation211_spill] sm:$0xff] %v11281_v18  ;;  %5048 = vrot.lane.b32.xlu1 %v4955_v5, %s9232_s10 }
 0x3fd   : > { %6723 = vrot.lane.b32.xlu0 %v5144_v2, %s9241_s26 }
 0x3fe   : > { %v11285_v0 = vpop.permute.xlu1 %4844 }
 0x3ff   : > { %13263 = vst [vmem:[#allocation212_spill] sm:$0xff] %v11285_v0  ;;  %v11287_v56 = vpop.permute.xlu0 %5966 }
 0x400   : > { %13264 = vst [vmem:[#allocation213_spill] sm:$0xff] %v11287_v56  ;;  %5240 = vrot.lane.b32.xlu1 %v11289_v37, %s9233_s11 }
 0x401   : > { %4854 = vrot.lane.b32.xlu0 %v4762_v44, %s9231_s5 }
 0x402   : > { %v11294_v9 = vpop.permute.xlu1 %5036 }
 0x403   : > { %13265 = vst [vmem:[#allocation214_spill] sm:$0xff] %v11294_v9  ;;  %v11296_v18 = vpop.permute.xlu0 %6158 }
 0x404   : > { %13266 = vst [vmem:[#allocation215_spill] sm:$0xff] %v11296_v18  ;;  %5600 = vrot.lane.b32.xlu1 %v4763_v54, %s9238_s24 }
 0x405   : > { %5046 = vrot.lane.b32.xlu0 %v4954_v47, %s9232_s10 }
 0x406   : > { %v11300_v2 = vpop.permute.xlu1 %5228 }
 0x407   : > { %13267 = vst [vmem:[#allocation216_spill] sm:$0xff] %v11300_v2  ;;  %v11302_v56 = vpop.permute.xlu0 %4842 }
 0x408   : > { %13268 = vst [vmem:[#allocation217_spill] sm:$0xff] %v11302_v56  ;;  %5792 = vrot.lane.b32.xlu1 %v4955_v5, %s9239_s20 }
 0x409   : > { %5598 = vrot.lane.b32.xlu0 %v4762_v44, %s9238_s24 }
 0x40a   : > { %v11306_v0 = vpop.permute.xlu1 %5588 }
 0x40b   : > { %13269 = vst [vmem:[#allocation218_spill] sm:$0xff] %v11306_v0  ;;  %v11308_v49 = vpop.permute.xlu0 %5034 }
 0x40c   : > { %13270 = vst [vmem:[#allocation219_spill] sm:$0xff] %v11308_v49  ;;  %5984 = vrot.lane.b32.xlu1 %v11289_v37, %s9240_s25 }
 0x40d   : > { %5790 = vrot.lane.b32.xlu0 %v4954_v47, %s9239_s20 }
 0x40e   : > { %v11313_v18 = vpop.permute.xlu1 %5780 }
 0x40f   : > { %13271 = vst [vmem:[#allocation220_spill] sm:$0xff] %v11313_v18  ;;  %v11315_v9 = vpop.permute.xlu0 %5586  ;;  %v11329_v18 = vld [vmem:[#allocation2 + $0x332] sm:$0xff] }
 0x410   : > { %13272 = vst [vmem:[#allocation221_spill] sm:$0xff] %v11315_v9  ;;  %6345 = vrot.lane.b32.xlu1 %v4763_v54, %s9236_s19  ;;  %v4764_v9 = vld [vmem:[#allocation2 + $0x34e] sm:$0xff] }
 0x411   : > { %6343 = vrot.lane.b32.xlu0 %v4762_v44, %s9236_s19 }
 0x412   : > { %v11319_v2 = vpop.permute.xlu1 %5972 }
 0x413   : > { %13273 = vst [vmem:[#allocation222_spill] sm:$0xff] %v11319_v2  ;;  %v11321_v56 = vpop.permute.xlu0 %5778  ;;  %v6094_v2 = vld [vmem:[#allocation2 + $0x338] sm:$0xff] }
 0x414   : > { %13274 = vst [vmem:[#allocation223_spill] sm:$0xff] %v11321_v56  ;;  %6537 = vrot.lane.b32.xlu1 %v4955_v5, %s9237_s22  ;;  %v4765_v56 = vld [vmem:[#allocation2 + $0x356] sm:$0xff] }
 0x415   : > { %6535 = vrot.lane.b32.xlu0 %v4954_v47, %s9237_s22 }
 0x416   : > { %v11325_v49 = vpop.permute.xlu1 %5400 }
 0x417   : > { %13275 = vst [vmem:[#allocation224_spill] sm:$0xff] %v11325_v49  ;;  %v11327_v0 = vpop.permute.xlu0 %5226  ;;  %v4956_v49 = vld [vmem:[#allocation2 + $0x354] sm:$0xff] }
 0x418   : > { %13276 = vst [vmem:[#allocation225_spill] sm:$0xff] %v11327_v0  ;;  %5412 = vrot.lane.b32.xlu1 %v5329_v35, %s9234_s12  ;;  %v4957_v0 = vld [vmem:[#allocation2 + $0x35c] sm:$0xff] }
 0x419   : > { %5238 = vrot.lane.b32.xlu0 %v11329_v18, %s9233_s11 }
 0x41a   : > { %v11334_v54 = vpop.permute.xlu1 %4848 }
 0x41b   : > { %13277 = vst [vmem:[#allocation226_spill] sm:$0xff] %v11334_v54  ;;  %v11336_v44 = vpop.permute.xlu0 %5970 }
 0x41c   : > { %13278 = vst [vmem:[#allocation227_spill] sm:$0xff] %v11336_v44  ;;  %4860 = vrot.lane.b32.xlu1 %v4765_v56, %s9231_s5  ;;  %v11351_v44 = vld [vmem:[#allocation2 + $0x362] sm:$0xff] }
 0x41d   : > { %5982 = vrot.lane.b32.xlu0 %v11329_v18, %s9240_s25 }
 0x41e   : > { %v11341_v5 = vpop.permute.xlu1 %5040 }
 0x41f   : > { %13279 = vst [vmem:[#allocation228_spill] sm:$0xff] %v11341_v5  ;;  %v11343_v47 = vpop.permute.xlu0 %6162 }
 0x420   : > { %13280 = vst [vmem:[#allocation229_spill] sm:$0xff] %v11343_v47  ;;  %5052 = vrot.lane.b32.xlu1 %v4957_v0, %s9232_s10 }
 0x421   : > { %6174 = vrot.lane.b32.xlu0 %v6094_v2, %s9235_s15 }
 0x422   : > { %v11347_v35 = vpop.permute.xlu1 %5232 }
 0x423   : > { %13281 = vst [vmem:[#allocation230_spill] sm:$0xff] %v11347_v35  ;;  %v11349_v54 = vpop.permute.xlu0 %4846 }
 0x424   : > { %13282 = vst [vmem:[#allocation231_spill] sm:$0xff] %v11349_v54  ;;  %5244 = vrot.lane.b32.xlu1 %v11351_v44, %s9233_s11 }
 0x425   : > { %4858 = vrot.lane.b32.xlu0 %v4764_v9, %s9231_s5 }
 0x426   : > { %v11356_v5 = vpop.permute.xlu1 %5592 }
 0x427   : > { %13283 = vst [vmem:[#allocation232_spill] sm:$0xff] %v11356_v5  ;;  %v11358_v47 = vpop.permute.xlu0 %5038 }
 0x428   : > { %13284 = vst [vmem:[#allocation233_spill] sm:$0xff] %v11358_v47  ;;  %5604 = vrot.lane.b32.xlu1 %v4765_v56, %s9238_s24 }
 0x429   : > { %5050 = vrot.lane.b32.xlu0 %v4956_v49, %s9232_s10 }
 0x42a   : > { %v11362_v2 = vpop.permute.xlu1 %5784 }
 0x42b   : > { %13285 = vst [vmem:[#allocation234_spill] sm:$0xff] %v11362_v2  ;;  %v11364_v35 = vpop.permute.xlu0 %5590 }
 0x42c   : > { %13286 = vst [vmem:[#allocation235_spill] sm:$0xff] %v11364_v35  ;;  %5796 = vrot.lane.b32.xlu1 %v4957_v0, %s9239_s20 }
 0x42d   : > { %5602 = vrot.lane.b32.xlu0 %v4764_v9, %s9238_s24 }
 0x42e   : > { %v11368_v54 = vpop.permute.xlu1 %5976 }
 0x42f   : > { %13287 = vst [vmem:[#allocation236_spill] sm:$0xff] %v11368_v54  ;;  %v11370_v57 = vpop.permute.xlu0 %5782 }
 0x430   : > { %13288 = vst [vmem:[#allocation237_spill] sm:$0xff] %v11370_v57  ;;  %5988 = vrot.lane.b32.xlu1 %v11351_v44, %s9240_s25 }
 0x431   : > { %5794 = vrot.lane.b32.xlu0 %v4956_v49, %s9239_s20 }
 0x432   : > { %v11375_v47 = vpop.permute.xlu1 %6337 }
 0x433   : > { %13289 = vst [vmem:[#allocation238_spill] sm:$0xff] %v11375_v47  ;;  %v11377_v5 = vpop.permute.xlu0 %6335  ;;  %v11391_v47 = vld [vmem:[#allocation2 + $0x35a] sm:$0xff] }
 0x434   : > { %13290 = vst [vmem:[#allocation239_spill] sm:$0xff] %v11377_v5  ;;  %6349 = vrot.lane.b32.xlu1 %v4765_v56, %s9236_s19 }
 0x435   : > { %6347 = vrot.lane.b32.xlu0 %v4764_v9, %s9236_s19 }
 0x436   : > { %v11381_v35 = vpop.permute.xlu1 %6529 }
 0x437   : > { %13291 = vst [vmem:[#allocation240_spill] sm:$0xff] %v11381_v35  ;;  %v11383_v2 = vpop.permute.xlu0 %6527  ;;  %v6096_v35 = vld [vmem:[#allocation2 + $0x360] sm:$0xff] }
 0x438   : > { %13292 = vst [vmem:[#allocation241_spill] sm:$0xff] %v11383_v2  ;;  %6541 = vrot.lane.b32.xlu1 %v4957_v0, %s9237_s22  ;;  %v5523_v2 = vld [vmem:[#allocation2 + $0x37e] sm:$0xff] }
 0x439   : > { %6539 = vrot.lane.b32.xlu0 %v4956_v49, %s9237_s22 }
 0x43a   : > { %v11387_v57 = vpop.permute.xlu1 %6721 }
 0x43b   : > { %13293 = vst [vmem:[#allocation242_spill] sm:$0xff] %v11387_v57  ;;  %v11389_v54 = vpop.permute.xlu0 %5230  ;;  %v5715_v57 = vld [vmem:[#allocation2 + $0x384] sm:$0xff] }
 0x43c   : > { %13294 = vst [vmem:[#allocation243_spill] sm:$0xff] %v11389_v54  ;;  %5416 = vrot.lane.b32.xlu1 %v5331_v4, %s9234_s12  ;;  %v5522_v54 = vld [vmem:[#allocation2 + $0x376] sm:$0xff] }
 0x43d   : > { %5242 = vrot.lane.b32.xlu0 %v11391_v47, %s9233_s11 }
 0x43e   : > { %v11396_v56 = vpop.permute.xlu1 %5404 }
 0x43f   : > { %13295 = vst [vmem:[#allocation244_spill] sm:$0xff] %v11396_v56  ;;  %v11398_v9 = vpop.permute.xlu0 %5974  ;;  %v5714_v56 = vld [vmem:[#allocation2 + $0x37c] sm:$0xff] }
 0x440   : > { %13296 = vst [vmem:[#allocation245_spill] sm:$0xff] %v11398_v9  ;;  %5608 = vrot.lane.b32.xlu1 %v5523_v2, %s9238_s24  ;;  %v11413_v9 = vld [vmem:[#allocation2 + $0x38a] sm:$0xff] }
 0x441   : > { %5986 = vrot.lane.b32.xlu0 %v11391_v47, %s9240_s25 }
 0x442   : > { %v11403_v49 = vpop.permute.xlu1 %4852 }
 0x443   : > { %13297 = vst [vmem:[#allocation246_spill] sm:$0xff] %v11403_v49  ;;  %v11405_v0 = vpop.permute.xlu0 %6166 }
 0x444   : > { %13298 = vst [vmem:[#allocation247_spill] sm:$0xff] %v11405_v0  ;;  %5800 = vrot.lane.b32.xlu1 %v5715_v57, %s9239_s20 }
 0x445   : > { %6178 = vrot.lane.b32.xlu0 %v6096_v35, %s9235_s15 }
 0x446   : > { %v11409_v4 = vpop.permute.xlu1 %5044 }
 0x447   : > { %13299 = vst [vmem:[#allocation248_spill] sm:$0xff] %v11409_v4  ;;  %v11411_v5 = vpop.permute.xlu0 %6719 }
 0x448   : > { %13300 = vst [vmem:[#allocation249_spill] sm:$0xff] %v11411_v5  ;;  %5992 = vrot.lane.b32.xlu1 %v11413_v9, %s9240_s25 }
 0x449   : > { %5606 = vrot.lane.b32.xlu0 %v5522_v54, %s9238_s24 }
 0x44a   : > { %v11418_v49 = vpop.permute.xlu1 %5236 }
 0x44b   : > { %13301 = vst [vmem:[#allocation250_spill] sm:$0xff] %v11418_v49  ;;  %v11420_v0 = vpop.permute.xlu0 %4850  ;;  %v5333_v49 = vld [vmem:[#allocation2 + $0x3a0] sm:$0xff] }
 0x44c   : > { %13302 = vst [vmem:[#allocation251_spill] sm:$0xff] %v11420_v0  ;;  %6353 = vrot.lane.b32.xlu1 %v5523_v2, %s9236_s19 }
 0x44d   : > { %5798 = vrot.lane.b32.xlu0 %v5714_v56, %s9239_s20 }
 0x44e   : > { %v11424_v35 = vpop.permute.xlu1 %5596 }
 0x44f   : > { %13303 = vst [vmem:[#allocation252_spill] sm:$0xff] %v11424_v35  ;;  %v11426_v5 = vpop.permute.xlu0 %5042  ;;  %v5525_v35 = vld [vmem:[#allocation2 + $0x3a6] sm:$0xff] }
 0x450   : > { %13304 = vst [vmem:[#allocation253_spill] sm:$0xff] %v11426_v5  ;;  %6545 = vrot.lane.b32.xlu1 %v5715_v57, %s9237_s22  ;;  %v5524_v5 = vld [vmem:[#allocation2 + $0x39e] sm:$0xff] }
 0x451   : > { %6351 = vrot.lane.b32.xlu0 %v5522_v54, %s9236_s19 }
 0x452   : > { %v11430_v4 = vpop.permute.xlu1 %5788 }
 0x453   : > { %13305 = vst [vmem:[#allocation254_spill] sm:$0xff] %v11430_v4  ;;  %v11432_v51 = vpop.permute.xlu0 %5594  ;;  %v5716_v4 = vld [vmem:[#allocation2 + $0x3a4] sm:$0xff] }
 0x454   : > { %13306 = vst [vmem:[#allocation255_spill] sm:$0xff] %v11432_v51  ;;  %5420 = vrot.lane.b32.xlu1 %v5333_v49, %s9234_s12  ;;  %v5717_v51 = vld [vmem:[#allocation2 + $0x3ac] sm:$0xff] }
 0x455   : > { %6543 = vrot.lane.b32.xlu0 %v5714_v56, %s9237_s22  ;;  %v6098_v49 = vld [vmem:[#allocation2 + $0x388] sm:$0xff] }
 0x456   : > { %v11436_v2 = vpop.permute.xlu1 %5980 }
 0x457   : > { %13307 = vst [vmem:[#allocation256_spill] sm:$0xff] %v11436_v2  ;;  %v11438_v0 = vpop.permute.xlu0 %5786  ;;  %v11455_v2 = vld [vmem:[#allocation2 + $0x3b2] sm:$0xff] }
 0x458   : > { %13308 = vst [vmem:[#allocation257_spill] sm:$0xff] %v11438_v0  ;;  %5612 = vrot.lane.b32.xlu1 %v5525_v35, %s9238_s24 }
 0x459   : > { %5990 = vrot.lane.b32.xlu0 %v11440_v11, %s9240_s25 }
 0x45a   : > { %v11445_v57 = vpop.permute.xlu1 %6341 }
 0x45b   : > { %13309 = vst [vmem:[#allocation258_spill] sm:$0xff] %v11445_v57  ;;  %v11447_v54 = vpop.permute.xlu0 %6339 }
 0x45c   : > { %13310 = vst [vmem:[#allocation259_spill] sm:$0xff] %v11447_v54  ;;  %5804 = vrot.lane.b32.xlu1 %v5717_v51, %s9239_s20 }
 0x45d   : > { %6182 = vrot.lane.b32.xlu0 %v6098_v49, %s9235_s15 }
 0x45e   : > { %v11451_v56 = vpop.permute.xlu1 %6533 }
 0x45f   : > { %13311 = vst [vmem:[#allocation260_spill] sm:$0xff] %v11451_v56  ;;  %v11453_v0 = vpop.permute.xlu0 %6531 }
 0x460   : > { %13312 = vst [vmem:[#allocation261_spill] sm:$0xff] %v11453_v0  ;;  %5996 = vrot.lane.b32.xlu1 %v11455_v2, %s9240_s25 }
 0x461   : > { %5610 = vrot.lane.b32.xlu0 %v5524_v5, %s9238_s24 }
 0x462   : > { %v11460_v57 = vpop.permute.xlu1 %6725 }
 0x463   : > { %13313 = vst [vmem:[#allocation262_spill] sm:$0xff] %v11460_v57  ;;  %v11462_v54 = vpop.permute.xlu0 %5234  ;;  %v11476_v57 = vld [vmem:[#allocation2 + $0x3c8] sm:$0xff] }
 0x464   : > { %13314 = vst [vmem:[#allocation263_spill] sm:$0xff] %v11462_v54  ;;  %6357 = vrot.lane.b32.xlu1 %v5525_v35, %s9236_s19 }
 0x465   : > { %5802 = vrot.lane.b32.xlu0 %v5716_v4, %s9239_s20 }
 0x466   : > { %v11466_v49 = vpop.permute.xlu1 %5408 }
 0x467   : > { %13315 = vst [vmem:[#allocation264_spill] sm:$0xff] %v11466_v49  ;;  %v11468_v0 = vpop.permute.xlu0 %5978  ;;  %v11485_v49 = vld [vmem:[#allocation2 + $0x3aa] sm:$0xff] }
 0x468   : > { %13316 = vst [vmem:[#allocation265_spill] sm:$0xff] %v11468_v0  ;;  %6549 = vrot.lane.b32.xlu1 %v5717_v51, %s9237_s22  ;;  %v5527_v0 = vld [vmem:[#allocation2 + $0x3ce] sm:$0xff] }
 0x469   : > { %6355 = vrot.lane.b32.xlu0 %v5524_v5, %s9236_s19 }
 0x46a   : > { %v11472_v56 = vpop.permute.xlu1 %4856 }
 0x46b   : > { %13317 = vst [vmem:[#allocation266_spill] sm:$0xff] %v11472_v56  ;;  %v11474_v31 = vpop.permute.xlu0 %6170  ;;  %v6100_v56 = vld [vmem:[#allocation2 + $0x3b0] sm:$0xff] }
 0x46c   : > { %13318 = vst [vmem:[#allocation267_spill] sm:$0xff] %v11474_v31  ;;  %5424 = vrot.lane.b32.xlu1 %v11476_v57, %s9234_s12  ;;  %v11494_v31 = vld [vmem:[#allocation2 + $0x3d4] sm:$0xff] }
 0x46d   : > { %6547 = vrot.lane.b32.xlu0 %v5716_v4, %s9237_s22 }
 0x46e   : > { %v11481_v35 = vpop.permute.xlu1 %5048 }
 0x46f   : > { %13319 = vst [vmem:[#allocation268_spill] sm:$0xff] %v11481_v35  ;;  %v11483_v54 = vpop.permute.xlu0 %6723  ;;  %v11503_v35 = vld [vmem:[#allocation2 + $0x3da] sm:$0xff] }
 0x470   : > { %13320 = vst [vmem:[#allocation269_spill] sm:$0xff] %v11483_v54  ;;  %5616 = vrot.lane.b32.xlu1 %v5527_v0, %s9238_s24 }
 0x471   : > { %5994 = vrot.lane.b32.xlu0 %v11485_v49, %s9240_s25 }
 0x472   : > { %v11490_v51 = vpop.permute.xlu1 %5240 }
 0x473   : > { %13321 = vst [vmem:[#allocation270_spill] sm:$0xff] %v11490_v51  ;;  %v11492_v5 = vpop.permute.xlu0 %4854 }
 0x474   : > { %13322 = vst [vmem:[#allocation271_spill] sm:$0xff] %v11492_v5  ;;  %5808 = vrot.lane.b32.xlu1 %v11494_v31, %s9239_s20 }
 0x475   : > { %6186 = vrot.lane.b32.xlu0 %v6100_v56, %s9235_s15 }
 0x476   : > { %v11499_v4 = vpop.permute.xlu1 %5600 }
 0x477   : > { %13323 = vst [vmem:[#allocation272_spill] sm:$0xff] %v11499_v4  ;;  %v11501_v54 = vpop.permute.xlu0 %5046 }
 0x478   : > { %13324 = vst [vmem:[#allocation273_spill] sm:$0xff] %v11501_v54  ;;  %6000 = vrot.lane.b32.xlu1 %v11503_v35, %s9240_s25 }
 0x479   : > { %5614 = vrot.lane.b32.xlu0 %v5526_v12, %s9238_s24 }
 0x47a   : > { %v11508_v51 = vpop.permute.xlu1 %5792 }
 0x47b   : > { %13325 = vst [vmem:[#allocation274_spill] sm:$0xff] %v11508_v51  ;;  %v11510_v5 = vpop.permute.xlu0 %5598 }
 0x47c   : > { %13326 = vst [vmem:[#allocation275_spill] sm:$0xff] %v11510_v5  ;;  %6361 = vrot.lane.b32.xlu1 %v5527_v0, %s9236_s19  ;;  %v11528_v5 = vld [vmem:[#allocation2 + $0x3f0] sm:$0xff] }
 0x47d   : > { %5806 = vrot.lane.b32.xlu0 %v11512_v46, %s9239_s20 }
 0x47e   : > { %v11517_v56 = vpop.permute.xlu1 %5984 }
 0x47f   : > { %13327 = vst [vmem:[#allocation276_spill] sm:$0xff] %v11517_v56  ;;  %v11519_v54 = vpop.permute.xlu0 %5790  ;;  %v5529_v56 = vld [vmem:[#allocation2 + $0x3f6] sm:$0xff] }
 0x480   : > { %13328 = vst [vmem:[#allocation277_spill] sm:$0xff] %v11519_v54  ;;  %6553 = vrot.lane.b32.xlu1 %v11494_v31, %s9237_s22 }
 0x481   : > { %6359 = vrot.lane.b32.xlu0 %v5526_v12, %s9236_s19 }
 0x482   : > { %v11524_v4 = vpop.permute.xlu1 %6345 }
 0x483   : > { %13329 = vst [vmem:[#allocation278_spill] sm:$0xff] %v11524_v4  ;;  %v11526_v51 = vpop.permute.xlu0 %6343  ;;  %v11547_v4 = vld [vmem:[#allocation2 + $0x3fc] sm:$0xff] }
 0x484   : > { %13330 = vst [vmem:[#allocation279_spill] sm:$0xff] %v11526_v51  ;;  %5428 = vrot.lane.b32.xlu1 %v11528_v5, %s9234_s12 }
 0x485   : > { %6551 = vrot.lane.b32.xlu0 %v11512_v46, %s9237_s22 }
 0x486   : > { %v11534_v0 = vpop.permute.xlu1 %6537 }
 0x487   : > { %13331 = vst [vmem:[#allocation280_spill] sm:$0xff] %v11534_v0  ;;  %v11536_v54 = vpop.permute.xlu0 %6535 }
 0x488   : > { %13332 = vst [vmem:[#allocation281_spill] sm:$0xff] %v11536_v54  ;;  %5620 = vrot.lane.b32.xlu1 %v5529_v56, %s9238_s24 }
 0x489   : > { %5998 = vrot.lane.b32.xlu0 %v11538_v30, %s9240_s25 }
 0x48a   : > { %v11543_v12 = vpop.permute.xlu1 %5412 }
 0x48b   : > { %13333 = vst [vmem:[#allocation282_spill] sm:$0xff] %v11543_v12  ;;  %v11545_v51 = vpop.permute.xlu0 %5238 }
 0x48c   : > { %13334 = vst [vmem:[#allocation283_spill] sm:$0xff] %v11545_v51  ;;  %5812 = vrot.lane.b32.xlu1 %v11547_v4, %s9239_s20 }
 0x48d   : > { %6190 = vrot.lane.b32.xlu0 %v6102_v58, %s9235_s15 }
 0x48e   : > { %v11552_v54 = vpop.permute.xlu1 %4860 }
 0x48f   : > { %v11554_v0 = vpop.permute.xlu0 %5982 }
 0x490   : > { %13335 = vst [vmem:[#allocation284_spill] sm:$0xff] %v11554_v0  ;;  %6004 = vrot.lane.b32.xlu1 %v11556_v60, %s9240_s25 }
 0x491   : > { %5618 = vrot.lane.b32.xlu0 %v5528_v40, %s9238_s24 }
 0x492   : > { %v11561_v51 = vpop.permute.xlu1 %5052 }
 0x493   : > { %v11563_v12 = vpop.permute.xlu0 %6174 }
 0x494   : > { %13336 = vst [vmem:[#allocation285_spill] sm:$0xff] %v11563_v12  ;;  %6365 = vrot.lane.b32.xlu1 %v5529_v56, %s9236_s19  ;;  %v11581_v12 = vld [vmem:[#allocation2 + $0x418] sm:$0xff] }
 0x495   : > { %5810 = vrot.lane.b32.xlu0 %v11565_v42, %s9239_s20 }
 0x496   : > { %v11570_v58 = vpop.permute.xlu1 %5244 }
 0x497   : > { %v11572_v0 = vpop.permute.xlu0 %4858 }
 0x498   : > { %6557 = vrot.lane.b32.xlu1 %v11547_v4, %s9237_s22 }
 0x499   : > { %6363 = vrot.lane.b32.xlu0 %v5528_v40, %s9236_s19 }
 0x49a   : > { %v11577_v43 = vpop.permute.xlu1 %5604 }
 0x49b   : > { %13337 = vst [vmem:[#allocation286_spill] sm:$0xff] %v11577_v43  ;;  %v11579_v59 = vpop.permute.xlu0 %5050 }
 0x49c   : > { %5432 = vrot.lane.b32.xlu1 %v11581_v12, %s9234_s12 }
 0x49d   : > { %6555 = vrot.lane.b32.xlu0 %v11565_v42, %s9237_s22 }
 0x49e   : > { %v11587_v56 = vpop.permute.xlu1 %5796 }
 0x49f   : > { %13338 = vst [vmem:[#allocation287_spill] sm:$0xff] %v11587_v56  ;;  %v11589_v7 = vpop.permute.xlu0 %5602 }
 0x4a0   : > { %13339 = vst [vmem:[#allocation288_spill] sm:$0xff] %v11589_v7  ;;  %5624 = vrot.lane.b32.xlu1 %v5531_v3, %s9238_s24 }
 0x4a1   : > { %6002 = vrot.lane.b32.xlu0 %v11591_v16, %s9240_s25 }
 0x4a2   : > { %v11596_v40 = vpop.permute.xlu1 %5988 }
 0x4a3   : > { %13340 = vst [vmem:[#allocation289_spill] sm:$0xff] %v11596_v40  ;;  %v11598_v43 = vpop.permute.xlu0 %5794 }
 0x4a4   : > { %13341 = vst [vmem:[#allocation290_spill] sm:$0xff] %v11598_v43  ;;  %5816 = vrot.lane.b32.xlu1 %v11600_v48, %s9239_s20 }
 0x4a5   : > { %6194 = vrot.lane.b32.xlu0 %v6104_v21, %s9235_s15 }
 0x4a6   : > { %v11605_v7 = vpop.permute.xlu1 %6349 }
 0x4a7   : > { %13342 = vst [vmem:[#allocation291_spill] sm:$0xff] %v11605_v7  ;;  %v11607_v56 = vpop.permute.xlu0 %6347 }
 0x4a8   : > { %13343 = vst [vmem:[#allocation292_spill] sm:$0xff] %v11607_v56  ;;  %6008 = vrot.lane.b32.xlu1 %v11609_v39, %s9240_s25 }
 0x4a9   : > { %5622 = vrot.lane.b32.xlu0 %v5530_v26, %s9238_s24 }
 0x4aa   : > { %v11614_v43 = vpop.permute.xlu1 %6541 }
 0x4ab   : > { %13344 = vst [vmem:[#allocation293_spill] sm:$0xff] %v11614_v43  ;;  %v11616_v40 = vpop.permute.xlu0 %6539 }
 0x4ac   : > { %13345 = vst [vmem:[#allocation294_spill] sm:$0xff] %v11616_v40  ;;  %6369 = vrot.lane.b32.xlu1 %v5531_v3, %s9236_s19  ;;  %v11634_v40 = vld [vmem:[#allocation2 + $0x440] sm:$0xff] }
 0x4ad   : > { %5814 = vrot.lane.b32.xlu0 %v11618_v28, %s9239_s20 }
 0x4ae   : > { %v11623_v21 = vpop.permute.xlu1 %5416 }
 0x4af   : > { %13346 = vst [vmem:[#allocation295_spill] sm:$0xff] %v11623_v21  ;;  %v11625_v56 = vpop.permute.xlu0 %5242 }
 0x4b0   : > { %6561 = vrot.lane.b32.xlu1 %v11600_v48, %s9237_s22 }
 0x4b1   : > { %6367 = vrot.lane.b32.xlu0 %v5530_v26, %s9236_s19 }
 0x4b2   : > { %v11630_v7 = vpop.permute.xlu1 %5608 }
 0x4b3   : > { %13347 = vst [vmem:[#allocation296_spill] sm:$0xff] %v11630_v7  ;;  %v11632_v43 = vpop.permute.xlu0 %5986  ;;  %v11653_v7 = vld [vmem:[#allocation2 + $0x44c] sm:$0xff] }
 0x4b4   : > { %13348 = vst [vmem:[#allocation297_spill] sm:$0xff] %v11632_v43  ;;  %5436 = vrot.lane.b32.xlu1 %v11634_v40, %s9234_s12 }
 0x4b5   : > { %6559 = vrot.lane.b32.xlu0 %v11618_v28, %s9237_s22 }
 0x4b6   : > { %v11640_v3 = vpop.permute.xlu1 %5800 }
 0x4b7   : > { %13349 = vst [vmem:[#allocation298_spill] sm:$0xff] %v11640_v3  ;;  %v11642_v21 = vpop.permute.xlu0 %6178 }
 0x4b8   : > { %13350 = vst [vmem:[#allocation299_spill] sm:$0xff] %v11642_v21  ;;  %5628 = vrot.lane.b32.xlu1 %v5533_v6, %s9238_s24 }
 0x4b9   : > { %6006 = vrot.lane.b32.xlu0 %v11644_v32, %s9240_s25 }
 0x4ba   : > { %v11649_v26 = vpop.permute.xlu1 %5992 }
 0x4bb   : > { %13351 = vst [vmem:[#allocation300_spill] sm:$0xff] %v11649_v26  ;;  %v11651_v43 = vpop.permute.xlu0 %5606 }
 0x4bc   : > { %13352 = vst [vmem:[#allocation301_spill] sm:$0xff] %v11651_v43  ;;  %5820 = vrot.lane.b32.xlu1 %v11653_v7, %s9239_s20 }
 0x4bd   : > { %6198 = vrot.lane.b32.xlu0 %v11655_v62, %s9235_s15 }
 0x4be   : > { %v11661_v21 = vpop.permute.xlu1 %6353 }
 0x4bf   : > { %13353 = vst [vmem:[#allocation302_spill] sm:$0xff] %v11661_v21  ;;  %v11663_v3 = vpop.permute.xlu0 %5798 }
 0x4c0   : > { %13354 = vst [vmem:[#allocation303_spill] sm:$0xff] %v11663_v3  ;;  %6012 = vrot.lane.b32.xlu1 %v5917_v8, %s9240_s25 }
 0x4c1   : > { %5626 = vrot.lane.b32.xlu0 %v5532_v10, %s9238_s24 }
 0x4c2   : > { %v11667_v43 = vpop.permute.xlu1 %6545 }
 0x4c3   : > { %13355 = vst [vmem:[#allocation304_spill] sm:$0xff] %v11667_v43  ;;  %v11669_v26 = vpop.permute.xlu0 %6351 }
 0x4c4   : > { %13356 = vst [vmem:[#allocation305_spill] sm:$0xff] %v11669_v26  ;;  %6373 = vrot.lane.b32.xlu1 %v5533_v6, %s9236_s19 }
 0x4c5   : > { %5818 = vrot.lane.b32.xlu0 %v11671_v52, %s9239_s20 }
 0x4c6   : > { %v11676_v21 = vpop.permute.xlu1 %5420 }
 0x4c7   : > { %v11678_v3 = vpop.permute.xlu0 %6543 }
 0x4c8   : > { %13357 = vst [vmem:[#allocation306_spill] sm:$0xff] %v11678_v3  ;;  %6565 = vrot.lane.b32.xlu1 %v11653_v7, %s9237_s22  ;;  %v5916_v3 = vld [vmem:[#allocation2 + $0x44a] sm:$0xff] }
 0x4c9   : > { %6371 = vrot.lane.b32.xlu0 %v5532_v10, %s9236_s19 }
 0x4ca   : > { %v11683_v20 = vpop.permute.xlu1 %5612 }
 0x4cb   : > { %13358 = vst [vmem:[#allocation307_spill] sm:$0xff] %v11683_v20  ;;  %v11685_v43 = vpop.permute.xlu0 %5990 }
 0x4cc   : > { %13359 = vst [vmem:[#allocation308_spill] sm:$0xff] %v11685_v43  ;;  %6729 = vrot.lane.b32.xlu1 %v11289_v37, %s9241_s26  ;;  %v11702_v43 = vld [vmem:[#allocation2 + $0x450] sm:$0xff] }
 0x4cd   : > { %6563 = vrot.lane.b32.xlu0 %v11671_v52, %s9237_s22 }
 0x4ce   : > { %v11691_v6 = vpop.permute.xlu1 %5804 }
 0x4cf   : > { %v11693_v26 = vpop.permute.xlu0 %6182 }
 0x4d0   : > { %13360 = vst [vmem:[#allocation309_spill] sm:$0xff] %v11693_v26  ;;  %6733 = vrot.lane.b32.xlu1 %v11351_v44, %s9241_s26 }
 0x4d1   : > { %6010 = vrot.lane.b32.xlu0 %v5916_v3, %s9240_s25 }
 0x4d2   : > { %v11698_v10 = vpop.permute.xlu1 %5996 }
 0x4d3   : > { %v11700_v20 = vpop.permute.xlu0 %5610 }
 0x4d4   : > { %13361 = vst [vmem:[#allocation310_spill] sm:$0xff] %v11700_v20  ;;  %6737 = vrot.lane.b32.xlu1 %v11413_v9, %s9241_s26 }
 0x4d5   : > { %6202 = vrot.lane.b32.xlu0 %v11702_v43, %s9235_s15 }
 0x4d6   : > { %v11708_v37 = vpop.permute.xlu1 %6357 }
 0x4d7   : > { %13362 = vst [vmem:[#allocation311_spill] sm:$0xff] %v11708_v37  ;;  %v11710_v26 = vpop.permute.xlu0 %5802 }
 0x4d8   : > { %13363 = vst [vmem:[#allocation312_spill] sm:$0xff] %v11710_v26  ;;  %6741 = vrot.lane.b32.xlu1 %v11455_v2, %s9241_s26 }
 0x4d9   : > { %6727 = vrot.lane.b32.xlu0 %v11329_v18, %s9241_s26 }
 0x4da   : > { %v11716_v44 = vpop.permute.xlu1 %6549 }
 0x4db   : > { %13364 = vst [vmem:[#allocation313_spill] sm:$0xff] %v11716_v44  ;;  %v11718_v20 = vpop.permute.xlu0 %6355  ;;  %v13486_v44 = vld [vmem:[#allocation40_spill] sm:$0xff] }
 0x4dc   : > { %13365 = vst [vmem:[#allocation314_spill] sm:$0xff] %v11718_v20  ;;  %6745 = vrot.lane.b32.xlu1 %v11503_v35, %s9241_s26 }
 0x4dd   : > { %6731 = vrot.lane.b32.xlu0 %v11391_v47, %s9241_s26 }
 0x4de   : > { %v11724_v9 = vpop.permute.xlu1 %5424 }
 0x4df   : > { %13366 = vst [vmem:[#allocation315_spill] sm:$0xff] %v11724_v9  ;;  %v11726_v37 = vpop.permute.xlu0 %6547 }
 0x4e0   : > { %13367 = vst [vmem:[#allocation316_spill] sm:$0xff] %v11726_v37  ;;  %6749 = vrot.lane.b32.xlu1 %v11556_v60, %s9241_s26  ;;  %v6676_v60 = vld [vmem:[#allocation2 + $0x47a] sm:$0xff] }
 0x4e1   : > { %6735 = vrot.lane.b32.xlu0 %v11440_v11, %s9241_s26 }
 0x4e2   : > { %v11732_v18 = vpop.permute.xlu1 %5616 }
 0x4e3   : > { %13368 = vst [vmem:[#allocation317_spill] sm:$0xff] %v11732_v18  ;;  %v11734_v2 = vpop.permute.xlu0 %5994 }
 0x4e4   : > { %13369 = vst [vmem:[#allocation318_spill] sm:$0xff] %v11734_v2  ;;  %6753 = vrot.lane.b32.xlu1 %v11609_v39, %s9241_s26  ;;  %v6678_v39 = vld [vmem:[#allocation2 + $0x4a2] sm:$0xff] }
 0x4e5   : > { %6739 = vrot.lane.b32.xlu0 %v11485_v49, %s9241_s26 }
 0x4e6   : > { %v11740_v47 = vpop.permute.xlu1 %5808 }
 0x4e7   : > { %13370 = vst [vmem:[#allocation319_spill] sm:$0xff] %v11740_v47  ;;  %v11742_v35 = vpop.permute.xlu0 %6186 }
 0x4e8   : > { %13371 = vst [vmem:[#allocation320_spill] sm:$0xff] %v11742_v35  ;;  %6757 = vrot.lane.b32.xlu1 %v5917_v8, %s9241_s26 }
 0x4e9   : > { %6743 = vrot.lane.b32.xlu0 %v11538_v30, %s9241_s26  ;;  %v6680_v30 = vld [vmem:[#allocation2 + $0x4ca] sm:$0xff] }
 0x4ea   : > { %v11747_v11 = vpop.permute.xlu1 %6000 }
 0x4eb   : > { %13372 = vst [vmem:[#allocation321_spill] sm:$0xff] %v11747_v11  ;;  %v11749_v37 = vpop.permute.xlu0 %5614 }
 0x4ec   : > { %13373 = vst [vmem:[#allocation322_spill] sm:$0xff] %v11749_v37  ;;  %6761 = vrot.lane.b32.xlu1 %v6676_v60, %s9241_s26  ;;  %v6675_v60 = vld [vmem:[#allocation2 + $0x472] sm:$0xff] }
 0x4ed   : > { %6747 = vrot.lane.b32.xlu0 %v11591_v16, %s9241_s26  ;;  %v6682_v16 = vld [vmem:[#allocation2 + $0x4f2] sm:$0xff] }
 0x4ee   : > { %v11754_v49 = vpop.permute.xlu1 %6361 }
 0x4ef   : > { %13374 = vst [vmem:[#allocation323_spill] sm:$0xff] %v11754_v49  ;;  %v11756_v47 = vpop.permute.xlu0 %5806 }
 0x4f0   : > { %13375 = vst [vmem:[#allocation324_spill] sm:$0xff] %v11756_v47  ;;  %6765 = vrot.lane.b32.xlu1 %v6678_v39, %s9241_s26  ;;  %v6677_v39 = vld [vmem:[#allocation2 + $0x49a] sm:$0xff] }
 0x4f1   : > { %6751 = vrot.lane.b32.xlu0 %v11644_v32, %s9241_s26  ;;  %v6684_v32 = vld [vmem:[#allocation2 + $0x51a] sm:$0xff] }
 0x4f2   : > { %v11761_v8 = vpop.permute.xlu1 %6553 }
 0x4f3   : > { %13376 = vst [vmem:[#allocation325_spill] sm:$0xff] %v11761_v8  ;;  %v11763_v11 = vpop.permute.xlu0 %6359 }
 0x4f4   : > { %13377 = vst [vmem:[#allocation326_spill] sm:$0xff] %v11763_v11  ;;  %6769 = vrot.lane.b32.xlu1 %v6680_v30, %s9241_s26  ;;  %v6679_v30 = vld [vmem:[#allocation2 + $0x4c2] sm:$0xff] }
 0x4f5   : > { %6755 = vrot.lane.b32.xlu0 %v5916_v3, %s9241_s26  ;;  %v6686_v3 = vld [vmem:[#allocation2 + $0x542] sm:$0xff] }
 0x4f6   : > { %v11767_v37 = vpop.permute.xlu1 %5428 }
 0x4f7   : > { %13378 = vst [vmem:[#allocation327_spill] sm:$0xff] %v11767_v37  ;;  %v11769_v18 = vpop.permute.xlu0 %6551 }
 0x4f8   : > { %13379 = vst [vmem:[#allocation328_spill] sm:$0xff] %v11769_v18  ;;  %6773 = vrot.lane.b32.xlu1 %v6682_v16, %s9241_s26  ;;  %v6681_v16 = vld [vmem:[#allocation2 + $0x4ea] sm:$0xff] }
 0x4f9   : > { %6759 = vrot.lane.b32.xlu0 %v6675_v60, %s9241_s26 }
 0x4fa   : > { %v11773_v47 = vpop.permute.xlu1 %5620 }
 0x4fb   : > { %13380 = vst [vmem:[#allocation329_spill] sm:$0xff] %v11773_v47  ;;  %v11775_v8 = vpop.permute.xlu0 %5998 }
 0x4fc   : > { %13381 = vst [vmem:[#allocation330_spill] sm:$0xff] %v11775_v8  ;;  %6777 = vrot.lane.b32.xlu1 %v6684_v32, %s9241_s26  ;;  %v6683_v32 = vld [vmem:[#allocation2 + $0x512] sm:$0xff] }
 0x4fd   : > { %6763 = vrot.lane.b32.xlu0 %v6677_v39, %s9241_s26 }
 0x4fe   : > { %v11779_v11 = vpop.permute.xlu1 %5812 }
 0x4ff   : > { %13382 = vst [vmem:[#allocation331_spill] sm:$0xff] %v11779_v11  ;;  %v11781_v37 = vpop.permute.xlu0 %6190 }
 0x500   : > { %13383 = vst [vmem:[#allocation332_spill] sm:$0xff] %v11781_v37  ;;  %6781 = vrot.lane.b32.xlu1 %v6686_v3, %s9241_s26  ;;  %v6685_v3 = vld [vmem:[#allocation2 + $0x53a] sm:$0xff] }
 0x501   : > { %6767 = vrot.lane.b32.xlu0 %v6679_v30, %s9241_s26 }
 0x502   : > { %v11785_v60 = vpop.permute.xlu1 %6004 }
 0x503   : > { %13384 = vst [vmem:[#allocation333_spill] sm:$0xff] %v11785_v60  ;;  %v11787_v18 = vpop.permute.xlu0 %5618 }
 0x504   : > { %13385 = vst [vmem:[#allocation334_spill] sm:$0xff] %v11787_v18  ;;  %6914 = vrot.lane.b32.xlu1 %v11476_v57, %s9242_s27 }
 0x505   : > { %6771 = vrot.lane.b32.xlu0 %v6681_v16, %s9241_s26 }
 0x506   : > { %v11792_v39 = vpop.permute.xlu1 %6365 }
 0x507   : > { %13386 = vst [vmem:[#allocation335_spill] sm:$0xff] %v11792_v39  ;;  %v11794_v8 = vpop.permute.xlu0 %5810 }
 0x508   : > { %13387 = vst [vmem:[#allocation336_spill] sm:$0xff] %v11794_v8  ;;  %6918 = vrot.lane.b32.xlu1 %v11528_v5, %s9242_s27  ;;  %v11812_v5 = vld [vmem:[#allocation2 + $0x8] sm:$0xff] }
 0x509   : > { %6775 = vrot.lane.b32.xlu0 %v6683_v32, %s9241_s26 }
 0x50a   : > { %v11799_v30 = vpop.permute.xlu1 %6557 }
 0x50b   : > { %13388 = vst [vmem:[#allocation337_spill] sm:$0xff] %v11799_v30  ;;  %v11801_v37 = vpop.permute.xlu0 %6363 }
 0x50c   : > { %13389 = vst [vmem:[#allocation338_spill] sm:$0xff] %v11801_v37  ;;  %6922 = vrot.lane.b32.xlu1 %v11581_v12, %s9242_s27 }
 0x50d   : > { %6779 = vrot.lane.b32.xlu0 %v6685_v3, %s9241_s26 }
 0x50e   : > { %v11806_v57 = vpop.permute.xlu1 %5432 }
 0x50f   : > { %13390 = vst [vmem:[#allocation339_spill] sm:$0xff] %v11806_v57  ;;  %v11808_v16 = vpop.permute.xlu0 %6555 }
 0x510   : > { %13391 = vst [vmem:[#allocation340_spill] sm:$0xff] %v11808_v16  ;;  %6926 = vrot.lane.b32.xlu1 %v11634_v40, %s9242_s27 }
 0x511   : > { %6912 = vrot.lane.b32.xlu0 %v11812_v5, %s9242_s27 }
 0x512   : > { %v11816_v32 = vpop.permute.xlu1 %5624 }
 0x513   : > { %13392 = vst [vmem:[#allocation341_spill] sm:$0xff] %v11816_v32  ;;  %v11818_v8 = vpop.permute.xlu0 %6002 }
 0x514   : > { %13393 = vst [vmem:[#allocation342_spill] sm:$0xff] %v11818_v8  ;;  %6930 = vrot.lane.b32.xlu1 %v11812_v5, %s9242_s27 }
 0x515   : > { %6916 = vrot.lane.b32.xlu0 %v11812_v5, %s9242_s27 }
 0x516   : > { %v11824_v12 = vpop.permute.xlu1 %5816 }
 0x517   : > { %13394 = vst [vmem:[#allocation343_spill] sm:$0xff] %v11824_v12  ;;  %v11826_v3 = vpop.permute.xlu0 %6194 }
 0x518   : > { %13395 = vst [vmem:[#allocation344_spill] sm:$0xff] %v11826_v3  ;;  %6934 = vrot.lane.b32.xlu1 %v11812_v5, %s9242_s27 }
 0x519   : > { %6920 = vrot.lane.b32.xlu0 %v11812_v5, %s9242_s27 }
 0x51a   : > { %v11832_v40 = vpop.permute.xlu1 %6008 }
 0x51b   : > { %13396 = vst [vmem:[#allocation345_spill] sm:$0xff] %v11832_v40  ;;  %v11834_v18 = vpop.permute.xlu0 %5622 }
 0x51c   : > { %13397 = vst [vmem:[#allocation346_spill] sm:$0xff] %v11834_v18  ;;  %6938 = vrot.lane.b32.xlu1 %v11812_v5, %s9242_s27 }
 0x51d   : > { %6924 = vrot.lane.b32.xlu0 %v11812_v5, %s9242_s27 }
 0x51e   : > { %v11840_v8 = vpop.permute.xlu1 %6369 }
 0x51f   : > { %13398 = vst [vmem:[#allocation347_spill] sm:$0xff] %v11840_v8  ;;  %v11842_v12 = vpop.permute.xlu0 %5814 }
 0x520   : > { %13399 = vst [vmem:[#allocation348_spill] sm:$0xff] %v11842_v12  ;;  %6942 = vrot.lane.b32.xlu1 %v11812_v5, %s9242_s27 }
 0x521   : > { %6928 = vrot.lane.b32.xlu0 %v11812_v5, %s9242_s27 }
 0x522   : > { %v11848_v3 = vpop.permute.xlu1 %6561 }
 0x523   : > { %13400 = vst [vmem:[#allocation349_spill] sm:$0xff] %v11848_v3  ;;  %v11850_v40 = vpop.permute.xlu0 %6367 }
 0x524   : > { %13401 = vst [vmem:[#allocation350_spill] sm:$0xff] %v11850_v40  ;;  %6946 = vrot.lane.b32.xlu1 %v11812_v5, %s9242_s27 }
 0x525   : > { %6932 = vrot.lane.b32.xlu0 %v11812_v5, %s9242_s27 }
 0x526   : > { %v11856_v18 = vpop.permute.xlu1 %5436 }
 0x527   : > { %v11858_v16 = vpop.permute.xlu0 %6559 }
 0x528   : > { %13402 = vst [vmem:[#allocation351_spill] sm:$0xff] %v11858_v16  ;;  %6950 = vrot.lane.b32.xlu1 %v11812_v5, %s9242_s27 }
 0x529   : > { %6936 = vrot.lane.b32.xlu0 %v11812_v5, %s9242_s27 }
 0x52a   : > { %v11864_v12 = vpop.permute.xlu1 %5628 }
 0x52b   : > { %v11866_v32 = vpop.permute.xlu0 %6006 }
 0x52c   : > { %13403 = vst [vmem:[#allocation352_spill] sm:$0xff] %v11866_v32  ;;  %6954 = vrot.lane.b32.xlu1 %v11812_v5, %s9242_s27 }
 0x52d   : > { %6940 = vrot.lane.b32.xlu0 %v11812_v5, %s9242_s27 }
 0x52e   : > { %v11872_v40 = vpop.permute.xlu1 %5820 }
 0x52f   : > { %v11874_v60 = vpop.permute.xlu0 %6198 }
 0x530   : > { %13404 = vst [vmem:[#allocation353_spill] sm:$0xff] %v11874_v60  ;;  %6958 = vrot.lane.b32.xlu1 %v11812_v5, %s9242_s27 }
 0x531   : > { %6944 = vrot.lane.b32.xlu0 %v11812_v5, %s9242_s27 }
 0x532   : > { %v11880_v16 = vpop.permute.xlu1 %6012 }
 0x533   : > { %v11882_v37 = vpop.permute.xlu0 %5626 }
 0x534   : > { %6962 = vrot.lane.b32.xlu1 %v11812_v5, %s9242_s27 }
 0x535   : > { %6948 = vrot.lane.b32.xlu0 %v11812_v5, %s9242_s27 }
 0x536   : > { %v11888_v32 = vpop.permute.xlu1 %6373 }
 0x537   : > { %13405 = vst [vmem:[#allocation354_spill] sm:$0xff] %v11888_v32  ;;  %v11890_v57 = vpop.permute.xlu0 %5818 }
 0x538   : > { %6966 = vrot.lane.b32.xlu1 %v11812_v5, %s9242_s27 }
 0x539   : > { %6952 = vrot.lane.b32.xlu0 %v11812_v5, %s9242_s27 }
 0x53a   : > { %v11896_v60 = vpop.permute.xlu1 %6565 }
 0x53b   : > { %13406 = vst [vmem:[#allocation355_spill] sm:$0xff] %v11896_v60  ;;  %v11898_v11 = vpop.permute.xlu0 %6371 }
 0x53c   : > { %13407 = vst [vmem:[#allocation356_spill] sm:$0xff] %v11898_v11  ;;  %6970 = vrot.lane.b32.xlu1 %v11812_v5, %s9242_s27 }
 0x53d   : > { %6956 = vrot.lane.b32.xlu0 %v11812_v5, %s9242_s27 }
 0x53e   : > { %v11904_v47 = vpop.permute.xlu1 %6729 }
 0x53f   : > { %v11906_v32 = vpop.permute.xlu0 %6563 }
 0x540   : > { %13408 = vst [vmem:[#allocation357_spill] sm:$0xff] %v11906_v32  ;;  %6974 = vrot.lane.b32.xlu1 %v11812_v5, %s9242_s27 }
 0x541   : > { %6960 = vrot.lane.b32.xlu0 %v11812_v5, %s9242_s27 }
 0x542   : > { %v11912_v3 = vpop.permute.xlu1 %6733 }
 0x543   : > { %v11914_v60 = vpop.permute.xlu0 %6010 }
 0x544   : > { %7106 = vrot.lane.b32.xlu1 %v11494_v31, %s9243_s29 }
 0x545   : > { %6964 = vrot.lane.b32.xlu0 %v11812_v5, %s9242_s27 }
 0x546   : > { %v11920_v11 = vpop.permute.xlu1 %6737 }
 0x547   : > { %13409 = vst [vmem:[#allocation358_spill] sm:$0xff] %v11920_v11  ;;  %v11922_v32 = vpop.permute.xlu0 %6202 }
 0x548   : > { %7110 = vrot.lane.b32.xlu1 %v11547_v4, %s9243_s29  ;;  %v7049_v4 = vld [vmem:[#allocation2 + $0x474] sm:$0xff] }
 0x549   : > { %6968 = vrot.lane.b32.xlu0 %v11812_v5, %s9242_s27 }
 0x54a   : > { %v11928_v8 = vpop.permute.xlu1 %6741 }
 0x54b   : > { %13410 = vst [vmem:[#allocation359_spill] sm:$0xff] %v11928_v8  ;;  %v11930_v30 = vpop.permute.xlu0 %6727 }
 0x54c   : > { %13411 = vst [vmem:[#allocation360_spill] sm:$0xff] %v11930_v30  ;;  %7114 = vrot.lane.b32.xlu1 %v11600_v48, %s9243_s29  ;;  %v7051_v48 = vld [vmem:[#allocation2 + $0x49c] sm:$0xff] }
 0x54d   : > { %6972 = vrot.lane.b32.xlu0 %v11812_v5, %s9242_s27 }
 0x54e   : > { %v11936_v31 = vpop.permute.xlu1 %6745 }
 0x54f   : > { %13412 = vst [vmem:[#allocation361_spill] sm:$0xff] %v11936_v31  ;;  %v11938_v39 = vpop.permute.xlu0 %6731 }
 0x550   : > { %13413 = vst [vmem:[#allocation362_spill] sm:$0xff] %v11938_v39  ;;  %7118 = vrot.lane.b32.xlu1 %v11653_v7, %s9243_s29 }
 0x551   : > { %7104 = vrot.lane.b32.xlu0 %v11512_v46, %s9243_s29  ;;  %v7053_v46 = vld [vmem:[#allocation2 + $0x4c4] sm:$0xff] }
 0x552   : > { %v11944_v35 = vpop.permute.xlu1 %6749 }
 0x553   : > { %13414 = vst [vmem:[#allocation363_spill] sm:$0xff] %v11944_v35  ;;  %v11946_v20 = vpop.permute.xlu0 %6735 }
 0x554   : > { %13415 = vst [vmem:[#allocation364_spill] sm:$0xff] %v11946_v20  ;;  %7122 = vrot.lane.b32.xlu1 %v7049_v4, %s9243_s29  ;;  %v7048_v4 = vld [vmem:[#allocation2 + $0x46c] sm:$0xff] }
 0x555   : > { %7108 = vrot.lane.b32.xlu0 %v11565_v42, %s9243_s29  ;;  %v7055_v42 = vld [vmem:[#allocation2 + $0x4ec] sm:$0xff] }
 0x556   : > { %v11951_v31 = vpop.permute.xlu1 %6753 }
 0x557   : > { %13416 = vst [vmem:[#allocation365_spill] sm:$0xff] %v11951_v31  ;;  %v11953_v39 = vpop.permute.xlu0 %6739 }
 0x558   : > { %13417 = vst [vmem:[#allocation366_spill] sm:$0xff] %v11953_v39  ;;  %7126 = vrot.lane.b32.xlu1 %v7051_v48, %s9243_s29  ;;  %v7050_v48 = vld [vmem:[#allocation2 + $0x494] sm:$0xff] }
 0x559   : > { %7112 = vrot.lane.b32.xlu0 %v11618_v28, %s9243_s29  ;;  %v7057_v28 = vld [vmem:[#allocation2 + $0x514] sm:$0xff] }
 0x55a   : > { %v11958_v7 = vpop.permute.xlu1 %6757 }
 0x55b   : > { %13418 = vst [vmem:[#allocation367_spill] sm:$0xff] %v11958_v7  ;;  %v11960_v35 = vpop.permute.xlu0 %6743 }
 0x55c   : > { %13419 = vst [vmem:[#allocation368_spill] sm:$0xff] %v11960_v35  ;;  %7130 = vrot.lane.b32.xlu1 %v7053_v46, %s9243_s29  ;;  %v7052_v46 = vld [vmem:[#allocation2 + $0x4bc] sm:$0xff] }
 0x55d   : > { %7116 = vrot.lane.b32.xlu0 %v11671_v52, %s9243_s29  ;;  %v7059_v52 = vld [vmem:[#allocation2 + $0x53c] sm:$0xff] }
 0x55e   : > { %v11965_v31 = vpop.permute.xlu1 %6761 }
 0x55f   : > { %13420 = vst [vmem:[#allocation369_spill] sm:$0xff] %v11965_v31  ;;  %v11967_v39 = vpop.permute.xlu0 %6747 }
 0x560   : > { %13421 = vst [vmem:[#allocation370_spill] sm:$0xff] %v11967_v39  ;;  %7134 = vrot.lane.b32.xlu1 %v7055_v42, %s9243_s29  ;;  %v7061_v42 = vld [vmem:[#allocation2 + $0x564] sm:$0xff] }
 0x561   : > { %7120 = vrot.lane.b32.xlu0 %v7048_v4, %s9243_s29  ;;  %v7054_v4 = vld [vmem:[#allocation2 + $0x4e4] sm:$0xff] }
 0x562   : > { %v11971_v7 = vpop.permute.xlu1 %6765 }
 0x563   : > { %13422 = vst [vmem:[#allocation371_spill] sm:$0xff] %v11971_v7  ;;  %v11973_v35 = vpop.permute.xlu0 %6751 }
 0x564   : > { %13423 = vst [vmem:[#allocation372_spill] sm:$0xff] %v11973_v35  ;;  %7138 = vrot.lane.b32.xlu1 %v7057_v28, %s9243_s29  ;;  %v7063_v28 = vld [vmem:[#allocation2 + $0x58c] sm:$0xff] }
 0x565   : > { %7124 = vrot.lane.b32.xlu0 %v7050_v48, %s9243_s29  ;;  %v7056_v48 = vld [vmem:[#allocation2 + $0x50c] sm:$0xff] }
 0x566   : > { %v11977_v20 = vpop.permute.xlu1 %6769 }
 0x567   : > { %13424 = vst [vmem:[#allocation373_spill] sm:$0xff] %v11977_v20  ;;  %v11979_v31 = vpop.permute.xlu0 %6755 }
 0x568   : > { %13425 = vst [vmem:[#allocation374_spill] sm:$0xff] %v11979_v31  ;;  %7142 = vrot.lane.b32.xlu1 %v7059_v52, %s9243_s29  ;;  %v7065_v52 = vld [vmem:[#allocation2 + $0x5b4] sm:$0xff] }
 0x569   : > { %7128 = vrot.lane.b32.xlu0 %v7052_v46, %s9243_s29  ;;  %v7058_v46 = vld [vmem:[#allocation2 + $0x534] sm:$0xff] }
 0x56a   : > { %v11983_v39 = vpop.permute.xlu1 %6773 }
 0x56b   : > { %13426 = vst [vmem:[#allocation375_spill] sm:$0xff] %v11983_v39  ;;  %v11985_v7 = vpop.permute.xlu0 %6759 }
 0x56c   : > { %13427 = vst [vmem:[#allocation376_spill] sm:$0xff] %v11985_v7  ;;  %7146 = vrot.lane.b32.xlu1 %v7061_v42, %s9243_s29  ;;  %v7067_v42 = vld [vmem:[#allocation2 + $0x5dc] sm:$0xff] }
 0x56d   : > { %7132 = vrot.lane.b32.xlu0 %v7054_v4, %s9243_s29  ;;  %v7060_v4 = vld [vmem:[#allocation2 + $0x55c] sm:$0xff] }
 0x56e   : > { %v11989_v35 = vpop.permute.xlu1 %6777 }
 0x56f   : > { %13428 = vst [vmem:[#allocation377_spill] sm:$0xff] %v11989_v35  ;;  %v11991_v20 = vpop.permute.xlu0 %6763 }
 0x570   : > { %13429 = vst [vmem:[#allocation378_spill] sm:$0xff] %v11991_v20  ;;  %7150 = vrot.lane.b32.xlu1 %v7063_v28, %s9243_s29  ;;  %v7069_v28 = vld [vmem:[#allocation2 + $0x604] sm:$0xff] }
 0x571   : > { %7136 = vrot.lane.b32.xlu0 %v7056_v48, %s9243_s29  ;;  %v7062_v48 = vld [vmem:[#allocation2 + $0x584] sm:$0xff] }
 0x572   : > { %v11995_v31 = vpop.permute.xlu1 %6781 }
 0x573   : > { %v11997_v39 = vpop.permute.xlu0 %6767 }
 0x574   : > { %13430 = vst [vmem:[#allocation379_spill] sm:$0xff] %v11997_v39  ;;  %7154 = vrot.lane.b32.xlu1 %v7065_v52, %s9243_s29  ;;  %v7071_v52 = vld [vmem:[#allocation2 + $0x62c] sm:$0xff] }
 0x575   : > { %7140 = vrot.lane.b32.xlu0 %v7058_v46, %s9243_s29  ;;  %v7064_v46 = vld [vmem:[#allocation2 + $0x5ac] sm:$0xff] }
 0x576   : > { %v12001_v7 = vpop.permute.xlu1 %6914 }
 0x577   : > { %v12003_v35 = vpop.permute.xlu0 %6771 }
 0x578   : > { %13431 = vst [vmem:[#allocation380_spill] sm:$0xff] %v12003_v35  ;;  %7158 = vrot.lane.b32.xlu1 %v7067_v42, %s9243_s29  ;;  %v7233_v42 = vld [vmem:[#allocation2 + $0x3e0] sm:$0xff] }
 0x579   : > { %7144 = vrot.lane.b32.xlu0 %v7060_v4, %s9243_s29  ;;  %v7066_v4 = vld [vmem:[#allocation2 + $0x5d4] sm:$0xff] }
 0x57a   : > { %v12007_v20 = vpop.permute.xlu1 %6918 }
 0x57b   : > { %v12009_v9 = vpop.permute.xlu0 %6775 }
 0x57c   : > { %13432 = vst [vmem:[#allocation381_spill] sm:$0xff] %v12009_v9  ;;  %7162 = vrot.lane.b32.xlu1 %v7069_v28, %s9243_s29  ;;  %v7235_v28 = vld [vmem:[#allocation2 + $0x408] sm:$0xff] }
 0x57d   : > { %7148 = vrot.lane.b32.xlu0 %v7062_v48, %s9243_s29  ;;  %v7068_v48 = vld [vmem:[#allocation2 + $0x5fc] sm:$0xff] }
 0x57e   : > { %v12013_v39 = vpop.permute.xlu1 %6922 }
 0x57f   : > { %v12015_v30 = vpop.permute.xlu0 %6779 }
 0x580   : > { %7166 = vrot.lane.b32.xlu1 %v7071_v52, %s9243_s29  ;;  %v7237_v52 = vld [vmem:[#allocation2 + $0x430] sm:$0xff] }
 0x581   : > { %7152 = vrot.lane.b32.xlu0 %v7064_v46, %s9243_s29  ;;  %v7070_v46 = vld [vmem:[#allocation2 + $0x624] sm:$0xff] }
 0x582   : > { %v12019_v35 = vpop.permute.xlu1 %6926 }
 0x583   : > { %13433 = vst [vmem:[#allocation382_spill] sm:$0xff] %v12019_v35  ;;  %v12021_v8 = vpop.permute.xlu0 %6912 }
 0x584   : > { %13434 = vst [vmem:[#allocation383_spill] sm:$0xff] %v12021_v8  ;;  %7298 = vrot.lane.b32.xlu1 %v7233_v42, %s9244_s21  ;;  %v7239_v42 = vld [vmem:[#allocation2 + $0x458] sm:$0xff] }
 0x585   : > { %7156 = vrot.lane.b32.xlu0 %v7066_v4, %s9243_s29 }
 0x586   : > { %v12025_v9 = vpop.permute.xlu1 %6930 }
 0x587   : > { %13435 = vst [vmem:[#allocation384_spill] sm:$0xff] %v12025_v9  ;;  %v12027_v49 = vpop.permute.xlu0 %6916 }
 0x588   : > { %13436 = vst [vmem:[#allocation385_spill] sm:$0xff] %v12027_v49  ;;  %7302 = vrot.lane.b32.xlu1 %v7235_v28, %s9244_s21  ;;  %v7232_v49 = vld [vmem:[#allocation2 + $0x3d8] sm:$0xff]  ;;  %v9092_v28 = vld [vmem:[#allocation2 + $0x260] sm:$0xff] }
 0x589   : > { %7160 = vrot.lane.b32.xlu0 %v7068_v48, %s9243_s29  ;;  %v4540_v48 = vadd.f32 %v9092_v28, %v11192_v38 }
 0x58a   : > { %v12031_v2 = vpop.permute.xlu1 %6934 }
 0x58b   : > { %13437 = vst [vmem:[#allocation386_spill] sm:$0xff] %v12031_v2  ;;  %v12033_v26 = vpop.permute.xlu0 %6920 }
 0x58c   : > { %13438 = vst [vmem:[#allocation387_spill] sm:$0xff] %v12033_v26  ;;  %7306 = vrot.lane.b32.xlu1 %v7237_v52, %s9244_s21  ;;  %v7234_v52 = vld [vmem:[#allocation2 + $0x400] sm:$0xff] }
 0x58d   : > { %7164 = vrot.lane.b32.xlu0 %v7070_v46, %s9243_s29  ;;  %v4732_v46 = vadd.f32 %v10304_v55, %v4540_v48 }
 0x58e   : > { %v12037_v4 = vpop.permute.xlu1 %6938 }
 0x58f   : > { %13439 = vst [vmem:[#allocation388_spill] sm:$0xff] %v12037_v4  ;;  %v12039_v9 = vpop.permute.xlu0 %6924 }
 0x590   : > { %13440 = vst [vmem:[#allocation389_spill] sm:$0xff] %v12039_v9  ;;  %7310 = vrot.lane.b32.xlu1 %v7239_v42, %s9244_s21 }
 0x591   : > { %7296 = vrot.lane.b32.xlu0 %v7232_v49, %s9244_s21  ;;  %v4925_v49 = vadd.f32 %v11552_v54, %v4732_v46 }
 0x592   : > { %v12044_v2 = vpop.permute.xlu1 %6942 }
 0x593   : > { %13441 = vst [vmem:[#allocation390_spill] sm:$0xff] %v12044_v2  ;;  %v12046_v26 = vpop.permute.xlu0 %6928  ;;  %v5117_v38 = vadd.f32 %v11561_v51, %v4925_v49  ;;  %v13484_v2 = vld [vmem:[#allocation38_spill] sm:$0xff] }
 0x594   : > { %13442 = vst [vmem:[#allocation391_spill] sm:$0xff] %v12046_v26  ;;  %7314 = vrot.lane.b32.xlu1 %v11812_v5, %s9244_s21 }
 0x595   : > { %7300 = vrot.lane.b32.xlu0 %v7234_v52, %s9244_s21  ;;  %v5309_v55 = vadd.f32 %v11570_v58, %v5117_v38 }
 0x596   : > { %v12052_v9 = vpop.permute.xlu1 %6946 }
 0x597   : > { %13443 = vst [vmem:[#allocation392_spill] sm:$0xff] %v12052_v9  ;;  %v12054_v42 = vpop.permute.xlu0 %6932  ;;  %v5501_v54 = vadd.f32 %v11856_v18, %v5309_v55 }
 0x598   : > { %13444 = vst [vmem:[#allocation393_spill] sm:$0xff] %v12054_v42  ;;  %7318 = vrot.lane.b32.xlu1 %v11812_v5, %s9244_s21 }
 0x599   : > { %7304 = vrot.lane.b32.xlu0 %v11655_v62, %s9244_s21  ;;  %v4539_v62 = vadd.f32 %v11812_v5, %v11202_v50  ;;  %v5693_v51 = vadd.f32 %v11864_v12, %v5501_v54 }
 0x59a   : > { %v12062_v28 = vpop.permute.xlu1 %6950 }
 0x59b   : > { %13445 = vst [vmem:[#allocation394_spill] sm:$0xff] %v12062_v28  ;;  %v12064_v26 = vpop.permute.xlu0 %6936  ;;  %v4731_v58 = vadd.f32 %v11233_v53, %v4539_v62  ;;  %v4510_v62 = vadd.f32 %v11812_v5, %v9826_v22 }
 0x59c   : > { %13446 = vst [vmem:[#allocation395_spill] sm:$0xff] %v12064_v26  ;;  %7322 = vrot.lane.b32.xlu1 %v11812_v5, %s9244_s21  ;;  %v13480_v26 = vld [vmem:[#allocation28_spill] sm:$0xff] }
 0x59d   : > { %7308 = vrot.lane.b32.xlu0 %v11702_v43, %s9244_s21  ;;  %v5885_v43 = vadd.f32 %v11872_v40, %v5693_v51  ;;  %v4924_v49 = vadd.f32 %v11572_v0, %v4731_v58 }
 0x59e   : > { %v12072_v48 = vpop.permute.xlu1 %6954 }
 0x59f   : > { %13447 = vst [vmem:[#allocation396_spill] sm:$0xff] %v12072_v48  ;;  %v12074_v52 = vpop.permute.xlu0 %6940  ;;  %v6077_v50 = vadd.f32 %v11880_v16, %v5885_v43  ;;  %v5116_v12 = vadd.f32 %v11579_v59, %v4924_v49  ;;  %v13457_v49 = vld [vmem:[#allocation11_spill] sm:$0xff] }
 0x5a0   : > { %13448 = vst [vmem:[#allocation397_spill] sm:$0xff] %v12074_v52  ;;  %7326 = vrot.lane.b32.xlu1 %v11812_v5, %s9244_s21  ;;  %v13479_v52 = vld [vmem:[#allocation34_spill] sm:$0xff] }
 0x5a1   : > { %7312 = vrot.lane.b32.xlu0 %v11812_v5, %s9244_s21  ;;  %v5308_v40 = vadd.f32 %v11625_v56, %v5116_v12  ;;  %v6269_v55 = vadd.f32 %v10860_v61, %v6077_v50  ;;  %v4509_v56 = vadd.f32 %v11812_v5, %v9818_v14  ;;  %v4515_v14 = vadd.f32 %v11812_v5, %v13457_v49  ;;  %v13458_v50 = vld [vmem:[#allocation10_spill] sm:$0xff]  ;;  %v13459_v12 = vld [vmem:[#allocation12_spill] sm:$0xff]  ;;  %v13463_v49 = vld [vmem:[#allocation17_spill] sm:$0xff] }
 0x5a2   : > { %v12085_v18 = vpop.permute.xlu1 %6958  ;;  %v4512_v22 = vadd.f32 %v11812_v5, %v13458_v50  ;;  %v4521_v50 = vadd.f32 %v11812_v5, %v13463_v49  ;;  %v13470_v49 = vld [vmem:[#allocation22_spill] sm:$0xff] }
 0x5a3   : > { %13449 = vst [vmem:[#allocation398_spill] sm:$0xff] %v12085_v18  ;;  %v12087_v46 = vpop.permute.xlu0 %6944  ;;  %v5500_v59 = vadd.f32 %v10849_v23, %v5308_v40  ;;  %v6462_v54 = vadd.f32 %v10952_v34, %v6269_v55  ;;  %v4513_v23 = vadd.f32 %v11812_v5, %v9832_v29  ;;  %v4511_v34 = vadd.f32 %v11812_v5, %v9829_v27  ;;  %v13460_v27 = vld [vmem:[#allocation13_spill] sm:$0xff] }
 0x5a4   : > { %13450 = vst [vmem:[#allocation399_spill] sm:$0xff] %v12087_v46  ;;  %7330 = vrot.lane.b32.xlu1 %v11812_v5, %s9244_s21  ;;  %v4514_v40 = vadd.f32 %v11812_v5, %v13459_v12  ;;  %v4517_v29 = vadd.f32 %v11812_v5, %v13460_v27  ;;  %v13464_v12 = vld [vmem:[#allocation16_spill] sm:$0xff] }
 0x5a5   : > { %7316 = vrot.lane.b32.xlu0 %v11812_v5, %s9244_s21  ;;  %v5692_v61 = vadd.f32 %v11882_v37, %v5500_v59  ;;  %v6654_v37 = vadd.f32 %v11019_v25, %v6462_v54  ;;  %v13462_v54 = vld [vmem:[#allocation15_spill] sm:$0xff]  ;;  %v4703_v48 = vadd.f32 %v13479_v52, %v4511_v34  ;;  %v13487_v34 = vld [vmem:[#allocation33_spill] sm:$0xff] }
 0x5a6   : > { %v12096_v38 = vpop.permute.xlu1 %6962  ;;  %v4709_v52 = vadd.f32 %v13486_v44, %v4517_v29  ;;  %v4706_v11 = vadd.f32 %v13487_v34, %v4514_v40  ;;  %v13493_v44 = vld [vmem:[#allocation39_spill] sm:$0xff]  ;;  %v13494_v29 = vld [vmem:[#allocation56_spill] sm:$0xff]  ;;  %v13495_v34 = vld [vmem:[#allocation58_spill] sm:$0xff] }
 0x5a7   : > { %13451 = vst [vmem:[#allocation400_spill] sm:$0xff] %v12096_v38  ;;  %v12098_v53 = vpop.permute.xlu0 %6948  ;;  %v5884_v43 = vadd.f32 %v11890_v57, %v5692_v61  ;;  %v13461_v57 = vld [vmem:[#allocation14_spill] sm:$0xff]  ;;  %v6846_v59 = vadd.f32 %v11995_v31, %v6654_v37  ;;  %v4519_v61 = vadd.f32 %v11812_v5, %v13462_v54 }
 0x5a8   : > { %13452 = vst [vmem:[#allocation401_spill] sm:$0xff] %v12098_v53  ;;  %7334 = vrot.lane.b32.xlu1 %v11812_v5, %s9244_s21  ;;  %v4516_v25 = vadd.f32 %v11812_v5, %v13461_v57  ;;  %v13467_v57 = vld [vmem:[#allocation19_spill] sm:$0xff]  ;;  %v4525_v53 = vadd.f32 %v11812_v5, %v13470_v49  ;;  %v13476_v49 = vld [vmem:[#allocation25_spill] sm:$0xff] }
 0x5a9   : > { %7320 = vrot.lane.b32.xlu0 %v11812_v5, %s9244_s21  ;;  %v6076_v55 = vadd.f32 %v11914_v60, %v5884_v43  ;;  %v4523_v60 = vadd.f32 %v11812_v5, %v13467_v57  ;;  %v13468_v43 = vld [vmem:[#allocation20_spill] sm:$0xff]  ;;  %v13473_v57 = vld [vmem:[#allocation27_spill] sm:$0xff] }
 0x5aa   : > { %v12106_v0 = vpop.permute.xlu1 %6966  ;;  %v4522_v31 = vadd.f32 %v11812_v5, %v13468_v43 }
 0x5ab   : > { %13453 = vst [vmem:[#allocation402_spill] sm:$0xff] %v12106_v0  ;;  %v12108_v16 = vpop.permute.xlu0 %6952  ;;  %v6268_v37 = vadd.f32 %v11922_v32, %v6076_v55  ;;  %v4529_v32 = vadd.f32 %v11812_v5, %v13473_v57  ;;  %v13474_v55 = vld [vmem:[#allocation23_spill] sm:$0xff]  ;;  %v12192_v57 = vadd.f32 %v11812_v5, %v13480_v26  ;;  %v13488_v26 = vld [vmem:[#allocation42_spill] sm:$0xff] }
 0x5ac   : > { %13454 = vst [vmem:[#allocation403_spill] sm:$0xff] %v12108_v16  ;;  %7338 = vrot.lane.b32.xlu1 %v11812_v5, %s9244_s21 }
 0x5ad   : > { %7324 = vrot.lane.b32.xlu0 %v11812_v5, %s9244_s21 }
 0x5ae   : > { %v12121_v51 = vpop.permute.xlu1 %6970 }
 0x5af   : > { %13455 = vst [vmem:[#allocation404_spill] sm:$0xff] %v12121_v51  ;;  %v12123_v58 = vpop.permute.xlu0 %6956  ;;  %v13465_v51 = vld [vmem:[#allocation18_spill] sm:$0xff] }
 0x5b0   : > { %13456 = vst [vmem:[#allocation405_spill] sm:$0xff] %v12123_v58  ;;  %7342 = vrot.lane.b32.xlu1 %v11812_v5, %s9244_s21  ;;  %v4518_v58 = vadd.f32 %v11812_v5, %v13464_v12  ;;  %v4520_v16 = vadd.f32 %v11812_v5, %v13465_v51  ;;  %v13471_v12 = vld [vmem:[#allocation24_spill] sm:$0xff]  ;;  %v13472_v51 = vld [vmem:[#allocation21_spill] sm:$0xff] }
 0x5b1   : > { %7328 = vrot.lane.b32.xlu0 %v11812_v5, %s9244_s21  ;;  %v4527_v38 = vadd.f32 %v11812_v5, %v13471_v12  ;;  %v4524_v46 = vadd.f32 %v11812_v5, %v13472_v51  ;;  %v12182_v12 = vadd.f32 %v11812_v5, %v13476_v49  ;;  %v13477_v51 = vld [vmem:[#allocation32_spill] sm:$0xff]  ;;  %v13483_v49 = vld [vmem:[#allocation30_spill] sm:$0xff] }
 0x5b2   : > { %v6975_v27 = vpop.permute.xlu1 %6974  ;;  %v4702_v9 = vadd.f32 %v13483_v49, %v4510_v62  ;;  %v13490_v49 = vld [vmem:[#allocation44_spill] sm:$0xff]  ;;  %v4712_v40 = vadd.f32 %v13493_v44, %v4520_v16  ;;  %v13501_v16 = vld [vmem:[#allocation50_spill] sm:$0xff] }
 0x5b3   : > { %v12155_v0 = vpop.permute.xlu0 %6960  ;;  %v12162_v54 = vadd.f32 %v6975_v27, %v6846_v59  ;;  %v4526_v59 = vadd.f32 %v11812_v5, %v13474_v55  ;;  %v13475_v27 = vld [vmem:[#allocation29_spill] sm:$0xff] }
 0x5b4   : > { %13466 = vst [vmem:[#allocation11_spill] sm:$0xff] %v12155_v0  ;;  %7346 = vrot.lane.b32.xlu1 %v11812_v5, %s9244_s21  ;;  %v4531_v43 = vadd.f32 %v11812_v5, %v13475_v27  ;;  %v13478_v0 = vld [vmem:[#allocation26_spill] sm:$0xff]  ;;  %v13482_v27 = vld [vmem:[#allocation36_spill] sm:$0xff] }
 0x5b5   : > { %13469 = vst [vmem:[#allocation10_spill] sm:$0xff] %v12162_v54  ;;  %7332 = vrot.lane.b32.xlu0 %v11812_v5, %s9244_s21  ;;  %v4701_v54 = vadd.f32 %v13477_v51, %v4509_v56  ;;  %v12187_v18 = vadd.f32 %v11812_v5, %v13478_v0  ;;  %v4705_v42 = vadd.f32 %v13482_v27, %v4513_v23  ;;  %v13485_v0 = vld [vmem:[#allocation31_spill] sm:$0xff] }
 0x5b6   : > { %v12194_v55 = vpop.permute.xlu1 %7106  ;;  %v4707_v56 = vadd.f32 %v13484_v2, %v4515_v14  ;;  %v6461_v51 = vadd.f32 %v10946_v41, %v6268_v37  ;;  %v4704_v4 = vadd.f32 %v13485_v0, %v4512_v22  ;;  %v4711_v23 = vadd.f32 %v13488_v26, %v4519_v61  ;;  %v13489_v27 = vld [vmem:[#allocation35_spill] sm:$0xff]  ;;  %v13491_v41 = vld [vmem:[#allocation37_spill] sm:$0xff]  ;;  %v13492_v22 = vld [vmem:[#allocation46_spill] sm:$0xff] }
 0x5b7   : > { %v12196_v28 = vpop.permute.xlu0 %6964  ;;  %v4708_v62 = vadd.f32 %v13489_v27, %v4516_v25  ;;  %v12212_v2 = vadd.f32 %v13490_v49, %v4521_v50  ;;  %v4710_v14 = vadd.f32 %v13491_v41, %v4518_v58  ;;  %v12216_v37 = vadd.f32 %v13492_v22, %v4523_v60  ;;  %v13497_v61 = vld [vmem:[#allocation48_spill] sm:$0xff]  ;;  %v13498_v50 = vld [vmem:[#allocation59_spill] sm:$0xff]  ;;  %v13500_v49 = vld [vmem:[#allocation41_spill] sm:$0xff] }
 0x5b8   : > { %13481 = vst [vmem:[#allocation12_spill] sm:$0xff] %v12196_v28  ;;  %7350 = vrot.lane.b32.xlu1 %v11812_v5, %s9244_s21  ;;  %v4894_v0 = vadd.f32 %v13494_v29, %v4701_v54  ;;  %v4896_v28 = vadd.f32 %v13495_v34, %v4703_v48  ;;  %v12226_v25 = vadd.f32 %v13497_v61, %v4525_v53  ;;  %v13499_v27 = vld [vmem:[#allocation60_spill] sm:$0xff]  ;;  %v13502_v48 = vld [vmem:[#allocation61_spill] sm:$0xff]  ;;  %v13503_v53 = vld [vmem:[#allocation43_spill] sm:$0xff] }
 0x5b9   : > { %7336 = vrot.lane.b32.xlu0 %v11812_v5, %s9244_s21  ;;  %v4898_v26 = vadd.f32 %v13498_v50, %v4705_v42  ;;  %v4895_v58 = vadd.f32 %v13499_v27, %v4702_v9  ;;  %v6653_v60 = vadd.f32 %v11014_v15, %v6461_v51  ;;  %v12232_v41 = vadd.f32 %v13500_v49, %v4522_v31  ;;  %v13504_v9 = vld [vmem:[#allocation63_spill] sm:$0xff]  ;;  %v13505_v15 = vld [vmem:[#allocation65_spill] sm:$0xff]  ;;  %v13506_v29 = vld [vmem:[#allocation52_spill] sm:$0xff] }
 0x5ba   : > { %v12221_v8 = vpop.permute.xlu1 %7110  ;;  %v12235_v54 = vadd.f32 %v13501_v16, %v4527_v38  ;;  %v4900_v22 = vadd.f32 %v13502_v48, %v4707_v56  ;;  %v12243_v42 = vadd.f32 %v13503_v53, %v4524_v46  ;;  %v4902_v44 = vadd.f32 %v13504_v9, %v4709_v52  ;;  %v13507_v34 = vld [vmem:[#allocation67_spill] sm:$0xff]  ;;  %v13508_v61 = vld [vmem:[#allocation69_spill] sm:$0xff]  ;;  %v13509_v27 = vld [vmem:[#allocation62_spill] sm:$0xff] }
 0x5bb   : > { %v12223_v35 = vpop.permute.xlu0 %6968  ;;  %v4904_v51 = vadd.f32 %v13505_v15, %v4711_v23  ;;  %v6845_v31 = vadd.f32 %v12015_v30, %v6653_v60  ;;  %v12249_v38 = vadd.f32 %v13506_v29, %v4529_v32  ;;  %v5086_v56 = vadd.f32 %v13507_v34, %v4894_v0  ;;  %v13510_v46 = vld [vmem:[#allocation71_spill] sm:$0xff]  ;;  %v13512_v9 = vld [vmem:[#allocation72_spill] sm:$0xff]  ;;  %v13514_v30 = vld [vmem:[#allocation73_spill] sm:$0xff] }
 0x5bc   : > { %13496 = vst [vmem:[#allocation13_spill] sm:$0xff] %v12223_v35  ;;  %7354 = vrot.lane.b32.xlu1 %v11812_v5, %s9244_s21  ;;  %v5088_v50 = vadd.f32 %v13508_v61, %v4896_v28  ;;  %v4897_v49 = vadd.f32 %v13509_v27, %v4704_v4  ;;  %v5090_v53 = vadd.f32 %v13510_v46, %v4898_v26  ;;  %v13511_v35 = vld [vmem:[#allocation64_spill] sm:$0xff]  ;;  %v13515_v60 = vld [vmem:[#allocation66_spill] sm:$0xff]  ;;  %v13517_v4 = vld [vmem:[#allocation45_spill] sm:$0xff] }
 0x5bd   : > { %7340 = vrot.lane.b32.xlu0 %v11812_v5, %s9244_s21  ;;  %v4899_v52 = vadd.f32 %v13511_v35, %v4706_v11  ;;  %v5087_v23 = vadd.f32 %v13512_v9, %v4895_v58  ;;  %v5092_v32 = vadd.f32 %v13514_v30, %v4900_v22  ;;  %v4901_v29 = vadd.f32 %v13515_v60, %v4708_v62  ;;  %v13516_v0 = vld [vmem:[#allocation68_spill] sm:$0xff]  ;;  %v13518_v35 = vld [vmem:[#allocation54_spill] sm:$0xff]  ;;  %v13519_v26 = vld [vmem:[#allocation75_spill] sm:$0xff] }
 0x5be   : > { %v12254_v16 = vpop.permute.xlu1 %7114  ;;  %v4903_v34 = vadd.f32 %v13516_v0, %v4710_v14  ;;  %v12269_v28 = vadd.f32 %v13517_v4, %v4526_v59  ;;  %v12272_v11 = vadd.f32 %v13518_v35, %v4531_v43  ;;  %v5094_v58 = vadd.f32 %v13519_v26, %v4902_v44  ;;  %v13521_v61 = vld [vmem:[#allocation70_spill] sm:$0xff]  ;;  %v13522_v27 = vld [vmem:[#allocation79_spill] sm:$0xff]  ;;  %v13527_v35 = vld [vmem:[#allocation76_spill] sm:$0xff] }
 0x5bf   : > { %v6973_v48 = vpop.permute.xlu0 %6972  ;;  %v4905_v62 = vadd.f32 %v13521_v61, %v4712_v40  ;;  %v5278_v14 = vadd.f32 %v13522_v27, %v5086_v56  ;;  %v13524_v9 = vld [vmem:[#allocation74_spill] sm:$0xff]  ;;  %v13525_v59 = vld [vmem:[#allocation47_spill] sm:$0xff]  ;;  %v13528_v26 = vld [vmem:[#allocation84_spill] sm:$0xff] }
 0x5c0   : > { %v12259_v15 = vadd.f32 %v6973_v48, %v6845_v31  ;;  %7358 = vrot.lane.b32.xlu1 %v11812_v5, %s9244_s21  ;;  %v13520_v31 = vld [vmem:[#allocation77_spill] sm:$0xff]  ;;  %v5089_v30 = vadd.f32 %v13524_v9, %v4897_v49  ;;  %v12286_v43 = vadd.f32 %v13525_v59, %v12182_v12  ;;  %v13526_v4 = vld [vmem:[#allocation83_spill] sm:$0xff]  ;;  %v5279_v40 = vadd.f32 %v13528_v26, %v5087_v23  ;;  %v13531_v61 = vld [vmem:[#allocation78_spill] sm:$0xff] }
 0x5c1   : > { %7344 = vrot.lane.b32.xlu0 %v11812_v5, %s9244_s21  ;;  %v5096_v22 = vadd.f32 %v13520_v31, %v4904_v51  ;;  %v13523_v48 = vld [vmem:[#allocation81_spill] sm:$0xff]  ;;  %v5282_v44 = vadd.f32 %v13526_v4, %v5090_v53  ;;  %v5091_v51 = vadd.f32 %v13527_v35, %v4899_v52  ;;  %v5093_v27 = vadd.f32 %v13531_v61, %v4901_v29  ;;  %v13533_v12 = vld [vmem:[#allocation51_spill] sm:$0xff]  ;;  %v13536_v35 = vld [vmem:[#allocation82_spill] sm:$0xff] }
 0x5c2   : > { %13513 = vst [vmem:[#allocation14_spill] sm:$0xff] %v12259_v15  ;;  %v5280_v46 = vadd.f32 %v13523_v48, %v5088_v50  ;;  %v12280_v60 = vpop.permute.xlu1 %7118  ;;  %v13529_v56 = vld [vmem:[#allocation49_spill] sm:$0xff]  ;;  %v13532_v48 = vld [vmem:[#allocation80_spill] sm:$0xff]  ;;  %v12302_v53 = vadd.f32 %v13533_v12, %v12192_v57  ;;  %v13534_v52 = vld [vmem:[#allocation87_spill] sm:$0xff]  ;;  %v5097_v26 = vadd.f32 %v13536_v35, %v4905_v62 }
 0x5c3   : > { %v12282_v0 = vpop.permute.xlu0 %7104  ;;  %v12293_v31 = vadd.f32 %v13529_v56, %v12187_v18  ;;  %v13530_v50 = vld [vmem:[#allocation85_spill] sm:$0xff]  ;;  %v5095_v9 = vadd.f32 %v13532_v48, %v4903_v34  ;;  %v5286_v59 = vadd.f32 %v13534_v52, %v5094_v58  ;;  %v5471_v18 = vadd.f32 %v11028_v13, %v5279_v40  ;;  %v13537_v34 = vld [vmem:[#allocation86_spill] sm:$0xff]  ;;  %v13539_v57 = vld [vmem:[#allocation88_spill] sm:$0xff] }
 0x5c4   : > { %v5284_v49 = vadd.f32 %v13530_v50, %v5092_v32  ;;  %v13535_v23 = vld [vmem:[#allocation89_spill] sm:$0xff]  ;;  %v5470_v32 = vadd.f32 %v10680_v17, %v5278_v14  ;;  %v5472_v29 = vadd.f32 %v10690_v33, %v5280_v46  ;;  %v5281_v56 = vadd.f32 %v13537_v34, %v5089_v30  ;;  %v13540_v62 = vld [vmem:[#allocation90_spill] sm:$0xff]  ;;  %v13547_v12 = vld [vmem:[#allocation151_spill] sm:$0xff] }
 0x5c5   : > { %7348 = vrot.lane.b32.xlu0 %v11812_v5, %s9244_s21  ;;  %v5288_v4 = vadd.f32 %v13535_v23, %v5096_v22  ;;  %v5283_v48 = vadd.f32 %v13539_v57, %v5091_v51  ;;  %v5474_v58 = vadd.f32 %v10700_v45, %v5282_v44  ;;  %v4906_v22 = vadd.f32 %v11030_v36, %v12212_v2  ;;  %v9093_v14 = vld [vmem:[#allocation2 + $0x1e8] sm:$0xff]  ;;  %v13541_v45 = vld [vmem:[#allocation140_spill] sm:$0xff] }
 0x5c6   : > { %v12311_v50 = vpop.permute.xlu1 %7122  ;;  %v5663_v13 = vadd.f32 %v11060_v63, %v5471_v18  ;;  %v5285_v40 = vadd.f32 %v13540_v62, %v5093_v27  ;;  %v12322_v17 = vadd.f32 %v10710_v19, %v5284_v49  ;;  %v12325_v33 = vadd.f32 %v10675_v1, %v5095_v9  ;;  %v13542_v36 = vld [vmem:[#allocation139_spill] sm:$0xff]  ;;  %v13543_v63 = vld [vmem:[#allocation141_spill] sm:$0xff]  ;;  %v13548_v52 = vld [vmem:[#allocation154_spill] sm:$0xff] }
 0x5c7   : > { %v12313_v61 = vpop.permute.xlu0 %7108  ;;  %v4534_v46 = vadd.f32 %v9093_v14, %v11034_v24  ;;  %v4907_v30 = vadd.f32 %v13541_v45, %v12232_v41  ;;  %v5098_v2 = vadd.f32 %v13542_v36, %v4906_v22  ;;  %v5662_v44 = vadd.f32 %v13543_v63, %v5470_v32  ;;  %v13544_v51 = vld [vmem:[#allocation147_spill] sm:$0xff]  ;;  %v13551_v35 = vld [vmem:[#allocation142_spill] sm:$0xff]  ;;  %v13555_v14 = vld [vmem:[#allocation97_spill] sm:$0xff] }
 0x5c8   : > { %13538 = vst [vmem:[#allocation15_spill] sm:$0xff] %v12313_v61  ;;  %v5855_v27 = vadd.f32 %v13544_v51, %v5663_v13  ;;  %v13545_v19 = vld [vmem:[#allocation95_spill] sm:$0xff]  ;;  %v5473_v24 = vadd.f32 %v13547_v12, %v5281_v56  ;;  %v4908_v23 = vadd.f32 %v13548_v52, %v12216_v37  ;;  %v13553_v22 = vld [vmem:[#allocation146_spill] sm:$0xff]  ;;  %v13557_v36 = vld [vmem:[#allocation156_spill] sm:$0xff] }
 0x5c9   : > { %7352 = vrot.lane.b32.xlu0 %v11812_v5, %s9244_s21  ;;  %v12336_v49 = vadd.f32 %v13545_v19, %v5286_v59  ;;  %v13546_v1 = vld [vmem:[#allocation91_spill] sm:$0xff]  ;;  %v5099_v34 = vadd.f32 %v13551_v35, %v4907_v30  ;;  %v5290_v13 = vadd.f32 %v13553_v22, %v5098_v2  ;;  %v13554_v59 = vld [vmem:[#allocation149_spill] sm:$0xff]  ;;  %v13556_v45 = vld [vmem:[#allocation138_spill] sm:$0xff] }
 0x5ca   : > { %v12339_v9 = vadd.f32 %v13546_v1, %v5097_v26  ;;  %v12344_v18 = vpop.permute.xlu1 %7126  ;;  %v13552_v32 = vld [vmem:[#allocation143_spill] sm:$0xff]  ;;  %v6047_v62 = vadd.f32 %v13554_v59, %v5855_v27  ;;  %v12353_v26 = vadd.f32 %v13555_v14, %v5288_v4  ;;  %v4533_v56 = vadd.f32 %v11812_v5, %v13556_v45  ;;  %v13558_v63 = vld [vmem:[#allocation161_spill] sm:$0xff]  ;;  %v13559_v30 = vld [vmem:[#allocation144_spill] sm:$0xff] }
 0x5cb   : > { %13549 = vst [vmem:[#allocation17_spill] sm:$0xff] %v12344_v18  ;;  %v12346_v41 = vpop.permute.xlu0 %7112  ;;  %v5854_v57 = vadd.f32 %v13552_v32, %v5662_v44  ;;  %v5100_v37 = vadd.f32 %v13557_v36, %v4908_v23  ;;  %v5665_v51 = vadd.f32 %v13558_v63, %v5473_v24  ;;  %v12362_v19 = vadd.f32 %v13559_v30, %v5099_v34  ;;  %v13560_v44 = vld [vmem:[#allocation148_spill] sm:$0xff]  ;;  %v13561_v27 = vld [vmem:[#allocation153_spill] sm:$0xff]  ;;  %v13564_v23 = vld [vmem:[#allocation155_spill] sm:$0xff] }
 0x5cc   : > { %13550 = vst [vmem:[#allocation16_spill] sm:$0xff] %v12346_v41  ;;  %v9094_v1 = vld [vmem:[#allocation2 + $0x210] sm:$0xff]  ;;  %v13562_v4 = vld [vmem:[#allocation53_spill] sm:$0xff]  ;;  %v4909_v24 = vadd.f32 %v13564_v23, %v12243_v42  ;;  %v13570_v30 = vld [vmem:[#allocation158_spill] sm:$0xff] }
 0x5cd   : > { %7356 = vrot.lane.b32.xlu0 %v11812_v5, %s9244_s21  ;;  %v6046_v2 = vadd.f32 %v13560_v44, %v5854_v57  ;;  %v4536_v12 = vadd.f32 %v9094_v1, %v13561_v27  ;;  %v12367_v52 = vadd.f32 %v13562_v4, %v4534_v46  ;;  %v13563_v35 = vld [vmem:[#allocation145_spill] sm:$0xff]  ;;  %v13565_v22 = vld [vmem:[#allocation163_spill] sm:$0xff]  ;;  %v13566_v14 = vld [vmem:[#allocation164_spill] sm:$0xff]  ;;  %v5664_v46 = vadd.f32 %v13570_v30, %v5472_v29 }
 0x5ce   : > { %v12370_v32 = vadd.f32 %v13563_v35, %v4533_v56  ;;  %v5857_v59 = vadd.f32 %v13565_v22, %v5665_v51  ;;  %v5292_v45 = vadd.f32 %v13566_v14, %v5100_v37  ;;  %v12376_v34 = vpop.permute.xlu1 %7130  ;;  %v13569_v57 = vld [vmem:[#allocation150_spill] sm:$0xff]  ;;  %v13571_v44 = vld [vmem:[#allocation99_spill] sm:$0xff]  ;;  %v13572_v56 = vld [vmem:[#allocation92_spill] sm:$0xff] }
 0x5cf   : > { %13567 = vst [vmem:[#allocation18_spill] sm:$0xff] %v12376_v34  ;;  %v12378_v36 = vpop.permute.xlu0 %7116  ;;  %v12381_v63 = vadd.f32 %v13569_v57, %v6046_v2  ;;  %v12385_v1 = vadd.f32 %v13571_v44, %v5290_v13  ;;  %v12388_v27 = vadd.f32 %v13572_v56, %v6047_v62  ;;  %v13573_v42 = vld [vmem:[#allocation152_spill] sm:$0xff]  ;;  %v13574_v4 = vld [vmem:[#allocation157_spill] sm:$0xff]  ;;  %v13576_v22 = vld [vmem:[#allocation167_spill] sm:$0xff] }
 0x5d0   : > { %13568 = vst [vmem:[#allocation19_spill] sm:$0xff] %v12378_v36  ;;  %v4535_v51 = vadd.f32 %v11812_v5, %v13573_v42  ;;  %v5101_v37 = vadd.f32 %v13574_v4, %v4909_v24  ;;  %v13575_v35 = vld [vmem:[#allocation165_spill] sm:$0xff]  ;;  %v5475_v14 = vadd.f32 %v13576_v22, %v5283_v48  ;;  %v13577_v15 = vld [vmem:[#allocation160_spill] sm:$0xff]  ;;  %v13579_v30 = vld [vmem:[#allocation183_spill] sm:$0xff] }
 0x5d1   : > { %v6049_v23 = vadd.f32 %v13575_v35, %v5857_v59  ;;  %v5856_v2 = vadd.f32 %v13577_v15, %v5664_v46  ;;  %v13578_v57 = vld [vmem:[#allocation172_spill] sm:$0xff]  ;;  %v5477_v13 = vadd.f32 %v13579_v30, %v5285_v40  ;;  %v13580_v44 = vld [vmem:[#allocation55_spill] sm:$0xff]  ;;  %v13582_v42 = vld [vmem:[#allocation162_spill] sm:$0xff] }
 0x5d2   : > { %v4910_v29 = vadd.f32 %v13578_v57, %v12226_v25  ;;  %v12400_v36 = vadd.f32 %v13580_v44, %v4536_v12  ;;  %v13581_v62 = vld [vmem:[#allocation159_spill] sm:$0xff]  ;;  %v12406_v34 = vadd.f32 %v13582_v42, %v4535_v51  ;;  %v13583_v24 = vld [vmem:[#allocation177_spill] sm:$0xff]  ;;  %v13584_v4 = vld [vmem:[#allocation102_spill] sm:$0xff]  ;;  %v12412_v15 = vpop.permute.xlu1 %7134 }
 0x5d3   : > { %v12403_v56 = vadd.f32 %v13581_v62, %v5101_v37  ;;  %v5667_v59 = vadd.f32 %v13583_v24, %v5475_v14  ;;  %v12410_v48 = vadd.f32 %v13584_v4, %v5292_v45  ;;  %13585 = vst [vmem:[#allocation20_spill] sm:$0xff] %v12412_v15  ;;  %v12414_v46 = vpop.permute.xlu0 %7120  ;;  %v13587_v25 = vld [vmem:[#allocation166_spill] sm:$0xff]  ;;  %v9095_v35 = vld [vmem:[#allocation2 + $0x238] sm:$0xff]  ;;  %v13590_v30 = vld [vmem:[#allocation191_spill] sm:$0xff] }
 0x5d4   : > { %13586 = vst [vmem:[#allocation22_spill] sm:$0xff] %v12414_v46  ;;  %v6048_v40 = vadd.f32 %v13587_v25, %v5856_v2  ;;  %v13588_v12 = vld [vmem:[#allocation169_spill] sm:$0xff]  ;;  %v13589_v57 = vld [vmem:[#allocation174_spill] sm:$0xff]  ;;  %v5669_v44 = vadd.f32 %v13590_v30, %v5477_v13  ;;  %v13591_v51 = vld [vmem:[#allocation176_spill] sm:$0xff] }
 0x5d5   : > { %v4538_v22 = vadd.f32 %v9095_v35, %v13588_v12  ;;  %v5102_v37 = vadd.f32 %v13589_v57, %v4910_v29  ;;  %v5666_v62 = vadd.f32 %v13591_v51, %v5474_v58  ;;  %v13592_v42 = vld [vmem:[#allocation179_spill] sm:$0xff]  ;;  %v13593_v45 = vld [vmem:[#allocation188_spill] sm:$0xff]  ;;  %v13594_v4 = vld [vmem:[#allocation93_spill] sm:$0xff] }
 0x5d6   : > { %v5859_v14 = vadd.f32 %v13592_v42, %v5667_v59  ;;  %v4912_v24 = vadd.f32 %v13593_v45, %v12235_v54  ;;  %v12425_v15 = vadd.f32 %v13594_v4, %v6049_v23  ;;  %v13595_v46 = vld [vmem:[#allocation168_spill] sm:$0xff]  ;;  %v13596_v2 = vld [vmem:[#allocation171_spill] sm:$0xff]  ;;  %v13597_v35 = vld [vmem:[#allocation182_spill] sm:$0xff]  ;;  %v12439_v45 = vpop.permute.xlu1 %7138 }
 0x5d7   : > { %v12428_v41 = vadd.f32 %v13595_v46, %v6048_v40  ;;  %v4911_v25 = vadd.f32 %v13596_v2, %v12269_v28  ;;  %v5294_v29 = vadd.f32 %v13597_v35, %v5102_v37  ;;  %v13598_v12 = vld [vmem:[#allocation193_spill] sm:$0xff]  ;;  %v13599_v57 = vld [vmem:[#allocation178_spill] sm:$0xff]  ;;  %13603 = vst [vmem:[#allocation24_spill] sm:$0xff] %v12439_v45  ;;  %v12441_v46 = vpop.permute.xlu0 %7124  ;;  %v13607_v2 = vld [vmem:[#allocation195_spill] sm:$0xff] }
 0x5d8   : > { %v5861_v13 = vadd.f32 %v13598_v12, %v5669_v44  ;;  %v5858_v58 = vadd.f32 %v13599_v57, %v5666_v62  ;;  %v13600_v30 = vld [vmem:[#allocation181_spill] sm:$0xff]  ;;  %v13601_v51 = vld [vmem:[#allocation186_spill] sm:$0xff]  ;;  %13604 = vst [vmem:[#allocation21_spill] sm:$0xff] %v12441_v46  ;;  %v13610_v57 = vld [vmem:[#allocation187_spill] sm:$0xff] }
 0x5d9   : > { %v6051_v59 = vadd.f32 %v13600_v30, %v5859_v14  ;;  %v4913_v54 = vadd.f32 %v13601_v51, %v12286_v43  ;;  %v13602_v42 = vld [vmem:[#allocation190_spill] sm:$0xff]  ;;  %v13606_v4 = vld [vmem:[#allocation173_spill] sm:$0xff]  ;;  %v13609_v14 = vld [vmem:[#allocation184_spill] sm:$0xff] }
 0x5da   : > { %v5104_v23 = vadd.f32 %v13602_v42, %v4912_v24  ;;  %v13605_v40 = vld [vmem:[#allocation170_spill] sm:$0xff]  ;;  %v5103_v37 = vadd.f32 %v13606_v4, %v4911_v25  ;;  %v6053_v44 = vadd.f32 %v13607_v2, %v5861_v13  ;;  %v13608_v35 = vld [vmem:[#allocation57_spill] sm:$0xff]  ;;  %v6050_v12 = vadd.f32 %v13609_v14, %v5858_v58  ;;  %v13611_v24 = vld [vmem:[#allocation196_spill] sm:$0xff] }
 0x5db   : > { %v4537_v28 = vadd.f32 %v11812_v5, %v13605_v40  ;;  %v12448_v62 = vadd.f32 %v13608_v35, %v4538_v22  ;;  %v5105_v43 = vadd.f32 %v13610_v57, %v4913_v54  ;;  %v5479_v30 = vadd.f32 %v13611_v24, %v12325_v33  ;;  %v13612_v51 = vld [vmem:[#allocation197_spill] sm:$0xff]  ;;  %v13613_v46 = vld [vmem:[#allocation175_spill] sm:$0xff]  ;;  %v13614_v5 = vld [vmem:[#allocation180_spill] sm:$0xff] }
 0x5dc   : > { %v5296_v42 = vadd.f32 %v13612_v51, %v5104_v23  ;;  %v12456_v45 = vadd.f32 %v13613_v46, %v5103_v37  ;;  %v13615_v25 = vld [vmem:[#allocation192_spill] sm:$0xff]  ;;  %v13617_v58 = vld [vmem:[#allocation185_spill] sm:$0xff]  ;;  %v13620_v14 = vld [vmem:[#allocation94_spill] sm:$0xff]  ;;  %v12476_v37 = vpop.permute.xlu1 %7142 }
 0x5dd   : > { %v12459_v40 = vadd.f32 %v13614_v5, %v4537_v28  ;;  %v5668_v13 = vadd.f32 %v13615_v25, %v12322_v17  ;;  %v13616_v22 = vld [vmem:[#allocation104_spill] sm:$0xff]  ;;  %v12467_v2 = vadd.f32 %v13617_v58, %v6050_v12  ;;  %v13618_v54 = vld [vmem:[#allocation189_spill] sm:$0xff]  ;;  %v12474_v46 = vadd.f32 %v13620_v14, %v6051_v59  ;;  %13621 = vst [vmem:[#allocation27_spill] sm:$0xff] %v12476_v37  ;;  %v12478_v28 = vpop.permute.xlu0 %7128  ;;  %v13623_v57 = vld [vmem:[#allocation194_spill] sm:$0xff] }
 0x5de   : > { %v12464_v4 = vadd.f32 %v13616_v22, %v5294_v29  ;;  %v12470_v35 = vadd.f32 %v13618_v54, %v5105_v43  ;;  %v13619_v33 = vld [vmem:[#allocation204_spill] sm:$0xff]  ;;  %13622 = vst [vmem:[#allocation23_spill] sm:$0xff] %v12478_v28  ;;  %v13624_v29 = vld [vmem:[#allocation203_spill] sm:$0xff]  ;;  %v13625_v12 = vld [vmem:[#allocation210_spill] sm:$0xff] }
 0x5df   : > { %v5671_v23 = vadd.f32 %v13619_v33, %v5479_v30  ;;  %v5860_v17 = vadd.f32 %v13623_v57, %v5668_v13  ;;  %v4914_v24 = vadd.f32 %v13624_v29, %v12249_v38  ;;  %v5481_v51 = vadd.f32 %v13625_v12, %v12339_v9  ;;  %v13626_v5 = vld [vmem:[#allocation96_spill] sm:$0xff]  ;;  %v13627_v30 = vld [vmem:[#allocation198_spill] sm:$0xff]  ;;  %v13629_v58 = vld [vmem:[#allocation207_spill] sm:$0xff] }
 0x5e0   : > { %v12486_v43 = vadd.f32 %v13626_v5, %v6053_v44  ;;  %v4915_v25 = vadd.f32 %v13627_v30, %v12293_v31  ;;  %v13628_v59 = vld [vmem:[#allocation206_spill] sm:$0xff]  ;;  %v5670_v54 = vadd.f32 %v13629_v58, %v12336_v49  ;;  %v13631_v13 = vld [vmem:[#allocation199_spill] sm:$0xff]  ;;  %v13632_v38 = vld [vmem:[#allocation205_spill] sm:$0xff] }
 0x5e1   : > { %v5863_v22 = vadd.f32 %v13628_v59, %v5671_v23  ;;  %v13630_v33 = vld [vmem:[#allocation106_spill] sm:$0xff]  ;;  %v6052_v57 = vadd.f32 %v13631_v13, %v5860_v17  ;;  %v5106_v29 = vadd.f32 %v13632_v38, %v4914_v24  ;;  %v13634_v44 = vld [vmem:[#allocation217_spill] sm:$0xff]  ;;  %v13635_v5 = vld [vmem:[#allocation200_spill] sm:$0xff] }
 0x5e2   : > { %v12494_v14 = vadd.f32 %v13630_v33, %v5296_v42  ;;  %v13633_v28 = vld [vmem:[#allocation218_spill] sm:$0xff]  ;;  %v4916_v12 = vadd.f32 %v13634_v44, %v12272_v11  ;;  %v5107_v37 = vadd.f32 %v13635_v5, %v4915_v25  ;;  %v13636_v31 = vld [vmem:[#allocation208_spill] sm:$0xff]  ;;  %v13637_v23 = vld [vmem:[#allocation209_spill] sm:$0xff]  ;;  %v12506_v42 = vpop.permute.xlu1 %7146  ;;  %v12508_v33 = vpop.permute.xlu0 %7132 }
 0x5e3   : > { %v5673_v9 = vadd.f32 %v13633_v28, %v5481_v51  ;;  %v6055_v30 = vadd.f32 %v13636_v31, %v5863_v22  ;;  %v5862_v59 = vadd.f32 %v13637_v23, %v5670_v54  ;;  %v13638_v49 = vld [vmem:[#allocation224_spill] sm:$0xff]  ;;  %13639 = vst [vmem:[#allocation29_spill] sm:$0xff] %v12506_v42  ;;  %13640 = vst [vmem:[#allocation25_spill] sm:$0xff] %v12508_v33  ;;  %v13642_v28 = vld [vmem:[#allocation211_spill] sm:$0xff] }
 0x5e4   : > { %v5483_v58 = vadd.f32 %v13638_v49, %v12362_v19  ;;  %v13641_v17 = vld [vmem:[#allocation212_spill] sm:$0xff]  ;;  %v5298_v51 = vadd.f32 %v13642_v28, %v5106_v29  ;;  %v13644_v38 = vld [vmem:[#allocation219_spill] sm:$0xff]  ;;  %v13645_v44 = vld [vmem:[#allocation202_spill] sm:$0xff] }
 0x5e5   : > { %v4917_v24 = vadd.f32 %v13641_v17, %v12302_v53  ;;  %v13643_v13 = vld [vmem:[#allocation220_spill] sm:$0xff]  ;;  %v5108_v25 = vadd.f32 %v13644_v38, %v4916_v12  ;;  %v12516_v22 = vadd.f32 %v13645_v44, %v5107_v37  ;;  %v13646_v54 = vld [vmem:[#allocation201_spill] sm:$0xff]  ;;  %v13649_v33 = vld [vmem:[#allocation214_spill] sm:$0xff] }
 0x5e6   : > { %v5865_v11 = vadd.f32 %v13643_v13, %v5673_v9  ;;  %v12519_v5 = vadd.f32 %v13646_v54, %v6052_v57  ;;  %v13647_v19 = vld [vmem:[#allocation221_spill] sm:$0xff]  ;;  %v13648_v23 = vld [vmem:[#allocation232_spill] sm:$0xff]  ;;  %v13651_v29 = vld [vmem:[#allocation222_spill] sm:$0xff] }
 0x5e7   : > { %v5672_v31 = vadd.f32 %v13647_v19, %v12353_v26  ;;  %v5675_v49 = vadd.f32 %v13648_v23, %v5483_v58  ;;  %v5109_v42 = vadd.f32 %v13649_v33, %v4917_v24  ;;  %v13650_v53 = vld [vmem:[#allocation213_spill] sm:$0xff]  ;;  %v13653_v12 = vld [vmem:[#allocation223_spill] sm:$0xff]  ;;  %v13655_v57 = vld [vmem:[#allocation234_spill] sm:$0xff]  ;;  %v12535_v26 = vpop.permute.xlu1 %7150  ;;  %v12537_v58 = vpop.permute.xlu0 %7136 }
 0x5e8   : > { %v6054_v17 = vadd.f32 %v13650_v53, %v5862_v59  ;;  %v6057_v28 = vadd.f32 %v13651_v29, %v5865_v11  ;;  %v13652_v9 = vld [vmem:[#allocation225_spill] sm:$0xff]  ;;  %v13654_v37 = vld [vmem:[#allocation231_spill] sm:$0xff]  ;;  %v13656_v18 = vld [vmem:[#allocation98_spill] sm:$0xff]  ;;  %13657 = vst [vmem:[#allocation32_spill] sm:$0xff] %v12537_v58 }
 0x5e9   : > { %v5300_v13 = vadd.f32 %v13652_v9, %v5108_v25  ;;  %v5864_v38 = vadd.f32 %v13653_v12, %v5672_v31  ;;  %v4918_v44 = vadd.f32 %v13654_v37, %v12370_v32  ;;  %v5867_v54 = vadd.f32 %v13655_v57, %v5675_v49  ;;  %v13658_v33 = vld [vmem:[#allocation216_spill] sm:$0xff]  ;;  %v13659_v24 = vld [vmem:[#allocation215_spill] sm:$0xff]  ;;  %v13662_v32 = vld [vmem:[#allocation226_spill] sm:$0xff] }
 0x5ea   : > { %v12533_v61 = vadd.f32 %v13656_v18, %v6055_v30  ;;  %v5301_v59 = vadd.f32 %v13658_v33, %v5109_v42  ;;  %v12541_v11 = vadd.f32 %v13659_v24, %v6054_v17  ;;  %v13660_v25 = vld [vmem:[#allocation244_spill] sm:$0xff]  ;;  %v4919_v49 = vadd.f32 %v13662_v32, %v12367_v52  ;;  %v13663_v18 = vld [vmem:[#allocation227_spill] sm:$0xff]  ;;  %v13664_v53 = vld [vmem:[#allocation233_spill] sm:$0xff] }
 0x5eb   : > { %v5485_v19 = vadd.f32 %v13660_v25, %v12403_v56  ;;  %v13661_v31 = vld [vmem:[#allocation108_spill] sm:$0xff]  ;;  %v6056_v30 = vadd.f32 %v13663_v18, %v5864_v38  ;;  %v5110_v29 = vadd.f32 %v13664_v53, %v4918_v44  ;;  %v13666_v42 = vld [vmem:[#allocation235_spill] sm:$0xff]  ;;  %v13669_v56 = vld [vmem:[#allocation110_spill] sm:$0xff]  ;;  %v12569_v53 = vpop.permute.xlu1 %7154 }
 0x5ec   : > { %v12546_v23 = vadd.f32 %v13661_v31, %v5298_v51  ;;  %v13665_v9 = vld [vmem:[#allocation236_spill] sm:$0xff]  ;;  %v5674_v37 = vadd.f32 %v13666_v42, %v12385_v1  ;;  %v12560_v51 = vadd.f32 %v13669_v56, %v5300_v13  ;;  %v13671_v52 = vld [vmem:[#allocation229_spill] sm:$0xff]  ;;  %v13672_v38 = vld [vmem:[#allocation238_spill] sm:$0xff]  ;;  %13674 = vst [vmem:[#allocation26_spill] sm:$0xff] %v12569_v53  ;;  %v12571_v1 = vpop.permute.xlu0 %7140 }
 0x5ed   : > { %v6059_v12 = vadd.f32 %v13665_v9, %v5867_v54  ;;  %v13667_v17 = vld [vmem:[#allocation252_spill] sm:$0xff]  ;;  %v12564_v32 = vadd.f32 %v13671_v52, %v6056_v30  ;;  %v6432_v44 = vadd.f32 %v13672_v38, %v12388_v27  ;;  %v13673_v54 = vld [vmem:[#allocation243_spill] sm:$0xff]  ;;  %13675 = vst [vmem:[#allocation34_spill] sm:$0xff] %v12571_v1  ;;  %v13683_v38 = vld [vmem:[#allocation101_spill] sm:$0xff] }
 0x5ee   : > { %v5677_v57 = vadd.f32 %v13667_v17, %v5485_v19  ;;  %v13668_v33 = vld [vmem:[#allocation100_spill] sm:$0xff]  ;;  %v5302_v18 = vadd.f32 %v13673_v54, %v5110_v29  ;;  %v13676_v19 = vld [vmem:[#allocation237_spill] sm:$0xff]  ;;  %v13677_v9 = vld [vmem:[#allocation239_spill] sm:$0xff] }
 0x5ef   : > { %v12557_v24 = vadd.f32 %v13668_v33, %v6057_v28  ;;  %v13670_v25 = vld [vmem:[#allocation228_spill] sm:$0xff]  ;;  %v5866_v28 = vadd.f32 %v13676_v19, %v5674_v37  ;;  %v6431_v13 = vadd.f32 %v13677_v9, %v12381_v63  ;;  %v13678_v42 = vld [vmem:[#allocation251_spill] sm:$0xff]  ;;  %v13679_v17 = vld [vmem:[#allocation254_spill] sm:$0xff]  ;;  %v12586_v54 = vadd.f32 %v13683_v38, %v6059_v12  ;;  %v12599_v12 = vpop.permute.xlu1 %7158 }
 0x5f0   : > { %v5111_v31 = vadd.f32 %v13670_v25, %v4919_v49  ;;  %v4920_v49 = vadd.f32 %v13678_v42, %v12406_v34  ;;  %v5869_v30 = vadd.f32 %v13679_v17, %v5677_v57  ;;  %v13680_v33 = vld [vmem:[#allocation230_spill] sm:$0xff]  ;;  %v13681_v27 = vld [vmem:[#allocation240_spill] sm:$0xff]  ;;  %v13684_v37 = vld [vmem:[#allocation241_spill] sm:$0xff] }
 0x5f1   : > { %v6624_v25 = vadd.f32 %v13681_v27, %v6432_v44  ;;  %v13682_v29 = vld [vmem:[#allocation246_spill] sm:$0xff]  ;;  %v6623_v19 = vadd.f32 %v13684_v37, %v6431_v13  ;;  %v13685_v1 = vld [vmem:[#allocation245_spill] sm:$0xff]  ;;  %v13687_v34 = vld [vmem:[#allocation256_spill] sm:$0xff]  ;;  %v12601_v13 = vpop.permute.xlu0 %7144 }
 0x5f2   : > { %v12580_v56 = vadd.f32 %v13680_v33, %v5111_v31  ;;  %v4921_v52 = vadd.f32 %v13682_v29, %v12400_v36  ;;  %v6058_v63 = vadd.f32 %v13685_v1, %v5866_v28  ;;  %v13686_v9 = vld [vmem:[#allocation253_spill] sm:$0xff]  ;;  %v6061_v42 = vadd.f32 %v13687_v34, %v5869_v30  ;;  %v13688_v57 = vld [vmem:[#allocation242_spill] sm:$0xff]  ;;  %v13689_v31 = vld [vmem:[#allocation248_spill] sm:$0xff] }
 0x5f3   : > { %v5112_v53 = vadd.f32 %v13686_v9, %v4920_v49  ;;  %v6816_v17 = vadd.f32 %v13688_v57, %v6624_v25  ;;  %v13690_v44 = vld [vmem:[#allocation255_spill] sm:$0xff]  ;;  %v13691_v58 = vld [vmem:[#allocation112_spill] sm:$0xff]  ;;  %v13693_v49 = vld [vmem:[#allocation258_spill] sm:$0xff] }
 0x5f4   : > { %v5113_v33 = vadd.f32 %v13689_v31, %v4921_v52  ;;  %v5676_v27 = vadd.f32 %v13690_v44, %v12410_v48  ;;  %v12597_v36 = vadd.f32 %v13691_v58, %v5302_v18  ;;  %v13692_v1 = vld [vmem:[#allocation247_spill] sm:$0xff]  ;;  %v6434_v30 = vadd.f32 %v13693_v49, %v12425_v15  ;;  %v13694_v25 = vld [vmem:[#allocation264_spill] sm:$0xff]  ;;  %v13696_v48 = vld [vmem:[#allocation250_spill] sm:$0xff] }
 0x5f5   : > { %v12604_v28 = vadd.f32 %v13692_v1, %v6058_v63  ;;  %v5487_v29 = vadd.f32 %v13694_v25, %v12456_v45  ;;  %v13695_v52 = vld [vmem:[#allocation263_spill] sm:$0xff]  ;;  %v13697_v58 = vld [vmem:[#allocation249_spill] sm:$0xff]  ;;  %v13700_v31 = vld [vmem:[#allocation260_spill] sm:$0xff] }
 0x5f6   : > { %v5304_v38 = vadd.f32 %v13695_v52, %v5112_v53  ;;  %v12612_v37 = vadd.f32 %v13696_v48, %v5113_v33  ;;  %v12615_v18 = vadd.f32 %v13697_v58, %v6623_v19  ;;  %v13698_v9 = vld [vmem:[#allocation257_spill] sm:$0xff]  ;;  %v13699_v57 = vld [vmem:[#allocation259_spill] sm:$0xff]  ;;  %v6626_v44 = vadd.f32 %v13700_v31, %v6434_v30  ;;  %v13701_v15 = vld [vmem:[#allocation266_spill] sm:$0xff] }
 0x5f7   : > { %v5868_v34 = vadd.f32 %v13698_v9, %v5676_v27  ;;  %v6433_v63 = vadd.f32 %v13699_v57, %v12428_v41  ;;  %v4923_v1 = vadd.f32 %v13701_v15, %v12448_v62  ;;  %v13702_v49 = vld [vmem:[#allocation272_spill] sm:$0xff]  ;;  %v13703_v25 = vld [vmem:[#allocation103_spill] sm:$0xff]  ;;  %v13704_v33 = vld [vmem:[#allocation261_spill] sm:$0xff]  ;;  %v12634_v9 = vpop.permute.xlu1 %7162  ;;  %v12636_v62 = vpop.permute.xlu0 %7148 }
 0x5f8   : > { %v5679_v45 = vadd.f32 %v13702_v49, %v5487_v29  ;;  %v12625_v53 = vadd.f32 %v13703_v25, %v6061_v42  ;;  %v13705_v19 = vld [vmem:[#allocation265_spill] sm:$0xff]  ;;  %v13706_v27 = vld [vmem:[#allocation271_spill] sm:$0xff]  ;;  %13708 = vst [vmem:[#allocation28_spill] sm:$0xff] %v12634_v9  ;;  %13709 = vst [vmem:[#allocation36_spill] sm:$0xff] %v12636_v62 }
 0x5f9   : > { %v6625_v52 = vadd.f32 %v13704_v33, %v6433_v63  ;;  %v6060_v48 = vadd.f32 %v13705_v19, %v5868_v34  ;;  %v4922_v58 = vadd.f32 %v13706_v27, %v12459_v40  ;;  %v13707_v41 = vld [vmem:[#allocation295_spill] sm:$0xff]  ;;  %v13710_v29 = vld [vmem:[#allocation262_spill] sm:$0xff]  ;;  %v13711_v57 = vld [vmem:[#allocation268_spill] sm:$0xff] }
 0x5fa   : > { %v5491_v30 = vadd.f32 %v13707_v41, %v12516_v22  ;;  %v6818_v42 = vadd.f32 %v13710_v29, %v6626_v44  ;;  %v5115_v31 = vadd.f32 %v13711_v57, %v4923_v1  ;;  %v13712_v15 = vld [vmem:[#allocation274_spill] sm:$0xff]  ;;  %v13714_v25 = vld [vmem:[#allocation267_spill] sm:$0xff]  ;;  %v13715_v33 = vld [vmem:[#allocation273_spill] sm:$0xff]  ;;  %v5493_v41 = vadd.f32 %v11676_v21, %v5301_v59 }
 0x5fb   : > { %v5871_v63 = vadd.f32 %v13712_v15, %v5679_v45  ;;  %v13713_v49 = vld [vmem:[#allocation114_spill] sm:$0xff]  ;;  %v12645_v40 = vadd.f32 %v13714_v25, %v6060_v48  ;;  %v5114_v19 = vadd.f32 %v13715_v33, %v4922_v58  ;;  %v13716_v27 = vld [vmem:[#allocation296_spill] sm:$0xff]  ;;  %v13718_v44 = vld [vmem:[#allocation269_spill] sm:$0xff] }
 0x5fc   : > { %v12642_v34 = vadd.f32 %v13713_v49, %v5304_v38  ;;  %v5683_v22 = vadd.f32 %v13716_v27, %v5491_v30  ;;  %v13717_v9 = vld [vmem:[#allocation270_spill] sm:$0xff]  ;;  %v12654_v29 = vadd.f32 %v13718_v44, %v6625_v52  ;;  %v13719_v1 = vld [vmem:[#allocation276_spill] sm:$0xff]  ;;  %v13720_v38 = vld [vmem:[#allocation275_spill] sm:$0xff]  ;;  %v12669_v52 = vpop.permute.xlu1 %7166  ;;  %v12671_v49 = vpop.permute.xlu0 %7152 }
 0x5fd   : > { %v12651_v62 = vadd.f32 %v13717_v9, %v5115_v31  ;;  %v6063_v45 = vadd.f32 %v13719_v1, %v5871_v63  ;;  %v5678_v57 = vadd.f32 %v13720_v38, %v12464_v4  ;;  %v13721_v48 = vld [vmem:[#allocation282_spill] sm:$0xff]  ;;  %v13722_v30 = vld [vmem:[#allocation283_spill] sm:$0xff]  ;;  %13725 = vst [vmem:[#allocation30_spill] sm:$0xff] %v12671_v49  ;;  %v13727_v25 = vld [vmem:[#allocation277_spill] sm:$0xff] }
 0x5fe   : > { %v5489_v58 = vadd.f32 %v13721_v48, %v12470_v35  ;;  %v5306_v15 = vadd.f32 %v13722_v30, %v5114_v19  ;;  %v13723_v21 = vld [vmem:[#allocation298_spill] sm:$0xff]  ;;  %v13724_v9 = vld [vmem:[#allocation307_spill] sm:$0xff]  ;;  %v7009_v35 = vadd.f32 %v12001_v7, %v6816_v17  ;;  %v13733_v49 = vld [vmem:[#allocation281_spill] sm:$0xff] }
 0x5ff   : > { %v5875_v59 = vadd.f32 %v13723_v21, %v5683_v22  ;;  %v5685_v31 = vadd.f32 %v13724_v9, %v5493_v41  ;;  %v13726_v63 = vld [vmem:[#allocation278_spill] sm:$0xff]  ;;  %v5870_v33 = vadd.f32 %v13727_v25, %v5678_v57  ;;  %v13728_v27 = vld [vmem:[#allocation279_spill] sm:$0xff]  ;;  %v13730_v22 = vld [vmem:[#allocation300_spill] sm:$0xff] }
 0x600   : > { %v6436_v4 = vadd.f32 %v13726_v63, %v12474_v46  ;;  %v6435_v44 = vadd.f32 %v13728_v27, %v12467_v2  ;;  %v13729_v19 = vld [vmem:[#allocation286_spill] sm:$0xff]  ;;  %v13731_v41 = vld [vmem:[#allocation301_spill] sm:$0xff]  ;;  %v13732_v21 = vld [vmem:[#allocation280_spill] sm:$0xff]  ;;  %v7201_v2 = vadd.f32 %v12194_v55, %v7009_v35  ;;  %v7011_v35 = vadd.f32 %v12007_v20, %v6818_v42 }
 0x601   : > { %v5681_v1 = vadd.f32 %v13729_v19, %v5489_v58  ;;  %v6067_v38 = vadd.f32 %v13730_v22, %v5875_v59  ;;  %v5682_v48 = vadd.f32 %v13731_v41, %v12546_v23  ;;  %v5877_v30 = vadd.f32 %v11691_v6, %v5685_v31  ;;  %v13734_v57 = vld [vmem:[#allocation105_spill] sm:$0xff]  ;;  %v13735_v7 = vld [vmem:[#allocation287_spill] sm:$0xff]  ;;  %v13737_v23 = vld [vmem:[#allocation116_spill] sm:$0xff]  ;;  %v7299_v31 = vpop.permute.xlu1 %7298 }
 0x602   : > { %v6628_v9 = vadd.f32 %v13732_v21, %v6436_v4  ;;  %v12686_v46 = vadd.f32 %v13733_v49, %v6435_v44  ;;  %v12689_v63 = vadd.f32 %v13734_v57, %v6063_v45  ;;  %v13736_v58 = vld [vmem:[#allocation303_spill] sm:$0xff]  ;;  %v12697_v27 = vadd.f32 %v13737_v23, %v5306_v15  ;;  %v12699_v6 = vld [vmem:[#allocation7] ss:$0 sm:$0xff]  ;;  %v12701_v49 = vpop.permute.xlu0 %7156  ;;  %v13738_v4 = vld [vmem:[#allocation284_spill] sm:$0xff] }
 0x603   : > { %v5873_v17 = vadd.f32 %v13735_v7, %v5681_v1  ;;  %v5874_v59 = vadd.f32 %v13736_v58, %v5682_v48  ;;  %v6069_v25 = vadd.f32 %v11698_v10, %v5877_v30  ;;  %v6062_v45 = vadd.f32 %v13738_v4, %v5870_v33  ;;  %v13739_v44 = vld [vmem:[#allocation288_spill] sm:$0xff]  ;;  %v13740_v1 = vld [vmem:[#allocation289_spill] sm:$0xff]  ;;  %v13743_v33 = vld [vmem:[#allocation291_spill] sm:$0xff] }
 0x604   : > { %v5680_v55 = vadd.f32 %v13739_v44, %v12494_v14  ;;  %v7393_v19 = vadd.f32 %v7299_v31, %v7201_v2  ;;  %v13741_v41 = vld [vmem:[#allocation109_spill] sm:$0xff]  ;;  %v13742_v48 = vld [vmem:[#allocation308_spill] sm:$0xff]  ;;  %v6438_v30 = vadd.f32 %v13743_v33, %v12486_v43  ;;  %v6820_v14 = vadd.f32 %v11904_v47, %v6628_v9  ;;  %v13744_v21 = vld [vmem:[#allocation290_spill] sm:$0xff] }
 0x605   : > { %v6065_v22 = vadd.f32 %v13740_v1, %v5873_v17  ;;  %v6259_v10 = vadd.f32 %v13741_v41, %v6067_v38  ;;  %v6066_v15 = vadd.f32 %v13742_v48, %v5874_v59  ;;  %v7203_v20 = vadd.f32 %v12221_v8, %v7011_v35  ;;  %v13745_v57 = vld [vmem:[#allocation292_spill] sm:$0xff]  ;;  %v13746_v7 = vld [vmem:[#allocation111_spill] sm:$0xff]  ;;  %v13747_v58 = vld [vmem:[#allocation309_spill] sm:$0xff]  ;;  %v7303_v23 = vpop.permute.xlu1 %7302 }
 0x606   : > { %v7432_v42 = vadd.f32 %v12699_v6, %v7393_v19  ;;  %v5872_v38 = vadd.f32 %v13744_v21, %v5680_v55  ;;  %v6437_v2 = vadd.f32 %v13745_v57, %v12519_v5  ;;  %v6261_v17 = vadd.f32 %v13746_v7, %v6069_v25  ;;  %v12725_v31 = vpop.permute.xlu0 %7160  ;;  %v13748_v4 = vld [vmem:[#allocation285_spill] sm:$0xff]  ;;  %v13750_v55 = vld [vmem:[#allocation294_spill] sm:$0xff]  ;;  %v13752_v25 = vld [vmem:[#allocation107_spill] sm:$0xff] }
 0x607   : > { %v6258_v59 = vadd.f32 %v13747_v58, %v6066_v15  ;;  %v12728_v43 = vadd.f32 %v13748_v4, %v6062_v45  ;;  %v13749_v47 = vld [vmem:[#allocation293_spill] sm:$0xff]  ;;  %v7013_v8 = vadd.f32 %v12013_v39, %v6820_v14  ;;  %v7395_v44 = vadd.f32 %v7303_v23, %v7203_v20  ;;  %v13753_v41 = vld [vmem:[#allocation119_spill] sm:$0xff]  ;;  %v13754_v45 = vld [vmem:[#allocation302_spill] sm:$0xff] }
 0x608   : > { %v6630_v9 = vadd.f32 %v13749_v47, %v6438_v30  ;;  %7465 = vst.msk [vmem:[%s12713_s7 + $0x8] sm:$0xff] %vm7463_vm0, %v7432_v42  ;;  %v6629_v35 = vadd.f32 %v13750_v55, %v6437_v2  ;;  %v13751_v5 = vld [vmem:[#allocation297_spill] sm:$0xff]  ;;  %v12737_v1 = vadd.f32 %v13752_v25, %v6065_v22  ;;  %v6452_v48 = vadd.f32 %v13753_v41, %v6259_v10  ;;  %v13755_v14 = vld [vmem:[#allocation299_spill] sm:$0xff] }
 0x609   : > { %v6064_v19 = vadd.f32 %v13751_v5, %v5872_v38  ;;  %v6440_v15 = vadd.f32 %v13754_v45, %v12533_v61  ;;  %v7205_v39 = vadd.f32 %v12254_v16, %v7013_v8  ;;  %v7434_v30 = vadd.f32 %v12699_v6, %v7395_v44  ;;  %v13756_v42 = vld [vmem:[#allocation305_spill] sm:$0xff]  ;;  %v13757_v38 = vld [vmem:[#allocation118_spill] sm:$0xff]  ;;  %v7307_v10 = vpop.permute.xlu1 %7306  ;;  %v13759_v61 = vld [vmem:[#allocation304_spill] sm:$0xff] }
 0x60a   : > { %v6822_v33 = vadd.f32 %v11912_v3, %v6630_v9  ;;  %v6439_v21 = vadd.f32 %v13756_v42, %v12541_v11  ;;  %v6451_v22 = vadd.f32 %v13757_v38, %v6258_v59  ;;  %v13758_v57 = vld [vmem:[#allocation121_spill] sm:$0xff]  ;;  %v12752_v7 = vpop.permute.xlu0 %7164  ;;  %v13760_v3 = vld [vmem:[#allocation382_spill] sm:$0xff]  ;;  %v13761_v16 = vld [vmem:[#allocation383_spill] sm:$0xff] }
 0x60b   : > { %v12746_v20 = vadd.f32 %v13755_v14, %v6064_v19  ;;  %v6454_v2 = vadd.f32 %v13758_v57, %v6261_v17  ;;  %v6632_v58 = vadd.f32 %v13759_v61, %v6440_v15  ;;  %v7008_v4 = vadd.f32 %v13761_v16, %v12615_v18  ;;  %7467 = vst.msk [vmem:[%s12713_s7 + $0x18] sm:$0xff] %vm7463_vm0, %v7434_v30  ;;  %v13762_v9 = vld [vmem:[#allocation306_spill] sm:$0xff]  ;;  %v13763_v11 = vld [vmem:[#allocation311_spill] sm:$0xff]  ;;  %v13765_v55 = vld [vmem:[#allocation129_spill] sm:$0xff] }
 0x60c   : > { %v7015_v23 = vadd.f32 %v13760_v3, %v6822_v33  ;;  %v7397_v47 = vadd.f32 %v7307_v10, %v7205_v39  ;;  %v6631_v8 = vadd.f32 %v13762_v9, %v6439_v21  ;;  %v6442_v59 = vadd.f32 %v13763_v11, %v12557_v24  ;;  %v13764_v17 = vld [vmem:[#allocation310_spill] sm:$0xff]  ;;  %v13767_v15 = vld [vmem:[#allocation313_spill] sm:$0xff]  ;;  %v13768_v39 = vld [vmem:[#allocation312_spill] sm:$0xff] }
 0x60d   : > { %v5684_v44 = vadd.f32 %v13764_v17, %v12560_v51  ;;  %v12766_v5 = vadd.f32 %v13765_v55, %v6452_v48  ;;  %v13766_v19 = vld [vmem:[#allocation358_spill] sm:$0xff]  ;;  %v7200_v18 = vadd.f32 %v12282_v0, %v7008_v4  ;;  %v13769_v14 = vld [vmem:[#allocation131_spill] sm:$0xff]  ;;  %v13770_v42 = vld [vmem:[#allocation128_spill] sm:$0xff]  ;;  %v7311_v48 = vpop.permute.xlu1 %7310 }
 0x60e   : > { %v6824_v25 = vadd.f32 %v13766_v19, %v6632_v58  ;;  %v7207_v41 = vadd.f32 %v12280_v60, %v7015_v23  ;;  %v7436_v45 = vadd.f32 %v12699_v6, %v7397_v47  ;;  %v6634_v33 = vadd.f32 %v13767_v15, %v6442_v59  ;;  %v7297_v21 = vpop.permute.xlu0 %7296  ;;  %v13771_v38 = vld [vmem:[#allocation384_spill] sm:$0xff]  ;;  %v13772_v60 = vld [vmem:[#allocation385_spill] sm:$0xff]  ;;  %v13773_v58 = vld [vmem:[#allocation318_spill] sm:$0xff] }
 0x60f   : > { %v5876_v30 = vadd.f32 %v13768_v39, %v5684_v44  ;;  %v12775_v24 = vadd.f32 %v13769_v14, %v6454_v2  ;;  %v12778_v51 = vadd.f32 %v13770_v42, %v6451_v22  ;;  %v7010_v10 = vadd.f32 %v13772_v60, %v12654_v29  ;;  %v13774_v23 = vld [vmem:[#allocation323_spill] sm:$0xff]  ;;  %v13776_v4 = vld [vmem:[#allocation360_spill] sm:$0xff]  ;;  %v13779_v19 = vld [vmem:[#allocation314_spill] sm:$0xff] }
 0x610   : > { %v7017_v57 = vadd.f32 %v13771_v38, %v6824_v25  ;;  %7469 = vst.msk [vmem:[%s12713_s7 + $0x28] sm:$0xff] %vm7463_vm0, %v7436_v45  ;;  %v7399_v0 = vadd.f32 %v7311_v48, %v7207_v41  ;;  %v7392_v61 = vadd.f32 %v7297_v21, %v7200_v18  ;;  %v6444_v2 = vadd.f32 %v13774_v23, %v12586_v54  ;;  %v13775_v16 = vld [vmem:[#allocation359_spill] sm:$0xff]  ;;  %v13780_v25 = vld [vmem:[#allocation320_spill] sm:$0xff]  ;;  %v13781_v18 = vld [vmem:[#allocation325_spill] sm:$0xff] }
 0x611   : > { %v6068_v3 = vadd.f32 %v13773_v58, %v5876_v30  ;;  %v6826_v22 = vadd.f32 %v13775_v16, %v6634_v33  ;;  %v6819_v47 = vadd.f32 %v13776_v4, %v12686_v46  ;;  %v13777_v11 = vld [vmem:[#allocation15_spill] sm:$0xff]  ;;  %v6441_v54 = vadd.f32 %v13779_v19, %v12564_v32  ;;  %v7315_v15 = vpop.permute.xlu1 %7314  ;;  %v13782_v33 = vld [vmem:[#allocation386_spill] sm:$0xff]  ;;  %v13786_v38 = vld [vmem:[#allocation361_spill] sm:$0xff] }
 0x612   : > { %v7209_v9 = vadd.f32 %v12311_v50, %v7017_v57  ;;  %v7202_v29 = vadd.f32 %v13777_v11, %v7010_v10  ;;  %v7438_v59 = vadd.f32 %v12699_v6, %v7399_v0  ;;  %v7431_v17 = vadd.f32 %v12699_v6, %v7392_v61  ;;  %v13778_v44 = vld [vmem:[#allocation315_spill] sm:$0xff]  ;;  %v7301_v46 = vpop.permute.xlu0 %7300  ;;  %v13787_v60 = vld [vmem:[#allocation362_spill] sm:$0xff]  ;;  %v13788_v0 = vld [vmem:[#allocation17_spill] sm:$0xff] }
 0x613   : > { %v5495_v55 = vadd.f32 %v13778_v44, %v12580_v56  ;;  %v6260_v41 = vadd.f32 %v13780_v25, %v6068_v3  ;;  %v6636_v45 = vadd.f32 %v13781_v18, %v6444_v2  ;;  %v7019_v50 = vadd.f32 %v13782_v33, %v6826_v22  ;;  %v13783_v39 = vld [vmem:[#allocation387_spill] sm:$0xff]  ;;  %v13784_v56 = vld [vmem:[#allocation317_spill] sm:$0xff]  ;;  %v13789_v58 = vld [vmem:[#allocation16_spill] sm:$0xff] }
 0x614   : > { %v7012_v30 = vadd.f32 %v13783_v39, %v6819_v47  ;;  %7471 = vst.msk [vmem:[%s12713_s7 + $0x38] sm:$0xff] %vm7463_vm0, %v7438_v59  ;;  %v7401_v14 = vadd.f32 %v7315_v15, %v7209_v9  ;;  %7464 = vst.msk [vmem:[%s12713_s7] sm:$0xff] %vm7463_vm0, %v7431_v17  ;;  %v7394_v42 = vadd.f32 %v7301_v46, %v7202_v29  ;;  %v13785_v32 = vld [vmem:[#allocation335_spill] sm:$0xff]  ;;  %v13790_v16 = vld [vmem:[#allocation316_spill] sm:$0xff] }
 0x615   : > { %v5687_v48 = vadd.f32 %v13784_v56, %v5495_v55  ;;  %v6446_v21 = vadd.f32 %v13785_v32, %v12625_v53  ;;  %v6828_v57 = vadd.f32 %v13786_v38, %v6636_v45  ;;  %v6821_v10 = vadd.f32 %v13787_v60, %v6629_v35  ;;  %v13791_v4 = vld [vmem:[#allocation319_spill] sm:$0xff]  ;;  %v13792_v9 = vld [vmem:[#allocation120_spill] sm:$0xff]  ;;  %v13793_v53 = vld [vmem:[#allocation337_spill] sm:$0xff]  ;;  %v7319_v59 = vpop.permute.xlu1 %7318 }
 0x616   : > { %v7211_v61 = vadd.f32 %v13788_v0, %v7019_v50  ;;  %v7204_v3 = vadd.f32 %v13789_v58, %v7012_v30  ;;  %v7440_v23 = vadd.f32 %v12699_v6, %v7401_v14  ;;  %v7433_v2 = vadd.f32 %v12699_v6, %v7394_v42  ;;  %v7305_v17 = vpop.permute.xlu0 %7304  ;;  %v13794_v44 = vld [vmem:[#allocation388_spill] sm:$0xff]  ;;  %v13795_v55 = vld [vmem:[#allocation389_spill] sm:$0xff]  ;;  %v13797_v15 = vld [vmem:[#allocation347_spill] sm:$0xff] }
 0x617   : > { %v6633_v22 = vadd.f32 %v13790_v16, %v6441_v54  ;;  %v5879_v47 = vadd.f32 %v13791_v4, %v5687_v48  ;;  %v6453_v11 = vadd.f32 %v13792_v9, %v6260_v41  ;;  %v6638_v29 = vadd.f32 %v13793_v53, %v6446_v21  ;;  %v13796_v45 = vld [vmem:[#allocation321_spill] sm:$0xff]  ;;  %v13798_v46 = vld [vmem:[#allocation363_spill] sm:$0xff]  ;;  %v13799_v50 = vld [vmem:[#allocation364_spill] sm:$0xff] }
 0x618   : > { %v7021_v35 = vadd.f32 %v13794_v44, %v6828_v57  ;;  %v7014_v19 = vadd.f32 %v13795_v55, %v6821_v10  ;;  %7473 = vst.msk [vmem:[%s12713_s7 + $0x48] sm:$0xff] %vm7463_vm0, %v7440_v23  ;;  %v7403_v25 = vadd.f32 %v7319_v59, %v7211_v61  ;;  %7466 = vst.msk [vmem:[%s12713_s7 + $0x10] sm:$0xff] %vm7463_vm0, %v7433_v2  ;;  %v13800_v30 = vld [vmem:[#allocation18_spill] sm:$0xff]  ;;  %v13801_v42 = vld [vmem:[#allocation19_spill] sm:$0xff] }
 0x619   : > { %v7396_v18 = vadd.f32 %v7305_v17, %v7204_v3  ;;  %v6071_v54 = vadd.f32 %v13796_v45, %v5879_v47  ;;  %v6448_v41 = vadd.f32 %v13797_v15, %v12689_v63  ;;  %v6830_v33 = vadd.f32 %v13798_v46, %v6638_v29  ;;  %v13802_v21 = vld [vmem:[#allocation322_spill] sm:$0xff]  ;;  %v13803_v57 = vld [vmem:[#allocation327_spill] sm:$0xff]  ;;  %v13805_v0 = vld [vmem:[#allocation349_spill] sm:$0xff]  ;;  %v7323_v61 = vpop.permute.xlu1 %7322 }
 0x61a   : > { %v6823_v39 = vadd.f32 %v13799_v50, %v6631_v8  ;;  %v7213_v14 = vadd.f32 %v13800_v30, %v7021_v35  ;;  %v7206_v56 = vadd.f32 %v13801_v42, %v7014_v19  ;;  %v7442_v48 = vadd.f32 %v12699_v6, %v7403_v25  ;;  %v13804_v60 = vld [vmem:[#allocation326_spill] sm:$0xff]  ;;  %v7309_v58 = vpop.permute.xlu0 %7308  ;;  %v13807_v2 = vld [vmem:[#allocation391_spill] sm:$0xff]  ;;  %v13808_v47 = vld [vmem:[#allocation329_spill] sm:$0xff] }
 0x61b   : > { %v7435_v32 = vadd.f32 %v12699_v6, %v7396_v18  ;;  %v12837_v38 = vadd.f32 %v13802_v21, %v12597_v36  ;;  %v5497_v63 = vadd.f32 %v13803_v57, %v12612_v37  ;;  %v6443_v10 = vadd.f32 %v13804_v60, %v12604_v28  ;;  %v13806_v3 = vld [vmem:[#allocation390_spill] sm:$0xff]  ;;  %v13810_v53 = vld [vmem:[#allocation365_spill] sm:$0xff]  ;;  %v13812_v44 = vld [vmem:[#allocation20_spill] sm:$0xff] }
 0x61c   : > { %v6640_v8 = vadd.f32 %v13805_v0, %v6448_v41  ;;  %v7023_v23 = vadd.f32 %v13806_v3, %v6830_v33  ;;  %v7016_v16 = vadd.f32 %v13807_v2, %v6823_v39  ;;  %7475 = vst.msk [vmem:[%s12713_s7 + $0x58] sm:$0xff] %vm7463_vm0, %v7442_v48  ;;  %v7405_v4 = vadd.f32 %v7323_v61, %v7213_v14  ;;  %v13809_v37 = vld [vmem:[#allocation354_spill] sm:$0xff]  ;;  %v13814_v45 = vld [vmem:[#allocation328_spill] sm:$0xff]  ;;  %v13815_v41 = vld [vmem:[#allocation331_spill] sm:$0xff] }
 0x61d   : > { %7468 = vst.msk [vmem:[%s12713_s7 + $0x20] sm:$0xff] %vm7463_vm0, %v7435_v32  ;;  %v7398_v36 = vadd.f32 %v7309_v58, %v7206_v56  ;;  %v5689_v9 = vadd.f32 %v13808_v47, %v5497_v63  ;;  %v6450_v28 = vadd.f32 %v13809_v37, %v12737_v1  ;;  %v13811_v59 = vld [vmem:[#allocation366_spill] sm:$0xff]  ;;  %v6635_v15 = vadd.f32 %v13814_v45, %v6443_v10  ;;  %v13816_v33 = vld [vmem:[#allocation355_spill] sm:$0xff]  ;;  %v7327_v30 = vpop.permute.xlu1 %7326  ;;  %v13819_v56 = vld [vmem:[#allocation393_spill] sm:$0xff] }
 0x61e   : > { %v6832_v29 = vadd.f32 %v13810_v53, %v6640_v8  ;;  %v6825_v17 = vadd.f32 %v13811_v59, %v6633_v22  ;;  %v7215_v35 = vadd.f32 %v13812_v44, %v7023_v23  ;;  %v13813_v55 = vld [vmem:[#allocation22_spill] sm:$0xff]  ;;  %v7444_v25 = vadd.f32 %v12699_v6, %v7405_v4  ;;  %v7313_v14 = vpop.permute.xlu0 %7312  ;;  %v13818_v22 = vld [vmem:[#allocation392_spill] sm:$0xff]  ;;  %v13820_v57 = vld [vmem:[#allocation339_spill] sm:$0xff] }
 0x61f   : > { %v7208_v19 = vadd.f32 %v13813_v55, %v7016_v16  ;;  %v7437_v18 = vadd.f32 %v12699_v6, %v7398_v36  ;;  %v5881_v46 = vadd.f32 %v13815_v41, %v5689_v9  ;;  %v6642_v50 = vadd.f32 %v13816_v33, %v6450_v28  ;;  %v13817_v1 = vld [vmem:[#allocation130_spill] sm:$0xff]  ;;  %v13822_v10 = vld [vmem:[#allocation367_spill] sm:$0xff]  ;;  %v13823_v8 = vld [vmem:[#allocation368_spill] sm:$0xff] }
 0x620   : > { %v12863_v39 = vadd.f32 %v13817_v1, %v6453_v11  ;;  %v7025_v42 = vadd.f32 %v13818_v22, %v6832_v29  ;;  %v7018_v48 = vadd.f32 %v13819_v56, %v6825_v17  ;;  %7477 = vst.msk [vmem:[%s12713_s7 + $0x68] sm:$0xff] %vm7463_vm0, %v7444_v25  ;;  %v7407_v32 = vadd.f32 %v7327_v30, %v7215_v35  ;;  %v13821_v60 = vld [vmem:[#allocation338_spill] sm:$0xff]  ;;  %v13824_v58 = vld [vmem:[#allocation24_spill] sm:$0xff]  ;;  %v13825_v23 = vld [vmem:[#allocation21_spill] sm:$0xff] }
 0x621   : > { %7470 = vst.msk [vmem:[%s12713_s7 + $0x30] sm:$0xff] %vm7463_vm0, %v7437_v18  ;;  %v7400_v21 = vadd.f32 %v7313_v14, %v7208_v19  ;;  %v5499_v63 = vadd.f32 %v13820_v57, %v12651_v62  ;;  %v6445_v11 = vadd.f32 %v13821_v60, %v12645_v40  ;;  %v6834_v0 = vadd.f32 %v13822_v10, %v6642_v50  ;;  %v13826_v36 = vld [vmem:[#allocation113_spill] sm:$0xff]  ;;  %v13829_v40 = vld [vmem:[#allocation340_spill] sm:$0xff]  ;;  %v7331_v29 = vpop.permute.xlu1 %7330  ;;  %v13830_v17 = vld [vmem:[#allocation394_spill] sm:$0xff] }
 0x622   : > { %v6827_v61 = vadd.f32 %v13823_v8, %v6635_v15  ;;  %v7217_v3 = vadd.f32 %v13824_v58, %v7025_v42  ;;  %v7210_v2 = vadd.f32 %v13825_v23, %v7018_v48  ;;  %v7446_v16 = vadd.f32 %v12699_v6, %v7407_v32  ;;  %v13827_v62 = vld [vmem:[#allocation333_spill] sm:$0xff]  ;;  %v7317_v59 = vpop.permute.xlu0 %7316  ;;  %v13831_v35 = vld [vmem:[#allocation395_spill] sm:$0xff]  ;;  %v13833_v45 = vld [vmem:[#allocation350_spill] sm:$0xff] }
 0x623   : > { %v7439_v4 = vadd.f32 %v12699_v6, %v7400_v21  ;;  %v6263_v47 = vadd.f32 %v13826_v36, %v6071_v54  ;;  %v6073_v9 = vadd.f32 %v13827_v62, %v5881_v46  ;;  %v13828_v37 = vld [vmem:[#allocation341_spill] sm:$0xff]  ;;  %v6637_v53 = vadd.f32 %v13829_v40, %v6445_v11  ;;  %v13832_v18 = vld [vmem:[#allocation343_spill] sm:$0xff]  ;;  %v13835_v33 = vld [vmem:[#allocation370_spill] sm:$0xff] }
 0x624   : > { %v5691_v28 = vadd.f32 %v13828_v37, %v5499_v63  ;;  %v7027_v44 = vadd.f32 %v13830_v17, %v6834_v0  ;;  %v7020_v55 = vadd.f32 %v13831_v35, %v6827_v61  ;;  %7479 = vst.msk [vmem:[%s12713_s7 + $0x78] sm:$0xff] %vm7463_vm0, %v7446_v16  ;;  %v7409_v19 = vadd.f32 %v7331_v29, %v7217_v3  ;;  %v13834_v41 = vld [vmem:[#allocation369_spill] sm:$0xff]  ;;  %v13836_v1 = vld [vmem:[#allocation27_spill] sm:$0xff]  ;;  %v13842_v0 = vld [vmem:[#allocation396_spill] sm:$0xff] }
 0x625   : > { %7472 = vst.msk [vmem:[%s12713_s7 + $0x40] sm:$0xff] %vm7463_vm0, %v7439_v4  ;;  %v7402_v25 = vadd.f32 %v7317_v59, %v7210_v2  ;;  %v6447_v15 = vadd.f32 %v13833_v45, %v12728_v43  ;;  %v6836_v46 = vadd.f32 %v13834_v41, %v12766_v5  ;;  %v6829_v50 = vadd.f32 %v13835_v33, %v6637_v53  ;;  %v13837_v14 = vld [vmem:[#allocation23_spill] sm:$0xff]  ;;  %v13839_v21 = vld [vmem:[#allocation345_spill] sm:$0xff]  ;;  %v7335_v5 = vpop.permute.xlu1 %7334  ;;  %v13844_v2 = vld [vmem:[#allocation324_spill] sm:$0xff] }
 0x626   : > { %v5883_v54 = vadd.f32 %v13832_v18, %v5691_v28  ;;  %v7219_v30 = vadd.f32 %v13836_v1, %v7027_v44  ;;  %v7212_v22 = vadd.f32 %v13837_v14, %v7020_v55  ;;  %v7448_v42 = vadd.f32 %v12699_v6, %v7409_v19  ;;  %v13838_v48 = vld [vmem:[#allocation115_spill] sm:$0xff]  ;;  %v7321_v10 = vpop.permute.xlu0 %7320  ;;  %v13843_v61 = vld [vmem:[#allocation397_spill] sm:$0xff]  ;;  %v13845_v4 = vld [vmem:[#allocation356_spill] sm:$0xff] }
 0x627   : > { %v7441_v56 = vadd.f32 %v12699_v6, %v7402_v25  ;;  %v6265_v32 = vadd.f32 %v13838_v48, %v6073_v9  ;;  %v13840_v63 = vld [vmem:[#allocation351_spill] sm:$0xff]  ;;  %v7029_v8 = vadd.f32 %v13842_v0, %v6836_v46  ;;  %v7022_v58 = vadd.f32 %v13843_v61, %v6829_v50  ;;  %v13847_v9 = vld [vmem:[#allocation372_spill] sm:$0xff]  ;;  %v13848_v28 = vld [vmem:[#allocation29_spill] sm:$0xff] }
 0x628   : > { %v6075_v57 = vadd.f32 %v13839_v21, %v5883_v54  ;;  %v6639_v43 = vadd.f32 %v13840_v63, %v6447_v15  ;;  %v13841_v60 = vld [vmem:[#allocation123_spill] sm:$0xff]  ;;  %7481 = vst.msk [vmem:[%s12713_s7 + $0x88] sm:$0xff] %vm7463_vm0, %v7448_v42  ;;  %v7411_v3 = vadd.f32 %v7335_v5, %v7219_v30  ;;  %v7404_v23 = vadd.f32 %v7321_v10, %v7212_v22  ;;  %v13849_v53 = vld [vmem:[#allocation25_spill] sm:$0xff]  ;;  %v13854_v45 = vld [vmem:[#allocation398_spill] sm:$0xff] }
 0x629   : > { %v6456_v11 = vadd.f32 %v13841_v60, %v6263_v47  ;;  %7474 = vst.msk [vmem:[%s12713_s7 + $0x50] sm:$0xff] %vm7463_vm0, %v7441_v56  ;;  %v5878_v16 = vadd.f32 %v13844_v2, %v12837_v38  ;;  %v6449_v36 = vadd.f32 %v13845_v4, %v12746_v20  ;;  %v13846_v47 = vld [vmem:[#allocation371_spill] sm:$0xff]  ;;  %v7221_v40 = vadd.f32 %v13848_v28, %v7029_v8  ;;  %v13850_v44 = vld [vmem:[#allocation117_spill] sm:$0xff]  ;;  %v13856_v1 = vld [vmem:[#allocation330_spill] sm:$0xff] }
 0x62a   : > { %v6838_v62 = vadd.f32 %v13846_v47, %v12775_v24  ;;  %v6831_v37 = vadd.f32 %v13847_v9, %v6639_v43  ;;  %v7214_v29 = vadd.f32 %v13849_v53, %v7022_v58  ;;  %v7450_v59 = vadd.f32 %v12699_v6, %v7411_v3  ;;  %v13851_v35 = vld [vmem:[#allocation357_spill] sm:$0xff]  ;;  %v7339_v24 = vpop.permute.xlu1 %7338  ;;  %v7325_v54 = vpop.permute.xlu0 %7324  ;;  %v13855_v41 = vld [vmem:[#allocation399_spill] sm:$0xff]  ;;  %v13857_v14 = vld [vmem:[#allocation334_spill] sm:$0xff] }
 0x62b   : > { %v7443_v17 = vadd.f32 %v12699_v6, %v7404_v23  ;;  %v6267_v38 = vadd.f32 %v13850_v44, %v6075_v57  ;;  %v6641_v55 = vadd.f32 %v13851_v35, %v6449_v36  ;;  %v13852_v19 = vld [vmem:[#allocation133_spill] sm:$0xff]  ;;  %v7413_v33 = vadd.f32 %v7339_v24, %v7221_v40  ;;  %v13859_v48 = vld [vmem:[#allocation374_spill] sm:$0xff]  ;;  %v13860_v57 = vld [vmem:[#allocation32_spill] sm:$0xff] }
 0x62c   : > { %v6648_v20 = vadd.f32 %v13852_v19, %v6456_v11  ;;  %v13853_v25 = vld [vmem:[#allocation125_spill] sm:$0xff]  ;;  %v7031_v15 = vadd.f32 %v13854_v45, %v6838_v62  ;;  %v7024_v46 = vadd.f32 %v13855_v41, %v6831_v37  ;;  %7483 = vst.msk [vmem:[%s12713_s7 + $0x98] sm:$0xff] %vm7463_vm0, %v7450_v59  ;;  %v7406_v50 = vadd.f32 %v7325_v54, %v7214_v29  ;;  %v13861_v11 = vld [vmem:[#allocation332_spill] sm:$0xff]  ;;  %v13863_v8 = vld [vmem:[#allocation135_spill] sm:$0xff] }
 0x62d   : > { %v6458_v18 = vadd.f32 %v13853_v25, %v6265_v32  ;;  %7476 = vst.msk [vmem:[%s12713_s7 + $0x60] sm:$0xff] %vm7463_vm0, %v7443_v17  ;;  %v6070_v30 = vadd.f32 %v13856_v1, %v5878_v16  ;;  %v5688_v22 = vadd.f32 %v13857_v14, %v12642_v34  ;;  %v13858_v42 = vld [vmem:[#allocation373_spill] sm:$0xff]  ;;  %v6833_v32 = vadd.f32 %v13859_v48, %v6641_v55  ;;  %v13862_v10 = vld [vmem:[#allocation336_spill] sm:$0xff]  ;;  %v13864_v34 = vld [vmem:[#allocation127_spill] sm:$0xff] }
 0x62e   : > { %v6840_v56 = vadd.f32 %v13858_v42, %v6648_v20  ;;  %v7223_v21 = vadd.f32 %v12535_v26, %v7031_v15  ;;  %v7216_v63 = vadd.f32 %v13860_v57, %v7024_v46  ;;  %v7452_v43 = vadd.f32 %v12699_v6, %v7413_v33  ;;  %v7343_v3 = vpop.permute.xlu1 %7342  ;;  %v7329_v23 = vpop.permute.xlu0 %7328  ;;  %v13865_v2 = vld [vmem:[#allocation400_spill] sm:$0xff]  ;;  %v13866_v4 = vld [vmem:[#allocation401_spill] sm:$0xff]  ;;  %v13867_v62 = vld [vmem:[#allocation342_spill] sm:$0xff] }
 0x62f   : > { %v7445_v60 = vadd.f32 %v12699_v6, %v7406_v50  ;;  %v6262_v5 = vadd.f32 %v13861_v11, %v6070_v30  ;;  %v5880_v0 = vadd.f32 %v13862_v10, %v5688_v22  ;;  %v6650_v61 = vadd.f32 %v13863_v8, %v6458_v18  ;;  %v13868_v37 = vld [vmem:[#allocation346_spill] sm:$0xff]  ;;  %v13869_v40 = vld [vmem:[#allocation375_spill] sm:$0xff]  ;;  %v13870_v29 = vld [vmem:[#allocation376_spill] sm:$0xff] }
 0x630   : > { %v6460_v58 = vadd.f32 %v13864_v34, %v6267_v38  ;;  %v7033_v16 = vadd.f32 %v13865_v2, %v6840_v56  ;;  %v7026_v26 = vadd.f32 %v13866_v4, %v6833_v32  ;;  %7485 = vst.msk [vmem:[%s12713_s7 + $0xa8] sm:$0xff] %vm7463_vm0, %v7452_v43  ;;  %v7415_v36 = vadd.f32 %v7343_v3, %v7223_v21  ;;  %v13871_v17 = vld [vmem:[#allocation26_spill] sm:$0xff]  ;;  %v13874_v18 = vld [vmem:[#allocation344_spill] sm:$0xff]  ;;  %v13876_v45 = vld [vmem:[#allocation137_spill] sm:$0xff] }
 0x631   : > { %7478 = vst.msk [vmem:[%s12713_s7 + $0x70] sm:$0xff] %vm7463_vm0, %v7445_v60  ;;  %v7408_v47 = vadd.f32 %v7329_v23, %v7216_v63  ;;  %v6072_v9 = vadd.f32 %v13867_v62, %v5880_v0  ;;  %v5690_v28 = vadd.f32 %v13868_v37, %v12697_v27  ;;  %v6842_v53 = vadd.f32 %v13869_v40, %v6650_v61  ;;  %v13872_v38 = vld [vmem:[#allocation34_spill] sm:$0xff]  ;;  %v13875_v54 = vld [vmem:[#allocation348_spill] sm:$0xff]  ;;  %v13878_v50 = vld [vmem:[#allocation403_spill] sm:$0xff] }
 0x632   : > { %v6835_v59 = vadd.f32 %v13870_v29, %v12778_v51  ;;  %v7225_v44 = vadd.f32 %v13871_v17, %v7033_v16  ;;  %v7218_v35 = vadd.f32 %v13872_v38, %v7026_v26  ;;  %v7454_v55 = vadd.f32 %v12699_v6, %v7415_v36  ;;  %v13873_v20 = vld [vmem:[#allocation122_spill] sm:$0xff]  ;;  %v7347_v41 = vpop.permute.xlu1 %7346  ;;  %v7333_v46 = vpop.permute.xlu0 %7332  ;;  %v13879_v22 = vld [vmem:[#allocation352_spill] sm:$0xff]  ;;  %v13880_v56 = vld [vmem:[#allocation377_spill] sm:$0xff] }
 0x633   : > { %v7447_v19 = vadd.f32 %v12699_v6, %v7408_v47  ;;  %v6455_v25 = vadd.f32 %v13873_v20, %v6262_v5  ;;  %v6264_v24 = vadd.f32 %v13874_v18, %v6072_v9  ;;  %v5882_v27 = vadd.f32 %v13875_v54, %v5690_v28  ;;  %v13877_v33 = vld [vmem:[#allocation402_spill] sm:$0xff]  ;;  %v13882_v11 = vld [vmem:[#allocation124_spill] sm:$0xff]  ;;  %v13883_v10 = vld [vmem:[#allocation353_spill] sm:$0xff] }
 0x634   : > { %v6652_v15 = vadd.f32 %v13876_v45, %v6460_v58  ;;  %v7035_v51 = vadd.f32 %v13877_v33, %v6842_v53  ;;  %v7028_v1 = vadd.f32 %v13878_v50, %v6835_v59  ;;  %7487 = vst.msk [vmem:[%s12713_s7 + $0xb8] sm:$0xff] %vm7463_vm0, %v7454_v55  ;;  %v7417_v30 = vadd.f32 %v7347_v41, %v7225_v44  ;;  %v13881_v32 = vld [vmem:[#allocation378_spill] sm:$0xff]  ;;  %v13884_v8 = vld [vmem:[#allocation132_spill] sm:$0xff]  ;;  %v13886_v2 = vld [vmem:[#allocation405_spill] sm:$0xff] }
 0x635   : > { %7480 = vst.msk [vmem:[%s12713_s7 + $0x80] sm:$0xff] %vm7463_vm0, %v7447_v19  ;;  %v7410_v14 = vadd.f32 %v7333_v46, %v7218_v35  ;;  %v6074_v42 = vadd.f32 %v13879_v22, %v5882_v27  ;;  %v6837_v21 = vadd.f32 %v13881_v32, %v12863_v39  ;;  %v6457_v5 = vadd.f32 %v13882_v11, %v6264_v24  ;;  %v13885_v3 = vld [vmem:[#allocation404_spill] sm:$0xff]  ;;  %v13887_v16 = vld [vmem:[#allocation379_spill] sm:$0xff]  ;;  %v13890_v28 = vld [vmem:[#allocation134_spill] sm:$0xff] }
 0x636   : > { %v6844_v48 = vadd.f32 %v13880_v56, %v6652_v15  ;;  %v7227_v57 = vadd.f32 %v12599_v12, %v7035_v51  ;;  %v7220_v63 = vadd.f32 %v12601_v13, %v7028_v1  ;;  %v7456_v43 = vadd.f32 %v12699_v6, %v7417_v30  ;;  %v7351_v34 = vpop.permute.xlu1 %7350  ;;  %v7337_v58 = vpop.permute.xlu0 %7336  ;;  %v13888_v26 = vld [vmem:[#allocation28_spill] sm:$0xff]  ;;  %v13891_v59 = vld [vmem:[#allocation126_spill] sm:$0xff]  ;;  %v13892_v44 = vld [vmem:[#allocation11_spill] sm:$0xff] }
 0x637   : > { %v7449_v60 = vadd.f32 %v12699_v6, %v7410_v14  ;;  %v6266_v0 = vadd.f32 %v13883_v10, %v6074_v42  ;;  %v6647_v61 = vadd.f32 %v13884_v8, %v6455_v25  ;;  %v7030_v39 = vadd.f32 %v13886_v2, %v6837_v21  ;;  %v13889_v47 = vld [vmem:[#allocation36_spill] sm:$0xff]  ;;  %v13894_v25 = vld [vmem:[#allocation10_spill] sm:$0xff]  ;;  %v13898_v30 = vld [vmem:[#allocation381_spill] sm:$0xff] }
 0x638   : > { %v7037_v23 = vadd.f32 %v13885_v3, %v6844_v48  ;;  %7489 = vst.msk [vmem:[%s12713_s7 + $0xc8] sm:$0xff] %vm7463_vm0, %v7456_v43  ;;  %v7419_v12 = vadd.f32 %v7351_v34, %v7227_v57  ;;  %v7412_v13 = vadd.f32 %v7337_v58, %v7220_v63  ;;  %v6649_v40 = vadd.f32 %v13890_v28, %v6457_v5  ;;  %v13893_v19 = vld [vmem:[#allocation380_spill] sm:$0xff]  ;;  %v13895_v24 = vld [vmem:[#allocation30_spill] sm:$0xff]  ;;  %v13899_v32 = vld [vmem:[#allocation13_spill] sm:$0xff] }
 0x639   : > { %7482 = vst.msk [vmem:[%s12713_s7 + $0x90] sm:$0xff] %vm7463_vm0, %v7449_v60  ;;  %v6839_v4 = vadd.f32 %v13887_v16, %v6647_v61  ;;  %v7222_v62 = vadd.f32 %v13889_v47, %v7030_v39  ;;  %v6459_v17 = vadd.f32 %v13891_v59, %v6266_v0  ;;  %v7231_v18 = vadd.f32 %v12669_v52, %v13894_v25  ;;  %v13896_v46 = vld [vmem:[#allocation136_spill] sm:$0xff]  ;;  %v13900_v11 = vld [vmem:[#allocation14_spill] sm:$0xff] }
 0x63a   : > { %v7229_v36 = vadd.f32 %v13888_v26, %v7037_v23  ;;  %v7458_v9 = vadd.f32 %v12699_v6, %v7419_v12  ;;  %v7451_v37 = vadd.f32 %v12699_v6, %v7412_v13  ;;  %v7355_v53 = vpop.permute.xlu1 %7354  ;;  %v7341_v29 = vpop.permute.xlu0 %7340  ;;  %v6841_v20 = vadd.f32 %v13893_v19, %v6649_v40  ;;  %v13897_v51 = vld [vmem:[#allocation12_spill] sm:$0xff] }
 0x63b   : > { %v7032_v38 = vadd.f32 %v13892_v44, %v6839_v4  ;;  %v7414_v55 = vadd.f32 %v7341_v29, %v7222_v62  ;;  %v6651_v33 = vadd.f32 %v13896_v46, %v6459_v17  ;;  %v7230_v5 = vadd.f32 %v12752_v7, %v13900_v11 }
 0x63c   : > { %7491 = vst.msk [vmem:[%s12713_s7 + $0xd8] sm:$0xff] %vm7463_vm0, %v7458_v9  ;;  %v7421_v35 = vadd.f32 %v7355_v53, %v7229_v36  ;;  %7484 = vst.msk [vmem:[%s12713_s7 + $0xa0] sm:$0xff] %vm7463_vm0, %v7451_v37  ;;  %v7034_v50 = vadd.f32 %v13897_v51, %v6841_v20 }
 0x63d   : > { %v7224_v54 = vadd.f32 %v13895_v24, %v7032_v38  ;;  %v7453_v45 = vadd.f32 %v12699_v6, %v7414_v55  ;;  %v6843_v14 = vadd.f32 %v13898_v30, %v6651_v33 }
 0x63e   : > { %v7460_v27 = vadd.f32 %v12699_v6, %v7421_v35  ;;  %v7359_v15 = vpop.permute.xlu1 %7358  ;;  %v7345_v41 = vpop.permute.xlu0 %7344  ;;  %v7226_v22 = vadd.f32 %v12701_v49, %v7034_v50 }
 0x63f   : > { %v7423_v1 = vadd.f32 %v7359_v15, %v7231_v18  ;;  %7486 = vst.msk [vmem:[%s12713_s7 + $0xb0] sm:$0xff] %vm7463_vm0, %v7453_v45  ;;  %v7416_v52 = vadd.f32 %v7345_v41, %v7224_v54  ;;  %v7036_v21 = vadd.f32 %v13899_v32, %v6843_v14 }
 0x640   : > { %7493 = vst.msk [vmem:[%s12713_s7 + $0xe8] sm:$0xff] %vm7463_vm0, %v7460_v27 }
 0x641   : > { %v7462_v42 = vadd.f32 %v12699_v6, %v7423_v1  ;;  %v7455_v56 = vadd.f32 %v12699_v6, %v7416_v52  ;;  %v7228_v63 = vadd.f32 %v12725_v31, %v7036_v21 }
 0x642   : > { %v7349_v48 = vpop.permute.xlu0 %7348 }
 0x643   : > { %7495 = vst.msk [vmem:[%s12713_s7 + $0xf8] sm:$0xff] %vm7463_vm0, %v7462_v42  ;;  %7488 = vst.msk [vmem:[%s12713_s7 + $0xc0] sm:$0xff] %vm7463_vm0, %v7455_v56  ;;  %v7418_v57 = vadd.f32 %v7349_v48, %v7226_v22 }
 0x645   : > { %v7457_v43 = vadd.f32 %v12699_v6, %v7418_v57 }
 0x646   : > { %v7353_v60 = vpop.permute.xlu0 %7352 }
 0x647   : > { %7490 = vst.msk [vmem:[%s12713_s7 + $0xd0] sm:$0xff] %vm7463_vm0, %v7457_v43  ;;  %v7420_v49 = vadd.f32 %v7353_v60, %v7228_v63 }
 0x649   : > { %v7459_v10 = vadd.f32 %v12699_v6, %v7420_v49 }
 0x64a   : > { %v7357_v0 = vpop.permute.xlu0 %7356 }
 0x64b   : > { %7492 = vst.msk [vmem:[%s12713_s7 + $0xe0] sm:$0xff] %vm7463_vm0, %v7459_v10  ;;  %v7422_v8 = vadd.f32 %v7357_v0, %v7230_v5 }
 0x64d   : > { %v7461_v61 = vadd.f32 %v12699_v6, %v7422_v8 }
 0x64f   : > { %7494 = vst.msk [vmem:[%s12713_s7 + $0xf0] sm:$0xff] %vm7463_vm0, %v7461_v61 }
 0x650 PF: > { %p14_p9 = scmp.ge.s32.totalorder %s9361_s28, 4   ;;  %s13901_s12 = smov %s9212_s13 }
 0x651   : > { %s13902_s13 = smov %s9216_s14  ;;  %s13903_s14 = smov %s9372_s4 }
 0x652   : > { %s13904_s15 = smov %s9361_s28  ;;  %16 = sbr.rel (!%p14_p9) target bundleno = 4 (0x4), region = 85 }
 0x659   :  { %7517 = vsyncpa [#allocation4], 1 }
 0x65a   :  { %7519 = vsyncpa [#allocation4 + $0x1], 1 }
 0x65b   :  { %7520 = vsyncpa [#allocation6], 1 }

</bundles_post_ra>
